<compile_context>
chip_gen: v7x
topology: tpu7x:2x2x1
jax: 0.10.0
libtpu: 0.0.40
codegen_flags: <defaults>
</compile_context>

<pallas_src>
import functools

import jax
import jax.numpy as jnp
from jax import lax
from jax.experimental import pallas as pl
from jax.experimental.pallas import tpu as pltpu

EPS_BN = 1e-5   # BatchNorm1d default eps
EPS_IN = 1e-5   # InstanceNorm1d default eps
NEG_INF = -1e30


# ----------------------- scalar / weight packing layout ----------------------
# All d_model == 1 parameters live in a single flat SMEM float32 array.
# Per attention unit: (bn_scale, bn_shift, wq*wk, wv*wo)  -> 4 scalars
# Per ConvTranspose unit: (w0, w1, w2, bias)              -> 4 scalars

def _attn_scalar_base(section, i, n_layers):
    unit = {"ex": i,
            "sm1": n_layers + 2 * i,
            "sm2": n_layers + 2 * i + 1,
            "dec1": 3 * n_layers + 2 * i,
            "dec2": 3 * n_layers + 2 * i + 1}[section]
    return 4 * unit


def _ct_scalar_base(i, n_layers):
    return 4 * 5 * n_layers + 4 * i


def _num_scalars(n_layers):
    return 4 * 5 * n_layers + 4 * n_layers


def _ibn_index(section, i, n_layers):
    # stacked IbnBlock weight order: example-encoder, sample-encoder, decoder
    return {"ex": 0, "sm": 1, "dec": 2}[section] * n_layers + i


def _log2(n):
    assert n > 0 and (n & (n - 1)) == 0, "power-of-two length required"
    return n.bit_length() - 1


# --------------------------------- kernel ------------------------------------

def _aada_kernel(ex_ref, sm_ref, scal_ref,
                 w1_ref, b1_ref, w2_ref, b2_ref, w3_ref, b3_ref,
                 out_ref, *, n_layers, n_batch, seq_len, self_attention):
    f32 = jnp.float32
    N = n_batch
    L0 = seq_len

    W1, B1 = w1_ref[...], b1_ref[...]          # (3n, 3M, C), (3n, M, 1)
    W2, B2 = w2_ref[...], b2_ref[...]          # (3n, 3M, M), (3n, M, 1)
    W3, B3 = w3_ref[...], b3_ref[...]          # (3n, 3C, M), (3n, C, 1)
    xe0 = ex_ref[...]                          # (1, N*L)  batch lane-packed
    xs0 = sm_ref[...]                          # (1, N*L)

    # ---- constant matrices: built ONCE per distinct shape (trace-time memo) --
    _memo = {}

    def _get(key, builder):
        if key not in _memo:
            _memo[key] = builder()
        return _memo[key]

    def shift_mats(L):
        # y = x @ Mr -> y[:, l] = x[:, l-1] within each length-L segment (0 at
        # segment starts); Ml is the symmetric "next element" shift.
        def build():
            n = N * L
            lg = _log2(L)
            r = lax.broadcasted_iota(jnp.int32, (n, n), 0)
            c = lax.broadcasted_iota(jnp.int32, (n, n), 1)
            same = (r >> lg) == (c >> lg)
            mr = ((r == c - 1) & same).astype(f32)
            ml = ((r == c + 1) & same).astype(f32)
            return mr, ml
        return _get(("shift", L), build)

    def inorm_mat(L):
        # per-sample segment averaging matrix: (x @ P)[:, l] = mean over the
        # length-L segment containing l.
        def build():
            n = N * L
            lg = _log2(L)
            r = lax.broadcasted_iota(jnp.int32, (n, n), 0)
            c = lax.broadcasted_iota(jnp.int32, (n, n), 1)
            return ((r >> lg) == (c >> lg)).astype(f32) * (1.0 / L)
        return _get(("inorm", L), build)

    def pool_sels(nl):
        def build():
            r = lax.broadcasted_iota(jnp.int32, (nl, nl // 2), 0)
            c = lax.broadcasted_iota(jnp.int32, (nl, nl // 2), 1)
            return (r == 2 * c).astype(f32), (r == 2 * c + 1).astype(f32)
        return _get(("pool", nl), build)

    def put_sels(nl):
        def build():
            r = lax.broadcasted_iota(jnp.int32, (nl, 2 * nl), 0)
            c = lax.broadcasted_iota(jnp.int32, (nl, 2 * nl), 1)
            return (c == 2 * r).astype(f32), (c == 2 * r + 1).astype(f32)
        return _get(("put", nl), build)

    def eye_mat(nl):
        def build():
            r = lax.broadcasted_iota(jnp.int32, (nl, nl), 0)
            c = lax.broadcasted_iota(jnp.int32, (nl, nl), 1)
            return (r == c).astype(f32)
        return _get(("eye", nl), build)

    def attn_bias(Lq, Lk):
        # additive block-diagonal mask: 0 when query/key lanes belong to the
        # same sample, NEG_INF otherwise.
        def build():
            r = lax.broadcasted_iota(jnp.int32, (N * Lq, N * Lk), 0)
            c = lax.broadcasted_iota(jnp.int32, (N * Lq, N * Lk), 1)
            same = (r >> _log2(Lq)) == (c >> _log2(Lk))
            return jnp.where(same, 0.0, NEG_INF).astype(f32)
        return _get(("bias", Lq, Lk), build)

    # ---------------------------- building blocks ----------------------------
    def mm(a, b):
        return jnp.dot(a, b, preferred_element_type=f32)

    def conv3(x, wstk, bias, L):
        # Conv1d(k=3, s=1, p=1) with eval-BN folded.
        # wstk = [W[:,:,0]; W[:,:,1]; W[:,:,2]] stacked vertically: (3*Cout, Cin)
        cout = bias.shape[0]
        mr, ml = shift_mats(L)
        if wstk.shape[1] == 1:
            u = wstk * x                       # Cin == 1: outer-product broadcast
        else:
            u = mm(wstk, x)                    # (3*Cout, N*L)
        return (mm(u[:cout], mr) + u[cout:2 * cout]
                + mm(u[2 * cout:], ml) + bias)

    def ibn(x, idx, L):
        # IbnBlock: x + (conv-bn-relu, conv-bn-relu, conv-bn), InstanceNorm
        # (per-sample stats over L, no affine), ReLU.
        h = jnp.maximum(conv3(x, W1[idx], B1[idx], L), 0.0)
        h = jnp.maximum(conv3(h, W2[idx], B2[idx], L), 0.0)
        h = conv3(h, W3[idx], B3[idx], L)
        s = x + h
        p_avg = inorm_mat(L)
        mu = mm(s, p_avg)
        var = mm(jnp.square(s - mu), p_avg)
        return jnp.maximum((s - mu) * lax.rsqrt(var + EPS_IN), 0.0)

    def pool2(x):
        # max_pool1d(kernel=2, stride=2); pairs never straddle sample
        # boundaries, so the plain packed pairing is exact.
        nl = x.shape[1]
        sel_e, sel_o = pool_sels(nl)
        return jnp.maximum(mm(x, sel_e), mm(x, sel_o))

    def conv_t_up(x, base, L):
        # ConvTranspose1d(1, 1, 3, stride=2, padding=1, output_padding=1)
        w0, w1 = scal_ref[base + 0], scal_ref[base + 1]
        w2, bias = scal_ref[base + 2], scal_ref[base + 3]
        _, ml = shift_mats(L)
        even = w1 * x + bias                           # y[2m]   = w1*x[m] + b
        odd = w0 * mm(x, ml) + w2 * x + bias           # y[2m+1] = w0*x[m+1] + w2*x[m] + b
        nl = x.shape[1]
        put_e, put_o = put_sels(nl)
        return mm(even, put_e) + mm(odd, put_o)        # lane-dense interleave

    def attn_block(x, kv_raw, base, self_attn, Lq, Lk):
        # x_norm = eval-BatchNorm1d(x);  out = x_norm + Attention(q=x_norm,
        # k=v = x_norm (self) or kv_raw (cross)); residual on the POST-norm
        # value, matching the reference. d_model == n_heads == 1, so the linear
        # projections are pre-folded scalars (w_qk = wq*wk, w_vo = wv*wo).
        sc, sh = scal_ref[base + 0], scal_ref[base + 1]
        w_qk, w_vo = scal_ref[base + 2], scal_ref[base + 3]
        xb = x * sc + sh                               # (1, N*Lq)
        kv = xb if self_attn else kv_raw               # (1, N*Lk)
        # row -> column via hoisted identity (diag embed + lane reduce)
        q_col = jnp.sum(eye_mat(N * Lq) * xb, axis=1, keepdims=True)   # (N*Lq, 1)
        s = (q_col * kv) * w_qk + attn_bias(Lq, Lk)    # (N*Lq, N*Lk) block-diag
        m = jnp.max(s, axis=1, keepdims=True)
        e = jnp.exp(s - m)
        p = e * pl.reciprocal(jnp.sum(e, axis=1, keepdims=True), approx=True)
        # o[0, i] = sum_j kv[0, j] * p[i, j]  (transpose-rhs MXU matmul)
        o = lax.dot_general(kv, p, (((1,), (1,)), ((), ())),
                            preferred_element_type=f32)                # (1, N*Lq)
        return xb + w_vo * o

    # ------------------------------ forward ----------------------------------
    # ----- ExampleEncoder -----
    x = xe0
    cur = L0
    ex_feats, lens = [], []
    for i in range(n_layers):
        x = pool2(ibn(x, _ibn_index("ex", i, n_layers), cur))
        cur //= 2
        if self_attention:
            x = attn_block(x, x, _attn_scalar_base("ex", i, n_layers),
                           True, cur, cur)
        ex_feats.append(x)
        lens.append(cur)

    # ----- SampleEncoder -----
    x = xs0
    cur = L0
    sm_feats = []
    for i in range(n_layers):
        x = pool2(ibn(x, _ibn_index("sm", i, n_layers), cur))
        cur //= 2
        if self_attention:
            x = attn_block(x, x, _attn_scalar_base("sm1", i, n_layers),
                           True, cur, cur)
        x = attn_block(x, ex_feats[i], _attn_scalar_base("sm2", i, n_layers),
                       False, cur, lens[i])
        sm_feats.append(x)

    # ----- Decoder (cross-attends against reversed(sample feats)) -----
    x = sm_feats[-1]
    cur = lens[-1]
    for i in range(n_layers):
        x = conv_t_up(x, _ct_scalar_base(i, n_layers), cur)   # UpSampleNetwork.up_sampler
        cur *= 2
        x = ibn(x, _ibn_index("dec", i, n_layers), cur)        # UpSampleNetwork.res
        if self_attention:
            x = attn_block(x, x, _attn_scalar_base("dec1", i, n_layers),
                           True, cur, cur)
        j = n_layers - 1 - i
        x = attn_block(x, sm_feats[j], _attn_scalar_base("dec2", i, n_layers),
                       False, cur, lens[j])

    out_ref[...] = jnp.maximum(x, 0.0)                 # final ReLU, (1, N*L)


# -------------------------------- wrapper ------------------------------------

def aada_forward(params, examples, samples, *, n_layers, self_attention=True):
    """examples, samples: (N, L) -> pred_apps (N, L); eval-mode forward,
    one fused Pallas kernel for the whole network (batch lane-packed)."""
    N, L = examples.shape
    assert samples.shape == (N, L)
    assert L % (2 ** n_layers) == 0
    assert (L & (L - 1)) == 0, "power-of-two L required (shift-based segments)"

    kernel = functools.partial(_aada_kernel, n_layers=n_layers, n_batch=N,
                               seq_len=L, self_attention=self_attention)
    vmem = pl.BlockSpec(memory_space=pltpu.MemorySpace.VMEM)
    smem = pl.BlockSpec(memory_space=pltpu.MemorySpace.SMEM)

    ex_packed = examples.astype(jnp.float32).reshape(1, N * L)
    sm_packed = samples.astype(jnp.float32).reshape(1, N * L)

    out = pl.pallas_call(
        kernel,
        out_shape=jax.ShapeDtypeStruct((1, N * L), jnp.float32),
        in_specs=[vmem, vmem, smem, vmem, vmem, vmem, vmem, vmem, vmem],
        out_specs=vmem,
    )(ex_packed, sm_packed,
      params["scalars"], params["ibn_w1"], params["ibn_b1"],
      params["ibn_w2"], params["ibn_b2"], params["ibn_w3"], params["ibn_b3"])
    return out.reshape(N, L)


# --------------------------- parameter creation ------------------------------

def _bn_init(key, c):
    k1, k2, k3, k4 = jax.random.split(key, 4)
    gamma = 1.0 + 0.1 * jax.random.normal(k1, (c,), jnp.float32)
    beta = 0.1 * jax.random.normal(k2, (c,), jnp.float32)
    rmean = 0.1 * jax.random.normal(k3, (c,), jnp.float32)
    rvar = jax.random.uniform(k4, (c,), jnp.float32, 0.5, 1.5)
    return gamma, beta, rmean, rvar


def _conv_init(key, cout, cin, scale=0.3):
    kw, kb = jax.random.split(key)
    w = scale * jax.random.normal(kw, (cout, cin, 3), jnp.float32)
    b = 0.1 * jax.random.normal(kb, (cout,), jnp.float32)
    return w, b


def _fold_conv_bn(w, b, bn):
    # eval-mode BatchNorm folded into the conv; per-tap weights stacked
    # VERTICALLY so the kernel does u = Wstk @ x then shift-matrix matmuls.
    gamma, beta, rmean, rvar = bn
    s = gamma / jnp.sqrt(rvar + EPS_BN)
    wf = w * s[:, None, None]                                   # (Cout, Cin, 3)
    bf = b * s + beta - rmean * s
    wstk = jnp.concatenate([wf[:, :, 0], wf[:, :, 1], wf[:, :, 2]], axis=0)
    return wstk, bf[:, None]                                    # (3Cout, Cin), (Cout, 1)


def _ibn_init(key, c, m):
    ks = jax.random.split(key, 6)
    w1, b1 = _conv_init(ks[0], m, c)
    w2, b2 = _conv_init(ks[1], m, m)
    w3, b3 = _conv_init(ks[2], c, m)
    return (_fold_conv_bn(w1, b1, _bn_init(ks[3], m)),
            _fold_conv_bn(w2, b2, _bn_init(ks[4], m)),
            _fold_conv_bn(w3, b3, _bn_init(ks[5], c)))


def _bn_scalar(key):
    gamma, beta, rmean, rvar = _bn_init(key, 1)
    s = gamma / jnp.sqrt(rvar + EPS_BN)
    return s[0], (beta - rmean * s)[0]


def _attn_unit(key):
    # (norm scale, norm shift, wq*wk, wv*wo) for one Attention block, d_model=1
    ks = jax.random.split(key, 5)
    sc, sh = _bn_scalar(ks[0])
    wq, wk, wv, wo = [0.5 * jax.random.normal(k, (), jnp.float32) for k in ks[1:]]
    return [sc, sh, wq * wk, wv * wo]          # score/output scales pre-folded


def _convt_unit(key):
    # (w0, w1, w2, bias) for ConvTranspose1d(1, 1, 3, stride=2, pad=1, out_pad=1)
    kw, kb = jax.random.split(key)
    w = 0.5 * jax.random.normal(kw, (3,), jnp.float32)
    b = 0.1 * jax.random.normal(kb, (), jnp.float32)
    return [w[0], w[1], w[2], b]


def init_params(key, inplates, midplates, n_heads, n_layers):
    assert inplates == 1 and n_heads == 1, (
        "AadaNet.forward adds a channel dim to (N, L) inputs -> inplates == 1")
    c, m = inplates, midplates
    k_ibn, k_attn, k_ct = jax.random.split(key, 3)

    # canonical IbnBlock order: example-encoder, sample-encoder, decoder layers
    ibn = [_ibn_init(k, c, m) for k in jax.random.split(k_ibn, 3 * n_layers)]
    params = {
        "ibn_w1": jnp.stack([blk[0][0] for blk in ibn]),        # (3n, 3M, C)
        "ibn_b1": jnp.stack([blk[0][1] for blk in ibn]),        # (3n, M, 1)
        "ibn_w2": jnp.stack([blk[1][0] for blk in ibn]),        # (3n, 3M, M)
        "ibn_b2": jnp.stack([blk[1][1] for blk in ibn]),
        "ibn_w3": jnp.stack([blk[2][0] for blk in ibn]),        # (3n, 3C, M)
        "ibn_b3": jnp.stack([blk[2][1] for blk in ibn]),
    }

    # scalar table (SMEM): attention units in _attn_scalar_base order, then the
    # decoder ConvTranspose units in _ct_scalar_base order.
    scalars = []
    for k in jax.random.split(k_attn, 5 * n_layers):
        scalars.extend(_attn_unit(k))
    for k in jax.random.split(k_ct, n_layers):
        scalars.extend(_convt_unit(k))
    params["scalars"] = jnp.stack([jnp.asarray(v, jnp.float32) for v in scalars])
    assert params["scalars"].shape[0] == _num_scalars(n_layers)
    return params


# ----------------------------------- main ------------------------------------

if __name__ == "__main__":
    # AadaNet(inplates=1, midplates=8, n_heads=1, dropout=0.1, n_layers=2,
    #         self_attention=True, variation=False)   [variation unused in forward]
    INPLATES, MIDPLATES, N_HEADS, N_LAYERS = 1, 8, 1, 2
    N, L = 2, 64                                        # L divisible by 2**n_layers

    key = jax.random.PRNGKey(0)
    kp, ke, ks = jax.random.split(key, 3)
    params = init_params(kp, INPLATES, MIDPLATES, N_HEADS, N_LAYERS)
    examples = jax.random.normal(ke, (N, L), jnp.float32)
    samples = jax.random.normal(ks, (N, L), jnp.float32)

    fwd = jax.jit(functools.partial(aada_forward, n_layers=N_LAYERS,
                                    self_attention=True))
    out = jax.block_until_ready(fwd(params, examples, samples))

    assert out.shape == (N, L), out.shape
    assert bool(jnp.all(jnp.isfinite(out)))
    print("KERNEL_OK")
</pallas_src>

<mosaic_0001>
module attributes {stable_mosaic.version = 11 : i64} {
  func.func @_aada_kernel(%arg0: memref<1x128xf32, #tpu.memory_space<vmem>>, %arg1: memref<1x128xf32, #tpu.memory_space<vmem>>, %arg2: memref<48xf32, #tpu.memory_space<smem>>, %arg3: memref<6x24x1xf32, #tpu.memory_space<vmem>>, %arg4: memref<6x8x1xf32, #tpu.memory_space<vmem>>, %arg5: memref<6x24x8xf32, #tpu.memory_space<vmem>>, %arg6: memref<6x8x1xf32, #tpu.memory_space<vmem>>, %arg7: memref<6x3x8xf32, #tpu.memory_space<vmem>>, %arg8: memref<6x1x1xf32, #tpu.memory_space<vmem>>, %arg9: memref<1x128xf32, #tpu.memory_space<vmem>>) attributes {dimension_semantics = [], scalar_prefetch = 0 : i64, scratch_operands = 0 : i64, tpu.core_type = #tpu.core_type<tc>} {
    %c0 = arith.constant 0 : index
    %c0_0 = arith.constant 0 : index
    %c0_1 = arith.constant 0 : index
    %0 = vector.load %arg3[%c0, %c0_0, %c0_1] : memref<6x24x1xf32, #tpu.memory_space<vmem>>, vector<6x24x1xf32>
    %c0_2 = arith.constant 0 : index
    %c0_3 = arith.constant 0 : index
    %c0_4 = arith.constant 0 : index
    %1 = vector.load %arg4[%c0_2, %c0_3, %c0_4] : memref<6x8x1xf32, #tpu.memory_space<vmem>>, vector<6x8x1xf32>
    %c0_5 = arith.constant 0 : index
    %c0_6 = arith.constant 0 : index
    %c0_7 = arith.constant 0 : index
    %2 = vector.load %arg5[%c0_5, %c0_6, %c0_7] : memref<6x24x8xf32, #tpu.memory_space<vmem>>, vector<6x24x8xf32>
    %c0_8 = arith.constant 0 : index
    %c0_9 = arith.constant 0 : index
    %c0_10 = arith.constant 0 : index
    %3 = vector.load %arg6[%c0_8, %c0_9, %c0_10] : memref<6x8x1xf32, #tpu.memory_space<vmem>>, vector<6x8x1xf32>
    %c0_11 = arith.constant 0 : index
    %c0_12 = arith.constant 0 : index
    %c0_13 = arith.constant 0 : index
    %4 = vector.load %arg7[%c0_11, %c0_12, %c0_13] : memref<6x3x8xf32, #tpu.memory_space<vmem>>, vector<6x3x8xf32>
    %c0_14 = arith.constant 0 : index
    %c0_15 = arith.constant 0 : index
    %c0_16 = arith.constant 0 : index
    %5 = vector.load %arg8[%c0_14, %c0_15, %c0_16] : memref<6x1x1xf32, #tpu.memory_space<vmem>>, vector<6x1x1xf32>
    %c0_17 = arith.constant 0 : index
    %c0_18 = arith.constant 0 : index
    %6 = vector.load %arg0[%c0_17, %c0_18] : memref<1x128xf32, #tpu.memory_space<vmem>>, vector<1x128xf32>
    %c0_19 = arith.constant 0 : index
    %c0_20 = arith.constant 0 : index
    %7 = vector.load %arg1[%c0_19, %c0_20] : memref<1x128xf32, #tpu.memory_space<vmem>>, vector<1x128xf32>
    %8 = vector.extract_strided_slice %0 {offsets = [0, 0, 0], sizes = [1, 24, 1], strides = [1, 1, 1]} : vector<6x24x1xf32> to vector<1x24x1xf32>
    %9 = vector.shape_cast %8 : vector<1x24x1xf32> to vector<24x1xf32>
    %10 = vector.extract_strided_slice %1 {offsets = [0, 0, 0], sizes = [1, 8, 1], strides = [1, 1, 1]} : vector<6x8x1xf32> to vector<1x8x1xf32>
    %11 = vector.shape_cast %10 : vector<1x8x1xf32> to vector<8x1xf32>
    %12 = tpu.iota {dimensions = array<i32: 0>} : vector<128x128xi32>
    %13 = tpu.iota {dimensions = array<i32: 1>} : vector<128x128xi32>
    %c6_i32 = arith.constant 6 : i32
    %14 = vector.broadcast %c6_i32 : i32 to vector<128x128xi32>
    %15 = arith.shrsi %12, %14 : vector<128x128xi32>
    %c6_i32_21 = arith.constant 6 : i32
    %16 = vector.broadcast %c6_i32_21 : i32 to vector<128x128xi32>
    %17 = arith.shrsi %13, %16 : vector<128x128xi32>
    %18 = arith.cmpi eq, %15, %17 : vector<128x128xi32>
    %c1_i32 = arith.constant 1 : i32
    %19 = vector.broadcast %c1_i32 : i32 to vector<128x128xi32>
    %20 = arith.subi %13, %19 : vector<128x128xi32>
    %21 = arith.cmpi eq, %12, %20 : vector<128x128xi32>
    %22 = arith.andi %21, %18 : vector<128x128xi1>
    %23 = arith.extui %22 : vector<128x128xi1> to vector<128x128xi32>
    %24 = arith.sitofp %23 : vector<128x128xi32> to vector<128x128xf32>
    %c1_i32_22 = arith.constant 1 : i32
    %25 = vector.broadcast %c1_i32_22 : i32 to vector<128x128xi32>
    %26 = arith.addi %13, %25 : vector<128x128xi32>
    %27 = arith.cmpi eq, %12, %26 : vector<128x128xi32>
    %28 = arith.andi %27, %18 : vector<128x128xi1>
    %29 = arith.extui %28 : vector<128x128xi1> to vector<128x128xi32>
    %30 = arith.sitofp %29 : vector<128x128xi32> to vector<128x128xf32>
    %31 = vector.broadcast %9 : vector<24x1xf32> to vector<24x128xf32>
    %32 = vector.broadcast %6 : vector<1x128xf32> to vector<24x128xf32>
    %33 = arith.mulf %31, %32 : vector<24x128xf32>
    %34 = vector.extract_strided_slice %33 {offsets = [0, 0], sizes = [8, 128], strides = [1, 1]} : vector<24x128xf32> to vector<8x128xf32>
    %cst = arith.constant dense<0.000000e+00> : vector<8x128xf32>
    %35 = tpu.matmul %34, %24, %cst {dimension_numbers = #tpu.dot_dimension_numbers<[1], [0], [0], [1], [0, 0, 1, 1], [], []>} : vector<8x128xf32>, vector<128x128xf32>, vector<8x128xf32> -> vector<8x128xf32>
    %36 = vector.extract_strided_slice %33 {offsets = [8, 0], sizes = [8, 128], strides = [1, 1]} : vector<24x128xf32> to vector<8x128xf32>
    %37 = arith.addf %35, %36 : vector<8x128xf32>
    %38 = vector.extract_strided_slice %33 {offsets = [16, 0], sizes = [8, 128], strides = [1, 1]} : vector<24x128xf32> to vector<8x128xf32>
    %cst_23 = arith.constant dense<0.000000e+00> : vector<8x128xf32>
    %39 = tpu.matmul %38, %30, %cst_23 {dimension_numbers = #tpu.dot_dimension_numbers<[1], [0], [0], [1], [0, 0, 1, 1], [], []>} : vector<8x128xf32>, vector<128x128xf32>, vector<8x128xf32> -> vector<8x128xf32>
    %40 = arith.addf %37, %39 : vector<8x128xf32>
    %41 = vector.broadcast %11 : vector<8x1xf32> to vector<8x128xf32>
    %42 = arith.addf %40, %41 : vector<8x128xf32>
    %cst_24 = arith.constant 0.000000e+00 : f32
    %43 = vector.broadcast %cst_24 : f32 to vector<8x128xf32>
    %44 = arith.maximumf %42, %43 : vector<8x128xf32>
    %45 = vector.extract_strided_slice %2 {offsets = [0, 0, 0], sizes = [1, 24, 8], strides = [1, 1, 1]} : vector<6x24x8xf32> to vector<1x24x8xf32>
    %46 = vector.shape_cast %45 : vector<1x24x8xf32> to vector<24x8xf32>
    %47 = vector.extract_strided_slice %3 {offsets = [0, 0, 0], sizes = [1, 8, 1], strides = [1, 1, 1]} : vector<6x8x1xf32> to vector<1x8x1xf32>
    %48 = vector.shape_cast %47 : vector<1x8x1xf32> to vector<8x1xf32>
    %cst_25 = arith.constant dense<0.000000e+00> : vector<24x128xf32>
    %49 = tpu.matmul %46, %44, %cst_25 {dimension_numbers = #tpu.dot_dimension_numbers<[1], [0], [0], [1], [0, 0, 1, 1], [], []>} : vector<24x8xf32>, vector<8x128xf32>, vector<24x128xf32> -> vector<24x128xf32>
    %50 = vector.extract_strided_slice %49 {offsets = [0, 0], sizes = [8, 128], strides = [1, 1]} : vector<24x128xf32> to vector<8x128xf32>
    %cst_26 = arith.constant dense<0.000000e+00> : vector<8x128xf32>
    %51 = tpu.matmul %50, %24, %cst_26 {dimension_numbers = #tpu.dot_dimension_numbers<[1], [0], [0], [1], [0, 0, 1, 1], [], []>} : vector<8x128xf32>, vector<128x128xf32>, vector<8x128xf32> -> vector<8x128xf32>
    %52 = vector.extract_strided_slice %49 {offsets = [8, 0], sizes = [8, 128], strides = [1, 1]} : vector<24x128xf32> to vector<8x128xf32>
    %53 = arith.addf %51, %52 : vector<8x128xf32>
    %54 = vector.extract_strided_slice %49 {offsets = [16, 0], sizes = [8, 128], strides = [1, 1]} : vector<24x128xf32> to vector<8x128xf32>
    %cst_27 = arith.constant dense<0.000000e+00> : vector<8x128xf32>
    %55 = tpu.matmul %54, %30, %cst_27 {dimension_numbers = #tpu.dot_dimension_numbers<[1], [0], [0], [1], [0, 0, 1, 1], [], []>} : vector<8x128xf32>, vector<128x128xf32>, vector<8x128xf32> -> vector<8x128xf32>
    %56 = arith.addf %53, %55 : vector<8x128xf32>
    %57 = vector.broadcast %48 : vector<8x1xf32> to vector<8x128xf32>
    %58 = arith.addf %56, %57 : vector<8x128xf32>
    %cst_28 = arith.constant 0.000000e+00 : f32
    %59 = vector.broadcast %cst_28 : f32 to vector<8x128xf32>
    %60 = arith.maximumf %58, %59 : vector<8x128xf32>
    %61 = vector.extract_strided_slice %4 {offsets = [0, 0, 0], sizes = [1, 3, 8], strides = [1, 1, 1]} : vector<6x3x8xf32> to vector<1x3x8xf32>
    %62 = vector.shape_cast %61 : vector<1x3x8xf32> to vector<3x8xf32>
    %63 = vector.extract_strided_slice %5 {offsets = [0, 0, 0], sizes = [1, 1, 1], strides = [1, 1, 1]} : vector<6x1x1xf32> to vector<1x1x1xf32>
    %64 = vector.shape_cast %63 : vector<1x1x1xf32> to vector<1x1xf32>
    %cst_29 = arith.constant dense<0.000000e+00> : vector<3x128xf32>
    %65 = tpu.matmul %62, %60, %cst_29 {dimension_numbers = #tpu.dot_dimension_numbers<[1], [0], [0], [1], [0, 0, 1, 1], [], []>} : vector<3x8xf32>, vector<8x128xf32>, vector<3x128xf32> -> vector<3x128xf32>
    %66 = vector.extract_strided_slice %65 {offsets = [0, 0], sizes = [1, 128], strides = [1, 1]} : vector<3x128xf32> to vector<1x128xf32>
    %cst_30 = arith.constant dense<0.000000e+00> : vector<1x128xf32>
    %67 = tpu.matmul %66, %24, %cst_30 {dimension_numbers = #tpu.dot_dimension_numbers<[1], [0], [0], [1], [0, 0, 1, 1], [], []>} : vector<1x128xf32>, vector<128x128xf32>, vector<1x128xf32> -> vector<1x128xf32>
    %68 = vector.extract_strided_slice %65 {offsets = [1, 0], sizes = [1, 128], strides = [1, 1]} : vector<3x128xf32> to vector<1x128xf32>
    %69 = arith.addf %67, %68 : vector<1x128xf32>
    %70 = vector.extract_strided_slice %65 {offsets = [2, 0], sizes = [1, 128], strides = [1, 1]} : vector<3x128xf32> to vector<1x128xf32>
    %cst_31 = arith.constant dense<0.000000e+00> : vector<1x128xf32>
    %71 = tpu.matmul %70, %30, %cst_31 {dimension_numbers = #tpu.dot_dimension_numbers<[1], [0], [0], [1], [0, 0, 1, 1], [], []>} : vector<1x128xf32>, vector<128x128xf32>, vector<1x128xf32> -> vector<1x128xf32>
    %72 = arith.addf %69, %71 : vector<1x128xf32>
    %73 = vector.broadcast %64 : vector<1x1xf32> to vector<1x128xf32>
    %74 = arith.addf %72, %73 : vector<1x128xf32>
    %75 = arith.addf %6, %74 : vector<1x128xf32>
    %76 = tpu.iota {dimensions = array<i32: 0>} : vector<128x128xi32>
    %77 = tpu.iota {dimensions = array<i32: 1>} : vector<128x128xi32>
    %c6_i32_32 = arith.constant 6 : i32
    %78 = vector.broadcast %c6_i32_32 : i32 to vector<128x128xi32>
    %79 = arith.shrsi %76, %78 : vector<128x128xi32>
    %c6_i32_33 = arith.constant 6 : i32
    %80 = vector.broadcast %c6_i32_33 : i32 to vector<128x128xi32>
    %81 = arith.shrsi %77, %80 : vector<128x128xi32>
    %82 = arith.cmpi eq, %79, %81 : vector<128x128xi32>
    %83 = arith.extui %82 : vector<128x128xi1> to vector<128x128xi32>
    %84 = arith.sitofp %83 : vector<128x128xi32> to vector<128x128xf32>
    %cst_34 = arith.constant 1.562500e-02 : f32
    %85 = vector.broadcast %cst_34 : f32 to vector<128x128xf32>
    %86 = arith.mulf %84, %85 : vector<128x128xf32>
    %cst_35 = arith.constant dense<0.000000e+00> : vector<1x128xf32>
    %87 = tpu.matmul %75, %86, %cst_35 {dimension_numbers = #tpu.dot_dimension_numbers<[1], [0], [0], [1], [0, 0, 1, 1], [], []>} : vector<1x128xf32>, vector<128x128xf32>, vector<1x128xf32> -> vector<1x128xf32>
    %88 = arith.subf %75, %87 : vector<1x128xf32>
    %89 = arith.mulf %88, %88 : vector<1x128xf32>
    %cst_36 = arith.constant dense<0.000000e+00> : vector<1x128xf32>
    %90 = tpu.matmul %89, %86, %cst_36 {dimension_numbers = #tpu.dot_dimension_numbers<[1], [0], [0], [1], [0, 0, 1, 1], [], []>} : vector<1x128xf32>, vector<128x128xf32>, vector<1x128xf32> -> vector<1x128xf32>
    %91 = arith.subf %75, %87 : vector<1x128xf32>
    %cst_37 = arith.constant 9.99999974E-6 : f32
    %92 = vector.broadcast %cst_37 : f32 to vector<1x128xf32>
    %93 = arith.addf %90, %92 : vector<1x128xf32>
    %94 = math.rsqrt %93 : vector<1x128xf32>
    %95 = arith.mulf %91, %94 : vector<1x128xf32>
    %cst_38 = arith.constant 0.000000e+00 : f32
    %96 = vector.broadcast %cst_38 : f32 to vector<1x128xf32>
    %97 = arith.maximumf %95, %96 : vector<1x128xf32>
    %98 = tpu.iota {dimensions = array<i32: 0>} : vector<128x64xi32>
    %99 = tpu.iota {dimensions = array<i32: 1>} : vector<128x64xi32>
    %c2_i32 = arith.constant 2 : i32
    %100 = vector.broadcast %c2_i32 : i32 to vector<128x64xi32>
    %101 = arith.muli %100, %99 : vector<128x64xi32>
    %102 = arith.cmpi eq, %98, %101 : vector<128x64xi32>
    %103 = arith.extui %102 : vector<128x64xi1> to vector<128x64xi32>
    %104 = arith.sitofp %103 : vector<128x64xi32> to vector<128x64xf32>
    %c2_i32_39 = arith.constant 2 : i32
    %105 = vector.broadcast %c2_i32_39 : i32 to vector<128x64xi32>
    %106 = arith.muli %105, %99 : vector<128x64xi32>
    %c1_i32_40 = arith.constant 1 : i32
    %107 = vector.broadcast %c1_i32_40 : i32 to vector<128x64xi32>
    %108 = arith.addi %106, %107 : vector<128x64xi32>
    %109 = arith.cmpi eq, %98, %108 : vector<128x64xi32>
    %110 = arith.extui %109 : vector<128x64xi1> to vector<128x64xi32>
    %111 = arith.sitofp %110 : vector<128x64xi32> to vector<128x64xf32>
    %cst_41 = arith.constant dense<0.000000e+00> : vector<1x64xf32>
    %112 = tpu.matmul %97, %104, %cst_41 {dimension_numbers = #tpu.dot_dimension_numbers<[1], [0], [0], [1], [0, 0, 1, 1], [], []>} : vector<1x128xf32>, vector<128x64xf32>, vector<1x64xf32> -> vector<1x64xf32>
    %cst_42 = arith.constant dense<0.000000e+00> : vector<1x64xf32>
    %113 = tpu.matmul %97, %111, %cst_42 {dimension_numbers = #tpu.dot_dimension_numbers<[1], [0], [0], [1], [0, 0, 1, 1], [], []>} : vector<1x128xf32>, vector<128x64xf32>, vector<1x64xf32> -> vector<1x64xf32>
    %114 = arith.maximumf %112, %113 : vector<1x64xf32>
    %c0_43 = arith.constant 0 : index
    %115 = memref.load %arg2[%c0_43] : memref<48xf32, #tpu.memory_space<smem>>
    %c1 = arith.constant 1 : index
    %116 = memref.load %arg2[%c1] : memref<48xf32, #tpu.memory_space<smem>>
    %c2 = arith.constant 2 : index
    %117 = memref.load %arg2[%c2] : memref<48xf32, #tpu.memory_space<smem>>
    %c3 = arith.constant 3 : index
    %118 = memref.load %arg2[%c3] : memref<48xf32, #tpu.memory_space<smem>>
    %119 = vector.broadcast %115 : f32 to vector<1x64xf32>
    %120 = arith.mulf %114, %119 : vector<1x64xf32>
    %121 = vector.broadcast %116 : f32 to vector<1x64xf32>
    %122 = arith.addf %120, %121 : vector<1x64xf32>
    %123 = tpu.iota {dimensions = array<i32: 0>} : vector<64x64xi32>
    %124 = tpu.iota {dimensions = array<i32: 1>} : vector<64x64xi32>
    %125 = arith.cmpi eq, %123, %124 : vector<64x64xi32>
    %126 = arith.extui %125 : vector<64x64xi1> to vector<64x64xi32>
    %127 = arith.sitofp %126 : vector<64x64xi32> to vector<64x64xf32>
    %128 = vector.broadcast %122 : vector<1x64xf32> to vector<64x64xf32>
    %129 = arith.mulf %127, %128 : vector<64x64xf32>
    %cst_44 = arith.constant dense<0.000000e+00> : vector<64xf32>
    %130 = vector.multi_reduction <add>, %129, %cst_44 [1] : vector<64x64xf32> to vector<64xf32>
    %131 = vector.shape_cast %130 : vector<64xf32> to vector<64x1xf32>
    %132 = vector.broadcast %131 : vector<64x1xf32> to vector<64x64xf32>
    %133 = vector.broadcast %122 : vector<1x64xf32> to vector<64x64xf32>
    %134 = arith.mulf %132, %133 : vector<64x64xf32>
    %135 = vector.broadcast %117 : f32 to vector<64x64xf32>
    %136 = arith.mulf %134, %135 : vector<64x64xf32>
    %137 = tpu.iota {dimensions = array<i32: 0>} : vector<64x64xi32>
    %138 = tpu.iota {dimensions = array<i32: 1>} : vector<64x64xi32>
    %c5_i32 = arith.constant 5 : i32
    %139 = vector.broadcast %c5_i32 : i32 to vector<64x64xi32>
    %140 = arith.shrsi %137, %139 : vector<64x64xi32>
    %c5_i32_45 = arith.constant 5 : i32
    %141 = vector.broadcast %c5_i32_45 : i32 to vector<64x64xi32>
    %142 = arith.shrsi %138, %141 : vector<64x64xi32>
    %143 = arith.cmpi eq, %140, %142 : vector<64x64xi32>
    %cst_46 = arith.constant 0.000000e+00 : f32
    %cst_47 = arith.constant -1.000000e+30 : f32
    %144 = vector.broadcast %cst_46 : f32 to vector<64x64xf32>
    %145 = vector.broadcast %cst_47 : f32 to vector<64x64xf32>
    %146 = arith.select %143, %144, %145 : vector<64x64xi1>, vector<64x64xf32>
    %147 = arith.addf %136, %146 : vector<64x64xf32>
    %cst_48 = arith.constant dense<0xFF800000> : vector<64xf32>
    %148 = vector.multi_reduction <maximumf>, %147, %cst_48 [1] : vector<64x64xf32> to vector<64xf32>
    %149 = vector.shape_cast %148 : vector<64xf32> to vector<64x1xf32>
    %150 = vector.broadcast %149 : vector<64x1xf32> to vector<64x64xf32>
    %151 = arith.subf %147, %150 : vector<64x64xf32>
    %152 = math.exp %151 : vector<64x64xf32>
    %cst_49 = arith.constant dense<0.000000e+00> : vector<64xf32>
    %153 = vector.multi_reduction <add>, %152, %cst_49 [1] : vector<64x64xf32> to vector<64xf32>
    %154 = vector.shape_cast %153 : vector<64xf32> to vector<64x1xf32>
    %155 = tpu.reciprocal %154 {approx = true} : vector<64x1xf32> -> vector<64x1xf32>
    %156 = vector.broadcast %155 : vector<64x1xf32> to vector<64x64xf32>
    %157 = arith.mulf %152, %156 : vector<64x64xf32>
    %cst_50 = arith.constant dense<0.000000e+00> : vector<1x64xf32>
    %158 = tpu.matmul %122, %157, %cst_50 {dimension_numbers = #tpu.dot_dimension_numbers<[1], [1], [0], [0], [0, 0, 1, 0], [], []>} : vector<1x64xf32>, vector<64x64xf32>, vector<1x64xf32> -> vector<1x64xf32>
    %159 = vector.broadcast %118 : f32 to vector<1x64xf32>
    %160 = arith.mulf %159, %158 : vector<1x64xf32>
    %161 = arith.addf %122, %160 : vector<1x64xf32>
    %162 = vector.extract_strided_slice %0 {offsets = [1, 0, 0], sizes = [1, 24, 1], strides = [1, 1, 1]} : vector<6x24x1xf32> to vector<1x24x1xf32>
    %163 = vector.shape_cast %162 : vector<1x24x1xf32> to vector<24x1xf32>
    %164 = vector.extract_strided_slice %1 {offsets = [1, 0, 0], sizes = [1, 8, 1], strides = [1, 1, 1]} : vector<6x8x1xf32> to vector<1x8x1xf32>
    %165 = vector.shape_cast %164 : vector<1x8x1xf32> to vector<8x1xf32>
    %166 = tpu.iota {dimensions = array<i32: 0>} : vector<64x64xi32>
    %167 = tpu.iota {dimensions = array<i32: 1>} : vector<64x64xi32>
    %c5_i32_51 = arith.constant 5 : i32
    %168 = vector.broadcast %c5_i32_51 : i32 to vector<64x64xi32>
    %169 = arith.shrsi %166, %168 : vector<64x64xi32>
    %c5_i32_52 = arith.constant 5 : i32
    %170 = vector.broadcast %c5_i32_52 : i32 to vector<64x64xi32>
    %171 = arith.shrsi %167, %170 : vector<64x64xi32>
    %172 = arith.cmpi eq, %169, %171 : vector<64x64xi32>
    %c1_i32_53 = arith.constant 1 : i32
    %173 = vector.broadcast %c1_i32_53 : i32 to vector<64x64xi32>
    %174 = arith.subi %167, %173 : vector<64x64xi32>
    %175 = arith.cmpi eq, %166, %174 : vector<64x64xi32>
    %176 = arith.andi %175, %172 : vector<64x64xi1>
    %177 = arith.extui %176 : vector<64x64xi1> to vector<64x64xi32>
    %178 = arith.sitofp %177 : vector<64x64xi32> to vector<64x64xf32>
    %c1_i32_54 = arith.constant 1 : i32
    %179 = vector.broadcast %c1_i32_54 : i32 to vector<64x64xi32>
    %180 = arith.addi %167, %179 : vector<64x64xi32>
    %181 = arith.cmpi eq, %166, %180 : vector<64x64xi32>
    %182 = arith.andi %181, %172 : vector<64x64xi1>
    %183 = arith.extui %182 : vector<64x64xi1> to vector<64x64xi32>
    %184 = arith.sitofp %183 : vector<64x64xi32> to vector<64x64xf32>
    %185 = vector.broadcast %163 : vector<24x1xf32> to vector<24x64xf32>
    %186 = vector.broadcast %161 : vector<1x64xf32> to vector<24x64xf32>
    %187 = arith.mulf %185, %186 : vector<24x64xf32>
    %188 = vector.extract_strided_slice %187 {offsets = [0, 0], sizes = [8, 64], strides = [1, 1]} : vector<24x64xf32> to vector<8x64xf32>
    %cst_55 = arith.constant dense<0.000000e+00> : vector<8x64xf32>
    %189 = tpu.matmul %188, %178, %cst_55 {dimension_numbers = #tpu.dot_dimension_numbers<[1], [0], [0], [1], [0, 0, 1, 1], [], []>} : vector<8x64xf32>, vector<64x64xf32>, vector<8x64xf32> -> vector<8x64xf32>
    %190 = vector.extract_strided_slice %187 {offsets = [8, 0], sizes = [8, 64], strides = [1, 1]} : vector<24x64xf32> to vector<8x64xf32>
    %191 = arith.addf %189, %190 : vector<8x64xf32>
    %192 = vector.extract_strided_slice %187 {offsets = [16, 0], sizes = [8, 64], strides = [1, 1]} : vector<24x64xf32> to vector<8x64xf32>
    %cst_56 = arith.constant dense<0.000000e+00> : vector<8x64xf32>
    %193 = tpu.matmul %192, %184, %cst_56 {dimension_numbers = #tpu.dot_dimension_numbers<[1], [0], [0], [1], [0, 0, 1, 1], [], []>} : vector<8x64xf32>, vector<64x64xf32>, vector<8x64xf32> -> vector<8x64xf32>
    %194 = arith.addf %191, %193 : vector<8x64xf32>
    %195 = vector.broadcast %165 : vector<8x1xf32> to vector<8x64xf32>
    %196 = arith.addf %194, %195 : vector<8x64xf32>
    %cst_57 = arith.constant 0.000000e+00 : f32
    %197 = vector.broadcast %cst_57 : f32 to vector<8x64xf32>
    %198 = arith.maximumf %196, %197 : vector<8x64xf32>
    %199 = vector.extract_strided_slice %2 {offsets = [1, 0, 0], sizes = [1, 24, 8], strides = [1, 1, 1]} : vector<6x24x8xf32> to vector<1x24x8xf32>
    %200 = vector.shape_cast %199 : vector<1x24x8xf32> to vector<24x8xf32>
    %201 = vector.extract_strided_slice %3 {offsets = [1, 0, 0], sizes = [1, 8, 1], strides = [1, 1, 1]} : vector<6x8x1xf32> to vector<1x8x1xf32>
    %202 = vector.shape_cast %201 : vector<1x8x1xf32> to vector<8x1xf32>
    %cst_58 = arith.constant dense<0.000000e+00> : vector<24x64xf32>
    %203 = tpu.matmul %200, %198, %cst_58 {dimension_numbers = #tpu.dot_dimension_numbers<[1], [0], [0], [1], [0, 0, 1, 1], [], []>} : vector<24x8xf32>, vector<8x64xf32>, vector<24x64xf32> -> vector<24x64xf32>
    %204 = vector.extract_strided_slice %203 {offsets = [0, 0], sizes = [8, 64], strides = [1, 1]} : vector<24x64xf32> to vector<8x64xf32>
    %cst_59 = arith.constant dense<0.000000e+00> : vector<8x64xf32>
    %205 = tpu.matmul %204, %178, %cst_59 {dimension_numbers = #tpu.dot_dimension_numbers<[1], [0], [0], [1], [0, 0, 1, 1], [], []>} : vector<8x64xf32>, vector<64x64xf32>, vector<8x64xf32> -> vector<8x64xf32>
    %206 = vector.extract_strided_slice %203 {offsets = [8, 0], sizes = [8, 64], strides = [1, 1]} : vector<24x64xf32> to vector<8x64xf32>
    %207 = arith.addf %205, %206 : vector<8x64xf32>
    %208 = vector.extract_strided_slice %203 {offsets = [16, 0], sizes = [8, 64], strides = [1, 1]} : vector<24x64xf32> to vector<8x64xf32>
    %cst_60 = arith.constant dense<0.000000e+00> : vector<8x64xf32>
    %209 = tpu.matmul %208, %184, %cst_60 {dimension_numbers = #tpu.dot_dimension_numbers<[1], [0], [0], [1], [0, 0, 1, 1], [], []>} : vector<8x64xf32>, vector<64x64xf32>, vector<8x64xf32> -> vector<8x64xf32>
    %210 = arith.addf %207, %209 : vector<8x64xf32>
    %211 = vector.broadcast %202 : vector<8x1xf32> to vector<8x64xf32>
    %212 = arith.addf %210, %211 : vector<8x64xf32>
    %cst_61 = arith.constant 0.000000e+00 : f32
    %213 = vector.broadcast %cst_61 : f32 to vector<8x64xf32>
    %214 = arith.maximumf %212, %213 : vector<8x64xf32>
    %215 = vector.extract_strided_slice %4 {offsets = [1, 0, 0], sizes = [1, 3, 8], strides = [1, 1, 1]} : vector<6x3x8xf32> to vector<1x3x8xf32>
    %216 = vector.shape_cast %215 : vector<1x3x8xf32> to vector<3x8xf32>
    %217 = vector.extract_strided_slice %5 {offsets = [1, 0, 0], sizes = [1, 1, 1], strides = [1, 1, 1]} : vector<6x1x1xf32> to vector<1x1x1xf32>
    %218 = vector.shape_cast %217 : vector<1x1x1xf32> to vector<1x1xf32>
    %cst_62 = arith.constant dense<0.000000e+00> : vector<3x64xf32>
    %219 = tpu.matmul %216, %214, %cst_62 {dimension_numbers = #tpu.dot_dimension_numbers<[1], [0], [0], [1], [0, 0, 1, 1], [], []>} : vector<3x8xf32>, vector<8x64xf32>, vector<3x64xf32> -> vector<3x64xf32>
    %220 = vector.extract_strided_slice %219 {offsets = [0, 0], sizes = [1, 64], strides = [1, 1]} : vector<3x64xf32> to vector<1x64xf32>
    %cst_63 = arith.constant dense<0.000000e+00> : vector<1x64xf32>
    %221 = tpu.matmul %220, %178, %cst_63 {dimension_numbers = #tpu.dot_dimension_numbers<[1], [0], [0], [1], [0, 0, 1, 1], [], []>} : vector<1x64xf32>, vector<64x64xf32>, vector<1x64xf32> -> vector<1x64xf32>
    %222 = vector.extract_strided_slice %219 {offsets = [1, 0], sizes = [1, 64], strides = [1, 1]} : vector<3x64xf32> to vector<1x64xf32>
    %223 = arith.addf %221, %222 : vector<1x64xf32>
    %224 = vector.extract_strided_slice %219 {offsets = [2, 0], sizes = [1, 64], strides = [1, 1]} : vector<3x64xf32> to vector<1x64xf32>
    %cst_64 = arith.constant dense<0.000000e+00> : vector<1x64xf32>
    %225 = tpu.matmul %224, %184, %cst_64 {dimension_numbers = #tpu.dot_dimension_numbers<[1], [0], [0], [1], [0, 0, 1, 1], [], []>} : vector<1x64xf32>, vector<64x64xf32>, vector<1x64xf32> -> vector<1x64xf32>
    %226 = arith.addf %223, %225 : vector<1x64xf32>
    %227 = vector.broadcast %218 : vector<1x1xf32> to vector<1x64xf32>
    %228 = arith.addf %226, %227 : vector<1x64xf32>
    %229 = arith.addf %161, %228 : vector<1x64xf32>
    %230 = tpu.iota {dimensions = array<i32: 0>} : vector<64x64xi32>
    %231 = tpu.iota {dimensions = array<i32: 1>} : vector<64x64xi32>
    %c5_i32_65 = arith.constant 5 : i32
    %232 = vector.broadcast %c5_i32_65 : i32 to vector<64x64xi32>
    %233 = arith.shrsi %230, %232 : vector<64x64xi32>
    %c5_i32_66 = arith.constant 5 : i32
    %234 = vector.broadcast %c5_i32_66 : i32 to vector<64x64xi32>
    %235 = arith.shrsi %231, %234 : vector<64x64xi32>
    %236 = arith.cmpi eq, %233, %235 : vector<64x64xi32>
    %237 = arith.extui %236 : vector<64x64xi1> to vector<64x64xi32>
    %238 = arith.sitofp %237 : vector<64x64xi32> to vector<64x64xf32>
    %cst_67 = arith.constant 3.125000e-02 : f32
    %239 = vector.broadcast %cst_67 : f32 to vector<64x64xf32>
    %240 = arith.mulf %238, %239 : vector<64x64xf32>
    %cst_68 = arith.constant dense<0.000000e+00> : vector<1x64xf32>
    %241 = tpu.matmul %229, %240, %cst_68 {dimension_numbers = #tpu.dot_dimension_numbers<[1], [0], [0], [1], [0, 0, 1, 1], [], []>} : vector<1x64xf32>, vector<64x64xf32>, vector<1x64xf32> -> vector<1x64xf32>
    %242 = arith.subf %229, %241 : vector<1x64xf32>
    %243 = arith.mulf %242, %242 : vector<1x64xf32>
    %cst_69 = arith.constant dense<0.000000e+00> : vector<1x64xf32>
    %244 = tpu.matmul %243, %240, %cst_69 {dimension_numbers = #tpu.dot_dimension_numbers<[1], [0], [0], [1], [0, 0, 1, 1], [], []>} : vector<1x64xf32>, vector<64x64xf32>, vector<1x64xf32> -> vector<1x64xf32>
    %245 = arith.subf %229, %241 : vector<1x64xf32>
    %cst_70 = arith.constant 9.99999974E-6 : f32
    %246 = vector.broadcast %cst_70 : f32 to vector<1x64xf32>
    %247 = arith.addf %244, %246 : vector<1x64xf32>
    %248 = math.rsqrt %247 : vector<1x64xf32>
    %249 = arith.mulf %245, %248 : vector<1x64xf32>
    %cst_71 = arith.constant 0.000000e+00 : f32
    %250 = vector.broadcast %cst_71 : f32 to vector<1x64xf32>
    %251 = arith.maximumf %249, %250 : vector<1x64xf32>
    %252 = tpu.iota {dimensions = array<i32: 0>} : vector<64x32xi32>
    %253 = tpu.iota {dimensions = array<i32: 1>} : vector<64x32xi32>
    %c2_i32_72 = arith.constant 2 : i32
    %254 = vector.broadcast %c2_i32_72 : i32 to vector<64x32xi32>
    %255 = arith.muli %254, %253 : vector<64x32xi32>
    %256 = arith.cmpi eq, %252, %255 : vector<64x32xi32>
    %257 = arith.extui %256 : vector<64x32xi1> to vector<64x32xi32>
    %258 = arith.sitofp %257 : vector<64x32xi32> to vector<64x32xf32>
    %c2_i32_73 = arith.constant 2 : i32
    %259 = vector.broadcast %c2_i32_73 : i32 to vector<64x32xi32>
    %260 = arith.muli %259, %253 : vector<64x32xi32>
    %c1_i32_74 = arith.constant 1 : i32
    %261 = vector.broadcast %c1_i32_74 : i32 to vector<64x32xi32>
    %262 = arith.addi %260, %261 : vector<64x32xi32>
    %263 = arith.cmpi eq, %252, %262 : vector<64x32xi32>
    %264 = arith.extui %263 : vector<64x32xi1> to vector<64x32xi32>
    %265 = arith.sitofp %264 : vector<64x32xi32> to vector<64x32xf32>
    %cst_75 = arith.constant dense<0.000000e+00> : vector<1x32xf32>
    %266 = tpu.matmul %251, %258, %cst_75 {dimension_numbers = #tpu.dot_dimension_numbers<[1], [0], [0], [1], [0, 0, 1, 1], [], []>} : vector<1x64xf32>, vector<64x32xf32>, vector<1x32xf32> -> vector<1x32xf32>
    %cst_76 = arith.constant dense<0.000000e+00> : vector<1x32xf32>
    %267 = tpu.matmul %251, %265, %cst_76 {dimension_numbers = #tpu.dot_dimension_numbers<[1], [0], [0], [1], [0, 0, 1, 1], [], []>} : vector<1x64xf32>, vector<64x32xf32>, vector<1x32xf32> -> vector<1x32xf32>
    %268 = arith.maximumf %266, %267 : vector<1x32xf32>
    %c4 = arith.constant 4 : index
    %269 = memref.load %arg2[%c4] : memref<48xf32, #tpu.memory_space<smem>>
    %c5 = arith.constant 5 : index
    %270 = memref.load %arg2[%c5] : memref<48xf32, #tpu.memory_space<smem>>
    %c6 = arith.constant 6 : index
    %271 = memref.load %arg2[%c6] : memref<48xf32, #tpu.memory_space<smem>>
    %c7 = arith.constant 7 : index
    %272 = memref.load %arg2[%c7] : memref<48xf32, #tpu.memory_space<smem>>
    %273 = vector.broadcast %269 : f32 to vector<1x32xf32>
    %274 = arith.mulf %268, %273 : vector<1x32xf32>
    %275 = vector.broadcast %270 : f32 to vector<1x32xf32>
    %276 = arith.addf %274, %275 : vector<1x32xf32>
    %277 = tpu.iota {dimensions = array<i32: 0>} : vector<32x32xi32>
    %278 = tpu.iota {dimensions = array<i32: 1>} : vector<32x32xi32>
    %279 = arith.cmpi eq, %277, %278 : vector<32x32xi32>
    %280 = arith.extui %279 : vector<32x32xi1> to vector<32x32xi32>
    %281 = arith.sitofp %280 : vector<32x32xi32> to vector<32x32xf32>
    %282 = vector.broadcast %276 : vector<1x32xf32> to vector<32x32xf32>
    %283 = arith.mulf %281, %282 : vector<32x32xf32>
    %cst_77 = arith.constant dense<0.000000e+00> : vector<32xf32>
    %284 = vector.multi_reduction <add>, %283, %cst_77 [1] : vector<32x32xf32> to vector<32xf32>
    %285 = vector.shape_cast %284 : vector<32xf32> to vector<32x1xf32>
    %286 = vector.broadcast %285 : vector<32x1xf32> to vector<32x32xf32>
    %287 = vector.broadcast %276 : vector<1x32xf32> to vector<32x32xf32>
    %288 = arith.mulf %286, %287 : vector<32x32xf32>
    %289 = vector.broadcast %271 : f32 to vector<32x32xf32>
    %290 = arith.mulf %288, %289 : vector<32x32xf32>
    %291 = tpu.iota {dimensions = array<i32: 0>} : vector<32x32xi32>
    %292 = tpu.iota {dimensions = array<i32: 1>} : vector<32x32xi32>
    %c4_i32 = arith.constant 4 : i32
    %293 = vector.broadcast %c4_i32 : i32 to vector<32x32xi32>
    %294 = arith.shrsi %291, %293 : vector<32x32xi32>
    %c4_i32_78 = arith.constant 4 : i32
    %295 = vector.broadcast %c4_i32_78 : i32 to vector<32x32xi32>
    %296 = arith.shrsi %292, %295 : vector<32x32xi32>
    %297 = arith.cmpi eq, %294, %296 : vector<32x32xi32>
    %cst_79 = arith.constant 0.000000e+00 : f32
    %cst_80 = arith.constant -1.000000e+30 : f32
    %298 = vector.broadcast %cst_79 : f32 to vector<32x32xf32>
    %299 = vector.broadcast %cst_80 : f32 to vector<32x32xf32>
    %300 = arith.select %297, %298, %299 : vector<32x32xi1>, vector<32x32xf32>
    %301 = arith.addf %290, %300 : vector<32x32xf32>
    %cst_81 = arith.constant dense<0xFF800000> : vector<32xf32>
    %302 = vector.multi_reduction <maximumf>, %301, %cst_81 [1] : vector<32x32xf32> to vector<32xf32>
    %303 = vector.shape_cast %302 : vector<32xf32> to vector<32x1xf32>
    %304 = vector.broadcast %303 : vector<32x1xf32> to vector<32x32xf32>
    %305 = arith.subf %301, %304 : vector<32x32xf32>
    %306 = math.exp %305 : vector<32x32xf32>
    %cst_82 = arith.constant dense<0.000000e+00> : vector<32xf32>
    %307 = vector.multi_reduction <add>, %306, %cst_82 [1] : vector<32x32xf32> to vector<32xf32>
    %308 = vector.shape_cast %307 : vector<32xf32> to vector<32x1xf32>
    %309 = tpu.reciprocal %308 {approx = true} : vector<32x1xf32> -> vector<32x1xf32>
    %310 = vector.broadcast %309 : vector<32x1xf32> to vector<32x32xf32>
    %311 = arith.mulf %306, %310 : vector<32x32xf32>
    %cst_83 = arith.constant dense<0.000000e+00> : vector<1x32xf32>
    %312 = tpu.matmul %276, %311, %cst_83 {dimension_numbers = #tpu.dot_dimension_numbers<[1], [1], [0], [0], [0, 0, 1, 0], [], []>} : vector<1x32xf32>, vector<32x32xf32>, vector<1x32xf32> -> vector<1x32xf32>
    %313 = vector.broadcast %272 : f32 to vector<1x32xf32>
    %314 = arith.mulf %313, %312 : vector<1x32xf32>
    %315 = arith.addf %276, %314 : vector<1x32xf32>
    %316 = vector.extract_strided_slice %0 {offsets = [2, 0, 0], sizes = [1, 24, 1], strides = [1, 1, 1]} : vector<6x24x1xf32> to vector<1x24x1xf32>
    %317 = vector.shape_cast %316 : vector<1x24x1xf32> to vector<24x1xf32>
    %318 = vector.extract_strided_slice %1 {offsets = [2, 0, 0], sizes = [1, 8, 1], strides = [1, 1, 1]} : vector<6x8x1xf32> to vector<1x8x1xf32>
    %319 = vector.shape_cast %318 : vector<1x8x1xf32> to vector<8x1xf32>
    %320 = vector.broadcast %317 : vector<24x1xf32> to vector<24x128xf32>
    %321 = vector.broadcast %7 : vector<1x128xf32> to vector<24x128xf32>
    %322 = arith.mulf %320, %321 : vector<24x128xf32>
    %323 = vector.extract_strided_slice %322 {offsets = [0, 0], sizes = [8, 128], strides = [1, 1]} : vector<24x128xf32> to vector<8x128xf32>
    %cst_84 = arith.constant dense<0.000000e+00> : vector<8x128xf32>
    %324 = tpu.matmul %323, %24, %cst_84 {dimension_numbers = #tpu.dot_dimension_numbers<[1], [0], [0], [1], [0, 0, 1, 1], [], []>} : vector<8x128xf32>, vector<128x128xf32>, vector<8x128xf32> -> vector<8x128xf32>
    %325 = vector.extract_strided_slice %322 {offsets = [8, 0], sizes = [8, 128], strides = [1, 1]} : vector<24x128xf32> to vector<8x128xf32>
    %326 = arith.addf %324, %325 : vector<8x128xf32>
    %327 = vector.extract_strided_slice %322 {offsets = [16, 0], sizes = [8, 128], strides = [1, 1]} : vector<24x128xf32> to vector<8x128xf32>
    %cst_85 = arith.constant dense<0.000000e+00> : vector<8x128xf32>
    %328 = tpu.matmul %327, %30, %cst_85 {dimension_numbers = #tpu.dot_dimension_numbers<[1], [0], [0], [1], [0, 0, 1, 1], [], []>} : vector<8x128xf32>, vector<128x128xf32>, vector<8x128xf32> -> vector<8x128xf32>
    %329 = arith.addf %326, %328 : vector<8x128xf32>
    %330 = vector.broadcast %319 : vector<8x1xf32> to vector<8x128xf32>
    %331 = arith.addf %329, %330 : vector<8x128xf32>
    %cst_86 = arith.constant 0.000000e+00 : f32
    %332 = vector.broadcast %cst_86 : f32 to vector<8x128xf32>
    %333 = arith.maximumf %331, %332 : vector<8x128xf32>
    %334 = vector.extract_strided_slice %2 {offsets = [2, 0, 0], sizes = [1, 24, 8], strides = [1, 1, 1]} : vector<6x24x8xf32> to vector<1x24x8xf32>
    %335 = vector.shape_cast %334 : vector<1x24x8xf32> to vector<24x8xf32>
    %336 = vector.extract_strided_slice %3 {offsets = [2, 0, 0], sizes = [1, 8, 1], strides = [1, 1, 1]} : vector<6x8x1xf32> to vector<1x8x1xf32>
    %337 = vector.shape_cast %336 : vector<1x8x1xf32> to vector<8x1xf32>
    %cst_87 = arith.constant dense<0.000000e+00> : vector<24x128xf32>
    %338 = tpu.matmul %335, %333, %cst_87 {dimension_numbers = #tpu.dot_dimension_numbers<[1], [0], [0], [1], [0, 0, 1, 1], [], []>} : vector<24x8xf32>, vector<8x128xf32>, vector<24x128xf32> -> vector<24x128xf32>
    %339 = vector.extract_strided_slice %338 {offsets = [0, 0], sizes = [8, 128], strides = [1, 1]} : vector<24x128xf32> to vector<8x128xf32>
    %cst_88 = arith.constant dense<0.000000e+00> : vector<8x128xf32>
    %340 = tpu.matmul %339, %24, %cst_88 {dimension_numbers = #tpu.dot_dimension_numbers<[1], [0], [0], [1], [0, 0, 1, 1], [], []>} : vector<8x128xf32>, vector<128x128xf32>, vector<8x128xf32> -> vector<8x128xf32>
    %341 = vector.extract_strided_slice %338 {offsets = [8, 0], sizes = [8, 128], strides = [1, 1]} : vector<24x128xf32> to vector<8x128xf32>
    %342 = arith.addf %340, %341 : vector<8x128xf32>
    %343 = vector.extract_strided_slice %338 {offsets = [16, 0], sizes = [8, 128], strides = [1, 1]} : vector<24x128xf32> to vector<8x128xf32>
    %cst_89 = arith.constant dense<0.000000e+00> : vector<8x128xf32>
    %344 = tpu.matmul %343, %30, %cst_89 {dimension_numbers = #tpu.dot_dimension_numbers<[1], [0], [0], [1], [0, 0, 1, 1], [], []>} : vector<8x128xf32>, vector<128x128xf32>, vector<8x128xf32> -> vector<8x128xf32>
    %345 = arith.addf %342, %344 : vector<8x128xf32>
    %346 = vector.broadcast %337 : vector<8x1xf32> to vector<8x128xf32>
    %347 = arith.addf %345, %346 : vector<8x128xf32>
    %cst_90 = arith.constant 0.000000e+00 : f32
    %348 = vector.broadcast %cst_90 : f32 to vector<8x128xf32>
    %349 = arith.maximumf %347, %348 : vector<8x128xf32>
    %350 = vector.extract_strided_slice %4 {offsets = [2, 0, 0], sizes = [1, 3, 8], strides = [1, 1, 1]} : vector<6x3x8xf32> to vector<1x3x8xf32>
    %351 = vector.shape_cast %350 : vector<1x3x8xf32> to vector<3x8xf32>
    %352 = vector.extract_strided_slice %5 {offsets = [2, 0, 0], sizes = [1, 1, 1], strides = [1, 1, 1]} : vector<6x1x1xf32> to vector<1x1x1xf32>
    %353 = vector.shape_cast %352 : vector<1x1x1xf32> to vector<1x1xf32>
    %cst_91 = arith.constant dense<0.000000e+00> : vector<3x128xf32>
    %354 = tpu.matmul %351, %349, %cst_91 {dimension_numbers = #tpu.dot_dimension_numbers<[1], [0], [0], [1], [0, 0, 1, 1], [], []>} : vector<3x8xf32>, vector<8x128xf32>, vector<3x128xf32> -> vector<3x128xf32>
    %355 = vector.extract_strided_slice %354 {offsets = [0, 0], sizes = [1, 128], strides = [1, 1]} : vector<3x128xf32> to vector<1x128xf32>
    %cst_92 = arith.constant dense<0.000000e+00> : vector<1x128xf32>
    %356 = tpu.matmul %355, %24, %cst_92 {dimension_numbers = #tpu.dot_dimension_numbers<[1], [0], [0], [1], [0, 0, 1, 1], [], []>} : vector<1x128xf32>, vector<128x128xf32>, vector<1x128xf32> -> vector<1x128xf32>
    %357 = vector.extract_strided_slice %354 {offsets = [1, 0], sizes = [1, 128], strides = [1, 1]} : vector<3x128xf32> to vector<1x128xf32>
    %358 = arith.addf %356, %357 : vector<1x128xf32>
    %359 = vector.extract_strided_slice %354 {offsets = [2, 0], sizes = [1, 128], strides = [1, 1]} : vector<3x128xf32> to vector<1x128xf32>
    %cst_93 = arith.constant dense<0.000000e+00> : vector<1x128xf32>
    %360 = tpu.matmul %359, %30, %cst_93 {dimension_numbers = #tpu.dot_dimension_numbers<[1], [0], [0], [1], [0, 0, 1, 1], [], []>} : vector<1x128xf32>, vector<128x128xf32>, vector<1x128xf32> -> vector<1x128xf32>
    %361 = arith.addf %358, %360 : vector<1x128xf32>
    %362 = vector.broadcast %353 : vector<1x1xf32> to vector<1x128xf32>
    %363 = arith.addf %361, %362 : vector<1x128xf32>
    %364 = arith.addf %7, %363 : vector<1x128xf32>
    %cst_94 = arith.constant dense<0.000000e+00> : vector<1x128xf32>
    %365 = tpu.matmul %364, %86, %cst_94 {dimension_numbers = #tpu.dot_dimension_numbers<[1], [0], [0], [1], [0, 0, 1, 1], [], []>} : vector<1x128xf32>, vector<128x128xf32>, vector<1x128xf32> -> vector<1x128xf32>
    %366 = arith.subf %364, %365 : vector<1x128xf32>
    %367 = arith.mulf %366, %366 : vector<1x128xf32>
    %cst_95 = arith.constant dense<0.000000e+00> : vector<1x128xf32>
    %368 = tpu.matmul %367, %86, %cst_95 {dimension_numbers = #tpu.dot_dimension_numbers<[1], [0], [0], [1], [0, 0, 1, 1], [], []>} : vector<1x128xf32>, vector<128x128xf32>, vector<1x128xf32> -> vector<1x128xf32>
    %369 = arith.subf %364, %365 : vector<1x128xf32>
    %cst_96 = arith.constant 9.99999974E-6 : f32
    %370 = vector.broadcast %cst_96 : f32 to vector<1x128xf32>
    %371 = arith.addf %368, %370 : vector<1x128xf32>
    %372 = math.rsqrt %371 : vector<1x128xf32>
    %373 = arith.mulf %369, %372 : vector<1x128xf32>
    %cst_97 = arith.constant 0.000000e+00 : f32
    %374 = vector.broadcast %cst_97 : f32 to vector<1x128xf32>
    %375 = arith.maximumf %373, %374 : vector<1x128xf32>
    %cst_98 = arith.constant dense<0.000000e+00> : vector<1x64xf32>
    %376 = tpu.matmul %375, %104, %cst_98 {dimension_numbers = #tpu.dot_dimension_numbers<[1], [0], [0], [1], [0, 0, 1, 1], [], []>} : vector<1x128xf32>, vector<128x64xf32>, vector<1x64xf32> -> vector<1x64xf32>
    %cst_99 = arith.constant dense<0.000000e+00> : vector<1x64xf32>
    %377 = tpu.matmul %375, %111, %cst_99 {dimension_numbers = #tpu.dot_dimension_numbers<[1], [0], [0], [1], [0, 0, 1, 1], [], []>} : vector<1x128xf32>, vector<128x64xf32>, vector<1x64xf32> -> vector<1x64xf32>
    %378 = arith.maximumf %376, %377 : vector<1x64xf32>
    %c8 = arith.constant 8 : index
    %379 = memref.load %arg2[%c8] : memref<48xf32, #tpu.memory_space<smem>>
    %c9 = arith.constant 9 : index
    %380 = memref.load %arg2[%c9] : memref<48xf32, #tpu.memory_space<smem>>
    %c10 = arith.constant 10 : index
    %381 = memref.load %arg2[%c10] : memref<48xf32, #tpu.memory_space<smem>>
    %c11 = arith.constant 11 : index
    %382 = memref.load %arg2[%c11] : memref<48xf32, #tpu.memory_space<smem>>
    %383 = vector.broadcast %379 : f32 to vector<1x64xf32>
    %384 = arith.mulf %378, %383 : vector<1x64xf32>
    %385 = vector.broadcast %380 : f32 to vector<1x64xf32>
    %386 = arith.addf %384, %385 : vector<1x64xf32>
    %387 = vector.broadcast %386 : vector<1x64xf32> to vector<64x64xf32>
    %388 = arith.mulf %127, %387 : vector<64x64xf32>
    %cst_100 = arith.constant dense<0.000000e+00> : vector<64xf32>
    %389 = vector.multi_reduction <add>, %388, %cst_100 [1] : vector<64x64xf32> to vector<64xf32>
    %390 = vector.shape_cast %389 : vector<64xf32> to vector<64x1xf32>
    %391 = vector.broadcast %390 : vector<64x1xf32> to vector<64x64xf32>
    %392 = vector.broadcast %386 : vector<1x64xf32> to vector<64x64xf32>
    %393 = arith.mulf %391, %392 : vector<64x64xf32>
    %394 = vector.broadcast %381 : f32 to vector<64x64xf32>
    %395 = arith.mulf %393, %394 : vector<64x64xf32>
    %396 = arith.addf %395, %146 : vector<64x64xf32>
    %cst_101 = arith.constant dense<0xFF800000> : vector<64xf32>
    %397 = vector.multi_reduction <maximumf>, %396, %cst_101 [1] : vector<64x64xf32> to vector<64xf32>
    %398 = vector.shape_cast %397 : vector<64xf32> to vector<64x1xf32>
    %399 = vector.broadcast %398 : vector<64x1xf32> to vector<64x64xf32>
    %400 = arith.subf %396, %399 : vector<64x64xf32>
    %401 = math.exp %400 : vector<64x64xf32>
    %cst_102 = arith.constant dense<0.000000e+00> : vector<64xf32>
    %402 = vector.multi_reduction <add>, %401, %cst_102 [1] : vector<64x64xf32> to vector<64xf32>
    %403 = vector.shape_cast %402 : vector<64xf32> to vector<64x1xf32>
    %404 = tpu.reciprocal %403 {approx = true} : vector<64x1xf32> -> vector<64x1xf32>
    %405 = vector.broadcast %404 : vector<64x1xf32> to vector<64x64xf32>
    %406 = arith.mulf %401, %405 : vector<64x64xf32>
    %cst_103 = arith.constant dense<0.000000e+00> : vector<1x64xf32>
    %407 = tpu.matmul %386, %406, %cst_103 {dimension_numbers = #tpu.dot_dimension_numbers<[1], [1], [0], [0], [0, 0, 1, 0], [], []>} : vector<1x64xf32>, vector<64x64xf32>, vector<1x64xf32> -> vector<1x64xf32>
    %408 = vector.broadcast %382 : f32 to vector<1x64xf32>
    %409 = arith.mulf %408, %407 : vector<1x64xf32>
    %410 = arith.addf %386, %409 : vector<1x64xf32>
    %c12 = arith.constant 12 : index
    %411 = memref.load %arg2[%c12] : memref<48xf32, #tpu.memory_space<smem>>
    %c13 = arith.constant 13 : index
    %412 = memref.load %arg2[%c13] : memref<48xf32, #tpu.memory_space<smem>>
    %c14 = arith.constant 14 : index
    %413 = memref.load %arg2[%c14] : memref<48xf32, #tpu.memory_space<smem>>
    %c15 = arith.constant 15 : index
    %414 = memref.load %arg2[%c15] : memref<48xf32, #tpu.memory_space<smem>>
    %415 = vector.broadcast %411 : f32 to vector<1x64xf32>
    %416 = arith.mulf %410, %415 : vector<1x64xf32>
    %417 = vector.broadcast %412 : f32 to vector<1x64xf32>
    %418 = arith.addf %416, %417 : vector<1x64xf32>
    %419 = vector.broadcast %418 : vector<1x64xf32> to vector<64x64xf32>
    %420 = arith.mulf %127, %419 : vector<64x64xf32>
    %cst_104 = arith.constant dense<0.000000e+00> : vector<64xf32>
    %421 = vector.multi_reduction <add>, %420, %cst_104 [1] : vector<64x64xf32> to vector<64xf32>
    %422 = vector.shape_cast %421 : vector<64xf32> to vector<64x1xf32>
    %423 = vector.broadcast %422 : vector<64x1xf32> to vector<64x64xf32>
    %424 = vector.broadcast %161 : vector<1x64xf32> to vector<64x64xf32>
    %425 = arith.mulf %423, %424 : vector<64x64xf32>
    %426 = vector.broadcast %413 : f32 to vector<64x64xf32>
    %427 = arith.mulf %425, %426 : vector<64x64xf32>
    %428 = arith.addf %427, %146 : vector<64x64xf32>
    %cst_105 = arith.constant dense<0xFF800000> : vector<64xf32>
    %429 = vector.multi_reduction <maximumf>, %428, %cst_105 [1] : vector<64x64xf32> to vector<64xf32>
    %430 = vector.shape_cast %429 : vector<64xf32> to vector<64x1xf32>
    %431 = vector.broadcast %430 : vector<64x1xf32> to vector<64x64xf32>
    %432 = arith.subf %428, %431 : vector<64x64xf32>
    %433 = math.exp %432 : vector<64x64xf32>
    %cst_106 = arith.constant dense<0.000000e+00> : vector<64xf32>
    %434 = vector.multi_reduction <add>, %433, %cst_106 [1] : vector<64x64xf32> to vector<64xf32>
    %435 = vector.shape_cast %434 : vector<64xf32> to vector<64x1xf32>
    %436 = tpu.reciprocal %435 {approx = true} : vector<64x1xf32> -> vector<64x1xf32>
    %437 = vector.broadcast %436 : vector<64x1xf32> to vector<64x64xf32>
    %438 = arith.mulf %433, %437 : vector<64x64xf32>
    %cst_107 = arith.constant dense<0.000000e+00> : vector<1x64xf32>
    %439 = tpu.matmul %161, %438, %cst_107 {dimension_numbers = #tpu.dot_dimension_numbers<[1], [1], [0], [0], [0, 0, 1, 0], [], []>} : vector<1x64xf32>, vector<64x64xf32>, vector<1x64xf32> -> vector<1x64xf32>
    %440 = vector.broadcast %414 : f32 to vector<1x64xf32>
    %441 = arith.mulf %440, %439 : vector<1x64xf32>
    %442 = arith.addf %418, %441 : vector<1x64xf32>
    %443 = vector.extract_strided_slice %0 {offsets = [3, 0, 0], sizes = [1, 24, 1], strides = [1, 1, 1]} : vector<6x24x1xf32> to vector<1x24x1xf32>
    %444 = vector.shape_cast %443 : vector<1x24x1xf32> to vector<24x1xf32>
    %445 = vector.extract_strided_slice %1 {offsets = [3, 0, 0], sizes = [1, 8, 1], strides = [1, 1, 1]} : vector<6x8x1xf32> to vector<1x8x1xf32>
    %446 = vector.shape_cast %445 : vector<1x8x1xf32> to vector<8x1xf32>
    %447 = vector.broadcast %444 : vector<24x1xf32> to vector<24x64xf32>
    %448 = vector.broadcast %442 : vector<1x64xf32> to vector<24x64xf32>
    %449 = arith.mulf %447, %448 : vector<24x64xf32>
    %450 = vector.extract_strided_slice %449 {offsets = [0, 0], sizes = [8, 64], strides = [1, 1]} : vector<24x64xf32> to vector<8x64xf32>
    %cst_108 = arith.constant dense<0.000000e+00> : vector<8x64xf32>
    %451 = tpu.matmul %450, %178, %cst_108 {dimension_numbers = #tpu.dot_dimension_numbers<[1], [0], [0], [1], [0, 0, 1, 1], [], []>} : vector<8x64xf32>, vector<64x64xf32>, vector<8x64xf32> -> vector<8x64xf32>
    %452 = vector.extract_strided_slice %449 {offsets = [8, 0], sizes = [8, 64], strides = [1, 1]} : vector<24x64xf32> to vector<8x64xf32>
    %453 = arith.addf %451, %452 : vector<8x64xf32>
    %454 = vector.extract_strided_slice %449 {offsets = [16, 0], sizes = [8, 64], strides = [1, 1]} : vector<24x64xf32> to vector<8x64xf32>
    %cst_109 = arith.constant dense<0.000000e+00> : vector<8x64xf32>
    %455 = tpu.matmul %454, %184, %cst_109 {dimension_numbers = #tpu.dot_dimension_numbers<[1], [0], [0], [1], [0, 0, 1, 1], [], []>} : vector<8x64xf32>, vector<64x64xf32>, vector<8x64xf32> -> vector<8x64xf32>
    %456 = arith.addf %453, %455 : vector<8x64xf32>
    %457 = vector.broadcast %446 : vector<8x1xf32> to vector<8x64xf32>
    %458 = arith.addf %456, %457 : vector<8x64xf32>
    %cst_110 = arith.constant 0.000000e+00 : f32
    %459 = vector.broadcast %cst_110 : f32 to vector<8x64xf32>
    %460 = arith.maximumf %458, %459 : vector<8x64xf32>
    %461 = vector.extract_strided_slice %2 {offsets = [3, 0, 0], sizes = [1, 24, 8], strides = [1, 1, 1]} : vector<6x24x8xf32> to vector<1x24x8xf32>
    %462 = vector.shape_cast %461 : vector<1x24x8xf32> to vector<24x8xf32>
    %463 = vector.extract_strided_slice %3 {offsets = [3, 0, 0], sizes = [1, 8, 1], strides = [1, 1, 1]} : vector<6x8x1xf32> to vector<1x8x1xf32>
    %464 = vector.shape_cast %463 : vector<1x8x1xf32> to vector<8x1xf32>
    %cst_111 = arith.constant dense<0.000000e+00> : vector<24x64xf32>
    %465 = tpu.matmul %462, %460, %cst_111 {dimension_numbers = #tpu.dot_dimension_numbers<[1], [0], [0], [1], [0, 0, 1, 1], [], []>} : vector<24x8xf32>, vector<8x64xf32>, vector<24x64xf32> -> vector<24x64xf32>
    %466 = vector.extract_strided_slice %465 {offsets = [0, 0], sizes = [8, 64], strides = [1, 1]} : vector<24x64xf32> to vector<8x64xf32>
    %cst_112 = arith.constant dense<0.000000e+00> : vector<8x64xf32>
    %467 = tpu.matmul %466, %178, %cst_112 {dimension_numbers = #tpu.dot_dimension_numbers<[1], [0], [0], [1], [0, 0, 1, 1], [], []>} : vector<8x64xf32>, vector<64x64xf32>, vector<8x64xf32> -> vector<8x64xf32>
    %468 = vector.extract_strided_slice %465 {offsets = [8, 0], sizes = [8, 64], strides = [1, 1]} : vector<24x64xf32> to vector<8x64xf32>
    %469 = arith.addf %467, %468 : vector<8x64xf32>
    %470 = vector.extract_strided_slice %465 {offsets = [16, 0], sizes = [8, 64], strides = [1, 1]} : vector<24x64xf32> to vector<8x64xf32>
    %cst_113 = arith.constant dense<0.000000e+00> : vector<8x64xf32>
    %471 = tpu.matmul %470, %184, %cst_113 {dimension_numbers = #tpu.dot_dimension_numbers<[1], [0], [0], [1], [0, 0, 1, 1], [], []>} : vector<8x64xf32>, vector<64x64xf32>, vector<8x64xf32> -> vector<8x64xf32>
    %472 = arith.addf %469, %471 : vector<8x64xf32>
    %473 = vector.broadcast %464 : vector<8x1xf32> to vector<8x64xf32>
    %474 = arith.addf %472, %473 : vector<8x64xf32>
    %cst_114 = arith.constant 0.000000e+00 : f32
    %475 = vector.broadcast %cst_114 : f32 to vector<8x64xf32>
    %476 = arith.maximumf %474, %475 : vector<8x64xf32>
    %477 = vector.extract_strided_slice %4 {offsets = [3, 0, 0], sizes = [1, 3, 8], strides = [1, 1, 1]} : vector<6x3x8xf32> to vector<1x3x8xf32>
    %478 = vector.shape_cast %477 : vector<1x3x8xf32> to vector<3x8xf32>
    %479 = vector.extract_strided_slice %5 {offsets = [3, 0, 0], sizes = [1, 1, 1], strides = [1, 1, 1]} : vector<6x1x1xf32> to vector<1x1x1xf32>
    %480 = vector.shape_cast %479 : vector<1x1x1xf32> to vector<1x1xf32>
    %cst_115 = arith.constant dense<0.000000e+00> : vector<3x64xf32>
    %481 = tpu.matmul %478, %476, %cst_115 {dimension_numbers = #tpu.dot_dimension_numbers<[1], [0], [0], [1], [0, 0, 1, 1], [], []>} : vector<3x8xf32>, vector<8x64xf32>, vector<3x64xf32> -> vector<3x64xf32>
    %482 = vector.extract_strided_slice %481 {offsets = [0, 0], sizes = [1, 64], strides = [1, 1]} : vector<3x64xf32> to vector<1x64xf32>
    %cst_116 = arith.constant dense<0.000000e+00> : vector<1x64xf32>
    %483 = tpu.matmul %482, %178, %cst_116 {dimension_numbers = #tpu.dot_dimension_numbers<[1], [0], [0], [1], [0, 0, 1, 1], [], []>} : vector<1x64xf32>, vector<64x64xf32>, vector<1x64xf32> -> vector<1x64xf32>
    %484 = vector.extract_strided_slice %481 {offsets = [1, 0], sizes = [1, 64], strides = [1, 1]} : vector<3x64xf32> to vector<1x64xf32>
    %485 = arith.addf %483, %484 : vector<1x64xf32>
    %486 = vector.extract_strided_slice %481 {offsets = [2, 0], sizes = [1, 64], strides = [1, 1]} : vector<3x64xf32> to vector<1x64xf32>
    %cst_117 = arith.constant dense<0.000000e+00> : vector<1x64xf32>
    %487 = tpu.matmul %486, %184, %cst_117 {dimension_numbers = #tpu.dot_dimension_numbers<[1], [0], [0], [1], [0, 0, 1, 1], [], []>} : vector<1x64xf32>, vector<64x64xf32>, vector<1x64xf32> -> vector<1x64xf32>
    %488 = arith.addf %485, %487 : vector<1x64xf32>
    %489 = vector.broadcast %480 : vector<1x1xf32> to vector<1x64xf32>
    %490 = arith.addf %488, %489 : vector<1x64xf32>
    %491 = arith.addf %442, %490 : vector<1x64xf32>
    %cst_118 = arith.constant dense<0.000000e+00> : vector<1x64xf32>
    %492 = tpu.matmul %491, %240, %cst_118 {dimension_numbers = #tpu.dot_dimension_numbers<[1], [0], [0], [1], [0, 0, 1, 1], [], []>} : vector<1x64xf32>, vector<64x64xf32>, vector<1x64xf32> -> vector<1x64xf32>
    %493 = arith.subf %491, %492 : vector<1x64xf32>
    %494 = arith.mulf %493, %493 : vector<1x64xf32>
    %cst_119 = arith.constant dense<0.000000e+00> : vector<1x64xf32>
    %495 = tpu.matmul %494, %240, %cst_119 {dimension_numbers = #tpu.dot_dimension_numbers<[1], [0], [0], [1], [0, 0, 1, 1], [], []>} : vector<1x64xf32>, vector<64x64xf32>, vector<1x64xf32> -> vector<1x64xf32>
    %496 = arith.subf %491, %492 : vector<1x64xf32>
    %cst_120 = arith.constant 9.99999974E-6 : f32
    %497 = vector.broadcast %cst_120 : f32 to vector<1x64xf32>
    %498 = arith.addf %495, %497 : vector<1x64xf32>
    %499 = math.rsqrt %498 : vector<1x64xf32>
    %500 = arith.mulf %496, %499 : vector<1x64xf32>
    %cst_121 = arith.constant 0.000000e+00 : f32
    %501 = vector.broadcast %cst_121 : f32 to vector<1x64xf32>
    %502 = arith.maximumf %500, %501 : vector<1x64xf32>
    %cst_122 = arith.constant dense<0.000000e+00> : vector<1x32xf32>
    %503 = tpu.matmul %502, %258, %cst_122 {dimension_numbers = #tpu.dot_dimension_numbers<[1], [0], [0], [1], [0, 0, 1, 1], [], []>} : vector<1x64xf32>, vector<64x32xf32>, vector<1x32xf32> -> vector<1x32xf32>
    %cst_123 = arith.constant dense<0.000000e+00> : vector<1x32xf32>
    %504 = tpu.matmul %502, %265, %cst_123 {dimension_numbers = #tpu.dot_dimension_numbers<[1], [0], [0], [1], [0, 0, 1, 1], [], []>} : vector<1x64xf32>, vector<64x32xf32>, vector<1x32xf32> -> vector<1x32xf32>
    %505 = arith.maximumf %503, %504 : vector<1x32xf32>
    %c16 = arith.constant 16 : index
    %506 = memref.load %arg2[%c16] : memref<48xf32, #tpu.memory_space<smem>>
    %c17 = arith.constant 17 : index
    %507 = memref.load %arg2[%c17] : memref<48xf32, #tpu.memory_space<smem>>
    %c18 = arith.constant 18 : index
    %508 = memref.load %arg2[%c18] : memref<48xf32, #tpu.memory_space<smem>>
    %c19 = arith.constant 19 : index
    %509 = memref.load %arg2[%c19] : memref<48xf32, #tpu.memory_space<smem>>
    %510 = vector.broadcast %506 : f32 to vector<1x32xf32>
    %511 = arith.mulf %505, %510 : vector<1x32xf32>
    %512 = vector.broadcast %507 : f32 to vector<1x32xf32>
    %513 = arith.addf %511, %512 : vector<1x32xf32>
    %514 = vector.broadcast %513 : vector<1x32xf32> to vector<32x32xf32>
    %515 = arith.mulf %281, %514 : vector<32x32xf32>
    %cst_124 = arith.constant dense<0.000000e+00> : vector<32xf32>
    %516 = vector.multi_reduction <add>, %515, %cst_124 [1] : vector<32x32xf32> to vector<32xf32>
    %517 = vector.shape_cast %516 : vector<32xf32> to vector<32x1xf32>
    %518 = vector.broadcast %517 : vector<32x1xf32> to vector<32x32xf32>
    %519 = vector.broadcast %513 : vector<1x32xf32> to vector<32x32xf32>
    %520 = arith.mulf %518, %519 : vector<32x32xf32>
    %521 = vector.broadcast %508 : f32 to vector<32x32xf32>
    %522 = arith.mulf %520, %521 : vector<32x32xf32>
    %523 = arith.addf %522, %300 : vector<32x32xf32>
    %cst_125 = arith.constant dense<0xFF800000> : vector<32xf32>
    %524 = vector.multi_reduction <maximumf>, %523, %cst_125 [1] : vector<32x32xf32> to vector<32xf32>
    %525 = vector.shape_cast %524 : vector<32xf32> to vector<32x1xf32>
    %526 = vector.broadcast %525 : vector<32x1xf32> to vector<32x32xf32>
    %527 = arith.subf %523, %526 : vector<32x32xf32>
    %528 = math.exp %527 : vector<32x32xf32>
    %cst_126 = arith.constant dense<0.000000e+00> : vector<32xf32>
    %529 = vector.multi_reduction <add>, %528, %cst_126 [1] : vector<32x32xf32> to vector<32xf32>
    %530 = vector.shape_cast %529 : vector<32xf32> to vector<32x1xf32>
    %531 = tpu.reciprocal %530 {approx = true} : vector<32x1xf32> -> vector<32x1xf32>
    %532 = vector.broadcast %531 : vector<32x1xf32> to vector<32x32xf32>
    %533 = arith.mulf %528, %532 : vector<32x32xf32>
    %cst_127 = arith.constant dense<0.000000e+00> : vector<1x32xf32>
    %534 = tpu.matmul %513, %533, %cst_127 {dimension_numbers = #tpu.dot_dimension_numbers<[1], [1], [0], [0], [0, 0, 1, 0], [], []>} : vector<1x32xf32>, vector<32x32xf32>, vector<1x32xf32> -> vector<1x32xf32>
    %535 = vector.broadcast %509 : f32 to vector<1x32xf32>
    %536 = arith.mulf %535, %534 : vector<1x32xf32>
    %537 = arith.addf %513, %536 : vector<1x32xf32>
    %c20 = arith.constant 20 : index
    %538 = memref.load %arg2[%c20] : memref<48xf32, #tpu.memory_space<smem>>
    %c21 = arith.constant 21 : index
    %539 = memref.load %arg2[%c21] : memref<48xf32, #tpu.memory_space<smem>>
    %c22 = arith.constant 22 : index
    %540 = memref.load %arg2[%c22] : memref<48xf32, #tpu.memory_space<smem>>
    %c23 = arith.constant 23 : index
    %541 = memref.load %arg2[%c23] : memref<48xf32, #tpu.memory_space<smem>>
    %542 = vector.broadcast %538 : f32 to vector<1x32xf32>
    %543 = arith.mulf %537, %542 : vector<1x32xf32>
    %544 = vector.broadcast %539 : f32 to vector<1x32xf32>
    %545 = arith.addf %543, %544 : vector<1x32xf32>
    %546 = vector.broadcast %545 : vector<1x32xf32> to vector<32x32xf32>
    %547 = arith.mulf %281, %546 : vector<32x32xf32>
    %cst_128 = arith.constant dense<0.000000e+00> : vector<32xf32>
    %548 = vector.multi_reduction <add>, %547, %cst_128 [1] : vector<32x32xf32> to vector<32xf32>
    %549 = vector.shape_cast %548 : vector<32xf32> to vector<32x1xf32>
    %550 = vector.broadcast %549 : vector<32x1xf32> to vector<32x32xf32>
    %551 = vector.broadcast %315 : vector<1x32xf32> to vector<32x32xf32>
    %552 = arith.mulf %550, %551 : vector<32x32xf32>
    %553 = vector.broadcast %540 : f32 to vector<32x32xf32>
    %554 = arith.mulf %552, %553 : vector<32x32xf32>
    %555 = arith.addf %554, %300 : vector<32x32xf32>
    %cst_129 = arith.constant dense<0xFF800000> : vector<32xf32>
    %556 = vector.multi_reduction <maximumf>, %555, %cst_129 [1] : vector<32x32xf32> to vector<32xf32>
    %557 = vector.shape_cast %556 : vector<32xf32> to vector<32x1xf32>
    %558 = vector.broadcast %557 : vector<32x1xf32> to vector<32x32xf32>
    %559 = arith.subf %555, %558 : vector<32x32xf32>
    %560 = math.exp %559 : vector<32x32xf32>
    %cst_130 = arith.constant dense<0.000000e+00> : vector<32xf32>
    %561 = vector.multi_reduction <add>, %560, %cst_130 [1] : vector<32x32xf32> to vector<32xf32>
    %562 = vector.shape_cast %561 : vector<32xf32> to vector<32x1xf32>
    %563 = tpu.reciprocal %562 {approx = true} : vector<32x1xf32> -> vector<32x1xf32>
    %564 = vector.broadcast %563 : vector<32x1xf32> to vector<32x32xf32>
    %565 = arith.mulf %560, %564 : vector<32x32xf32>
    %cst_131 = arith.constant dense<0.000000e+00> : vector<1x32xf32>
    %566 = tpu.matmul %315, %565, %cst_131 {dimension_numbers = #tpu.dot_dimension_numbers<[1], [1], [0], [0], [0, 0, 1, 0], [], []>} : vector<1x32xf32>, vector<32x32xf32>, vector<1x32xf32> -> vector<1x32xf32>
    %567 = vector.broadcast %541 : f32 to vector<1x32xf32>
    %568 = arith.mulf %567, %566 : vector<1x32xf32>
    %569 = arith.addf %545, %568 : vector<1x32xf32>
    %c40 = arith.constant 40 : index
    %570 = memref.load %arg2[%c40] : memref<48xf32, #tpu.memory_space<smem>>
    %c41 = arith.constant 41 : index
    %571 = memref.load %arg2[%c41] : memref<48xf32, #tpu.memory_space<smem>>
    %c42 = arith.constant 42 : index
    %572 = memref.load %arg2[%c42] : memref<48xf32, #tpu.memory_space<smem>>
    %c43 = arith.constant 43 : index
    %573 = memref.load %arg2[%c43] : memref<48xf32, #tpu.memory_space<smem>>
    %574 = tpu.iota {dimensions = array<i32: 0>} : vector<32x32xi32>
    %575 = tpu.iota {dimensions = array<i32: 1>} : vector<32x32xi32>
    %c4_i32_132 = arith.constant 4 : i32
    %576 = vector.broadcast %c4_i32_132 : i32 to vector<32x32xi32>
    %577 = arith.shrsi %574, %576 : vector<32x32xi32>
    %c4_i32_133 = arith.constant 4 : i32
    %578 = vector.broadcast %c4_i32_133 : i32 to vector<32x32xi32>
    %579 = arith.shrsi %575, %578 : vector<32x32xi32>
    %580 = arith.cmpi eq, %577, %579 : vector<32x32xi32>
    %c1_i32_134 = arith.constant 1 : i32
    %581 = vector.broadcast %c1_i32_134 : i32 to vector<32x32xi32>
    %582 = arith.addi %575, %581 : vector<32x32xi32>
    %583 = arith.cmpi eq, %574, %582 : vector<32x32xi32>
    %584 = arith.andi %583, %580 : vector<32x32xi1>
    %585 = arith.extui %584 : vector<32x32xi1> to vector<32x32xi32>
    %586 = arith.sitofp %585 : vector<32x32xi32> to vector<32x32xf32>
    %587 = vector.broadcast %571 : f32 to vector<1x32xf32>
    %588 = arith.mulf %587, %569 : vector<1x32xf32>
    %589 = vector.broadcast %573 : f32 to vector<1x32xf32>
    %590 = arith.addf %588, %589 : vector<1x32xf32>
    %cst_135 = arith.constant dense<0.000000e+00> : vector<1x32xf32>
    %591 = tpu.matmul %569, %586, %cst_135 {dimension_numbers = #tpu.dot_dimension_numbers<[1], [0], [0], [1], [0, 0, 1, 1], [], []>} : vector<1x32xf32>, vector<32x32xf32>, vector<1x32xf32> -> vector<1x32xf32>
    %592 = vector.broadcast %570 : f32 to vector<1x32xf32>
    %593 = arith.mulf %592, %591 : vector<1x32xf32>
    %594 = vector.broadcast %572 : f32 to vector<1x32xf32>
    %595 = arith.mulf %594, %569 : vector<1x32xf32>
    %596 = arith.addf %593, %595 : vector<1x32xf32>
    %597 = vector.broadcast %573 : f32 to vector<1x32xf32>
    %598 = arith.addf %596, %597 : vector<1x32xf32>
    %599 = tpu.iota {dimensions = array<i32: 0>} : vector<32x64xi32>
    %600 = tpu.iota {dimensions = array<i32: 1>} : vector<32x64xi32>
    %c2_i32_136 = arith.constant 2 : i32
    %601 = vector.broadcast %c2_i32_136 : i32 to vector<32x64xi32>
    %602 = arith.muli %601, %599 : vector<32x64xi32>
    %603 = arith.cmpi eq, %600, %602 : vector<32x64xi32>
    %604 = arith.extui %603 : vector<32x64xi1> to vector<32x64xi32>
    %605 = arith.sitofp %604 : vector<32x64xi32> to vector<32x64xf32>
    %c2_i32_137 = arith.constant 2 : i32
    %606 = vector.broadcast %c2_i32_137 : i32 to vector<32x64xi32>
    %607 = arith.muli %606, %599 : vector<32x64xi32>
    %c1_i32_138 = arith.constant 1 : i32
    %608 = vector.broadcast %c1_i32_138 : i32 to vector<32x64xi32>
    %609 = arith.addi %607, %608 : vector<32x64xi32>
    %610 = arith.cmpi eq, %600, %609 : vector<32x64xi32>
    %611 = arith.extui %610 : vector<32x64xi1> to vector<32x64xi32>
    %612 = arith.sitofp %611 : vector<32x64xi32> to vector<32x64xf32>
    %cst_139 = arith.constant dense<0.000000e+00> : vector<1x64xf32>
    %613 = tpu.matmul %590, %605, %cst_139 {dimension_numbers = #tpu.dot_dimension_numbers<[1], [0], [0], [1], [0, 0, 1, 1], [], []>} : vector<1x32xf32>, vector<32x64xf32>, vector<1x64xf32> -> vector<1x64xf32>
    %cst_140 = arith.constant dense<0.000000e+00> : vector<1x64xf32>
    %614 = tpu.matmul %598, %612, %cst_140 {dimension_numbers = #tpu.dot_dimension_numbers<[1], [0], [0], [1], [0, 0, 1, 1], [], []>} : vector<1x32xf32>, vector<32x64xf32>, vector<1x64xf32> -> vector<1x64xf32>
    %615 = arith.addf %613, %614 : vector<1x64xf32>
    %616 = vector.extract_strided_slice %0 {offsets = [4, 0, 0], sizes = [1, 24, 1], strides = [1, 1, 1]} : vector<6x24x1xf32> to vector<1x24x1xf32>
    %617 = vector.shape_cast %616 : vector<1x24x1xf32> to vector<24x1xf32>
    %618 = vector.extract_strided_slice %1 {offsets = [4, 0, 0], sizes = [1, 8, 1], strides = [1, 1, 1]} : vector<6x8x1xf32> to vector<1x8x1xf32>
    %619 = vector.shape_cast %618 : vector<1x8x1xf32> to vector<8x1xf32>
    %620 = vector.broadcast %617 : vector<24x1xf32> to vector<24x64xf32>
    %621 = vector.broadcast %615 : vector<1x64xf32> to vector<24x64xf32>
    %622 = arith.mulf %620, %621 : vector<24x64xf32>
    %623 = vector.extract_strided_slice %622 {offsets = [0, 0], sizes = [8, 64], strides = [1, 1]} : vector<24x64xf32> to vector<8x64xf32>
    %cst_141 = arith.constant dense<0.000000e+00> : vector<8x64xf32>
    %624 = tpu.matmul %623, %178, %cst_141 {dimension_numbers = #tpu.dot_dimension_numbers<[1], [0], [0], [1], [0, 0, 1, 1], [], []>} : vector<8x64xf32>, vector<64x64xf32>, vector<8x64xf32> -> vector<8x64xf32>
    %625 = vector.extract_strided_slice %622 {offsets = [8, 0], sizes = [8, 64], strides = [1, 1]} : vector<24x64xf32> to vector<8x64xf32>
    %626 = arith.addf %624, %625 : vector<8x64xf32>
    %627 = vector.extract_strided_slice %622 {offsets = [16, 0], sizes = [8, 64], strides = [1, 1]} : vector<24x64xf32> to vector<8x64xf32>
    %cst_142 = arith.constant dense<0.000000e+00> : vector<8x64xf32>
    %628 = tpu.matmul %627, %184, %cst_142 {dimension_numbers = #tpu.dot_dimension_numbers<[1], [0], [0], [1], [0, 0, 1, 1], [], []>} : vector<8x64xf32>, vector<64x64xf32>, vector<8x64xf32> -> vector<8x64xf32>
    %629 = arith.addf %626, %628 : vector<8x64xf32>
    %630 = vector.broadcast %619 : vector<8x1xf32> to vector<8x64xf32>
    %631 = arith.addf %629, %630 : vector<8x64xf32>
    %cst_143 = arith.constant 0.000000e+00 : f32
    %632 = vector.broadcast %cst_143 : f32 to vector<8x64xf32>
    %633 = arith.maximumf %631, %632 : vector<8x64xf32>
    %634 = vector.extract_strided_slice %2 {offsets = [4, 0, 0], sizes = [1, 24, 8], strides = [1, 1, 1]} : vector<6x24x8xf32> to vector<1x24x8xf32>
    %635 = vector.shape_cast %634 : vector<1x24x8xf32> to vector<24x8xf32>
    %636 = vector.extract_strided_slice %3 {offsets = [4, 0, 0], sizes = [1, 8, 1], strides = [1, 1, 1]} : vector<6x8x1xf32> to vector<1x8x1xf32>
    %637 = vector.shape_cast %636 : vector<1x8x1xf32> to vector<8x1xf32>
    %cst_144 = arith.constant dense<0.000000e+00> : vector<24x64xf32>
    %638 = tpu.matmul %635, %633, %cst_144 {dimension_numbers = #tpu.dot_dimension_numbers<[1], [0], [0], [1], [0, 0, 1, 1], [], []>} : vector<24x8xf32>, vector<8x64xf32>, vector<24x64xf32> -> vector<24x64xf32>
    %639 = vector.extract_strided_slice %638 {offsets = [0, 0], sizes = [8, 64], strides = [1, 1]} : vector<24x64xf32> to vector<8x64xf32>
    %cst_145 = arith.constant dense<0.000000e+00> : vector<8x64xf32>
    %640 = tpu.matmul %639, %178, %cst_145 {dimension_numbers = #tpu.dot_dimension_numbers<[1], [0], [0], [1], [0, 0, 1, 1], [], []>} : vector<8x64xf32>, vector<64x64xf32>, vector<8x64xf32> -> vector<8x64xf32>
    %641 = vector.extract_strided_slice %638 {offsets = [8, 0], sizes = [8, 64], strides = [1, 1]} : vector<24x64xf32> to vector<8x64xf32>
    %642 = arith.addf %640, %641 : vector<8x64xf32>
    %643 = vector.extract_strided_slice %638 {offsets = [16, 0], sizes = [8, 64], strides = [1, 1]} : vector<24x64xf32> to vector<8x64xf32>
    %cst_146 = arith.constant dense<0.000000e+00> : vector<8x64xf32>
    %644 = tpu.matmul %643, %184, %cst_146 {dimension_numbers = #tpu.dot_dimension_numbers<[1], [0], [0], [1], [0, 0, 1, 1], [], []>} : vector<8x64xf32>, vector<64x64xf32>, vector<8x64xf32> -> vector<8x64xf32>
    %645 = arith.addf %642, %644 : vector<8x64xf32>
    %646 = vector.broadcast %637 : vector<8x1xf32> to vector<8x64xf32>
    %647 = arith.addf %645, %646 : vector<8x64xf32>
    %cst_147 = arith.constant 0.000000e+00 : f32
    %648 = vector.broadcast %cst_147 : f32 to vector<8x64xf32>
    %649 = arith.maximumf %647, %648 : vector<8x64xf32>
    %650 = vector.extract_strided_slice %4 {offsets = [4, 0, 0], sizes = [1, 3, 8], strides = [1, 1, 1]} : vector<6x3x8xf32> to vector<1x3x8xf32>
    %651 = vector.shape_cast %650 : vector<1x3x8xf32> to vector<3x8xf32>
    %652 = vector.extract_strided_slice %5 {offsets = [4, 0, 0], sizes = [1, 1, 1], strides = [1, 1, 1]} : vector<6x1x1xf32> to vector<1x1x1xf32>
    %653 = vector.shape_cast %652 : vector<1x1x1xf32> to vector<1x1xf32>
    %cst_148 = arith.constant dense<0.000000e+00> : vector<3x64xf32>
    %654 = tpu.matmul %651, %649, %cst_148 {dimension_numbers = #tpu.dot_dimension_numbers<[1], [0], [0], [1], [0, 0, 1, 1], [], []>} : vector<3x8xf32>, vector<8x64xf32>, vector<3x64xf32> -> vector<3x64xf32>
    %655 = vector.extract_strided_slice %654 {offsets = [0, 0], sizes = [1, 64], strides = [1, 1]} : vector<3x64xf32> to vector<1x64xf32>
    %cst_149 = arith.constant dense<0.000000e+00> : vector<1x64xf32>
    %656 = tpu.matmul %655, %178, %cst_149 {dimension_numbers = #tpu.dot_dimension_numbers<[1], [0], [0], [1], [0, 0, 1, 1], [], []>} : vector<1x64xf32>, vector<64x64xf32>, vector<1x64xf32> -> vector<1x64xf32>
    %657 = vector.extract_strided_slice %654 {offsets = [1, 0], sizes = [1, 64], strides = [1, 1]} : vector<3x64xf32> to vector<1x64xf32>
    %658 = arith.addf %656, %657 : vector<1x64xf32>
    %659 = vector.extract_strided_slice %654 {offsets = [2, 0], sizes = [1, 64], strides = [1, 1]} : vector<3x64xf32> to vector<1x64xf32>
    %cst_150 = arith.constant dense<0.000000e+00> : vector<1x64xf32>
    %660 = tpu.matmul %659, %184, %cst_150 {dimension_numbers = #tpu.dot_dimension_numbers<[1], [0], [0], [1], [0, 0, 1, 1], [], []>} : vector<1x64xf32>, vector<64x64xf32>, vector<1x64xf32> -> vector<1x64xf32>
    %661 = arith.addf %658, %660 : vector<1x64xf32>
    %662 = vector.broadcast %653 : vector<1x1xf32> to vector<1x64xf32>
    %663 = arith.addf %661, %662 : vector<1x64xf32>
    %664 = arith.addf %615, %663 : vector<1x64xf32>
    %cst_151 = arith.constant dense<0.000000e+00> : vector<1x64xf32>
    %665 = tpu.matmul %664, %240, %cst_151 {dimension_numbers = #tpu.dot_dimension_numbers<[1], [0], [0], [1], [0, 0, 1, 1], [], []>} : vector<1x64xf32>, vector<64x64xf32>, vector<1x64xf32> -> vector<1x64xf32>
    %666 = arith.subf %664, %665 : vector<1x64xf32>
    %667 = arith.mulf %666, %666 : vector<1x64xf32>
    %cst_152 = arith.constant dense<0.000000e+00> : vector<1x64xf32>
    %668 = tpu.matmul %667, %240, %cst_152 {dimension_numbers = #tpu.dot_dimension_numbers<[1], [0], [0], [1], [0, 0, 1, 1], [], []>} : vector<1x64xf32>, vector<64x64xf32>, vector<1x64xf32> -> vector<1x64xf32>
    %669 = arith.subf %664, %665 : vector<1x64xf32>
    %cst_153 = arith.constant 9.99999974E-6 : f32
    %670 = vector.broadcast %cst_153 : f32 to vector<1x64xf32>
    %671 = arith.addf %668, %670 : vector<1x64xf32>
    %672 = math.rsqrt %671 : vector<1x64xf32>
    %673 = arith.mulf %669, %672 : vector<1x64xf32>
    %cst_154 = arith.constant 0.000000e+00 : f32
    %674 = vector.broadcast %cst_154 : f32 to vector<1x64xf32>
    %675 = arith.maximumf %673, %674 : vector<1x64xf32>
    %c24 = arith.constant 24 : index
    %676 = memref.load %arg2[%c24] : memref<48xf32, #tpu.memory_space<smem>>
    %c25 = arith.constant 25 : index
    %677 = memref.load %arg2[%c25] : memref<48xf32, #tpu.memory_space<smem>>
    %c26 = arith.constant 26 : index
    %678 = memref.load %arg2[%c26] : memref<48xf32, #tpu.memory_space<smem>>
    %c27 = arith.constant 27 : index
    %679 = memref.load %arg2[%c27] : memref<48xf32, #tpu.memory_space<smem>>
    %680 = vector.broadcast %676 : f32 to vector<1x64xf32>
    %681 = arith.mulf %675, %680 : vector<1x64xf32>
    %682 = vector.broadcast %677 : f32 to vector<1x64xf32>
    %683 = arith.addf %681, %682 : vector<1x64xf32>
    %684 = vector.broadcast %683 : vector<1x64xf32> to vector<64x64xf32>
    %685 = arith.mulf %127, %684 : vector<64x64xf32>
    %cst_155 = arith.constant dense<0.000000e+00> : vector<64xf32>
    %686 = vector.multi_reduction <add>, %685, %cst_155 [1] : vector<64x64xf32> to vector<64xf32>
    %687 = vector.shape_cast %686 : vector<64xf32> to vector<64x1xf32>
    %688 = vector.broadcast %687 : vector<64x1xf32> to vector<64x64xf32>
    %689 = vector.broadcast %683 : vector<1x64xf32> to vector<64x64xf32>
    %690 = arith.mulf %688, %689 : vector<64x64xf32>
    %691 = vector.broadcast %678 : f32 to vector<64x64xf32>
    %692 = arith.mulf %690, %691 : vector<64x64xf32>
    %693 = arith.addf %692, %146 : vector<64x64xf32>
    %cst_156 = arith.constant dense<0xFF800000> : vector<64xf32>
    %694 = vector.multi_reduction <maximumf>, %693, %cst_156 [1] : vector<64x64xf32> to vector<64xf32>
    %695 = vector.shape_cast %694 : vector<64xf32> to vector<64x1xf32>
    %696 = vector.broadcast %695 : vector<64x1xf32> to vector<64x64xf32>
    %697 = arith.subf %693, %696 : vector<64x64xf32>
    %698 = math.exp %697 : vector<64x64xf32>
    %cst_157 = arith.constant dense<0.000000e+00> : vector<64xf32>
    %699 = vector.multi_reduction <add>, %698, %cst_157 [1] : vector<64x64xf32> to vector<64xf32>
    %700 = vector.shape_cast %699 : vector<64xf32> to vector<64x1xf32>
    %701 = tpu.reciprocal %700 {approx = true} : vector<64x1xf32> -> vector<64x1xf32>
    %702 = vector.broadcast %701 : vector<64x1xf32> to vector<64x64xf32>
    %703 = arith.mulf %698, %702 : vector<64x64xf32>
    %cst_158 = arith.constant dense<0.000000e+00> : vector<1x64xf32>
    %704 = tpu.matmul %683, %703, %cst_158 {dimension_numbers = #tpu.dot_dimension_numbers<[1], [1], [0], [0], [0, 0, 1, 0], [], []>} : vector<1x64xf32>, vector<64x64xf32>, vector<1x64xf32> -> vector<1x64xf32>
    %705 = vector.broadcast %679 : f32 to vector<1x64xf32>
    %706 = arith.mulf %705, %704 : vector<1x64xf32>
    %707 = arith.addf %683, %706 : vector<1x64xf32>
    %c28 = arith.constant 28 : index
    %708 = memref.load %arg2[%c28] : memref<48xf32, #tpu.memory_space<smem>>
    %c29 = arith.constant 29 : index
    %709 = memref.load %arg2[%c29] : memref<48xf32, #tpu.memory_space<smem>>
    %c30 = arith.constant 30 : index
    %710 = memref.load %arg2[%c30] : memref<48xf32, #tpu.memory_space<smem>>
    %c31 = arith.constant 31 : index
    %711 = memref.load %arg2[%c31] : memref<48xf32, #tpu.memory_space<smem>>
    %712 = vector.broadcast %708 : f32 to vector<1x64xf32>
    %713 = arith.mulf %707, %712 : vector<1x64xf32>
    %714 = vector.broadcast %709 : f32 to vector<1x64xf32>
    %715 = arith.addf %713, %714 : vector<1x64xf32>
    %716 = vector.broadcast %715 : vector<1x64xf32> to vector<64x64xf32>
    %717 = arith.mulf %127, %716 : vector<64x64xf32>
    %cst_159 = arith.constant dense<0.000000e+00> : vector<64xf32>
    %718 = vector.multi_reduction <add>, %717, %cst_159 [1] : vector<64x64xf32> to vector<64xf32>
    %719 = vector.shape_cast %718 : vector<64xf32> to vector<64x1xf32>
    %720 = vector.broadcast %719 : vector<64x1xf32> to vector<64x32xf32>
    %721 = vector.broadcast %569 : vector<1x32xf32> to vector<64x32xf32>
    %722 = arith.mulf %720, %721 : vector<64x32xf32>
    %723 = vector.broadcast %710 : f32 to vector<64x32xf32>
    %724 = arith.mulf %722, %723 : vector<64x32xf32>
    %725 = tpu.iota {dimensions = array<i32: 0>} : vector<64x32xi32>
    %726 = tpu.iota {dimensions = array<i32: 1>} : vector<64x32xi32>
    %c5_i32_160 = arith.constant 5 : i32
    %727 = vector.broadcast %c5_i32_160 : i32 to vector<64x32xi32>
    %728 = arith.shrsi %725, %727 : vector<64x32xi32>
    %c4_i32_161 = arith.constant 4 : i32
    %729 = vector.broadcast %c4_i32_161 : i32 to vector<64x32xi32>
    %730 = arith.shrsi %726, %729 : vector<64x32xi32>
    %731 = arith.cmpi eq, %728, %730 : vector<64x32xi32>
    %cst_162 = arith.constant 0.000000e+00 : f32
    %cst_163 = arith.constant -1.000000e+30 : f32
    %732 = vector.broadcast %cst_162 : f32 to vector<64x32xf32>
    %733 = vector.broadcast %cst_163 : f32 to vector<64x32xf32>
    %734 = arith.select %731, %732, %733 : vector<64x32xi1>, vector<64x32xf32>
    %735 = arith.addf %724, %734 : vector<64x32xf32>
    %cst_164 = arith.constant dense<0xFF800000> : vector<64xf32>
    %736 = vector.multi_reduction <maximumf>, %735, %cst_164 [1] : vector<64x32xf32> to vector<64xf32>
    %737 = vector.shape_cast %736 : vector<64xf32> to vector<64x1xf32>
    %738 = vector.broadcast %737 : vector<64x1xf32> to vector<64x32xf32>
    %739 = arith.subf %735, %738 : vector<64x32xf32>
    %740 = math.exp %739 : vector<64x32xf32>
    %cst_165 = arith.constant dense<0.000000e+00> : vector<64xf32>
    %741 = vector.multi_reduction <add>, %740, %cst_165 [1] : vector<64x32xf32> to vector<64xf32>
    %742 = vector.shape_cast %741 : vector<64xf32> to vector<64x1xf32>
    %743 = tpu.reciprocal %742 {approx = true} : vector<64x1xf32> -> vector<64x1xf32>
    %744 = vector.broadcast %743 : vector<64x1xf32> to vector<64x32xf32>
    %745 = arith.mulf %740, %744 : vector<64x32xf32>
    %cst_166 = arith.constant dense<0.000000e+00> : vector<1x64xf32>
    %746 = tpu.matmul %569, %745, %cst_166 {dimension_numbers = #tpu.dot_dimension_numbers<[1], [1], [0], [0], [0, 0, 1, 0], [], []>} : vector<1x32xf32>, vector<64x32xf32>, vector<1x64xf32> -> vector<1x64xf32>
    %747 = vector.broadcast %711 : f32 to vector<1x64xf32>
    %748 = arith.mulf %747, %746 : vector<1x64xf32>
    %749 = arith.addf %715, %748 : vector<1x64xf32>
    %c44 = arith.constant 44 : index
    %750 = memref.load %arg2[%c44] : memref<48xf32, #tpu.memory_space<smem>>
    %c45 = arith.constant 45 : index
    %751 = memref.load %arg2[%c45] : memref<48xf32, #tpu.memory_space<smem>>
    %c46 = arith.constant 46 : index
    %752 = memref.load %arg2[%c46] : memref<48xf32, #tpu.memory_space<smem>>
    %c47 = arith.constant 47 : index
    %753 = memref.load %arg2[%c47] : memref<48xf32, #tpu.memory_space<smem>>
    %754 = vector.broadcast %751 : f32 to vector<1x64xf32>
    %755 = arith.mulf %754, %749 : vector<1x64xf32>
    %756 = vector.broadcast %753 : f32 to vector<1x64xf32>
    %757 = arith.addf %755, %756 : vector<1x64xf32>
    %cst_167 = arith.constant dense<0.000000e+00> : vector<1x64xf32>
    %758 = tpu.matmul %749, %184, %cst_167 {dimension_numbers = #tpu.dot_dimension_numbers<[1], [0], [0], [1], [0, 0, 1, 1], [], []>} : vector<1x64xf32>, vector<64x64xf32>, vector<1x64xf32> -> vector<1x64xf32>
    %759 = vector.broadcast %750 : f32 to vector<1x64xf32>
    %760 = arith.mulf %759, %758 : vector<1x64xf32>
    %761 = vector.broadcast %752 : f32 to vector<1x64xf32>
    %762 = arith.mulf %761, %749 : vector<1x64xf32>
    %763 = arith.addf %760, %762 : vector<1x64xf32>
    %764 = vector.broadcast %753 : f32 to vector<1x64xf32>
    %765 = arith.addf %763, %764 : vector<1x64xf32>
    %766 = tpu.iota {dimensions = array<i32: 0>} : vector<64x128xi32>
    %767 = tpu.iota {dimensions = array<i32: 1>} : vector<64x128xi32>
    %c2_i32_168 = arith.constant 2 : i32
    %768 = vector.broadcast %c2_i32_168 : i32 to vector<64x128xi32>
    %769 = arith.muli %768, %766 : vector<64x128xi32>
    %770 = arith.cmpi eq, %767, %769 : vector<64x128xi32>
    %771 = arith.extui %770 : vector<64x128xi1> to vector<64x128xi32>
    %772 = arith.sitofp %771 : vector<64x128xi32> to vector<64x128xf32>
    %c2_i32_169 = arith.constant 2 : i32
    %773 = vector.broadcast %c2_i32_169 : i32 to vector<64x128xi32>
    %774 = arith.muli %773, %766 : vector<64x128xi32>
    %c1_i32_170 = arith.constant 1 : i32
    %775 = vector.broadcast %c1_i32_170 : i32 to vector<64x128xi32>
    %776 = arith.addi %774, %775 : vector<64x128xi32>
    %777 = arith.cmpi eq, %767, %776 : vector<64x128xi32>
    %778 = arith.extui %777 : vector<64x128xi1> to vector<64x128xi32>
    %779 = arith.sitofp %778 : vector<64x128xi32> to vector<64x128xf32>
    %cst_171 = arith.constant dense<0.000000e+00> : vector<1x128xf32>
    %780 = tpu.matmul %757, %772, %cst_171 {dimension_numbers = #tpu.dot_dimension_numbers<[1], [0], [0], [1], [0, 0, 1, 1], [], []>} : vector<1x64xf32>, vector<64x128xf32>, vector<1x128xf32> -> vector<1x128xf32>
    %cst_172 = arith.constant dense<0.000000e+00> : vector<1x128xf32>
    %781 = tpu.matmul %765, %779, %cst_172 {dimension_numbers = #tpu.dot_dimension_numbers<[1], [0], [0], [1], [0, 0, 1, 1], [], []>} : vector<1x64xf32>, vector<64x128xf32>, vector<1x128xf32> -> vector<1x128xf32>
    %782 = arith.addf %780, %781 : vector<1x128xf32>
    %783 = vector.extract_strided_slice %0 {offsets = [5, 0, 0], sizes = [1, 24, 1], strides = [1, 1, 1]} : vector<6x24x1xf32> to vector<1x24x1xf32>
    %784 = vector.shape_cast %783 : vector<1x24x1xf32> to vector<24x1xf32>
    %785 = vector.extract_strided_slice %1 {offsets = [5, 0, 0], sizes = [1, 8, 1], strides = [1, 1, 1]} : vector<6x8x1xf32> to vector<1x8x1xf32>
    %786 = vector.shape_cast %785 : vector<1x8x1xf32> to vector<8x1xf32>
    %787 = vector.broadcast %784 : vector<24x1xf32> to vector<24x128xf32>
    %788 = vector.broadcast %782 : vector<1x128xf32> to vector<24x128xf32>
    %789 = arith.mulf %787, %788 : vector<24x128xf32>
    %790 = vector.extract_strided_slice %789 {offsets = [0, 0], sizes = [8, 128], strides = [1, 1]} : vector<24x128xf32> to vector<8x128xf32>
    %cst_173 = arith.constant dense<0.000000e+00> : vector<8x128xf32>
    %791 = tpu.matmul %790, %24, %cst_173 {dimension_numbers = #tpu.dot_dimension_numbers<[1], [0], [0], [1], [0, 0, 1, 1], [], []>} : vector<8x128xf32>, vector<128x128xf32>, vector<8x128xf32> -> vector<8x128xf32>
    %792 = vector.extract_strided_slice %789 {offsets = [8, 0], sizes = [8, 128], strides = [1, 1]} : vector<24x128xf32> to vector<8x128xf32>
    %793 = arith.addf %791, %792 : vector<8x128xf32>
    %794 = vector.extract_strided_slice %789 {offsets = [16, 0], sizes = [8, 128], strides = [1, 1]} : vector<24x128xf32> to vector<8x128xf32>
    %cst_174 = arith.constant dense<0.000000e+00> : vector<8x128xf32>
    %795 = tpu.matmul %794, %30, %cst_174 {dimension_numbers = #tpu.dot_dimension_numbers<[1], [0], [0], [1], [0, 0, 1, 1], [], []>} : vector<8x128xf32>, vector<128x128xf32>, vector<8x128xf32> -> vector<8x128xf32>
    %796 = arith.addf %793, %795 : vector<8x128xf32>
    %797 = vector.broadcast %786 : vector<8x1xf32> to vector<8x128xf32>
    %798 = arith.addf %796, %797 : vector<8x128xf32>
    %cst_175 = arith.constant 0.000000e+00 : f32
    %799 = vector.broadcast %cst_175 : f32 to vector<8x128xf32>
    %800 = arith.maximumf %798, %799 : vector<8x128xf32>
    %801 = vector.extract_strided_slice %2 {offsets = [5, 0, 0], sizes = [1, 24, 8], strides = [1, 1, 1]} : vector<6x24x8xf32> to vector<1x24x8xf32>
    %802 = vector.shape_cast %801 : vector<1x24x8xf32> to vector<24x8xf32>
    %803 = vector.extract_strided_slice %3 {offsets = [5, 0, 0], sizes = [1, 8, 1], strides = [1, 1, 1]} : vector<6x8x1xf32> to vector<1x8x1xf32>
    %804 = vector.shape_cast %803 : vector<1x8x1xf32> to vector<8x1xf32>
    %cst_176 = arith.constant dense<0.000000e+00> : vector<24x128xf32>
    %805 = tpu.matmul %802, %800, %cst_176 {dimension_numbers = #tpu.dot_dimension_numbers<[1], [0], [0], [1], [0, 0, 1, 1], [], []>} : vector<24x8xf32>, vector<8x128xf32>, vector<24x128xf32> -> vector<24x128xf32>
    %806 = vector.extract_strided_slice %805 {offsets = [0, 0], sizes = [8, 128], strides = [1, 1]} : vector<24x128xf32> to vector<8x128xf32>
    %cst_177 = arith.constant dense<0.000000e+00> : vector<8x128xf32>
    %807 = tpu.matmul %806, %24, %cst_177 {dimension_numbers = #tpu.dot_dimension_numbers<[1], [0], [0], [1], [0, 0, 1, 1], [], []>} : vector<8x128xf32>, vector<128x128xf32>, vector<8x128xf32> -> vector<8x128xf32>
    %808 = vector.extract_strided_slice %805 {offsets = [8, 0], sizes = [8, 128], strides = [1, 1]} : vector<24x128xf32> to vector<8x128xf32>
    %809 = arith.addf %807, %808 : vector<8x128xf32>
    %810 = vector.extract_strided_slice %805 {offsets = [16, 0], sizes = [8, 128], strides = [1, 1]} : vector<24x128xf32> to vector<8x128xf32>
    %cst_178 = arith.constant dense<0.000000e+00> : vector<8x128xf32>
    %811 = tpu.matmul %810, %30, %cst_178 {dimension_numbers = #tpu.dot_dimension_numbers<[1], [0], [0], [1], [0, 0, 1, 1], [], []>} : vector<8x128xf32>, vector<128x128xf32>, vector<8x128xf32> -> vector<8x128xf32>
    %812 = arith.addf %809, %811 : vector<8x128xf32>
    %813 = vector.broadcast %804 : vector<8x1xf32> to vector<8x128xf32>
    %814 = arith.addf %812, %813 : vector<8x128xf32>
    %cst_179 = arith.constant 0.000000e+00 : f32
    %815 = vector.broadcast %cst_179 : f32 to vector<8x128xf32>
    %816 = arith.maximumf %814, %815 : vector<8x128xf32>
    %817 = vector.extract_strided_slice %4 {offsets = [5, 0, 0], sizes = [1, 3, 8], strides = [1, 1, 1]} : vector<6x3x8xf32> to vector<1x3x8xf32>
    %818 = vector.shape_cast %817 : vector<1x3x8xf32> to vector<3x8xf32>
    %819 = vector.extract_strided_slice %5 {offsets = [5, 0, 0], sizes = [1, 1, 1], strides = [1, 1, 1]} : vector<6x1x1xf32> to vector<1x1x1xf32>
    %820 = vector.shape_cast %819 : vector<1x1x1xf32> to vector<1x1xf32>
    %cst_180 = arith.constant dense<0.000000e+00> : vector<3x128xf32>
    %821 = tpu.matmul %818, %816, %cst_180 {dimension_numbers = #tpu.dot_dimension_numbers<[1], [0], [0], [1], [0, 0, 1, 1], [], []>} : vector<3x8xf32>, vector<8x128xf32>, vector<3x128xf32> -> vector<3x128xf32>
    %822 = vector.extract_strided_slice %821 {offsets = [0, 0], sizes = [1, 128], strides = [1, 1]} : vector<3x128xf32> to vector<1x128xf32>
    %cst_181 = arith.constant dense<0.000000e+00> : vector<1x128xf32>
    %823 = tpu.matmul %822, %24, %cst_181 {dimension_numbers = #tpu.dot_dimension_numbers<[1], [0], [0], [1], [0, 0, 1, 1], [], []>} : vector<1x128xf32>, vector<128x128xf32>, vector<1x128xf32> -> vector<1x128xf32>
    %824 = vector.extract_strided_slice %821 {offsets = [1, 0], sizes = [1, 128], strides = [1, 1]} : vector<3x128xf32> to vector<1x128xf32>
    %825 = arith.addf %823, %824 : vector<1x128xf32>
    %826 = vector.extract_strided_slice %821 {offsets = [2, 0], sizes = [1, 128], strides = [1, 1]} : vector<3x128xf32> to vector<1x128xf32>
    %cst_182 = arith.constant dense<0.000000e+00> : vector<1x128xf32>
    %827 = tpu.matmul %826, %30, %cst_182 {dimension_numbers = #tpu.dot_dimension_numbers<[1], [0], [0], [1], [0, 0, 1, 1], [], []>} : vector<1x128xf32>, vector<128x128xf32>, vector<1x128xf32> -> vector<1x128xf32>
    %828 = arith.addf %825, %827 : vector<1x128xf32>
    %829 = vector.broadcast %820 : vector<1x1xf32> to vector<1x128xf32>
    %830 = arith.addf %828, %829 : vector<1x128xf32>
    %831 = arith.addf %782, %830 : vector<1x128xf32>
    %cst_183 = arith.constant dense<0.000000e+00> : vector<1x128xf32>
    %832 = tpu.matmul %831, %86, %cst_183 {dimension_numbers = #tpu.dot_dimension_numbers<[1], [0], [0], [1], [0, 0, 1, 1], [], []>} : vector<1x128xf32>, vector<128x128xf32>, vector<1x128xf32> -> vector<1x128xf32>
    %833 = arith.subf %831, %832 : vector<1x128xf32>
    %834 = arith.mulf %833, %833 : vector<1x128xf32>
    %cst_184 = arith.constant dense<0.000000e+00> : vector<1x128xf32>
    %835 = tpu.matmul %834, %86, %cst_184 {dimension_numbers = #tpu.dot_dimension_numbers<[1], [0], [0], [1], [0, 0, 1, 1], [], []>} : vector<1x128xf32>, vector<128x128xf32>, vector<1x128xf32> -> vector<1x128xf32>
    %836 = arith.subf %831, %832 : vector<1x128xf32>
    %cst_185 = arith.constant 9.99999974E-6 : f32
    %837 = vector.broadcast %cst_185 : f32 to vector<1x128xf32>
    %838 = arith.addf %835, %837 : vector<1x128xf32>
    %839 = math.rsqrt %838 : vector<1x128xf32>
    %840 = arith.mulf %836, %839 : vector<1x128xf32>
    %cst_186 = arith.constant 0.000000e+00 : f32
    %841 = vector.broadcast %cst_186 : f32 to vector<1x128xf32>
    %842 = arith.maximumf %840, %841 : vector<1x128xf32>
    %c32 = arith.constant 32 : index
    %843 = memref.load %arg2[%c32] : memref<48xf32, #tpu.memory_space<smem>>
    %c33 = arith.constant 33 : index
    %844 = memref.load %arg2[%c33] : memref<48xf32, #tpu.memory_space<smem>>
    %c34 = arith.constant 34 : index
    %845 = memref.load %arg2[%c34] : memref<48xf32, #tpu.memory_space<smem>>
    %c35 = arith.constant 35 : index
    %846 = memref.load %arg2[%c35] : memref<48xf32, #tpu.memory_space<smem>>
    %847 = vector.broadcast %843 : f32 to vector<1x128xf32>
    %848 = arith.mulf %842, %847 : vector<1x128xf32>
    %849 = vector.broadcast %844 : f32 to vector<1x128xf32>
    %850 = arith.addf %848, %849 : vector<1x128xf32>
    %851 = tpu.iota {dimensions = array<i32: 0>} : vector<128x128xi32>
    %852 = tpu.iota {dimensions = array<i32: 1>} : vector<128x128xi32>
    %853 = arith.cmpi eq, %851, %852 : vector<128x128xi32>
    %854 = arith.extui %853 : vector<128x128xi1> to vector<128x128xi32>
    %855 = arith.sitofp %854 : vector<128x128xi32> to vector<128x128xf32>
    %856 = vector.broadcast %850 : vector<1x128xf32> to vector<128x128xf32>
    %857 = arith.mulf %855, %856 : vector<128x128xf32>
    %cst_187 = arith.constant dense<0.000000e+00> : vector<128xf32>
    %858 = vector.multi_reduction <add>, %857, %cst_187 [1] : vector<128x128xf32> to vector<128xf32>
    %859 = vector.shape_cast %858 : vector<128xf32> to vector<128x1xf32>
    %860 = vector.broadcast %859 : vector<128x1xf32> to vector<128x128xf32>
    %861 = vector.broadcast %850 : vector<1x128xf32> to vector<128x128xf32>
    %862 = arith.mulf %860, %861 : vector<128x128xf32>
    %863 = vector.broadcast %845 : f32 to vector<128x128xf32>
    %864 = arith.mulf %862, %863 : vector<128x128xf32>
    %865 = tpu.iota {dimensions = array<i32: 0>} : vector<128x128xi32>
    %866 = tpu.iota {dimensions = array<i32: 1>} : vector<128x128xi32>
    %c6_i32_188 = arith.constant 6 : i32
    %867 = vector.broadcast %c6_i32_188 : i32 to vector<128x128xi32>
    %868 = arith.shrsi %865, %867 : vector<128x128xi32>
    %c6_i32_189 = arith.constant 6 : i32
    %869 = vector.broadcast %c6_i32_189 : i32 to vector<128x128xi32>
    %870 = arith.shrsi %866, %869 : vector<128x128xi32>
    %871 = arith.cmpi eq, %868, %870 : vector<128x128xi32>
    %cst_190 = arith.constant 0.000000e+00 : f32
    %cst_191 = arith.constant -1.000000e+30 : f32
    %872 = vector.broadcast %cst_190 : f32 to vector<128x128xf32>
    %873 = vector.broadcast %cst_191 : f32 to vector<128x128xf32>
    %874 = arith.select %871, %872, %873 : vector<128x128xi1>, vector<128x128xf32>
    %875 = arith.addf %864, %874 : vector<128x128xf32>
    %cst_192 = arith.constant dense<0xFF800000> : vector<128xf32>
    %876 = vector.multi_reduction <maximumf>, %875, %cst_192 [1] : vector<128x128xf32> to vector<128xf32>
    %877 = vector.shape_cast %876 : vector<128xf32> to vector<128x1xf32>
    %878 = vector.broadcast %877 : vector<128x1xf32> to vector<128x128xf32>
    %879 = arith.subf %875, %878 : vector<128x128xf32>
    %880 = math.exp %879 : vector<128x128xf32>
    %cst_193 = arith.constant dense<0.000000e+00> : vector<128xf32>
    %881 = vector.multi_reduction <add>, %880, %cst_193 [1] : vector<128x128xf32> to vector<128xf32>
    %882 = vector.shape_cast %881 : vector<128xf32> to vector<128x1xf32>
    %883 = tpu.reciprocal %882 {approx = true} : vector<128x1xf32> -> vector<128x1xf32>
    %884 = vector.broadcast %883 : vector<128x1xf32> to vector<128x128xf32>
    %885 = arith.mulf %880, %884 : vector<128x128xf32>
    %cst_194 = arith.constant dense<0.000000e+00> : vector<1x128xf32>
    %886 = tpu.matmul %850, %885, %cst_194 {dimension_numbers = #tpu.dot_dimension_numbers<[1], [1], [0], [0], [0, 0, 1, 0], [], []>} : vector<1x128xf32>, vector<128x128xf32>, vector<1x128xf32> -> vector<1x128xf32>
    %887 = vector.broadcast %846 : f32 to vector<1x128xf32>
    %888 = arith.mulf %887, %886 : vector<1x128xf32>
    %889 = arith.addf %850, %888 : vector<1x128xf32>
    %c36 = arith.constant 36 : index
    %890 = memref.load %arg2[%c36] : memref<48xf32, #tpu.memory_space<smem>>
    %c37 = arith.constant 37 : index
    %891 = memref.load %arg2[%c37] : memref<48xf32, #tpu.memory_space<smem>>
    %c38 = arith.constant 38 : index
    %892 = memref.load %arg2[%c38] : memref<48xf32, #tpu.memory_space<smem>>
    %c39 = arith.constant 39 : index
    %893 = memref.load %arg2[%c39] : memref<48xf32, #tpu.memory_space<smem>>
    %894 = vector.broadcast %890 : f32 to vector<1x128xf32>
    %895 = arith.mulf %889, %894 : vector<1x128xf32>
    %896 = vector.broadcast %891 : f32 to vector<1x128xf32>
    %897 = arith.addf %895, %896 : vector<1x128xf32>
    %898 = vector.broadcast %897 : vector<1x128xf32> to vector<128x128xf32>
    %899 = arith.mulf %855, %898 : vector<128x128xf32>
    %cst_195 = arith.constant dense<0.000000e+00> : vector<128xf32>
    %900 = vector.multi_reduction <add>, %899, %cst_195 [1] : vector<128x128xf32> to vector<128xf32>
    %901 = vector.shape_cast %900 : vector<128xf32> to vector<128x1xf32>
    %902 = vector.broadcast %901 : vector<128x1xf32> to vector<128x64xf32>
    %903 = vector.broadcast %442 : vector<1x64xf32> to vector<128x64xf32>
    %904 = arith.mulf %902, %903 : vector<128x64xf32>
    %905 = vector.broadcast %892 : f32 to vector<128x64xf32>
    %906 = arith.mulf %904, %905 : vector<128x64xf32>
    %907 = tpu.iota {dimensions = array<i32: 0>} : vector<128x64xi32>
    %908 = tpu.iota {dimensions = array<i32: 1>} : vector<128x64xi32>
    %c6_i32_196 = arith.constant 6 : i32
    %909 = vector.broadcast %c6_i32_196 : i32 to vector<128x64xi32>
    %910 = arith.shrsi %907, %909 : vector<128x64xi32>
    %c5_i32_197 = arith.constant 5 : i32
    %911 = vector.broadcast %c5_i32_197 : i32 to vector<128x64xi32>
    %912 = arith.shrsi %908, %911 : vector<128x64xi32>
    %913 = arith.cmpi eq, %910, %912 : vector<128x64xi32>
    %cst_198 = arith.constant 0.000000e+00 : f32
    %cst_199 = arith.constant -1.000000e+30 : f32
    %914 = vector.broadcast %cst_198 : f32 to vector<128x64xf32>
    %915 = vector.broadcast %cst_199 : f32 to vector<128x64xf32>
    %916 = arith.select %913, %914, %915 : vector<128x64xi1>, vector<128x64xf32>
    %917 = arith.addf %906, %916 : vector<128x64xf32>
    %cst_200 = arith.constant dense<0xFF800000> : vector<128xf32>
    %918 = vector.multi_reduction <maximumf>, %917, %cst_200 [1] : vector<128x64xf32> to vector<128xf32>
    %919 = vector.shape_cast %918 : vector<128xf32> to vector<128x1xf32>
    %920 = vector.broadcast %919 : vector<128x1xf32> to vector<128x64xf32>
    %921 = arith.subf %917, %920 : vector<128x64xf32>
    %922 = math.exp %921 : vector<128x64xf32>
    %cst_201 = arith.constant dense<0.000000e+00> : vector<128xf32>
    %923 = vector.multi_reduction <add>, %922, %cst_201 [1] : vector<128x64xf32> to vector<128xf32>
    %924 = vector.shape_cast %923 : vector<128xf32> to vector<128x1xf32>
    %925 = tpu.reciprocal %924 {approx = true} : vector<128x1xf32> -> vector<128x1xf32>
    %926 = vector.broadcast %925 : vector<128x1xf32> to vector<128x64xf32>
    %927 = arith.mulf %922, %926 : vector<128x64xf32>
    %cst_202 = arith.constant dense<0.000000e+00> : vector<1x128xf32>
    %928 = tpu.matmul %442, %927, %cst_202 {dimension_numbers = #tpu.dot_dimension_numbers<[1], [1], [0], [0], [0, 0, 1, 0], [], []>} : vector<1x64xf32>, vector<128x64xf32>, vector<1x128xf32> -> vector<1x128xf32>
    %929 = vector.broadcast %893 : f32 to vector<1x128xf32>
    %930 = arith.mulf %929, %928 : vector<1x128xf32>
    %931 = arith.addf %897, %930 : vector<1x128xf32>
    %cst_203 = arith.constant 0.000000e+00 : f32
    %932 = vector.broadcast %cst_203 : f32 to vector<1x128xf32>
    %933 = arith.maximumf %931, %932 : vector<1x128xf32>
    %c0_204 = arith.constant 0 : index
    %c0_205 = arith.constant 0 : index
    %934 = vector.load %arg9[%c0_204, %c0_205] : memref<1x128xf32, #tpu.memory_space<vmem>>, vector<1x128xf32>
    tpu.vector_store %arg9[%c0_204, %c0_205], %933 {strides = array<i32>} : memref<1x128xf32, #tpu.memory_space<vmem>>, vector<1x128xf32>,
    return
  }
}

</mosaic_0001>

<bundles_post_ra>
// kernel: aada_forward.1
= control target key start
LH: loop header
LB: loop body
LE: loop exit
PB: predicated region body
PF: predicated region fallthrough
CT: control target
= control target key end

     0   :  { %14 = vsyncpa [#allocation3], 0  ;;  %s18374_s0 = inlined_call_operand.vmem [shape: f32[1,128], index: 0, kind: input, shape index: {}]   ;;  %s18375_s1 = inlined_call_operand.vmem [shape: f32[1,128], index: 1, kind: input, shape index: {}]   ;;  %s18376_s2 = inlined_call_operand.vmem [shape: f32[48], index: 2, kind: input, shape index: {}]   ;;  %s18377_s3 = inlined_call_operand.vmem [shape: f32[6,24,1], index: 3, kind: input, shape index: {}]   ;;  %s18378_s4 = inlined_call_operand.vmem [shape: f32[6,8,1], index: 4, kind: input, shape index: {}]   ;;  %s18379_s5 = inlined_call_operand.vmem [shape: f32[6,24,8], index: 5, kind: input, shape index: {}]   ;;  %s18380_s6 = inlined_call_operand.vmem [shape: f32[6,8,1], index: 6, kind: input, shape index: {}]   ;;  %s18381_s7 = inlined_call_operand.vmem [shape: f32[6,3,8], index: 7, kind: input, shape index: {}]   ;;  %s18382_s8 = inlined_call_operand.vmem [shape: f32[6,1,1], index: 8, kind: input, shape index: {}]   ;;  %s18383_s9 = inlined_call_operand.vmem [shape: f32[1,128], index: 9, kind: output, shape index: {}]  }
   0x1   :  { %s25_s11 = sshll.u32 %s18376_s2, 4  ;;  %s26_s11 = int_to_ptr.vmem [resolvable:$true] %s25_s11 }
   0x2   :  { %s14348_s12 = scalar_lea.vmem %s26_s11, 16  ;;  %p14353_p1 = scmp.lt.s32.totalorder %s26_s11, %s26_s11 }
   0x3   :  { %p14349_p0 = scmp.ne.s32.totalorder %s26_s11, %s14348_s12  ;;  %p14354_p2 = scmp.lt.s32.totalorder %s14348_s12, %s14348_s12 }
   0x5   :  { %p14355_p3 = por %p14354_p2, %p14353_p1 }
   0x7   :  { %p14356_p4 = pnand %p14355_p3, %p14349_p0 }
   0x9   :  { %14359 = shalt.err (!%p14356_p4)
}
   0xa   :  { %s14362_s13 = smov [#allocation2]  }
   0xb   :  { %28 = dma.vmem_to_smem %s26_s11, 16, %s14362_s13, [#allocation3]  }
   0xc   :  { %14360 = dma.done.wait [#allocation3], 16  }
   0xd   :  { %14361 = vsyncadd [#allocation3], 4294967280 }
   0xe   :  { %44 = sfence }
   0xf   :  { %v45_v0 = vld [vmem:[%s18377_s3] sm:$0xff]  ;;  %v107_v1 = vlaneseq  ;;  %v14363_v2 = vmov 0   ;;  %v18492_v3 = vmov 0.0|0.0   ;;  %v47_v6 = vld [vmem:[%s18377_s3 + $0x10] sm:$0xff]  ;;  %vm18392_vm0 = vmmov 0   ;;  %v46_v25 = vld [vmem:[%s18377_s3 + $0x8] sm:$0xff] }
  0x10   :  { %13998 = vset.pattern.permute.xlu0 %v14363_v2  ;;  %12765 = vmatprep.subr.bf16.mxu0 %v18492_v3  ;;  %v18462_v7 = vmov 0.0   ;;  %v18769_v16 = vmov 0  ;;  %v87_v17 = vld [vmem:[%s18380_s6] sm:$0xff]  ;;  %v18773_v21 = vmov 0  ;;  %v18777_v23 = vmov 0  ;;  %s1361_s13 = sld [smem:[#allocation2]] }
  0x11   :  { %291 = vperm.xlu0 %13998, %v45_v0   ;;  %v14426_v4 = vshrl.u32 %v107_v1, 7  ;;  %v14428_v5 = vand.u32 127, %v107_v1  ;;  %12789 = vmatprep.subr.bf16.mxu1 %v18492_v3  ;;  %v18780_v24 = vmov 0  ;;  %v18783_v26 = vmov 0  ;;  %v63_v30 = vld [vmem:[%s18378_s4] sm:$0xff]  ;;  %s9295_s14 = sld [smem:[#allocation2 + $0x1]] }
  0x12   :  { %10901 = vmatprep.mubr.msk.f32.mxu0 %vm18392_vm0, %v18462_v7  ;;  %10936 = vmatprep.mubr.msk.f32.mxu1 %vm18392_vm0, %v18462_v7  ;;  %v18490_v28 = vmov 1.0|1.0   ;;  %v18787_v32 = vmov 0  ;;  %v18791_v34 = vmov 0  ;;  %v18794_v35 = vmov 0  ;;  %s9296_s15 = sld [smem:[#allocation2 + $0x2]] }
  0x13   :  { %18762 = vst [vmem:[#allocation5_spill] sm:$0xff] %v14426_v4  ;;  %18763 = vst [vmem:[#allocation6_spill] sm:$0xff] %v14428_v5  ;;  %v14439_v8 = vadd.s32 8, %v14426_v4  ;;  %v18460_v9 = vshra.s32 %v14426_v4, 6  ;;  %v14443_v10 = vshra.s32 %v14428_v5, 6  ;;  %v14446_v11 = vadd.s32 4294967295, %v14428_v5  ;;  %13999 = vset.pattern.permute.xlu1 %v14363_v2 }
  0x14   :  { %v14449_v12 = vadd.s32 16, %v14426_v4  ;;  %v14452_v13 = vadd.s32 24, %v14426_v4  ;;  %v14455_v14 = vadd.s32 32, %v14426_v4  ;;  %v14480_v20 = vadd.s32 1, %v14428_v5  ;;  %296 = vperm.xlu1 %13999, %v46_v25   ;;  %v99_v36 = vld [vmem:[%s18382_s8] sm:$0x1] }
  0x15   :  { %18764 = vst [vmem:[#allocation7_spill] sm:$0xff] %v14439_v8  ;;  %18765 = vst [vmem:[#allocation8_spill] sm:$0xff] %v14446_v11  ;;  %301 = vperm.xlu0 %13998, %v47_v6   ;;  %v18461_v15 = vshra.s32 %v14439_v8, 6  ;;  %vm14461_vm1 = vcmp.eq.s32.totalorder %v18460_v9, %v14443_v10  ;;  %vm18387_vm2 = vcmp.eq.s32.totalorder %v14426_v4, %v14446_v11  ;;  %v14492_v22 = vadd.s32 40, %v14426_v4  ;;  %s9419_s2 = sld [smem:[#allocation2 + $0x6]]  ;;  %s9560_s16 = sld [smem:[#allocation2 + $0xa]] }
  0x16   :  { %18766 = vst [vmem:[#allocation9_spill] sm:$0xff] %v14449_v12  ;;  %18767 = vst [vmem:[#allocation10_spill] sm:$0xff] %v14452_v13  ;;  %v18770_v16 = vsel %vm14461_vm1, 4294967295, %v18769_v16  ;;  %vm18389_vm3 = vcmp.eq.s32.totalorder %v14439_v8, %v14446_v11  ;;  %v18458_v18 = vshra.s32 %v14449_v12, 6  ;;  %v18459_v19 = vshra.s32 %v14452_v13, 6  ;;  %s9561_s17 = sld [smem:[#allocation2 + $0xb]] }
  0x17   :  { %18768 = vst [vmem:[#allocation11_spill] sm:$0xff] %v14455_v14  ;;  %18771 = vst [vmem:[#allocation12_spill] sm:$0xff] %v18770_v16  ;;  %vm14485_vm5 = vcmp.eq.s32.totalorder %v18461_v15, %v14443_v10  ;;  %vm18385_vm6 = vcmp.eq.s32.totalorder %v14449_v12, %v14446_v11  ;;  %vm18384_vm10 = vcmp.eq.s32.totalorder %v14452_v13, %v14446_v11  ;;  %v18456_v27 = vshra.s32 %v14455_v14, 6  ;;  %s9571_s18 = sld [smem:[#allocation2 + $0xc]]  ;;  %s9572_s19 = sld [smem:[#allocation2 + $0xd]] }
  0x18   :  { %vm176_vm4 = vmand %vm18387_vm2, %vm14461_vm1  ;;  %18772 = vst [vmem:[#allocation13_spill] sm:$0xff] %v14480_v20  ;;  %v18774_v21 = vsel %vm14485_vm5, 4294967295, %v18773_v21  ;;  %vm14502_vm8 = vcmp.eq.s32.totalorder %v18458_v18, %v14443_v10  ;;  %vm14509_vm9 = vcmp.eq.s32.totalorder %v18459_v19, %v14443_v10  ;;  %vm18386_vm13 = vcmp.eq.s32.totalorder %v14426_v4, %v14480_v20  ;;  %456 = vperm.xlu1 %13999, %v63_v30   ;;  %s9573_s20 = sld [smem:[#allocation2 + $0xe]]  ;;  %s9574_s10 = sld [smem:[#allocation2 + $0xf]] }
  0x19   :  { %18775 = vst [vmem:[#allocation14_spill] sm:$0xff] %v18774_v21  ;;  %18776 = vst [vmem:[#allocation15_spill] sm:$0xff] %v14492_v22  ;;  %v18778_v23 = vsel %vm14502_vm8, 4294967295, %v18777_v23  ;;  %v18781_v24 = vsel %vm14509_vm9, 4294967295, %v18780_v24  ;;  %694 = vperm.xlu0 %13998, %v87_v17   ;;  %v18457_v29 = vshra.s32 %v14492_v22, 6  ;;  %vm18388_vm15 = vcmp.eq.s32.totalorder %v14439_v8, %v14480_v20  ;;  %s9665_s21 = sld [smem:[#allocation2 + $0x13]] }
  0x1a   :  { %vm177_vm7 = vmand %vm18389_vm3, %vm14485_vm5  ;;  %18779 = vst [vmem:[#allocation16_spill] sm:$0xff] %v18778_v23  ;;  %v14546_v31 = vadd.s32 48, %v14426_v4  ;;  %v14553_v33 = vadd.s32 56, %v14426_v4  ;;  %v18797_v37 = vmov 0  ;;  %vm18399_vm3 = vcmp.eq.s32.totalorder %v14452_v13, %v14480_v20  ;;  %s9671_s22 = sld [smem:[#allocation2 + $0x14]]  ;;  %s9672_s23 = sld [smem:[#allocation2 + $0x15]] }
  0x1b   :  { %18782 = vst [vmem:[#allocation17_spill] sm:$0xff] %v18781_v24  ;;  %vm14518_vm11 = vmpackc.low %vm177_vm7, %vm176_vm4  ;;  %v14615_v40 = vadd.s32 64, %v14426_v4  ;;  %v18801_v41 = vmov 0  ;;  %v14622_v42 = vadd.s32 72, %v14426_v4  ;;  %v18805_v43 = vmov 0  ;;  %s9420_s24 = sld [smem:[#allocation2 + $0x7]] }
  0x1c   :  { %v18784_v26 = vsel %vm14518_vm11, 4294967295, %v18783_v26  ;;  %12767 = vmatpush3.bf16.msk.msra.mxu0 %vm14518_vm11, %v18490_v28  ;;  %vm178_vm12 = vmand %vm18385_vm6, %vm14502_vm8  ;;  %18786 = vst [vmem:[#allocation19_spill] sm:$0xff] %v14546_v31  ;;  %vm14580_vm6 = vcmp.eq.s32.totalorder %v18457_v29, %v14443_v10  ;;  %v18454_v38 = vshra.s32 %v14546_v31, 6  ;;  %v18455_v39 = vshra.s32 %v14553_v33, 6  ;;  %920 = vperm.xlu1 %13999, %v99_v36   ;;  %s9673_s25 = sld [smem:[#allocation2 + $0x16]]  ;;  %s9772_s27 = sld [smem:[#allocation2 + $0x19]] }
  0x1d   :  { %18785 = vst [vmem:[#allocation18_spill] sm:$0xff] %v18784_v26  ;;  %12768 = vmatprep.subr.bf16.mxu0 %v18492_v3  ;;  %vm179_vm14 = vmand %vm18384_vm10, %vm14509_vm9  ;;  %vm14563_vm10 = vcmp.eq.s32.totalorder %v18456_v27, %v14443_v10  ;;  %v18795_v35 = vsel %vm14580_vm6, 4294967295, %v18794_v35  ;;  %v18808_v44 = vmov 0  ;;  %v18811_v45 = vmov 0  ;;  %s9773_s28 = sld [smem:[#allocation2 + $0x1a]]  ;;  %s9784_s29 = sld [smem:[#allocation2 + $0x1c]] }
  0x1e   :  { %vm14548_vm4 = vmpackc.low %vm179_vm14, %vm178_vm12  ;;  %18790 = vst [vmem:[#allocation21_spill] sm:$0xff] %v14553_v33  ;;  %v18792_v34 = vsel %vm14563_vm10, 4294967295, %v18791_v34  ;;  %vm18390_vm12 = vcmp.eq.s32.totalorder %v14455_v14, %v14446_v11  ;;  %v18452_v46 = vshra.s32 %v14615_v40, 6  ;;  %v18453_v47 = vshra.s32 %v14622_v42, 6  ;;  %s9785_s30 = sld [smem:[#allocation2 + $0x1d]]  ;;  %s9950_s12 = sld [smem:[#allocation2 + $0x26]] }
  0x1f   :  { %v18788_v32 = vsel %vm14548_vm4, 4294967295, %v18787_v32  ;;  %vm241_vm7 = vmand %vm18386_vm13, %vm14461_vm1  ;;  %18793 = vst [vmem:[#allocation22_spill] sm:$0xff] %v18792_v34  ;;  %vm18391_vm13 = vcmp.eq.s32.totalorder %v14492_v22, %v14446_v11  ;;  %v14681_v48 = vadd.s32 80, %v14426_v4  ;;  %v18815_v49 = vmov 0  ;;  %s9949_s11 = sld [smem:[#allocation2 + $0x25]] }
  0x20   :  { %18789 = vst [vmem:[#allocation20_spill] sm:$0xff] %v18788_v32  ;;  %12770 = vmatpush3.bf16.msk.msra.mxu0 %vm14548_vm4, %v18490_v28  ;;  %vm242_vm14 = vmand %vm18388_vm15, %vm14485_vm5  ;;  %v14688_v50 = vadd.s32 88, %v14426_v4  ;;  %v18819_v51 = vmov 0  ;;  %v18822_v52 = vmov 0  ;;  %v18825_v53 = vmov 0 }
  0x21   :  { %18796 = vst [vmem:[#allocation23_spill] sm:$0xff] %v18795_v35  ;;  %vm14589_vm2 = vmpackc.low %vm242_vm14, %vm241_vm7  ;;  %12771 = vmatprep.subr.bf16.mxu0 %v18492_v3  ;;  %vm18394_vm7 = vcmp.eq.s32.totalorder %v14449_v12, %v14480_v20  ;;  %v18438_v54 = vshra.s32 %v14681_v48, 6  ;;  %v14741_v56 = vadd.s32 96, %v14426_v4  ;;  %v18829_v57 = vmov 0 }
  0x22   :  { %v18798_v37 = vsel %vm14589_vm2, 4294967295, %v18797_v37  ;;  %12791 = vmatpush3.bf16.msk.msra.mxu1 %vm14589_vm2, %v18490_v28  ;;  %vm180_vm15 = vmand %vm18390_vm12, %vm14563_vm10  ;;  %18800 = vst [vmem:[#allocation25_spill] sm:$0xff] %v14615_v40  ;;  %v18451_v55 = vshra.s32 %v14688_v50, 6  ;;  %v14748_v58 = vadd.s32 104, %v14426_v4  ;;  %v18833_v59 = vmov 0 }
  0x23   :  { %18799 = vst [vmem:[#allocation24_spill] sm:$0xff] %v18798_v37  ;;  %12792 = vmatprep.subr.bf16.mxu1 %v18492_v3  ;;  %vm181_vm14 = vmand %vm18391_vm13, %vm14580_vm6  ;;  %v18836_v60 = vmov 0  ;;  %v18839_v61 = vmov 0  ;;  %v18434_v62 = vshra.s32 %v14741_v56, 6  ;;  %v14801_v0 = vadd.s32 112, %v14426_v4 }
  0x24   :  { %vm14617_vm12 = vmpackc.low %vm181_vm14, %vm180_vm15  ;;  %18804 = vst [vmem:[#allocation27_spill] sm:$0xff] %v14622_v42  ;;  %vm14635_vm15 = vcmp.eq.s32.totalorder %v18454_v38, %v14443_v10  ;;  %vm18402_vm14 = vcmp.eq.s32.totalorder %v14546_v31, %v14446_v11  ;;  %v18437_v63 = vshra.s32 %v14748_v58, 6  ;;  %v18843_v1 = vmov 0 }
  0x25   :  { %v18802_v41 = vsel %vm14617_vm12, 4294967295, %v18801_v41  ;;  %12773 = vmatpush3.bf16.msk.msra.mxu0 %vm14617_vm12, %v18490_v28  ;;  %vm243_vm13 = vmand %vm18394_vm7, %vm14502_vm8  ;;  %v18806_v43 = vsel %vm14635_vm15, 4294967295, %v18805_v43  ;;  %vm14650_vm7 = vcmp.eq.s32.totalorder %v18455_v39, %v14443_v10  ;;  %vm18403_vm8 = vcmp.eq.s32.totalorder %v14553_v33, %v14446_v11  ;;  %18814 = vst [vmem:[#allocation31_spill] sm:$0xff] %v14681_v48 }
  0x26   :  { %18803 = vst [vmem:[#allocation26_spill] sm:$0xff] %v18802_v41  ;;  %18807 = vst [vmem:[#allocation28_spill] sm:$0xff] %v18806_v43  ;;  %12774 = vmatprep.subr.bf16.mxu0 %v18492_v3  ;;  %v18809_v44 = vsel %vm14650_vm7, 4294967295, %v18808_v44  ;;  %v14808_v2 = vadd.s32 120, %v14426_v4  ;;  %v18847_v6 = vmov 0  ;;  %v18850_v17 = vmov 0 }
  0x27   :  { %vm244_vm0 = vmand %vm18399_vm3, %vm14509_vm9  ;;  %18810 = vst [vmem:[#allocation29_spill] sm:$0xff] %v18809_v44  ;;  %vm18406_vm9 = vcmp.eq.s32.totalorder %v14455_v14, %v14480_v20  ;;  %v18853_v25 = vmov 0  ;;  %v18441_v30 = vshra.s32 %v14801_v0, 6 }
  0x28   :  { %vm14656_vm5 = vmpackc.low %vm244_vm0, %vm243_vm13  ;;  %vm18411_vm13 = vcmp.eq.s32.totalorder %v14492_v22, %v14480_v20  ;;  %18818 = vst [vmem:[#allocation33_spill] sm:$0xff] %v14688_v50  ;;  %v18450_v36 = vshra.s32 %v14808_v2, 6 }
  0x29   :  { %v18812_v45 = vsel %vm14656_vm5, 4294967295, %v18811_v45  ;;  %12794 = vmatpush3.bf16.msk.msra.mxu1 %vm14656_vm5, %v18490_v28  ;;  %vm182_vm3 = vmand %vm18402_vm14, %vm14635_vm15  ;;  %18828 = vst [vmem:[#allocation37_spill] sm:$0xff] %v14741_v56 }
  0x2a   :  { %18813 = vst [vmem:[#allocation30_spill] sm:$0xff] %v18812_v45  ;;  %12795 = vmatprep.subr.bf16.mxu1 %v18492_v3  ;;  %vm183_vm0 = vmand %vm18403_vm8, %vm14650_vm7 }
  0x2b   :  { %vm14683_vm14 = vmpackc.low %vm183_vm0, %vm182_vm3  ;;  %vm14701_vm3 = vcmp.eq.s32.totalorder %v18452_v46, %v14443_v10  ;;  %vm168_vm0 = vcmp.eq.s32.totalorder %v14615_v40, %v14446_v11  ;;  %18832 = vst [vmem:[#allocation39_spill] sm:$0xff] %v14748_v58  ;;  %v14937_v46 = vsub.s32 0, %v14426_v4 }
  0x2c   :  { %v18816_v49 = vsel %vm14683_vm14, 4294967295, %v18815_v49  ;;  %12776 = vmatpush3.bf16.msk.msra.mxu0 %vm14683_vm14, %v18490_v28  ;;  %vm245_vm8 = vmand %vm18406_vm9, %vm14563_vm10  ;;  %v18820_v51 = vsel %vm14701_vm3, 4294967295, %v18819_v51  ;;  %vm14716_vm9 = vcmp.eq.s32.totalorder %v18453_v47, %v14443_v10  ;;  %vm169_vm10 = vcmp.eq.s32.totalorder %v14622_v42, %v14446_v11  ;;  %18842 = vst [vmem:[#allocation43_spill] sm:$0xff] %v14801_v0  ;;  %v14942_v47 = vld [vmem:[%s18374_s0] sm:$0x1]  ;;  %s9297_s0 = sld [smem:[#allocation2 + $0x3]] }
  0x2d   :  { %18817 = vst [vmem:[#allocation32_spill] sm:$0xff] %v18816_v49  ;;  %18821 = vst [vmem:[#allocation34_spill] sm:$0xff] %v18820_v51  ;;  %12777 = vmatprep.subr.bf16.mxu0 %v18492_v3  ;;  %v18823_v52 = vsel %vm14716_vm9, 4294967295, %v18822_v52  ;;  %vm240_vm14 = vcmp.eq.s32.totalorder %v14808_v2, %v14480_v20  ;;  %v308_v38 = vrot.slane %v14942_v47, %v14937_v46 }
  0x2e   :  { %vm246_vm1 = vmand %vm18411_vm13, %vm14580_vm6  ;;  %18824 = vst [vmem:[#allocation35_spill] sm:$0xff] %v18823_v52  ;;  %vm18416_vm6 = vcmp.eq.s32.totalorder %v14546_v31, %v14480_v20 }
  0x2f   :  { %vm14722_vm5 = vmpackc.low %vm246_vm1, %vm245_vm8  ;;  %vm18421_vm8 = vcmp.eq.s32.totalorder %v14553_v33, %v14480_v20  ;;  %18846 = vst [vmem:[#allocation45_spill] sm:$0xff] %v14808_v2 }
  0x30   :  { %v18826_v53 = vsel %vm14722_vm5, 4294967295, %v18825_v53  ;;  %12797 = vmatpush3.bf16.msk.msra.mxu1 %vm14722_vm5, %v18490_v28  ;;  %vm184_vm13 = vmand %vm168_vm0, %vm14701_vm3  ;;  %vm170_vm0 = vcmp.eq.s32.totalorder %v14681_v48, %v14446_v11 }
  0x31   :  { %18827 = vst [vmem:[#allocation36_spill] sm:$0xff] %v18826_v53  ;;  %12798 = vmatprep.subr.bf16.mxu1 %v18492_v3  ;;  %vm185_vm1 = vmand %vm169_vm10, %vm14716_vm9 }
  0x32   :  { %vm14743_vm5 = vmpackc.low %vm185_vm1, %vm184_vm13  ;;  %vm14761_vm13 = vcmp.eq.s32.totalorder %v18438_v54, %v14443_v10  ;;  %v18862_v54 = vmov 0 }
  0x33   :  { %v18830_v57 = vsel %vm14743_vm5, 4294967295, %v18829_v57  ;;  %12779 = vmatpush3.bf16.msk.msra.mxu0 %vm14743_vm5, %v18490_v28  ;;  %vm247_vm10 = vmand %vm18416_vm6, %vm14635_vm15  ;;  %v18834_v59 = vsel %vm14761_vm13, 4294967295, %v18833_v59  ;;  %vm14776_vm6 = vcmp.eq.s32.totalorder %v18451_v55, %v14443_v10  ;;  %vm171_vm15 = vcmp.eq.s32.totalorder %v14688_v50, %v14446_v11 }
  0x34   :  { %18831 = vst [vmem:[#allocation38_spill] sm:$0xff] %v18830_v57  ;;  %18835 = vst [vmem:[#allocation40_spill] sm:$0xff] %v18834_v59  ;;  %12780 = vmatprep.subr.bf16.mxu0 %v18492_v3  ;;  %v18837_v60 = vsel %vm14776_vm6, 4294967295, %v18836_v60  ;;  %v18874_v55 = vmov 0 }
  0x35   :  { %vm248_vm1 = vmand %vm18421_vm8, %vm14650_vm7  ;;  %18838 = vst [vmem:[#allocation41_spill] sm:$0xff] %v18837_v60  ;;  %vm233_vm7 = vcmp.eq.s32.totalorder %v14615_v40, %v14480_v20 }
  0x36   :  { %vm14782_vm2 = vmpackc.low %vm248_vm1, %vm247_vm10  ;;  %vm234_vm1 = vcmp.eq.s32.totalorder %v14622_v42, %v14480_v20 }
  0x37   :  { %v18840_v61 = vsel %vm14782_vm2, 4294967295, %v18839_v61  ;;  %12800 = vmatpush3.bf16.msk.msra.mxu1 %vm14782_vm2, %v18490_v28  ;;  %vm186_vm8 = vmand %vm170_vm0, %vm14761_vm13  ;;  %vm14818_vm0 = vcmp.eq.s32.totalorder %v18434_v62, %v14443_v10  ;;  %v18856_v62 = vmov 0 }
  0x38   :  { %18841 = vst [vmem:[#allocation42_spill] sm:$0xff] %v18840_v61  ;;  %12801 = vmatprep.subr.bf16.mxu1 %v18492_v3  ;;  %vm187_vm10 = vmand %vm171_vm15, %vm14776_vm6  ;;  %v18848_v6 = vsel %vm14818_vm0, 4294967295, %v18847_v6 }
  0x39   :  { %vm14803_vm2 = vmpackc.low %vm187_vm10, %vm186_vm8  ;;  %18849 = vst [vmem:[#allocation46_spill] sm:$0xff] %v18848_v6  ;;  %vm172_vm8 = vcmp.eq.s32.totalorder %v14741_v56, %v14446_v11 }
  0x3a   :  { %v18844_v1 = vsel %vm14803_vm2, 4294967295, %v18843_v1  ;;  %12782 = vmatpush3.bf16.msk.msra.mxu0 %vm14803_vm2, %v18490_v28  ;;  %vm249_vm15 = vmand %vm233_vm7, %vm14701_vm3  ;;  %vm14830_vm2 = vcmp.eq.s32.totalorder %v18437_v63, %v14443_v10  ;;  %vm173_vm7 = vcmp.eq.s32.totalorder %v14748_v58, %v14446_v11  ;;  %v18859_v63 = vmov 0 }
  0x3b   :  { %18845 = vst [vmem:[#allocation44_spill] sm:$0xff] %v18844_v1  ;;  %vm250_vm10 = vmand %vm234_vm1, %vm14716_vm9  ;;  %12783 = vmatprep.subr.bf16.mxu0 %v18492_v3  ;;  %v18851_v17 = vsel %vm14830_vm2, 4294967295, %v18850_v17  ;;  %vm235_vm9 = vcmp.eq.s32.totalorder %v14681_v48, %v14480_v20 }
  0x3c   :  { %18852 = vst [vmem:[#allocation47_spill] sm:$0xff] %v18851_v17  ;;  %vm14836_vm3 = vmpackc.low %vm250_vm10, %vm249_vm15  ;;  %vm236_vm10 = vcmp.eq.s32.totalorder %v14688_v50, %v14480_v20 }
  0x3d   :  { %v18854_v25 = vsel %vm14836_vm3, 4294967295, %v18853_v25  ;;  %12803 = vmatpush3.bf16.msk.msra.mxu1 %vm14836_vm3, %v18490_v28  ;;  %vm188_vm1 = vmand %vm172_vm8, %vm14818_vm0  ;;  %vm14866_vm3 = vcmp.eq.s32.totalorder %v18441_v30, %v14443_v10  ;;  %v18865_v30 = vmov 0 }
  0x3e   :  { %18855 = vst [vmem:[#allocation48_spill] sm:$0xff] %v18854_v25  ;;  %12804 = vmatprep.subr.bf16.mxu1 %v18492_v3  ;;  %vm189_vm15 = vmand %vm173_vm7, %vm14830_vm2  ;;  %v18860_v63 = vsel %vm14866_vm3, 4294967295, %v18859_v63  ;;  %vm174_vm7 = vcmp.eq.s32.totalorder %v14801_v0, %v14446_v11 }
  0x3f   :  { %vm14854_vm5 = vmpackc.low %vm189_vm15, %vm188_vm1  ;;  %18861 = vst [vmem:[#allocation50_spill] sm:$0xff] %v18860_v63  ;;  %vm14878_vm15 = vcmp.eq.s32.totalorder %v18450_v36, %v14443_v10  ;;  %v18868_v10 = vmov 0  ;;  %v18871_v36 = vmov 0 }
  0x40   :  { %v18857_v62 = vsel %vm14854_vm5, 4294967295, %v18856_v62  ;;  %12785 = vmatpush3.bf16.msk.msra.mxu0 %vm14854_vm5, %v18490_v28  ;;  %vm251_vm8 = vmand %vm235_vm9, %vm14761_vm13  ;;  %v18863_v54 = vsel %vm14878_vm15, 4294967295, %v18862_v54  ;;  %vm175_vm9 = vcmp.eq.s32.totalorder %v14808_v2, %v14446_v11 }
  0x41   :  { %18858 = vst [vmem:[#allocation49_spill] sm:$0xff] %v18857_v62  ;;  %vm252_vm1 = vmand %vm236_vm10, %vm14776_vm6  ;;  %12786 = vmatprep.subr.bf16.mxu0 %v18492_v3  ;;  %vm237_vm6 = vcmp.eq.s32.totalorder %v14741_v56, %v14480_v20 }
  0x42   :  { %18864 = vst [vmem:[#allocation51_spill] sm:$0xff] %v18863_v54  ;;  %vm14884_vm13 = vmpackc.low %vm252_vm1, %vm251_vm8  ;;  %vm238_vm8 = vcmp.eq.s32.totalorder %v14748_v58, %v14480_v20 }
  0x43   :  { %v18866_v30 = vsel %vm14884_vm13, 4294967295, %v18865_v30  ;;  %12806 = vmatpush3.bf16.msk.msra.mxu1 %vm14884_vm13, %v18490_v28  ;;  %vm190_vm10 = vmand %vm174_vm7, %vm14866_vm3  ;;  %vm239_vm13 = vcmp.eq.s32.totalorder %v14801_v0, %v14480_v20  ;;  %v69_v0 = vld [vmem:[%s18379_s5] sm:$0xff] }
  0x44   :  { %18867 = vst [vmem:[#allocation52_spill] sm:$0xff] %v18866_v30  ;;  %12807 = vmatprep.subr.bf16.mxu1 %v18492_v3  ;;  %vm191_vm5 = vmand %vm175_vm9, %vm14878_vm15 }
  0x45   :  { %vm14900_vm1 = vmpackc.low %vm191_vm5, %vm190_vm10 }
  0x46   :  { %v18869_v10 = vsel %vm14900_vm1, 4294967295, %v18868_v10  ;;  %12788 = vmatpush3.bf16.msk.msra.mxu0 %vm14900_vm1, %v18490_v28  ;;  %vm253_vm7 = vmand %vm237_vm6, %vm14818_vm0  ;;  %vm18886_vm0 = vnez %v18840_v61 }
  0x47   :  { %18870 = vst [vmem:[#allocation53_spill] sm:$0xff] %v18869_v10  ;;  %vm254_vm9 = vmand %vm238_vm8, %vm14830_vm2  ;;  %10939 = vmatprep.subr.mxu0 %v18462_v7  ;;  %vm18885_vm2 = vnez %v18826_v53 }
  0x48   :  { %vm14916_vm5 = vmpackc.low %vm254_vm9, %vm253_vm7  ;;  %vm18879_vm7 = vnez %v18830_v57  ;;  %vm18880_vm9 = vnez %v18844_v1 }
  0x49   :  { %v18872_v36 = vsel %vm14916_vm5, 4294967295, %v18871_v36  ;;  %12809 = vmatpush3.bf16.msk.msra.mxu1 %vm14916_vm5, %v18490_v28  ;;  %vm255_vm6 = vmand %vm239_vm13, %vm14866_vm3  ;;  %vm18878_vm13 = vnez %v18816_v49  ;;  %vm18884_vm3 = vnez %v18812_v45 }
  0x4a   :  { %18873 = vst [vmem:[#allocation54_spill] sm:$0xff] %v18872_v36  ;;  %12810 = vmatprep.subr.bf16.mxu1 %v18492_v3  ;;  %vm256_vm10 = vmand %vm240_vm14, %vm14878_vm15  ;;  %vm18877_vm14 = vmmov 0   ;;  %vm18883_vm15 = vnez %v18798_v37  ;;  %v19005_v36 = vshra.s32 %v14492_v22, 5 }
  0x4b   :  { %vm14928_vm8 = vmpackc.low %vm256_vm10, %vm255_vm6  ;;  %vm18881_vm6 = vnez %v18857_v62  ;;  %vm18482_vm10 = vcmask 64512  }
  0x4c   :  { %v18875_v55 = vsel %vm14928_vm8, 4294967295, %v18874_v55 }
  0x4d   :  { %18876 = vst [vmem:[#allocation55_spill] sm:$0xff] %v18875_v55  ;;  %12812 = vmatpush3.bf16.msk.msra.mxu1 %vm14928_vm8, %v18490_v28 }
  0x4e   :  { %12813 = vmatprep.subr.bf16.mxu1 %v18492_v3 }
  0x90   :  { %v292_v39 = vpop.permute.xlu0 %291 }
  0x91   :  { %v310_v27 = vmul.f32 %v308_v38, %v292_v39 }
  0x93   :  { %10902 = vmatmul.mubr.f32.vlgmr.msra.gmra.mrb[0].mxu0 %v310_v27 }
  0x94   :  { %v302_v29 = vpop.permute.xlu0 %301  ;;  %10941 = vmatprep.mubr.msk.f32.mxu0 %vm18877_vm14, %v18462_v7 }
  0x95   :  { %v312_v18 = vmul.f32 %v308_v38, %v302_v29 }
  0x97   :  { %10937 = vmatmul.mubr.f32.vlgmr.msra.gmra.mrb[0].mxu1 %v312_v18  ;;  %v297_v18 = vpop.permute.xlu1 %296 }
  0x98   :  { %12815 = vmatpush3.bf16.msk.msra.mxu1 %vm14518_vm11, %v18490_v28  ;;  %10982 = vmatprep.mubr.msk.f32.mxu1 %vm18877_vm14, %v18462_v7  ;;  %v311_v27 = vmul.f32 %v308_v38, %v297_v18  ;;  %v18882_v38 = vmov 0.0  }
  0x99   :  { %12816 = vmatprep.subr.bf16.mxu1 %v18492_v3 }
  0x9b   :  { %v457_v20 = vpop.permute.xlu1 %456 }
  0x9c   :  { %12818 = vmatpush3.bf16.msk.msra.mxu1 %vm14548_vm4, %v18490_v28 }
  0x9d   :  { %12819 = vmatprep.subr.bf16.mxu1 %v18492_v3 }
  0xa0   :  { %12821 = vmatpush3.bf16.msk.msra.mxu1 %vm14617_vm12, %v18490_v28 }
  0xa1   :  { %12822 = vmatprep.subr.bf16.mxu1 %v18492_v3 }
  0xa4   :  { %12824 = vmatpush3.bf16.msk.msra.mxu1 %vm18878_vm13, %v18490_v28 }
  0xa5   :  { %12825 = vmatprep.subr.bf16.mxu1 %v18492_v3 }
  0xa8   :  { %12827 = vmatpush3.bf16.msk.msra.mxu1 %vm18879_vm7, %v18490_v28 }
  0xa9   :  { %12828 = vmatprep.subr.bf16.mxu1 %v18492_v3 }
  0xac   :  { %12830 = vmatpush3.bf16.msk.msra.mxu1 %vm18880_vm9, %v18490_v28 }
  0xad   :  { %12831 = vmatprep.subr.bf16.mxu1 %v18492_v3 }
  0xb0   :  { %12833 = vmatpush3.bf16.msk.msra.mxu1 %vm18881_vm6, %v18490_v28 }
  0xb1   :  { %12834 = vmatprep.subr.bf16.mxu1 %v18492_v3 }
  0xb4   :  { %12836 = vmatpush3.bf16.msk.msra.mxu1 %vm14900_vm1, %v18490_v28  ;;  %vm18887_vm1 = vnez %v18854_v25  ;;  %v19016_v25 = vmov 0 }
  0xb5   :  { %12885 = vmatprep.subr.bf16.mxu1 %v18492_v3 }
 0x166   :  { %v379_v29 = vpop.f32.mrb[0].mxu0 }
 0x167   :  { %v380_v39 = vadd.f32 %v379_v29, %v311_v27  ;;  %v10903_v19 = vpop.f32.mrb[1].mxu0 }
 0x16a   :  { %v449_v9 = vpop.f32.mrb[0].mxu1 }
 0x16b   :  { %v453_v15 = vadd.f32 %v449_v9, %v380_v39  ;;  %v10938_v7 = vpop.f32.mrb[1].mxu1  ;;  %v71_v9 = vld [vmem:[%s18379_s5 + $0x10] sm:$0xff] }
 0x16c   :  { %v70_v7 = vld [vmem:[%s18379_s5 + $0x8] sm:$0xff] }
 0x16d   :  { %v459_v11 = vadd.f32 %v457_v20, %v453_v15 }
 0x16f   :  { %v460_v2 = vmax.f32 %v459_v11, 0.0 }
 0x171   :  { %10940 = vmatpush3.msra.mxu0 %v460_v2 }
 0x172   :  { %10942 = vmatmul.mubr.msk.f32.vlgmr.msra.gmra.mrb[2].mxu0 %vm18482_vm10, %v69_v0  ;;  %12837 = vmatprep.subr.bf16.mxu0 %v18492_v3 }
 0x173   :  { %10944 = vmatprep.mubr.msk.f32.mxu0 %vm18877_vm14, %v18882_v38  ;;  %12839 = vmatpush3.bf16.msk.msra.mxu0 %vm18883_vm15, %v18490_v28 }
 0x174   :  { %12840 = vmatprep.subr.bf16.mxu0 %v18492_v3 }
 0x176   :  { %10945 = vmatmul.mubr.msk.f32.gmra.mrb[4].mxu0 %vm18482_vm10, %v70_v7 }
 0x177   :  { %10947 = vmatprep.mubr.msk.f32.mxu0 %vm18877_vm14, %v18882_v38  ;;  %12842 = vmatpush3.bf16.msk.msra.mxu0 %vm18884_vm3, %v18490_v28 }
 0x178   :  { %12843 = vmatprep.subr.bf16.mxu0 %v18492_v3 }
 0x17a   :  { %10948 = vmatmul.mubr.msk.f32.gmra.mrb[6].mxu0 %vm18482_vm10, %v71_v9  ;;  %vm18888_vm10 = vnez %v18866_v30 }
 0x17b   :  { %12845 = vmatpush3.bf16.msk.msra.mxu0 %vm18885_vm2, %v18490_v28  ;;  %11017 = vmatprep.mubr.msk.f32.mxu0 %vm18877_vm14, %v18882_v38 }
 0x17c   :  { %12846 = vmatprep.subr.bf16.mxu0 %v18492_v3 }
 0x17f   :  { %12848 = vmatpush3.bf16.msk.msra.mxu0 %vm18886_vm0, %v18490_v28 }
 0x180   :  { %12849 = vmatprep.subr.bf16.mxu0 %v18492_v3 }
 0x183   :  { %12851 = vmatpush3.bf16.msk.msra.mxu0 %vm18887_vm1, %v18490_v28 }
 0x184   :  { %12852 = vmatprep.subr.bf16.mxu0 %v18492_v3 }
 0x187   :  { %12854 = vmatpush3.bf16.msk.msra.mxu0 %vm18888_vm10, %v18490_v28 }
 0x188   :  { %12855 = vmatprep.subr.bf16.mxu0 %v18492_v3 }
 0x18b   :  { %12857 = vmatpush3.bf16.msk.msra.mxu0 %vm14916_vm5, %v18490_v28 }
 0x18c   :  { %12858 = vmatprep.subr.bf16.mxu0 %v18492_v3 }
 0x18f   :  { %12860 = vmatpush3.bf16.msk.msra.mxu0 %vm14928_vm8, %v18490_v28 }
 0x190   :  { %11020 = vmatprep.subr.mxu0 %v18882_v38 }
 0x245   :  { %v537_v11 = vpop.f32.mrb[2].mxu0 }
 0x246   :  { %v10943_v15 = vpop.f32.mrb[3].mxu0  ;;  %10983 = vmatmul.mubr.f32.vlgmr.msra.gmra.mrb[2].mxu1 %v537_v11  ;;  %v695_v11 = vpop.permute.xlu0 %694 }
 0x247   :  { %12887 = vmatpush3.bf16.msk.msra.mxu1 %vm18883_vm15, %v18490_v28  ;;  %11092 = vmatprep.mubr.msk.f32.mxu1 %vm18877_vm14, %v18882_v38 }
 0x248   :  { %12888 = vmatprep.subr.bf16.mxu1 %v18492_v3 }
 0x249   :  { %v542_v19 = vpop.f32.mrb[4].mxu0 }
 0x24a   :  { %v10946_v20 = vpop.f32.mrb[5].mxu0 }
 0x24b   :  { %12890 = vmatpush3.bf16.msk.msra.mxu1 %vm18884_vm3, %v18490_v28 }
 0x24c   :  { %12891 = vmatprep.subr.bf16.mxu1 %v18492_v3 }
 0x24d   :  { %v547_v0 = vpop.f32.mrb[6].mxu0 }
 0x24e   :  { %v10949_v2 = vpop.f32.mrb[7].mxu0  ;;  %11018 = vmatmul.mubr.f32.vlgmr.msra.gmra.mrb[8].mxu0 %v547_v0  ;;  %v93_v0 = vld [vmem:[%s18381_s7] sm:$0x7] }
 0x24f   :  { %11022 = vmatprep.mubr.msk.f32.mxu0 %vm18877_vm14, %v18882_v38  ;;  %12893 = vmatpush3.bf16.msk.msra.mxu1 %vm18885_vm2, %v18490_v28 }
 0x250   :  { %12894 = vmatprep.subr.bf16.mxu1 %v18492_v3 }
 0x253   :  { %12896 = vmatpush3.bf16.msk.msra.mxu1 %vm18886_vm0, %v18490_v28  ;;  %vm18894_vm0 = vnez %v18781_v24  ;;  %v18954_v24 = vmov 0 }
 0x254   :  { %12897 = vmatprep.subr.bf16.mxu1 %v18492_v3 }
 0x257   :  { %12899 = vmatpush3.bf16.msk.msra.mxu1 %vm18887_vm1, %v18490_v28  ;;  %vm18893_vm1 = vnez %v18778_v23  ;;  %v18958_v23 = vld [vmem:[#allocation45_spill] sm:$0xff] }
 0x258   :  { %12900 = vmatprep.subr.bf16.mxu1 %v18492_v3 }
 0x25b   :  { %12902 = vmatpush3.bf16.msk.msra.mxu1 %vm18888_vm10, %v18490_v28  ;;  %vm18892_vm10 = vnez %v18774_v21 }
 0x25c   :  { %12903 = vmatprep.subr.bf16.mxu1 %v18492_v3  ;;  %v9216_v2 = vsel %vm18892_vm10, 1.0, %v18882_v38  ;;  %vm18897_vm10 = vnez %v18795_v35  ;;  %v18948_v35 = vmov 0 }
 0x25f   :  { %12905 = vmatpush3.bf16.msk.msra.mxu1 %vm14916_vm5, %v18490_v28  ;;  %vm18889_vm5 = vcmask 64512  }
 0x260   :  { %12906 = vmatprep.subr.bf16.mxu1 %v18492_v3 }
 0x263   :  { %12908 = vmatpush3.bf16.msk.msra.mxu1 %vm14928_vm8, %v18490_v28  ;;  %vm18891_vm8 = vnez %v18770_v16  ;;  %v18959_v16 = vmov 0 }
 0x264   :  { %12933 = vmatprep.subr.bf16.mxu1 %v18492_v3 }
 0x319   :  { %v617_v18 = vpop.f32.mrb[2].mxu1 }
 0x31a   :  { %v618_v27 = vadd.f32 %v617_v18, %v542_v19  ;;  %v10984_v29 = vpop.f32.mrb[3].mxu1  ;;  %v9215_v19 = vsel %vm18891_vm8, 1.0, %v18882_v38  ;;  %vm18896_vm8 = vnez %v18792_v34  ;;  %v18957_v34 = vld [vmem:[#allocation43_spill] sm:$0xff] }
 0x31b   :  { %v961_v18 = vmul.f32 0.015625, %v9215_v19  ;;  %v9217_v29 = vsel %vm18893_vm1, 1.0, %v18882_v38  ;;  %vm18913_vm1 = vnez %v18863_v54 }
 0x321   :  { %v687_v39 = vpop.f32.mrb[8].mxu0 }
 0x322   :  { %v691_v7 = vadd.f32 %v687_v39, %v618_v27  ;;  %v11019_v9 = vpop.f32.mrb[9].mxu0  ;;  %v962_v27 = vmul.f32 0.015625, %v9216_v2  ;;  %v9218_v39 = vsel %vm18894_vm0, 1.0, %v18882_v38  ;;  %vm18900_vm0 = vnez %v18809_v44 }
 0x323   :  { %v963_v9 = vmul.f32 0.015625, %v9217_v29  ;;  %v15218_v44 = vmul.u32 2, %v14428_v5 }
 0x324   :  { %v697_v15 = vadd.f32 %v695_v11, %v691_v7  ;;  %v15120_v7 = vpack.c.bf16 %v962_v27, %v961_v18  ;;  %v964_v11 = vmul.f32 0.015625, %v9218_v39 }
 0x325   :  { %vm1126_vm2 = vcmp.eq.s32.totalorder %v14452_v13, %v15218_v44  ;;  %vm1127_vm15 = vcmp.eq.s32.totalorder %v14455_v14, %v15218_v44 }
 0x326   :  { %v698_v20 = vmax.f32 %v697_v15, 0.0  ;;  %18895 = vst [vmem:[#allocation56_spill] sm:$0xff] %v15120_v7  ;;  %v9219_v15 = vsel %vm18896_vm8, 1.0, %v18882_v38  ;;  %v15133_v18 = vpack.c.bf16 %v964_v11, %v963_v9  ;;  %vm18905_vm8 = vnez %v18834_v59 }
 0x327   :  { %v965_v27 = vmul.f32 0.015625, %v9219_v15 }
 0x328   :  { %11021 = vmatpush3.msra.mxu0 %v698_v20  ;;  %v9220_v20 = vsel %vm18897_vm10, 1.0, %v18882_v38  ;;  %18898 = vst [vmem:[#allocation57_spill] sm:$0xff] %v15133_v18  ;;  %vm18899_vm10 = vnez %v18806_v43  ;;  %v18951_v43 = vmov 0 }
 0x329   :  { %11023 = vmatmul.mubr.msk.f32.vlgmr.msra.gmra.mrb[10].mxu0 %vm18889_vm5, %v93_v0  ;;  %12861 = vmatprep.subr.bf16.mxu0 %v18492_v3  ;;  %vm18890_vm5 = vnez %v18869_v10  ;;  %v966_v29 = vmul.f32 0.015625, %v9220_v20  ;;  %v9221_v39 = vsel %vm18899_vm10, 1.0, %v18882_v38  ;;  %vm18902_vm10 = vnez %v18820_v51 }
 0x32a   :  { %12863 = vmatpush3.bf16.msk.msra.mxu0 %vm14518_vm11, %v18490_v28  ;;  %11057 = vmatprep.mubr.msk.f32.mxu0 %vm18877_vm14, %v18882_v38  ;;  %v967_v11 = vmul.f32 0.015625, %v9221_v39  ;;  %v9223_v20 = vsel %vm18902_vm10, 1.0, %v18882_v38  ;;  %vm18906_vm10 = vnez %v18837_v60  ;;  %vm1133_vm11 = vcmp.eq.s32.totalorder %v14681_v48, %v15218_v44 }
 0x32b   :  { %12864 = vmatprep.subr.bf16.mxu0 %v18492_v3  ;;  %v15149_v9 = vpack.c.bf16 %v966_v29, %v965_v27  ;;  %v969_v29 = vmul.f32 0.015625, %v9223_v20  ;;  %v18945_v51 = vmov 0 }
 0x32d   :  { %18901 = vst [vmem:[#allocation58_spill] sm:$0xff] %v15149_v9 }
 0x32e   :  { %12866 = vmatpush3.bf16.msk.msra.mxu0 %vm14548_vm4, %v18490_v28 }
 0x32f   :  { %12867 = vmatprep.subr.bf16.mxu0 %v18492_v3 }
 0x332   :  { %12869 = vmatpush3.bf16.msk.msra.mxu0 %vm14617_vm12, %v18490_v28 }
 0x333   :  { %12870 = vmatprep.subr.bf16.mxu0 %v18492_v3 }
 0x336   :  { %12872 = vmatpush3.bf16.msk.msra.mxu0 %vm18878_vm13, %v18490_v28 }
 0x337   :  { %12873 = vmatprep.subr.bf16.mxu0 %v18492_v3 }
 0x33a   :  { %12875 = vmatpush3.bf16.msk.msra.mxu0 %vm18879_vm7, %v18490_v28 }
 0x33b   :  { %12876 = vmatprep.subr.bf16.mxu0 %v18492_v3 }
 0x33e   :  { %12878 = vmatpush3.bf16.msk.msra.mxu0 %vm18880_vm9, %v18490_v28 }
 0x33f   :  { %12879 = vmatprep.subr.bf16.mxu0 %v18492_v3 }
 0x342   :  { %12881 = vmatpush3.bf16.msk.msra.mxu0 %vm18881_vm6, %v18490_v28 }
 0x343   :  { %12882 = vmatprep.subr.bf16.mxu0 %v18492_v3 }
 0x346   :  { %12884 = vmatpush3.bf16.msk.msra.mxu0 %vm18890_vm5, %v18490_v28  ;;  %v9226_v28 = vsel %vm18906_vm10, 1.0, %v18882_v38  ;;  %vm18909_vm10 = vnez %v18848_v6 }
 0x347   :  { %12909 = vmatprep.subr.bf16.mxu0 %v18492_v3  ;;  %v972_v20 = vmul.f32 0.015625, %v9226_v28  ;;  %v9227_v28 = vsel %vm18909_vm10, 1.0, %v18882_v38 }
 0x3fc   :  { %v15128_v0 = vpop.f32.mrb[10].mxu0 }
 0x3fd   :  { %v845_v19 = vrot.slane %v15128_v0, 2  ;;  %v11024_v2 = vpop.f32.mrb[11].mxu0  ;;  %11058 = vmatmul.mubr.f32.vlgmr.msra.gmra.mrb[12].mxu0 %v15128_v0 }
 0x3fe   :  { %12911 = vmatpush3.bf16.msra.mxu0 %v15120_v7  ;;  %11127 = vmatprep.mubr.msk.f32.mxu0 %vm18877_vm14, %v18882_v38  ;;  %v9222_v2 = vsel %vm18900_vm0, 1.0, %v18882_v38  ;;  %vm18903_vm0 = vnez %v18823_v52 }
 0x3ff   :  { %11093 = vmatmul.mubr.f32.vlgmr.msra.gmra.mrb[4].mxu1 %v845_v19  ;;  %12912 = vmatprep.subr.bf16.mxu0 %v18492_v3  ;;  %v968_v15 = vmul.f32 0.015625, %v9222_v2  ;;  %v9224_v19 = vsel %vm18903_vm0, 1.0, %v18882_v38  ;;  %v9225_v2 = vsel %vm18905_vm8, 1.0, %v18882_v38  ;;  %vm18910_vm0 = vnez %v18851_v17 }
 0x400   :  { %12935 = vmatpush3.bf16.msra.mxu1 %v15120_v7  ;;  %11162 = vmatprep.mubr.msk.f32.mxu1 %vm18877_vm14, %v18882_v38  ;;  %v970_v39 = vmul.f32 0.015625, %v9224_v19  ;;  %vm18912_vm8 = vnez %v18860_v63  ;;  %v18914_v17 = vmov 0.0|0.0  }
 0x401   :  { %12936 = vmatprep.subr.bf16.mxu1 %v18492_v3  ;;  %v15161_v27 = vpack.c.bf16 %v968_v15, %v967_v11  ;;  %v971_v15 = vmul.f32 0.015625, %v9225_v2 }
 0x402   :  { %12914 = vmatpush3.bf16.msra.mxu0 %v15133_v18  ;;  %v15173_v11 = vpack.c.bf16 %v970_v39, %v969_v29  ;;  %v9228_v29 = vsel %vm18910_vm0, 1.0, %v18882_v38  ;;  %v973_v39 = vmul.f32 0.015625, %v9227_v28  ;;  %vm1124_vm0 = vcmp.eq.s32.totalorder %v14439_v8, %v15218_v44 }
 0x403   :  { %12915 = vmatprep.subr.bf16.mxu0 %v18492_v3  ;;  %18904 = vst [vmem:[#allocation59_spill] sm:$0xff] %v15161_v27  ;;  %v15179_v19 = vpack.c.bf16 %v972_v20, %v971_v15  ;;  %v974_v2 = vmul.f32 0.015625, %v9228_v29  ;;  %v9229_v20 = vsel %vm18912_vm8, 1.0, %v18882_v38  ;;  %v773_v29 = vrot.slane %v15128_v0, 1 }
 0x404   :  { %12938 = vmatpush3.bf16.msra.mxu1 %v15133_v18  ;;  %18907 = vst [vmem:[#allocation60_spill] sm:$0xff] %v15173_v11  ;;  %v975_v60 = vmul.f32 0.015625, %v9229_v20  ;;  %vm1125_vm8 = vcmp.eq.s32.totalorder %v14449_v12, %v15218_v44  ;;  %v18924_v0 = vmov 0  ;;  %v19030_v18 = vmov 0 }
 0x405   :  { %12939 = vmatprep.subr.bf16.mxu1 %v18492_v3  ;;  %18908 = vst [vmem:[#allocation61_spill] sm:$0xff] %v15179_v19  ;;  %v15194_v15 = vpack.c.bf16 %v974_v2, %v973_v39  ;;  %v921_v39 = vpop.permute.xlu1 %920  ;;  %vm15236_vm3 = vmpackc.low %vm1126_vm2, %vm1125_vm8  ;;  %vm1129_vm2 = vcmp.eq.s32.totalorder %v14546_v31, %v15218_v44  ;;  %vm1130_vm8 = vcmp.eq.s32.totalorder %v14553_v33, %v15218_v44 }
 0x406   :  { %12917 = vmatpush3.bf16.msra.mxu0 %v15149_v9  ;;  %v926_v63 = vrot.slane %v921_v39, %v14937_v46  ;;  %vm15260_vm5 = vmpackc.low %vm1130_vm8, %vm1129_vm2 }
 0x407   :  { %12918 = vmatprep.subr.bf16.mxu0 %v18492_v3  ;;  %18911 = vst [vmem:[#allocation62_spill] sm:$0xff] %v15194_v15  ;;  %v18925_v0 = vsel %vm15260_vm5, 4294967295, %v18924_v0 }
 0x408   :  { %12941 = vmatpush3.bf16.msra.mxu1 %v15149_v9  ;;  %18926 = vst [vmem:[#allocation65_spill] sm:$0xff] %v18925_v0 }
 0x409   :  { %12942 = vmatprep.subr.bf16.mxu1 %v18492_v3 }
 0x40a   :  { %12920 = vmatpush3.bf16.msra.mxu0 %v15161_v27 }
 0x40b   :  { %12921 = vmatprep.subr.bf16.mxu0 %v18492_v3 }
 0x40c   :  { %12944 = vmatpush3.bf16.msra.mxu1 %v15161_v27  ;;  %v18999_v27 = vshra.s32 %v14546_v31, 5 }
 0x40d   :  { %12945 = vmatprep.subr.bf16.mxu1 %v18492_v3 }
 0x40e   :  { %12923 = vmatpush3.bf16.msra.mxu0 %v15173_v11 }
 0x40f   :  { %12924 = vmatprep.subr.bf16.mxu0 %v18492_v3 }
 0x410   :  { %12947 = vmatpush3.bf16.msra.mxu1 %v15173_v11  ;;  %v19026_v11 = vmov 0 }
 0x411   :  { %12948 = vmatprep.subr.bf16.mxu1 %v18492_v3 }
 0x412   :  { %12926 = vmatpush3.bf16.msra.mxu0 %v15179_v19 }
 0x413   :  { %12927 = vmatprep.subr.bf16.mxu0 %v18492_v3 }
 0x414   :  { %12950 = vmatpush3.bf16.msra.mxu1 %v15179_v19  ;;  %v18988_v19 = vshra.s32 %v14452_v13, 5 }
 0x415   :  { %12951 = vmatprep.subr.bf16.mxu1 %v18492_v3  ;;  %v9230_v3 = vsel %vm18913_vm1, 1.0, %v18882_v38  ;;  %vm1123_vm1 = vcmp.eq.s32.totalorder %v14426_v4, %v15218_v44 }
 0x416   :  { %12929 = vmatpush3.bf16.msra.mxu0 %v15194_v15  ;;  %v976_v6 = vmul.f32 0.015625, %v9230_v3  ;;  %vm15226_vm10 = vmpackc.low %vm1124_vm0, %vm1123_vm1  ;;  %vm1128_vm0 = vcmp.eq.s32.totalorder %v14492_v22, %v15218_v44 }
 0x417   :  { %12930 = vmatprep.subr.bf16.mxu0 %v18914_v17  ;;  %vm15248_vm1 = vmpackc.low %vm1128_vm0, %vm1127_vm15 }
 0x418   :  { %12953 = vmatpush3.bf16.msra.mxu1 %v15194_v15  ;;  %v15206_v28 = vpack.c.bf16 %v976_v6, %v975_v60  ;;  %v18986_v15 = vmov 0 }
 0x419   :  { %12954 = vmatprep.subr.bf16.mxu1 %v18914_v17 }
 0x41a   :  { %18915 = vst [vmem:[#allocation63_spill] sm:$0xff] %v15206_v28  ;;  %12932 = vmatpush3.bf16.msra.mxu0 %v15206_v28 }
 0x41b   :  { %12957 = vmatprep.subr.bf16.mxu0 %v18914_v17 }
 0x41c   :  { %12956 = vmatpush3.bf16.msra.mxu1 %v15206_v28  ;;  %v18985_v28 = vshra.s32 %v14455_v14, 5 }
 0x41d   :  { %12981 = vmatprep.subr.bf16.mxu1 %v18914_v17 }
 0x4d0   :  { %v841_v3 = vpop.f32.mrb[12].mxu0 }
 0x4d1   :  { %v842_v2 = vadd.f32 %v841_v3, %v773_v29  ;;  %v11059_v20 = vpop.f32.mrb[13].mxu0  ;;  %v1171_v29 = vadd.s32 1, %v15218_v44 }
 0x4d2   :  { %v913_v54 = vpop.f32.mrb[4].mxu1 }
 0x4d3   :  { %v917_v52 = vadd.f32 %v913_v54, %v842_v2  ;;  %v11094_v60 = vpop.f32.mrb[5].mxu1  ;;  %v18919_v54 = vmov 0  ;;  %vm1172_vm15 = vcmp.eq.s32.totalorder %v14426_v4, %v1171_v29  ;;  %vm1173_vm0 = vcmp.eq.s32.totalorder %v14439_v8, %v1171_v29 }
 0x4d4   :  { %v18920_v54 = vsel %vm15236_vm3, 4294967295, %v18919_v54  ;;  %vm15275_vm2 = vmpackc.low %vm1173_vm0, %vm1172_vm15  ;;  %v18927_v60 = vmov 0  ;;  %vm1174_vm8 = vcmp.eq.s32.totalorder %v14449_v12, %v1171_v29  ;;  %vm1175_vm6 = vcmp.eq.s32.totalorder %v14452_v13, %v1171_v29 }
 0x4d5   :  { %v927_v6 = vadd.f32 %v926_v63, %v917_v52  ;;  %v18916_v52 = vmov 0  ;;  %v18921_v63 = vmov 0  ;;  %v18928_v60 = vsel %vm15275_vm2, 4294967295, %v18927_v60  ;;  %vm15287_vm9 = vmpackc.low %vm1175_vm6, %vm1174_vm8 }
 0x4d6   :  { %v18917_v52 = vsel %vm15226_vm10, 4294967295, %v18916_v52  ;;  %v18922_v63 = vsel %vm15248_vm1, 4294967295, %v18921_v63  ;;  %18929 = vst [vmem:[#allocation66_spill] sm:$0xff] %v18928_v60  ;;  %vm1176_vm15 = vcmp.eq.s32.totalorder %v14455_v14, %v1171_v29  ;;  %vm1177_vm0 = vcmp.eq.s32.totalorder %v14492_v22, %v1171_v29 }
 0x4d7   :  { %v928_v59 = vadd.f32 %v927_v6, %v14942_v47  ;;  %v18918_v47 = vmov 1.0|1.0   ;;  %18923 = vst [vmem:[#allocation64_spill] sm:$0xff] %v18922_v63  ;;  %vm15297_vm7 = vmpackc.low %vm1177_vm0, %vm1176_vm15  ;;  %v18933_v6 = vmov 0  ;;  %vm1178_vm13 = vcmp.eq.s32.totalorder %v14546_v31, %v1171_v29 }
 0x4d8   :  { %v18934_v6 = vsel %vm15297_vm7, 4294967295, %v18933_v6  ;;  %vm1179_vm6 = vcmp.eq.s32.totalorder %v14553_v33, %v1171_v29  ;;  %vm1131_vm15 = vcmp.eq.s32.totalorder %v14615_v40, %v15218_v44  ;;  %vm1132_vm0 = vcmp.eq.s32.totalorder %v14622_v42, %v15218_v44 }
 0x4d9   :  { %11128 = vmatmul.mubr.f32.vlgmr.msra.gmra.mrb[14].mxu0 %v928_v59  ;;  %18935 = vst [vmem:[#allocation68_spill] sm:$0xff] %v18934_v6  ;;  %vm15307_vm8 = vmpackc.low %vm1179_vm6, %vm1178_vm13  ;;  %vm1180_vm12 = vcmp.eq.s32.totalorder %v14615_v40, %v1171_v29  ;;  %vm1181_vm4 = vcmp.eq.s32.totalorder %v14622_v42, %v1171_v29  ;;  %v1367_v40 = vstv %s9295_s14  ;;  %s9417_s14 = sld [smem:[#allocation2 + $0x4]] }
 0x4da   :  { %11197 = vmatprep.mubr.msk.f32.mxu0 %vm18877_vm14, %v18882_v38  ;;  %12959 = vmatpush3.bf16.msk.msra.mxu0 %vm15226_vm10, %v18918_v47  ;;  %vm15321_vm13 = vmpackc.low %vm1132_vm0, %vm1131_vm15  ;;  %vm1183_vm15 = vcmp.eq.s32.totalorder %v14688_v50, %v1171_v29  ;;  %vm1135_vm0 = vcmp.eq.s32.totalorder %v14741_v56, %v15218_v44 }
 0x4db   :  { %12960 = vmatprep.subr.bf16.mxu0 %v18914_v17  ;;  %vm15328_vm6 = vmpackc.low %vm1181_vm4, %vm1180_vm12 }
 0x4de   :  { %12962 = vmatpush3.bf16.msk.msra.mxu0 %vm15236_vm3, %v18918_v47 }
 0x4df   :  { %12963 = vmatprep.subr.bf16.mxu0 %v18914_v17 }
 0x4e2   :  { %12965 = vmatpush3.bf16.msk.msra.mxu0 %vm15248_vm1, %v18918_v47 }
 0x4e3   :  { %12966 = vmatprep.subr.bf16.mxu0 %v18914_v17 }
 0x4e6   :  { %12968 = vmatpush3.bf16.msk.msra.mxu0 %vm15260_vm5, %v18918_v47 }
 0x4e7   :  { %12969 = vmatprep.subr.bf16.mxu0 %v18914_v17 }
 0x4ea   :  { %12971 = vmatpush3.bf16.msk.msra.mxu0 %vm15321_vm13, %v18918_v47 }
 0x4eb   :  { %12972 = vmatprep.subr.bf16.mxu0 %v18914_v17 }
 0x5ac   :  { %v1043_v39 = vpop.f32.mrb[14].mxu0 }
 0x5ad   :  { %v15271_v3 = vsub.f32 %v928_v59, %v1043_v39  ;;  %v11129_v2 = vpop.f32.mrb[15].mxu0  ;;  %v18930_v59 = vmov 0  ;;  %v18936_v39 = vmov 0 }
 0x5ae   :  { %v18931_v59 = vsel %vm15287_vm9, 4294967295, %v18930_v59  ;;  %v18937_v39 = vsel %vm15307_vm8, 4294967295, %v18936_v39  ;;  %v18939_v2 = vmov 0 }
 0x5af   :  { %v1048_v20 = vmul.f32 %v15271_v3, %v15271_v3  ;;  %18932 = vst [vmem:[#allocation67_spill] sm:$0xff] %v18931_v59  ;;  %18938 = vst [vmem:[#allocation69_spill] sm:$0xff] %v18937_v39  ;;  %v18940_v2 = vsel %vm15321_vm13, 4294967295, %v18939_v2  ;;  %vm1136_vm13 = vcmp.eq.s32.totalorder %v14748_v58, %v15218_v44 }
 0x5b0   :  { %18941 = vst [vmem:[#allocation70_spill] sm:$0xff] %v18940_v2 }
 0x5b1   :  { %11163 = vmatmul.mubr.f32.vlgmr.msra.gmra.mrb[6].mxu1 %v1048_v20  ;;  %v18942_v20 = vmov 0 }
 0x5b2   :  { %12983 = vmatpush3.bf16.msk.msra.mxu1 %vm15275_vm2, %v18918_v47  ;;  %11232 = vmatprep.mubr.msk.f32.mxu1 %vm18877_vm14, %v18882_v38  ;;  %v18943_v20 = vsel %vm15328_vm6, 4294967295, %v18942_v20 }
 0x5b3   :  { %12984 = vmatprep.subr.bf16.mxu1 %v18914_v17  ;;  %18944 = vst [vmem:[#allocation71_spill] sm:$0xff] %v18943_v20 }
 0x5b6   :  { %12986 = vmatpush3.bf16.msk.msra.mxu1 %vm15287_vm9, %v18918_v47  ;;  %vm1185_vm9 = vcmp.eq.s32.totalorder %v14748_v58, %v1171_v29 }
 0x5b7   :  { %12987 = vmatprep.subr.bf16.mxu1 %v18914_v17 }
 0x5ba   :  { %12989 = vmatpush3.bf16.msk.msra.mxu1 %vm15297_vm7, %v18918_v47  ;;  %vm1182_vm7 = vcmp.eq.s32.totalorder %v14681_v48, %v1171_v29  ;;  %v1365_v48 = vstv %s1361_s13  ;;  %s9951_s13 = sld [smem:[#allocation2 + $0x27]] }
 0x5bb   :  { %12990 = vmatprep.subr.bf16.mxu1 %v18914_v17  ;;  %vm15347_vm12 = vmpackc.low %vm1183_vm15, %vm1182_vm7  ;;  %vm1138_vm15 = vcmp.eq.s32.totalorder %v18958_v23, %v15218_v44 }
 0x5bc   :  { %v18949_v35 = vsel %vm15347_vm12, 4294967295, %v18948_v35 }
 0x5bd   :  { %18950 = vst [vmem:[#allocation73_spill] sm:$0xff] %v18949_v35 }
 0x5be   :  { %12992 = vmatpush3.bf16.msk.msra.mxu1 %vm15307_vm8, %v18918_v47  ;;  %vm1134_vm8 = vcmp.eq.s32.totalorder %v14688_v50, %v15218_v44 }
 0x5bf   :  { %12993 = vmatprep.subr.bf16.mxu1 %v18914_v17  ;;  %vm15342_vm4 = vmpackc.low %vm1134_vm8, %vm1133_vm11  ;;  %vm1137_vm8 = vcmp.eq.s32.totalorder %v18957_v34, %v15218_v44  ;;  %v18962_v44 = vmov 0 }
 0x5c0   :  { %v18946_v51 = vsel %vm15342_vm4, 4294967295, %v18945_v51  ;;  %12974 = vmatpush3.bf16.msk.msra.mxu0 %vm15342_vm4, %v18918_v47  ;;  %vm15364_vm11 = vmpackc.low %vm1136_vm13, %vm1135_vm0  ;;  %vm1187_vm4 = vcmp.eq.s32.totalorder %v18958_v23, %v1171_v29  ;;  %vm1371_vm0 = vcmp.eq.s32.totalorder %v14449_v12, %v14428_v5 }
 0x5c1   :  { %18947 = vst [vmem:[#allocation72_spill] sm:$0xff] %v18946_v51  ;;  %12975 = vmatprep.subr.bf16.mxu0 %v18914_v17  ;;  %v18952_v43 = vsel %vm15364_vm11, 4294967295, %v18951_v43 }
 0x5c2   :  { %12995 = vmatpush3.bf16.msk.msra.mxu1 %vm15328_vm6, %v18918_v47  ;;  %vm1184_vm6 = vcmp.eq.s32.totalorder %v14741_v56, %v1171_v29  ;;  %18953 = vst [vmem:[#allocation74_spill] sm:$0xff] %v18952_v43 }
 0x5c3   :  { %12996 = vmatprep.subr.bf16.mxu1 %v18914_v17  ;;  %vm15369_vm7 = vmpackc.low %vm1185_vm9, %vm1184_vm6  ;;  %vm1370_vm6 = vcmp.eq.s32.totalorder %v14439_v8, %v14428_v5 }
 0x5c4   :  { %v18955_v24 = vsel %vm15369_vm7, 4294967295, %v18954_v24  ;;  %12977 = vmatpush3.bf16.msk.msra.mxu0 %vm15364_vm11, %v18918_v47  ;;  %vm15386_vm9 = vmpackc.low %vm1138_vm15, %vm1137_vm8  ;;  %vm18562_vm8 = vcmask 523264   ;;  %vm1375_vm15 = vcmp.eq.s32.totalorder %v14546_v31, %v14428_v5 }
 0x5c5   :  { %18956 = vst [vmem:[#allocation75_spill] sm:$0xff] %v18955_v24  ;;  %12978 = vmatprep.subr.bf16.mxu0 %v18914_v17  ;;  %v18960_v16 = vsel %vm15386_vm9, 4294967295, %v18959_v16  ;;  %v15449_v24 = vsel %vm1375_vm15, 1.0, %v18882_v38 }
 0x5c6   :  { %12998 = vmatpush3.bf16.msk.msra.mxu1 %vm15347_vm12, %v18918_v47  ;;  %vm1186_vm12 = vcmp.eq.s32.totalorder %v18957_v34, %v1171_v29  ;;  %18961 = vst [vmem:[#allocation76_spill] sm:$0xff] %v18960_v16  ;;  %18966 = vst [vmem:[#allocation79_spill] sm:$0xff] %v15449_v24 }
 0x5c7   :  { %12999 = vmatprep.subr.bf16.mxu1 %v18914_v17  ;;  %vm15391_vm13 = vmpackc.low %vm1187_vm4, %vm1186_vm12  ;;  %vm1369_vm4 = vcmp.eq.s32.totalorder %v14426_v4, %v14428_v5  ;;  %vm1373_vm12 = vcmp.eq.s32.totalorder %v14455_v14, %v14428_v5 }
 0x5c8   :  { %v18963_v44 = vsel %vm15391_vm13, 4294967295, %v18962_v44  ;;  %12980 = vmatpush3.bf16.msk.msra.mxu0 %vm15386_vm9, %v18918_v47 }
 0x5c9   :  { %18964 = vst [vmem:[#allocation77_spill] sm:$0xff] %v18963_v44  ;;  %13005 = vmatprep.subr.bf16.mxu0 %v18914_v17 }
 0x5ca   :  { %13001 = vmatpush3.bf16.msk.msra.mxu1 %vm15369_vm7, %v18918_v47 }
 0x5cb   :  { %13002 = vmatprep.subr.bf16.mxu1 %v18914_v17 }
 0x5ce   :  { %13004 = vmatpush3.bf16.msk.msra.mxu1 %vm15391_vm13, %v18918_v47 }
 0x5cf   :  { %13021 = vmatprep.subr.bf16.mxu1 %v18914_v17 }
 0x684   :  { %v1115_v29 = vpop.f32.mrb[6].mxu1 }
 0x685   :  { %v1116_v21 = vadd.f32 1e-05, %v1115_v29  ;;  %v11164_v23 = vpop.f32.mrb[7].mxu1 }
 0x687   :  { %14000 = vrsqrt.f32 %v1116_v21 }
 0x691   :  { %v14001_v58 = vpop.eup %14000 }
 0x692   :  { %v1120_v50 = vmul.f32 %v14001_v58, %v15271_v3 }
 0x694   :  { %v1121_v34 = vmax.f32 %v1120_v50, 0.0  ;;  %v15422_v50 = vsel %vm1369_vm4, 1.0, %v18882_v38  ;;  %vm1374_vm4 = vcmp.eq.s32.totalorder %v14492_v22, %v14428_v5 }
 0x696   :  { %11198 = vmatmul.mubr.f32.vlgmr.msra.gmra.mrb[16].mxu0 %v1121_v34  ;;  %11233 = vmatmul.mubr.f32.vlgmr.msra.gmra.mrb[8].mxu1 %v1121_v34 }
 0x697   :  { %11251 = vmatprep.mubr.msk.f32.mxu0 %vm18877_vm14, %v18882_v38  ;;  %11270 = vmatprep.mubr.msk.f32.mxu1 %vm18877_vm14, %v18882_v38 }
 0x769   :  { %v1286_v42 = vpop.f32.mrb[16].mxu0  ;;  %v1356_v56 = vpop.f32.mrb[8].mxu1 }
 0x76a   :  { %v1360_v29 = vmax.f32 %v1286_v42, %v1356_v56  ;;  %v11199_v23 = vpop.f32.mrb[17].mxu0  ;;  %v11234_v21 = vpop.f32.mrb[9].mxu1  ;;  %v15419_v42 = vsel %vm1370_vm6, 1.0, %v18882_v38  ;;  %v15432_v56 = vsel %vm1371_vm0, 1.0, %v18882_v38  ;;  %vm1372_vm6 = vcmp.eq.s32.totalorder %v14452_v13, %v14428_v5 }
 0x76b   :  { %v15452_v35 = vsel %vm1372_vm6, 1.0, %v18882_v38 }
 0x76c   :  { %v1366_v44 = vmul.f32 %v1365_v48, %v1360_v29 }
 0x76e   :  { %v15412_v34 = vadd.f32 %v1367_v40, %v1366_v44  ;;  %v15429_v40 = vsel %vm1373_vm12, 1.0, %v18882_v38  ;;  %vm1376_vm12 = vcmp.eq.s32.totalorder %v14553_v33, %v14428_v5 }
 0x76f   :  { %18965 = vst [vmem:[#allocation78_spill] sm:$0xff] %v15429_v40 }
 0x770   :  { %v15426_v48 = vrot.slane %v15412_v34, %v14937_v46 }
 0x772   :  { %v1398_v58 = vmul.f32 %v15419_v42, %v15426_v48  ;;  %v1397_v3 = vmul.f32 %v15422_v50, %v15426_v48  ;;  %v1401_v23 = vmul.f32 %v15429_v40, %v15426_v48  ;;  %v1399_v21 = vmul.f32 %v15432_v56, %v15426_v48 }
 0x773   :  { %v1403_v40 = vmul.f32 %v15449_v24, %v15426_v48  ;;  %v15472_v24 = vsel %vm1376_vm12, 1.0, %v18882_v38 }
 0x774   :  { %v1409_v44 = vsel %vm18562_vm8, %v1398_v58, 0.0  ;;  %v1406_v29 = vsel %vm18562_vm8, %v1397_v3, 0.0  ;;  %v1418_v58 = vsel %vm18562_vm8, %v1401_v23, 0.0  ;;  %v1412_v3 = vsel %vm18562_vm8, %v1399_v21, 0.0  ;;  %18968 = vst [vmem:[#allocation81_spill] sm:$0xff] %v15472_v24 }
 0x775   :  { %1410 = vadd.xlane.f32.xlu1 %v1409_v44  ;;  %1407 = vadd.xlane.f32.xlu0 %v1406_v29  ;;  %v1400_v44 = vmul.f32 %v15452_v35, %v15426_v48  ;;  %v15463_v29 = vsel %vm1374_vm4, 1.0, %v18882_v38  ;;  %v1424_v20 = vsel %vm18562_vm8, %v1403_v40, 0.0  ;;  %v18556_v40 = vshra.s32 %v14439_v8, 5 }
 0x776   :  { %18967 = vst [vmem:[#allocation80_spill] sm:$0xff] %v15463_v29  ;;  %v1402_v21 = vmul.f32 %v15463_v29, %v15426_v48  ;;  %v18979_v29 = vld [vmem:[#allocation13_spill] sm:$0xff] }
 0x777   :  { %v1415_v23 = vsel %vm18562_vm8, %v1400_v44, 0.0  ;;  %v15480_v44 = vshra.s32 %v14428_v5, 5  ;;  %vm18982_vm9 = vcmp.eq.s32.totalorder %v14426_v4, %v18979_v29 }
 0x779   :  { %1419 = vadd.xlane.f32.xlu1 %v1418_v58  ;;  %1413 = vadd.xlane.f32.xlu0 %v1412_v3  ;;  %v1421_v58 = vsel %vm18562_vm8, %v1402_v21, 0.0  ;;  %v1404_v3 = vmul.f32 %v15472_v24, %v15426_v48  ;;  %18969 = vst [vmem:[#allocation82_spill] sm:$0xff] %v15480_v44  ;;  %vm15487_vm0 = vcmp.eq.s32.totalorder %v18556_v40, %v15480_v44 }
 0x77a   :  { %v9390_v40 = vsel %vm15487_vm0, 1.0, %v18882_v38  ;;  %vm15546_vm2 = vcmp.eq.s32.totalorder %v18985_v28, %v15480_v44  ;;  %vm15593_vm5 = vcmp.eq.s32.totalorder %v18999_v27, %v15480_v44 }
 0x77b   :  { %v1427_v16 = vsel %vm18562_vm8, %v1404_v3, 0.0  ;;  %v18974_v3 = vld [vmem:[#allocation8_spill] sm:$0xff]  ;;  %v2385_v43 = vmul.f32 0.03125, %v9390_v40  ;;  %v18987_v15 = vsel %vm15546_vm2, 4294967295, %v18986_v15  ;;  %v18991_v40 = vmov 0 }
 0x77c   :  { %vm18975_vm6 = vcmp.eq.s32.totalorder %v14439_v8, %v18974_v3  ;;  %vm18981_vm13 = vcmp.eq.s32.totalorder %v14426_v4, %v18974_v3  ;;  %v9393_v28 = vsel %vm15546_vm2, 1.0, %v18882_v38  ;;  %v9395_v27 = vsel %vm15593_vm5, 1.0, %v18882_v38 }
 0x77d   :  { %1425 = vadd.xlane.f32.xlu1 %v1424_v20  ;;  %1416 = vadd.xlane.f32.xlu0 %v1415_v23  ;;  %v18557_v20 = vshra.s32 %v14426_v4, 5  ;;  %vm1669_vm4 = vmand %vm18975_vm6, %vm15487_vm0  ;;  %vm18980_vm6 = vcmp.eq.s32.totalorder %v14439_v8, %v18979_v29  ;;  %v2388_v7 = vmul.f32 0.03125, %v9393_v28  ;;  %vm19011_vm10 = vcmp.eq.s32.totalorder %v14452_v13, %v18974_v3 }
 0x77e   :  { %vm1693_vm8 = vmand %vm18980_vm6, %vm15487_vm0 }
 0x77f   :  { %vm15494_vm15 = vcmp.eq.s32.totalorder %v18557_v20, %v15480_v44  ;;  %v18976_v20 = vshra.s32 %v14449_v12, 5 }
 0x780   :  { %v9389_v23 = vsel %vm15494_vm15, 1.0, %v18882_v38  ;;  %vm1668_vm7 = vmand %vm18981_vm13, %vm15494_vm15 }
 0x781   :  { %1422 = vadd.xlane.f32.xlu0 %v1421_v58  ;;  %vm15513_vm12 = vcmp.eq.s32.totalorder %v18976_v20, %v15480_v44  ;;  %v2384_v51 = vmul.f32 0.03125, %v9389_v23  ;;  %vm1692_vm11 = vmand %vm18982_vm9, %vm15494_vm15  ;;  %v18983_v23 = vmov 0  ;;  %vm15553_vm9 = vcmp.eq.s32.totalorder %v18988_v19, %v15480_v44 }
 0x782   :  { %v9391_v2 = vsel %vm15513_vm12, 1.0, %v18882_v38  ;;  %vm15539_vm6 = vmpackc.low %vm1669_vm4, %vm1668_vm7  ;;  %v19032_v19 = vmov 0 }
 0x783   :  { %v15536_v20 = vpack.c.bf16 %v2385_v43, %v2384_v51  ;;  %v18984_v23 = vsel %vm15539_vm6, 4294967295, %v18983_v23  ;;  %v2386_v58 = vmul.f32 0.03125, %v9391_v2  ;;  %v18989_v43 = vmov 0  ;;  %vm15558_vm7 = vmpackc.low %vm1693_vm8, %vm1692_vm11  ;;  %13023 = vmatpush3.bf16.msk.msra.mxu1 %vm15539_vm6, %v18918_v47 }
 0x784   :  { %v18990_v43 = vsel %vm15553_vm9, 4294967295, %v18989_v43  ;;  %v18992_v40 = vsel %vm15558_vm7, 4294967295, %v18991_v40  ;;  %v9392_v2 = vsel %vm15553_vm9, 1.0, %v18882_v38  ;;  %vm18993_vm11 = vcmp.eq.s32.totalorder %v14449_v12, %v18974_v3  ;;  %13024 = vmatprep.subr.bf16.mxu1 %v18914_v17  ;;  %vm1671_vm6 = vmand %vm19011_vm10, %vm15553_vm9 }
 0x785   :  { %1428 = vadd.xlane.f32.xlu0 %v1427_v16  ;;  %vm15576_vm13 = vmand %vm18993_vm11, %vm15513_vm12  ;;  %v2387_v51 = vmul.f32 0.03125, %v9392_v2  ;;  %vm18996_vm8 = vcmp.eq.s32.totalorder %v14449_v12, %v18979_v29  ;;  %vm19002_vm11 = vcmp.eq.s32.totalorder %v14455_v14, %v18974_v3  ;;  %vm19012_vm7 = vcmp.eq.s32.totalorder %v14452_v13, %v18979_v29 }
 0x786   :  { %vm15586_vm4 = vmand %vm18996_vm8, %vm15513_vm12  ;;  %vm15615_vm8 = vcmp.eq.s32.totalorder %v19005_v36, %v15480_v44 }
 0x787   :  { %vm15603_vm1 = vmand %vm19002_vm11, %vm15546_vm2  ;;  %v15607_v55 = vpack.c.bf16 %v2387_v51, %v2386_v58  ;;  %vm19008_vm11 = vcmp.eq.s32.totalorder %v14455_v14, %v18979_v29  ;;  %v9394_v58 = vsel %vm15615_vm8, 1.0, %v18882_v38  ;;  %v2390_v51 = vmul.f32 0.03125, %v9395_v27 }
 0x788   :  { %vm15624_vm3 = vmand %vm19008_vm11, %vm15546_vm2  ;;  %v2389_v36 = vmul.f32 0.03125, %v9394_v58  ;;  %v19013_v14 = vshra.s32 %v14553_v33, 5  ;;  %v19018_v27 = vmov 0 }
 0x789   :  { %vm1695_vm11 = vmand %vm19012_vm7, %vm15553_vm9 }
 0x78a   :  { %vm15644_vm14 = vcmp.eq.s32.totalorder %v19013_v14, %v15480_v44  ;;  %vm15650_vm2 = vmpackc.low %vm1671_vm6, %vm15576_vm13  ;;  %v15654_v58 = vpack.c.bf16 %v2389_v36, %v2388_v7  ;;  %vm19020_vm6 = vcmp.eq.s32.totalorder %v14546_v31, %v18974_v3  ;;  %vm19021_vm13 = vcmp.eq.s32.totalorder %v14546_v31, %v18979_v29 }
 0x78b   :  { %v19017_v25 = vsel %vm15650_vm2, 4294967295, %v19016_v25  ;;  %v9396_v61 = vsel %vm15644_vm14, 1.0, %v18882_v38  ;;  %vm15661_vm10 = vmpackc.low %vm1695_vm11, %vm15586_vm4  ;;  %13026 = vmatpush3.bf16.msk.msra.mxu1 %vm15650_vm2, %v18918_v47  ;;  %vm19022_vm11 = vcmp.eq.s32.totalorder %v14492_v22, %v18974_v3  ;;  %v18646_v44 = vmov -1e+30  }
 0x78c   :  { %v19019_v27 = vsel %vm15661_vm10, 4294967295, %v19018_v27  ;;  %v2391_v14 = vmul.f32 0.03125, %v9396_v61  ;;  %vm1674_vm7 = vmand %vm19020_vm6, %vm15593_vm5  ;;  %13027 = vmatprep.subr.bf16.mxu1 %v18914_v17  ;;  %vm19023_vm6 = vcmp.eq.s32.totalorder %v14492_v22, %v18979_v29  ;;  %v19024_v61 = vmov 0 }
 0x78d   :  { %vm1698_vm4 = vmand %vm19021_vm13, %vm15593_vm5  ;;  %v15734_v31 = vsel %vm15487_vm0, 0.0, %v18646_v44  ;;  %v15748_v21 = vsel %vm15513_vm12, 0.0, %v18646_v44  ;;  %vm19037_vm0 = vcmask 523264   ;;  %vm19041_vm12 = vnez %v18990_v43 }
 0x78e   :  { %v15679_v7 = vpack.c.bf16 %v2391_v14, %v2390_v51  ;;  %vm1673_vm2 = vmand %vm19022_vm11, %vm15615_vm8  ;;  %vm19028_vm11 = vcmp.eq.s32.totalorder %v14553_v33, %v18974_v3  ;;  %v1438_v3 = vstv %s9296_s15  ;;  %19034 = vst [vmem:[#allocation8_spill] sm:$0xff] %v15734_v31  ;;  %v15777_v43 = vsel %vm15615_vm8, 0.0, %v18646_v44  ;;  %s9418_s15 = sld [smem:[#allocation2 + $0x5]] }
 0x78f   :  { %vm1697_vm10 = vmand %vm19023_vm6, %vm15615_vm8  ;;  %19036 = vst [vmem:[#allocation84_spill] sm:$0xff] %v15748_v21  ;;  %v15787_v2 = vsel %vm15644_vm14, 0.0, %v18646_v44 }
 0x790   :  { %vm15693_vm9 = vmpackc.low %vm1673_vm2, %vm15603_vm1  ;;  %19045 = vst [vmem:[#allocation88_spill] sm:$0xff] %v15777_v43 }
 0x791   :  { %v19025_v61 = vsel %vm15693_vm9, 4294967295, %v19024_v61  ;;  %vm15699_vm13 = vmpackc.low %vm1697_vm10, %vm15624_vm3  ;;  %13029 = vmatpush3.bf16.msk.msra.mxu1 %vm15693_vm9, %v18918_v47  ;;  %vm19029_vm3 = vcmp.eq.s32.totalorder %v14553_v33, %v18979_v29  ;;  %v15739_v33 = vsel %vm15494_vm15, 0.0, %v18646_v44  ;;  %19048 = vst [vmem:[#allocation89_spill] sm:$0xff] %v15787_v2 }
 0x792   :  { %v19027_v11 = vsel %vm15699_vm13, 4294967295, %v19026_v11  ;;  %vm1675_vm6 = vmand %vm19028_vm11, %vm15644_vm14  ;;  %13030 = vmatprep.subr.bf16.mxu1 %v18914_v17  ;;  %19035 = vst [vmem:[#allocation83_spill] sm:$0xff] %v15739_v33 }
 0x793   :  { %vm1699_vm1 = vmand %vm19029_vm3, %vm15644_vm14 }
 0x794   :  { %vm15717_vm2 = vmpackc.low %vm1675_vm6, %vm1674_vm7  ;;  %vm19039_vm7 = vnez %v18987_v15 }
 0x795   :  { %v19031_v18 = vsel %vm15717_vm2, 4294967295, %v19030_v18  ;;  %vm15721_vm10 = vmpackc.low %vm1699_vm1, %vm1698_vm4  ;;  %13032 = vmatpush3.bf16.msk.msra.mxu1 %vm15717_vm2, %v18918_v47 }
 0x796   :  { %v19033_v19 = vsel %vm15721_vm10, 4294967295, %v19032_v19  ;;  %13033 = vmatprep.subr.bf16.mxu1 %v18914_v17  ;;  %vm19038_vm15 = vmmov %vm19037_vm0 }
 0x797   :  { %vm19043_vm4 = vmmov %vm19037_vm0 }
 0x798   :  { %vm19046_vm11 = vmmov %vm19037_vm0 }
 0x799   :  { %vm19047_vm6 = vmmov %vm19037_vm0 }
 0x79a   :  { %vm19050_vm8 = vmmov %vm19037_vm0 }
 0x79b   :  { %vm19051_vm3 = vmmov %vm19037_vm0 }
 0x79c   :  { %vm19052_vm14 = vmmov %vm19037_vm0 }
 0x79d   :  { %vm19053_vm1 = vmmov %vm19037_vm0 }
 0x802   :  { %v1411_v28 = vpop.xlane.xlu1 %1410  ;;  %v1408_v36 = vpop.xlane.xlu0 %1407 }
 0x803   :  { %v1431_v51 = vmul.f32 %v1411_v28, %v15426_v48  ;;  %v1430_v14 = vmul.f32 %v1408_v36, %v15426_v48 }
 0x805   :  { %v1440_v22 = vmul.f32 %v1438_v3, %v1431_v51  ;;  %v1439_v29 = vmul.f32 %v1438_v3, %v1430_v14 }
 0x806   :  { %v1420_v53 = vpop.xlane.xlu1 %1419  ;;  %v1414_v45 = vpop.xlane.xlu0 %1413 }
 0x807   :  { %v1434_v37 = vmul.f32 %v1420_v53, %v15426_v48  ;;  %v1432_v28 = vmul.f32 %v1414_v45, %v15426_v48  ;;  %v1473_v36 = vadd.f32 %v15734_v31, %v1440_v22  ;;  %v1472_v13 = vadd.f32 %v15739_v33, %v1439_v29 }
 0x808   :  { %v15755_v22 = vsel %vm19039_vm7, 0.0, %v18646_v44  ;;  %v15763_v29 = vsel %vm19041_vm12, 0.0, %v18646_v44  ;;  %vm19055_vm7 = vmmov %vm19037_vm0 }
 0x809   :  { %v1443_v16 = vmul.f32 %v1438_v3, %v1434_v37  ;;  %v1441_v12 = vmul.f32 %v1438_v3, %v1432_v28  ;;  %v1483_v51 = vsel %vm19037_vm0, %v1473_v36, -inf  ;;  %v1480_v14 = vsel %vm19038_vm15, %v1472_v13, -inf  ;;  %19040 = vst [vmem:[#allocation85_spill] sm:$0xff] %v15755_v22  ;;  %19042 = vst [vmem:[#allocation86_spill] sm:$0xff] %v15763_v29 }
 0x80a   :  { %v1426_v4 = vpop.xlane.xlu1 %1425  ;;  %1484 = vmax.xlane.f32.xlu0 %v1483_v51  ;;  %1481 = vmax.xlane.f32.xlu1 %v1480_v14  ;;  %v1417_v53 = vpop.xlane.xlu0 %1416  ;;  %vm19054_vm15 = vmmov %vm19037_vm0 }
 0x80b   :  { %v1436_v45 = vmul.f32 %v1426_v4, %v15426_v48  ;;  %v1433_v24 = vmul.f32 %v1417_v53, %v15426_v48  ;;  %v1474_v37 = vadd.f32 %v15748_v21, %v1441_v12  ;;  %v1476_v33 = vadd.f32 %v15755_v22, %v1443_v16  ;;  %vm19056_vm12 = vmmov %vm19037_vm0 }
 0x80c   :  { %v15770_v4 = vsel %vm15593_vm5, 0.0, %v18646_v44  ;;  %vm19049_vm5 = vmmov %vm19037_vm0 }
 0x80d   :  { %v1445_v28 = vmul.f32 %v1438_v3, %v1436_v45  ;;  %v1442_v51 = vmul.f32 %v1438_v3, %v1433_v24  ;;  %v1486_v14 = vsel %vm19043_vm4, %v1474_v37, -inf  ;;  %19044 = vst [vmem:[#allocation87_spill] sm:$0xff] %v15770_v4  ;;  %v1492_v24 = vsel %vm19046_vm11, %v1476_v33, -inf  ;;  %vm19057_vm4 = vmmov %vm19037_vm0 }
 0x80e   :  { %1487 = vmax.xlane.f32.xlu1 %v1486_v14  ;;  %v1423_v15 = vpop.xlane.xlu0 %1422  ;;  %vm19058_vm11 = vmmov %vm19037_vm0 }
 0x80f   :  { %v1435_v12 = vmul.f32 %v1423_v15, %v15426_v48  ;;  %v1475_v53 = vadd.f32 %v15763_v29, %v1442_v51  ;;  %v1478_v14 = vadd.f32 %v15770_v4, %v1445_v28 }
 0x811   :  { %v1444_v45 = vmul.f32 %v1438_v3, %v1435_v12  ;;  %v1489_v16 = vsel %vm19047_vm6, %v1475_v53, -inf  ;;  %v1498_v12 = vsel %vm19049_vm5, %v1478_v14, -inf  ;;  %vm19059_vm6 = vmmov %vm19037_vm0 }
 0x812   :  { %1493 = vmax.xlane.f32.xlu1 %v1492_v24  ;;  %1490 = vmax.xlane.f32.xlu0 %v1489_v16  ;;  %v1429_v9 = vpop.xlane.xlu0 %1428  ;;  %vm15821_vm5 = vmpackc.low %vm19059_vm6, %vm19059_vm6 }
 0x813   :  { %v1437_v22 = vmul.f32 %v1429_v9, %v15426_v48  ;;  %v1477_v15 = vadd.f32 %v15777_v43, %v1444_v45 }
 0x815   :  { %v1446_v51 = vmul.f32 %v1438_v3, %v1437_v22  ;;  %v1495_v29 = vsel %vm19050_vm8, %v1477_v15, -inf  ;;  %vm19063_vm8 = vmmov %vm19037_vm0 }
 0x816   :  { %1499 = vmax.xlane.f32.xlu1 %v1498_v12  ;;  %1496 = vmax.xlane.f32.xlu0 %v1495_v29 }
 0x817   :  { %v1479_v28 = vadd.f32 %v15787_v2, %v1446_v51 }
 0x819   :  { %v1501_v24 = vsel %vm19051_vm3, %v1479_v28, -inf  ;;  %vm19064_vm3 = vmmov 0  }
 0x81a   :  { %1502 = vmax.xlane.f32.xlu0 %v1501_v24 }
 0x897   :  { %v1482_v48 = vpop.xlane.xlu1 %1481  ;;  %v1485_v16 = vpop.xlane.xlu0 %1484 }
 0x898   :  { %v1504_v45 = vsub.f32 %v1472_v13, %v1482_v48  ;;  %v1505_v9 = vsub.f32 %v1473_v36, %v1485_v16 }
 0x89a   :  { %v1512_v43 = vmul.f32 1.442695, %v1504_v45  ;;  %v1514_v30 = vmul.f32 1.442695, %v1505_v9 }
 0x89b   :  { %v1488_v44 = vpop.xlane.xlu1 %1487 }
 0x89c   :  { %14002 = vpow2.f32 %v1512_v43  ;;  %v1506_v3 = vsub.f32 %v1474_v37, %v1488_v44 }
 0x89d   :  { %14004 = vpow2.f32 %v1514_v30 }
 0x89e   :  { %v1516_v22 = vmul.f32 1.442695, %v1506_v3 }
 0x89f   :  { %v1494_v4 = vpop.xlane.xlu1 %1493  ;;  %v1491_v21 = vpop.xlane.xlu0 %1490 }
 0x8a0   :  { %14006 = vpow2.f32 %v1516_v22  ;;  %v1508_v29 = vsub.f32 %v1476_v33, %v1494_v4  ;;  %v1507_v12 = vsub.f32 %v1475_v53, %v1491_v21 }
 0x8a2   :  { %v1520_v51 = vmul.f32 1.442695, %v1508_v29  ;;  %v1518_v2 = vmul.f32 1.442695, %v1507_v12  ;;  %v48_v29 = vld [vmem:[%s18377_s3 + $0x18] sm:$0xff]  ;;  %v49_v12 = vld [vmem:[%s18377_s3 + $0x20] sm:$0xff] }
 0x8a3   :  { %v1500_v31 = vpop.xlane.xlu1 %1499  ;;  %v1497_v24 = vpop.xlane.xlu0 %1496 }
 0x8a4   :  { %14008 = vpow2.f32 %v1520_v51  ;;  %v1510_v5 = vsub.f32 %v1478_v14, %v1500_v31  ;;  %v1509_v13 = vsub.f32 %v1477_v15, %v1497_v24  ;;  %v64_v51 = vld [vmem:[%s18378_s4 + $0x8] sm:$0xff] }
 0x8a5   :  { %14010 = vpow2.f32 %v1518_v2  ;;  %v50_v24 = vld [vmem:[%s18377_s3 + $0x28] sm:$0xff] }
 0x8a6   :  { %v14003_v36 = vpop.eup %14002  ;;  %v1524_v48 = vmul.f32 1.442695, %v1510_v5  ;;  %v1522_v16 = vmul.f32 1.442695, %v1509_v13  ;;  %v100_v13 = vld [vmem:[%s18382_s8 + $0x1] sm:$0x1] }
 0x8a7   :  { %v14005_v43 = vpop.eup %14004  ;;  %v1503_v44 = vpop.xlane.xlu0 %1502  ;;  %v1528_v37 = vsel %vm19052_vm14, %v14003_v36, 0.0  ;;  %vm19065_vm14 = vmmov %vm19037_vm0 }
 0x8a8   :  { %14012 = vpow2.f32 %v1524_v48  ;;  %v1511_v45 = vsub.f32 %v1479_v28, %v1503_v44  ;;  %1529 = vadd.xlane.f32.xlu1 %v1528_v37  ;;  %v1531_v33 = vsel %vm19053_vm1, %v14005_v43, 0.0  ;;  %v88_v48 = vld [vmem:[%s18380_s6 + $0x8] sm:$0xff]  ;;  %vm19066_vm1 = vnez %v18992_v40 }
 0x8a9   :  { %14014 = vpow2.f32 %v1522_v16  ;;  %1532 = vadd.xlane.f32.xlu0 %v1531_v33 }
 0x8aa   :  { %v14007_v21 = vpop.eup %14006  ;;  %v1526_v4 = vmul.f32 1.442695, %v1511_v45 }
 0x8ab   :  { %v1534_v31 = vsel %vm19037_vm0, %v14007_v21, 0.0  ;;  %vm19067_vm0 = vnez %v19019_v27 }
 0x8ac   :  { %14016 = vpow2.f32 %v1526_v4  ;;  %1535 = vadd.xlane.f32.xlu1 %v1534_v31 }
 0x8ae   :  { %v14009_v53 = vpop.eup %14008 }
 0x8af   :  { %v14011_v5 = vpop.eup %14010  ;;  %v1540_v14 = vsel %vm19054_vm15, %v14009_v53, 0.0  ;;  %vm19068_vm15 = vmmov %vm19057_vm4 }
 0x8b0   :  { %1541 = vadd.xlane.f32.xlu1 %v1540_v14  ;;  %v1537_v15 = vsel %vm19055_vm7, %v14011_v5, 0.0  ;;  %vm19069_vm7 = vnez %v18984_v23 }
 0x8b1   :  { %1538 = vadd.xlane.f32.xlu0 %v1537_v15 }
 0x8b2   :  { %v14013_v2 = vpop.eup %14012 }
 0x8b3   :  { %v14015_v28 = vpop.eup %14014  ;;  %v1546_v9 = vsel %vm19056_vm12, %v14013_v2, 0.0  ;;  %vm19070_vm12 = vnez %v19017_v25 }
 0x8b4   :  { %1547 = vadd.xlane.f32.xlu1 %v1546_v9  ;;  %v1543_v30 = vsel %vm19057_vm4, %v14015_v28, 0.0  ;;  %vm19071_vm4 = vcmask 64512  }
 0x8b5   :  { %1544 = vadd.xlane.f32.xlu0 %v1543_v30  ;;  %v19060_v30 = vmov 0  ;;  %vm19073_vm6 = vmmov %vm19071_vm4 }
 0x8b6   :  { %v14017_v3 = vpop.eup %14016  ;;  %v19061_v30 = vsel %vm15821_vm5, 4294967295, %v19060_v30 }
 0x8b7   :  { %v1549_v22 = vsel %vm19058_vm11, %v14017_v3, 0.0  ;;  %19062 = vst [vmem:[#allocation90_spill] sm:$0xff] %v19061_v30  ;;  %vm19072_vm11 = vmmov %vm19071_vm4 }
 0x8b9   :  { %1550 = vadd.xlane.f32.xlu0 %v1549_v22 }
 0x8c5   :  { %1718 = vperm.xlu1 %13999, %v48_v29  }
 0x8c9   :  { %1723 = vperm.xlu1 %13999, %v49_v12  }
 0x8cd   :  { %1887 = vperm.xlu1 %13999, %v64_v51  }
 0x8cf   :  { %1728 = vperm.xlu0 %13998, %v50_v24  }
 0x8d1   :  { %2359 = vperm.xlu1 %13999, %v100_v13  }
 0x8d3   :  { %2130 = vperm.xlu0 %13998, %v88_v48  }
 0x935   :  { %v1530_v16 = vpop.xlane.xlu1 %1529 }
 0x936   :  { %14018 = vrcp.f32 %v1530_v16  ;;  %v1533_v44 = vpop.xlane.xlu0 %1532 }
 0x937   :  { %14020 = vrcp.f32 %v1533_v44 }
 0x939   :  { %v1536_v37 = vpop.xlane.xlu1 %1535 }
 0x93a   :  { %14022 = vrcp.f32 %v1536_v37 }
 0x93d   :  { %v1542_v15 = vpop.xlane.xlu1 %1541 }
 0x93e   :  { %v1539_v45 = vpop.xlane.xlu0 %1538 }
 0x93f   :  { %14024 = vrcp.f32 %v1539_v45 }
 0x940   :  { %v14019_v33 = vpop.eup %14018 }
 0x941   :  { %v14021_v4 = vpop.eup %14020  ;;  %v1560_v31 = vmul.f32 %v14019_v33, %v14003_v36  ;;  %v1548_v24 = vpop.xlane.xlu1 %1547 }
 0x942   :  { %v1561_v14 = vmul.f32 %v14021_v4, %v14005_v43  ;;  %v1545_v9 = vpop.xlane.xlu0 %1544 }
 0x943   :  { %14026 = vrcp.f32 %v1545_v9 }
 0x944   :  { %v13006_v22 = vpack.c.bf16 %v1561_v14, %v1560_v31  ;;  %14028 = vrcp.f32 %v1542_v15  ;;  %v14023_v29 = vpop.eup %14022 }
 0x945   :  { %v1562_v43 = vmul.f32 %v14023_v29, %v14007_v21  ;;  %v1719_v9 = vpop.permute.xlu1 %1718 }
 0x946   :  { %13008 = vmatpush3.bf16.xpose.msk.msra.mxu0 %vm15821_vm5, %v13006_v22  ;;  %v1551_v12 = vpop.xlane.xlu0 %1550 }
 0x947   :  { %13009 = vmatprep.subr.bf16.mxu0 %v18914_v17  ;;  %14030 = vrcp.f32 %v1551_v12 }
 0x948   :  { %14032 = vrcp.f32 %v1548_v24 }
 0x949   :  { %v14025_v36 = vpop.eup %14024 }
 0x94a   :  { %v1563_v51 = vmul.f32 %v14025_v36, %v14011_v5 }
 0x94c   :  { %v13010_v13 = vpack.c.bf16 %v1563_v51, %v1562_v43  ;;  %v1724_v43 = vpop.permute.xlu1 %1723 }
 0x94d   :  { %v14027_v48 = vpop.eup %14026 }
 0x94e   :  { %13012 = vmatpush3.bf16.xpose.msk.msra.mxu0 %vm15821_vm5, %v13010_v13  ;;  %v14029_v16 = vpop.eup %14028  ;;  %v1565_v44 = vmul.f32 %v14027_v48, %v14015_v28 }
 0x94f   :  { %13013 = vmatprep.subr.bf16.mxu0 %v18914_v17  ;;  %v1564_v37 = vmul.f32 %v14029_v16, %v14009_v53  ;;  %v1665_v53 = vstv %s9297_s0  ;;  %s9771_s0 = sld [smem:[#allocation2 + $0x18]] }
 0x951   :  { %v13014_v45 = vpack.c.bf16 %v1565_v44, %v1564_v37  ;;  %v14031_v33 = vpop.eup %14030  ;;  %v1888_v44 = vpop.permute.xlu1 %1887 }
 0x952   :  { %v14033_v21 = vpop.eup %14032  ;;  %v1567_v5 = vmul.f32 %v14031_v33, %v14017_v3  ;;  %v72_v33 = vld [vmem:[%s18379_s5 + $0x18] sm:$0xff] }
 0x953   :  { %v1566_v4 = vmul.f32 %v14033_v21, %v14013_v2  ;;  %v73_v21 = vld [vmem:[%s18379_s5 + $0x20] sm:$0xff] }
 0x955   :  { %v13018_v31 = vpack.c.bf16 %v1567_v5, %v1566_v4  ;;  %v74_v5 = vld [vmem:[%s18379_s5 + $0x28] sm:$0xff] }
 0x956   :  { %13016 = vmatpush3.bf16.xpose.msk.msra.mxu0 %vm15821_vm5, %v13014_v45 }
 0x957   :  { %13017 = vmatprep.subr.bf16.mxu0 %v18914_v17 }
 0x95e   :  { %13020 = vmatpush3.bf16.xpose.msk.msra.mxu0 %vm15821_vm5, %v13018_v31  ;;  %vm19096_vm5 = vnez %v18857_v62 }
 0x95f   :  { %11292 = vmatprep.subr.mxu0 %v18882_v38 }
 0x965   :  { %11252 = vmatmul.mubr.msk.f32.vlgmr.msra.gmra.mrb[18].mxu0 %vm19063_vm8, %v15412_v34 }
 0x966   :  { %11294 = vmatprep.mubr.msk.f32.mxu0 %vm19064_vm3, %v18882_v38 }
 0xa38   :  { %v1661_v28 = vpop.f32.mrb[18].mxu0 }
 0xa39   :  { %v1666_v14 = vmul.f32 %v1665_v53, %v1661_v28  ;;  %v11253_v15 = vpop.f32.mrb[19].mxu0 }
 0xa3b   :  { %v15842_v3 = vadd.f32 %v1666_v14, %v15412_v34  ;;  %v1729_v34 = vpop.permute.xlu0 %1728 }
 0xa3d   :  { %v15846_v2 = vrot.slane %v15842_v3, %v14937_v46 }
 0xa3f   :  { %v1735_v22 = vmul.f32 %v15846_v2, %v1719_v9  ;;  %v1737_v29 = vmul.f32 %v15846_v2, %v1729_v34  ;;  %v1736_v51 = vmul.f32 %v15846_v2, %v1724_v43  ;;  %v2131_v43 = vpop.permute.xlu0 %2130 }
 0xa41   :  { %11271 = vmatmul.mubr.msk.f32.vlgmr.msra.gmra.mrb[10].mxu1 %vm19065_vm14, %v1735_v22  ;;  %vm19074_vm14 = vmmov %vm19063_vm8 }
 0xa42   :  { %13035 = vmatpush3.bf16.msk.msra.mxu1 %vm19066_vm1, %v18918_v47  ;;  %11289 = vmatprep.mubr.msk.f32.mxu1 %vm19064_vm3, %v18882_v38 }
 0xa43   :  { %13036 = vmatprep.subr.bf16.mxu1 %v18914_v17 }
 0xa46   :  { %13038 = vmatpush3.bf16.msk.msra.mxu1 %vm19067_vm0, %v18918_v47 }
 0xa47   :  { %13039 = vmatprep.subr.bf16.mxu1 %v18914_v17 }
 0xa4a   :  { %13041 = vmatpush3.bf16.msk.msra.mxu1 %vm15699_vm13, %v18918_v47 }
 0xa4b   :  { %13042 = vmatprep.subr.bf16.mxu1 %v18914_v17 }
 0xa4e   :  { %13044 = vmatpush3.bf16.msk.msra.mxu1 %vm15721_vm10, %v18918_v47 }
 0xa4f   :  { %13045 = vmatprep.subr.bf16.mxu1 %v18914_v17 }
 0xa51   :  { %11290 = vmatmul.mubr.msk.f32.vlgmr.msra.gmra.mrb[12].mxu1 %vm19068_vm15, %v1737_v29  ;;  %vm19075_vm15 = vmmov %vm19071_vm4 }
 0xa52   :  { %13047 = vmatpush3.bf16.msk.msra.mxu1 %vm19069_vm7, %v18918_v47  ;;  %11319 = vmatprep.mubr.msk.f32.mxu1 %vm19064_vm3, %v18882_v38 }
 0xa53   :  { %13048 = vmatprep.subr.bf16.mxu1 %v18914_v17 }
 0xa56   :  { %13050 = vmatpush3.bf16.msk.msra.mxu1 %vm19070_vm12, %v18918_v47 }
 0xa57   :  { %13051 = vmatprep.subr.bf16.mxu1 %v18914_v17 }
 0xa5a   :  { %13053 = vmatpush3.bf16.msk.msra.mxu1 %vm15693_vm9, %v18918_v47 }
 0xa5b   :  { %13054 = vmatprep.subr.bf16.mxu1 %v18914_v17 }
 0xa5e   :  { %13056 = vmatpush3.bf16.msk.msra.mxu1 %vm15717_vm2, %v18918_v47 }
 0xa5f   :  { %11341 = vmatprep.subr.mxu1 %v18882_v38 }
 0xb14   :  { %v1807_v12 = vpop.f32.mrb[10].mxu1 }
 0xb15   :  { %v11272_v36 = vpop.f32.mrb[11].mxu1  ;;  %v1808_v24 = vadd.f32 %v1807_v12, %v1736_v51 }
 0xb24   :  { %v1880_v13 = vpop.f32.mrb[12].mxu1 }
 0xb25   :  { %v1884_v48 = vadd.f32 %v1880_v13, %v1808_v24  ;;  %v11291_v16 = vpop.f32.mrb[13].mxu1  ;;  %v94_v13 = vld [vmem:[%s18381_s7 + $0x4] sm:$0x7] }
 0xb27   :  { %v1890_v37 = vadd.f32 %v1888_v44, %v1884_v48 }
 0xb29   :  { %v1891_v45 = vmax.f32 %v1890_v37, 0.0 }
 0xb2b   :  { %11293 = vmatpush3.msra.mxu0 %v1891_v45  ;;  %v2360_v45 = vpop.permute.xlu1 %2359 }
 0xb2c   :  { %11295 = vmatmul.mubr.msk.f32.vlgmr.msra.gmra.mrb[20].mxu0 %vm19071_vm4, %v72_v33  ;;  %13057 = vmatprep.subr.bf16.mxu0 %v18914_v17  ;;  %vm19076_vm4 = vmmov %vm19063_vm8 }
 0xb2d   :  { %11297 = vmatprep.mubr.msk.f32.mxu0 %vm19064_vm3, %v18882_v38  ;;  %13059 = vmatpush3.bf16.msk.msra.mxu0 %vm19066_vm1, %v18918_v47 }
 0xb2e   :  { %13060 = vmatprep.subr.bf16.mxu0 %v18914_v17 }
 0xb30   :  { %11298 = vmatmul.mubr.msk.f32.gmra.mrb[22].mxu0 %vm19072_vm11, %v73_v21  ;;  %vm19077_vm11 = vmmov %vm19076_vm4 }
 0xb31   :  { %11300 = vmatprep.mubr.msk.f32.mxu0 %vm19064_vm3, %v18882_v38  ;;  %13062 = vmatpush3.bf16.msk.msra.mxu0 %vm19067_vm0, %v18918_v47 }
 0xb32   :  { %13063 = vmatprep.subr.bf16.mxu0 %v18914_v17 }
 0xb34   :  { %11301 = vmatmul.mubr.msk.f32.gmra.mrb[24].mxu0 %vm19073_vm6, %v74_v5  ;;  %vm19078_vm6 = vmmov %vm19076_vm4 }
 0xb35   :  { %13065 = vmatpush3.bf16.msk.msra.mxu0 %vm15699_vm13, %v18918_v47  ;;  %11338 = vmatprep.mubr.msk.f32.mxu0 %vm19064_vm3, %v18882_v38 }
 0xb36   :  { %13066 = vmatprep.subr.bf16.mxu0 %v18914_v17 }
 0xb39   :  { %13068 = vmatpush3.bf16.msk.msra.mxu0 %vm15721_vm10, %v18918_v47 }
 0xb3a   :  { %13069 = vmatprep.subr.bf16.mxu0 %v18914_v17 }
 0xbff   :  { %v1967_v4 = vpop.f32.mrb[20].mxu0 }
 0xc00   :  { %v11296_v31 = vpop.f32.mrb[21].mxu0  ;;  %11320 = vmatmul.mubr.msk.f32.vlgmr.msra.gmra.mrb[14].mxu1 %vm19063_vm8, %v1967_v4  ;;  %vm19079_vm8 = vnez %v18917_v52 }
 0xc01   :  { %11343 = vmatprep.mubr.msk.f32.mxu1 %vm19064_vm3, %v18882_v38  ;;  %v2365_v31 = vrot.slane %v2360_v45, %v14937_v46 }
 0xc03   :  { %v1972_v53 = vpop.f32.mrb[22].mxu0 }
 0xc04   :  { %v11299_v28 = vpop.f32.mrb[23].mxu0 }
 0xc07   :  { %v1977_v14 = vpop.f32.mrb[24].mxu0 }
 0xc08   :  { %v11302_v15 = vpop.f32.mrb[25].mxu0  ;;  %11339 = vmatmul.mubr.msk.f32.vlgmr.msra.gmra.mrb[26].mxu0 %vm19074_vm14, %v1977_v14  ;;  %vm19080_vm14 = vnez %v18920_v54 }
 0xc09   :  { %13071 = vmatpush3.bf16.msk.msra.mxu0 %vm19069_vm7, %v18918_v47  ;;  %11362 = vmatprep.mubr.msk.f32.mxu0 %vm19064_vm3, %v18882_v38  ;;  %vm19095_vm7 = vnez %v18844_v1 }
 0xc0a   :  { %13072 = vmatprep.subr.bf16.mxu0 %v18914_v17 }
 0xc0d   :  { %13074 = vmatpush3.bf16.msk.msra.mxu0 %vm19070_vm12, %v18918_v47  ;;  %vm19094_vm12 = vnez %v18830_v57 }
 0xc0e   :  { %13075 = vmatprep.subr.bf16.mxu0 %v18914_v17 }
 0xc11   :  { %13077 = vmatpush3.bf16.msk.msra.mxu0 %vm15693_vm9, %v18918_v47  ;;  %vm19091_vm9 = vnez %v18788_v32 }
 0xc12   :  { %13078 = vmatprep.subr.bf16.mxu0 %v18914_v17 }
 0xc15   :  { %13080 = vmatpush3.bf16.msk.msra.mxu0 %vm15717_vm2, %v18918_v47  ;;  %vm19090_vm2 = vnez %v18784_v26 }
 0xc16   :  { %13093 = vmatprep.subr.bf16.mxu0 %v18914_v17 }
 0xcd3   :  { %v2050_v9 = vpop.f32.mrb[14].mxu1 }
 0xcd4   :  { %v2051_v22 = vadd.f32 %v2050_v9, %v1972_v53  ;;  %v11321_v34 = vpop.f32.mrb[15].mxu1 }
 0xcdb   :  { %v2123_v29 = vpop.f32.mrb[26].mxu0 }
 0xcdc   :  { %v2127_v12 = vadd.f32 %v2123_v29, %v2051_v22  ;;  %v11340_v36 = vpop.f32.mrb[27].mxu0 }
 0xcde   :  { %v2133_v51 = vadd.f32 %v2131_v43, %v2127_v12 }
 0xce0   :  { %v2134_v24 = vmax.f32 %v2133_v51, 0.0 }
 0xce2   :  { %11342 = vmatpush3.msra.mxu1 %v2134_v24 }
 0xce3   :  { %11344 = vmatmul.mubr.msk.f32.vlgmr.msra.gmra.mrb[16].mxu1 %vm19075_vm15, %v94_v13  ;;  %13081 = vmatprep.subr.bf16.mxu1 %v18914_v17  ;;  %vm19081_vm15 = vnez %v18922_v63 }
 0xce4   :  { %13083 = vmatpush3.bf16.msk.msra.mxu1 %vm19066_vm1, %v18918_v47  ;;  %11381 = vmatprep.mubr.msk.f32.mxu1 %vm19064_vm3, %v18882_v38 }
 0xce5   :  { %13084 = vmatprep.subr.bf16.mxu1 %v18914_v17 }
 0xce8   :  { %13086 = vmatpush3.bf16.msk.msra.mxu1 %vm19067_vm0, %v18918_v47  ;;  %vm19088_vm0 = vcmask 523264  }
 0xce9   :  { %13087 = vmatprep.subr.bf16.mxu1 %v18914_v17  ;;  %vm19089_vm1 = vmmov %vm19088_vm0 }
 0xcec   :  { %13089 = vmatpush3.bf16.msk.msra.mxu1 %vm15699_vm13, %v18918_v47  ;;  %vm19086_vm13 = vnez %v18934_v6 }
 0xced   :  { %13090 = vmatprep.subr.bf16.mxu1 %v18914_v17 }
 0xcf0   :  { %13092 = vmatpush3.bf16.msk.msra.mxu1 %vm15721_vm10, %v18918_v47  ;;  %vm19085_vm10 = vnez %v18931_v59 }
 0xcf1   :  { %13105 = vmatprep.subr.bf16.mxu1 %v18914_v17 }
 0xdb6   :  { %v2204_v48 = vpop.f32.mrb[16].mxu1 }
 0xdb7   :  { %v2283_v16 = vrot.slane %v2204_v48, 2  ;;  %v11345_v44 = vpop.f32.mrb[17].mxu1  ;;  %11363 = vmatmul.mubr.msk.f32.vlgmr.msra.gmra.mrb[28].mxu0 %vm19076_vm4, %v2204_v48  ;;  %v2209_v37 = vrot.slane %v2204_v48, 1  ;;  %vm19082_vm4 = vnez %v18925_v0 }
 0xdb8   :  { %13095 = vmatpush3.bf16.msra.mxu0 %v15536_v20  ;;  %11400 = vmatprep.mubr.msk.f32.mxu0 %vm19064_vm3, %v18882_v38  ;;  %v2691_v44 = vstv %s9417_s14 }
 0xdb9   :  { %11382 = vmatmul.mubr.msk.f32.vlgmr.msra.gmra.mrb[18].mxu1 %vm19077_vm11, %v2283_v16  ;;  %13096 = vmatprep.subr.bf16.mxu0 %v18914_v17  ;;  %vm19083_vm11 = vmmov %vm19078_vm6 }
 0xdba   :  { %13107 = vmatpush3.bf16.msra.mxu1 %v15536_v20  ;;  %11419 = vmatprep.mubr.msk.f32.mxu1 %vm19064_vm3, %v18882_v38 }
 0xdbb   :  { %13108 = vmatprep.subr.bf16.mxu1 %v18914_v17 }
 0xdbc   :  { %13098 = vmatpush3.bf16.msra.mxu0 %v15607_v55 }
 0xdbd   :  { %13099 = vmatprep.subr.bf16.mxu0 %v18914_v17 }
 0xdbe   :  { %13110 = vmatpush3.bf16.msra.mxu1 %v15607_v55 }
 0xdbf   :  { %13111 = vmatprep.subr.bf16.mxu1 %v18914_v17 }
 0xdc0   :  { %13101 = vmatpush3.bf16.msra.mxu0 %v15654_v58 }
 0xdc1   :  { %13102 = vmatprep.subr.bf16.mxu0 %v18914_v17 }
 0xdc2   :  { %13113 = vmatpush3.bf16.msra.mxu1 %v15654_v58 }
 0xdc3   :  { %13114 = vmatprep.subr.bf16.mxu1 %v18914_v17 }
 0xdc4   :  { %13104 = vmatpush3.bf16.msra.mxu0 %v15679_v7 }
 0xdc5   :  { %13117 = vmatprep.subr.bf16.mxu0 %v18914_v17 }
 0xdc6   :  { %13116 = vmatpush3.bf16.msra.mxu1 %v15679_v7 }
 0xdc7   :  { %13129 = vmatprep.subr.bf16.mxu1 %v18914_v17 }
 0xe8a   :  { %v2279_v33 = vpop.f32.mrb[28].mxu0 }
 0xe8b   :  { %v2280_v21 = vadd.f32 %v2279_v33, %v2209_v37  ;;  %v11364_v5 = vpop.f32.mrb[29].mxu0 }
 0xe8c   :  { %v2352_v4 = vpop.f32.mrb[18].mxu1 }
 0xe8d   :  { %v2356_v53 = vadd.f32 %v2352_v4, %v2280_v21  ;;  %v11383_v28 = vpop.f32.mrb[19].mxu1  ;;  %v2693_v21 = vstv %s9418_s15  ;;  %s9558_s15 = sld [smem:[#allocation2 + $0x8]] }
 0xe8f   :  { %v2366_v14 = vadd.f32 %v2365_v31, %v2356_v53 }
 0xe91   :  { %v2367_v15 = vadd.f32 %v2366_v14, %v15842_v3 }
 0xe93   :  { %11401 = vmatmul.mubr.msk.f32.vlgmr.msra.gmra.mrb[30].mxu0 %vm19078_vm6, %v2367_v15  ;;  %vm19084_vm6 = vnez %v18928_v60 }
 0xe94   :  { %13119 = vmatpush3.bf16.msk.msra.mxu0 %vm19079_vm8, %v18918_v47  ;;  %11438 = vmatprep.mubr.msk.f32.mxu0 %vm19064_vm3, %v18882_v38 }
 0xe95   :  { %13120 = vmatprep.subr.bf16.mxu0 %v18914_v17 }
 0xe98   :  { %13122 = vmatpush3.bf16.msk.msra.mxu0 %vm19080_vm14, %v18918_v47 }
 0xe99   :  { %13123 = vmatprep.subr.bf16.mxu0 %v18914_v17 }
 0xe9c   :  { %13125 = vmatpush3.bf16.msk.msra.mxu0 %vm19081_vm15, %v18918_v47 }
 0xe9d   :  { %13126 = vmatprep.subr.bf16.mxu0 %v18914_v17 }
 0xea0   :  { %13128 = vmatpush3.bf16.msk.msra.mxu0 %vm19082_vm4, %v18918_v47 }
 0xea1   :  { %13141 = vmatprep.subr.bf16.mxu0 %v18914_v17 }
 0xf66   :  { %v2461_v9 = vpop.f32.mrb[30].mxu0 }
 0xf67   :  { %v2465_v22 = vsub.f32 %v2367_v15, %v2461_v9  ;;  %v11402_v34 = vpop.f32.mrb[31].mxu0 }
 0xf69   :  { %v2466_v29 = vmul.f32 %v2465_v22, %v2465_v22 }
 0xf6b   :  { %11420 = vmatmul.mubr.msk.f32.vlgmr.msra.gmra.mrb[20].mxu1 %vm19083_vm11, %v2466_v29  ;;  %vm19087_vm11 = vnez %v18937_v39 }
 0xf6c   :  { %13131 = vmatpush3.bf16.msk.msra.mxu1 %vm19084_vm6, %v18918_v47  ;;  %11457 = vmatprep.mubr.msk.f32.mxu1 %vm19064_vm3, %v18882_v38 }
 0xf6d   :  { %13132 = vmatprep.subr.bf16.mxu1 %v18914_v17 }
 0xf70   :  { %13134 = vmatpush3.bf16.msk.msra.mxu1 %vm19085_vm10, %v18918_v47 }
 0xf71   :  { %13135 = vmatprep.subr.bf16.mxu1 %v18914_v17 }
 0xf74   :  { %13137 = vmatpush3.bf16.msk.msra.mxu1 %vm19086_vm13, %v18918_v47  ;;  %vm18672_vm13 = vcmask 261120  }
 0xf75   :  { %13138 = vmatprep.subr.bf16.mxu1 %v18914_v17 }
 0xf78   :  { %13140 = vmatpush3.bf16.msk.msra.mxu1 %vm19087_vm11, %v18918_v47  ;;  %vm19097_vm11 = vnez %v18869_v10 }
 0xf79   :  { %13149 = vmatprep.subr.bf16.mxu1 %v18914_v17 }
0x103e   :  { %v2536_v12 = vpop.f32.mrb[20].mxu1 }
0x103f   :  { %v2537_v36 = vadd.f32 1e-05, %v2536_v12  ;;  %v11421_v43 = vpop.f32.mrb[21].mxu1  ;;  %v2726_v12 = vshra.s32 %v14439_v8, 4 }
0x1041   :  { %14034 = vrsqrt.f32 %v2537_v36  ;;  %v19099_v36 = vld [vmem:[#allocation6_spill] sm:$0xff] }
0x1042   :  { %v16083_v43 = vshra.s32 %v19099_v36, 4 }
0x1044   :  { %19100 = vst [vmem:[#allocation92_spill] sm:$0xff] %v16083_v43  ;;  %vm16087_vm10 = vcmp.eq.s32.totalorder %v2726_v12, %v16083_v43 }
0x104b   :  { %v14035_v51 = vpop.eup %14034 }
0x104c   :  { %v2541_v24 = vmul.f32 %v14035_v51, %v2465_v22  ;;  %v19101_v51 = vld [vmem:[#allocation5_spill] sm:$0xff] }
0x104e   :  { %v2542_v13 = vmax.f32 %v2541_v24, 0.0  ;;  %v2725_v24 = vshra.s32 %v19101_v51, 4 }
0x1050   :  { %11439 = vmatmul.mubr.msk.f32.vlgmr.msra.gmra.mrb[32].mxu0 %vm19088_vm0, %v2542_v13  ;;  %11458 = vmatmul.mubr.msk.f32.vlgmr.msra.gmra.mrb[22].mxu1 %vm19089_vm1, %v2542_v13  ;;  %vm19092_vm1 = vnez %v18802_v41  ;;  %vm19093_vm0 = vnez %v18816_v49  ;;  %v19102_v13 = vmov 0  ;;  %vm16092_vm6 = vcmp.eq.s32.totalorder %v2725_v24, %v16083_v43  ;;  %v19206_v41 = vld [vmem:[#allocation86_spill] sm:$0xff] }
0x1051   :  { %13151 = vmatpush3.bf16.msk.msra.mxu1 %vm19090_vm2, %v18918_v47  ;;  %11503 = vmatprep.mubr.msk.f32.mxu1 %vm19064_vm3, %v18882_v38  ;;  %v19103_v13 = vsel %vm16087_vm10, 4294967295, %v19102_v13 }
0x1052   :  { %13152 = vmatprep.subr.bf16.mxu1 %v18914_v17  ;;  %11468 = vmatprep.mubr.msk.f32.mxu0 %vm19064_vm3, %v18882_v38  ;;  %19104 = vst [vmem:[#allocation93_spill] sm:$0xff] %v19103_v13 }
0x1055   :  { %13154 = vmatpush3.bf16.msk.msra.mxu1 %vm19091_vm9, %v18918_v47 }
0x1056   :  { %13155 = vmatprep.subr.bf16.mxu1 %v18914_v17 }
0x1059   :  { %13157 = vmatpush3.bf16.msk.msra.mxu1 %vm19092_vm1, %v18918_v47 }
0x105a   :  { %13158 = vmatprep.subr.bf16.mxu1 %v18914_v17 }
0x105d   :  { %13160 = vmatpush3.bf16.msk.msra.mxu1 %vm19093_vm0, %v18918_v47 }
0x105e   :  { %13161 = vmatprep.subr.bf16.mxu1 %v18914_v17 }
0x1061   :  { %13163 = vmatpush3.bf16.msk.msra.mxu1 %vm19094_vm12, %v18918_v47 }
0x1062   :  { %13164 = vmatprep.subr.bf16.mxu1 %v18914_v17 }
0x1065   :  { %13166 = vmatpush3.bf16.msk.msra.mxu1 %vm19095_vm7, %v18918_v47 }
0x1066   :  { %13167 = vmatprep.subr.bf16.mxu1 %v18914_v17 }
0x1069   :  { %13169 = vmatpush3.bf16.msk.msra.mxu1 %vm19096_vm5, %v18918_v47 }
0x106a   :  { %13170 = vmatprep.subr.bf16.mxu1 %v18914_v17 }
0x106d   :  { %13172 = vmatpush3.bf16.msk.msra.mxu1 %vm19097_vm11, %v18918_v47 }
0x106e   :  { %11541 = vmatprep.subr.mxu1 %v18882_v38 }
0x1123   :  { %v2612_v48 = vpop.f32.mrb[32].mxu0  ;;  %v2682_v16 = vpop.f32.mrb[22].mxu1 }
0x1124   :  { %v2686_v37 = vmax.f32 %v2612_v48, %v2682_v16  ;;  %v11440_v45 = vpop.f32.mrb[33].mxu0  ;;  %v11459_v33 = vpop.f32.mrb[23].mxu1  ;;  %v19105_v48 = vmov 0  ;;  %v19108_v16 = vld [vmem:[#allocation9_spill] sm:$0xff] }
0x1125   :  { %v19106_v48 = vsel %vm16092_vm6, 4294967295, %v19105_v48 }
0x1126   :  { %v2692_v5 = vmul.f32 %v2691_v44, %v2686_v37  ;;  %19107 = vst [vmem:[#allocation94_spill] sm:$0xff] %v19106_v48  ;;  %v2727_v44 = vshra.s32 %v19108_v16, 4  ;;  %v2720_v37 = vstv %s9419_s2  ;;  %v19119_v16 = vmov 0  ;;  %s9559_s2 = sld [smem:[#allocation2 + $0x9]] }
0x1128   :  { %v16069_v4 = vadd.f32 %v2693_v21, %v2692_v5 }
0x112a   :  { %19098 = vst [vmem:[#allocation91_spill] sm:$0xff] %v16069_v4  ;;  %v2698_v31 = vrot.slane %v16069_v4, %v14937_v46 }
0x112c   :  { %v2700_v53 = vmul.f32 %v15419_v42, %v2698_v31  ;;  %v2699_v28 = vmul.f32 %v15422_v50, %v2698_v31  ;;  %v2701_v9 = vmul.f32 %v15432_v56, %v2698_v31  ;;  %v2702_v34 = vmul.f32 %v15452_v35, %v2698_v31 }
0x112e   :  { %v2707_v14 = vsel %vm18672_vm13, %v2700_v53, 0.0  ;;  %v2704_v15 = vsel %vm18672_vm13, %v2699_v28, 0.0  ;;  %v2710_v22 = vsel %vm18672_vm13, %v2701_v9, 0.0  ;;  %v2713_v29 = vsel %vm18672_vm13, %v2702_v34, 0.0  ;;  %v19115_v34 = vld [vmem:[#allocation10_spill] sm:$0xff] }
0x112f   :  { %2708 = vadd.xlane.f32.xlu1 %v2707_v14  ;;  %2705 = vadd.xlane.f32.xlu0 %v2704_v15  ;;  %v19109_v53 = vmov -1e+30   ;;  %vm16108_vm13 = vcmp.eq.s32.totalorder %v2727_v44, %v16083_v43 }
0x1130   :  { %v16100_v28 = vsel %vm16087_vm10, 0.0, %v19109_v53  ;;  %v16105_v14 = vsel %vm16092_vm6, 0.0, %v19109_v53  ;;  %v16118_v36 = vsel %vm16108_vm13, 0.0, %v19109_v53  ;;  %vm19117_vm10 = vcmask 261120  }
0x1131   :  { %19110 = vst [vmem:[#allocation95_spill] sm:$0xff] %v16100_v28  ;;  %19111 = vst [vmem:[#allocation96_spill] sm:$0xff] %v16105_v14 }
0x1132   :  { %19116 = vst [vmem:[#allocation98_spill] sm:$0xff] %v16118_v36  ;;  %vm19118_vm6 = vmmov %vm19117_vm10 }
0x1133   :  { %2711 = vadd.xlane.f32.xlu0 %v2710_v22  ;;  %v19112_v22 = vmov 0 }
0x1134   :  { %v19113_v22 = vsel %vm16108_vm13, 4294967295, %v19112_v22 }
0x1135   :  { %19114 = vst [vmem:[#allocation97_spill] sm:$0xff] %v19113_v22 }
0x1137   :  { %2714 = vadd.xlane.f32.xlu0 %v2713_v29  ;;  %v2728_v29 = vshra.s32 %v19115_v34, 4 }
0x1139   :  { %vm16123_vm4 = vcmp.eq.s32.totalorder %v2728_v29, %v16083_v43 }
0x113a   :  { %v19120_v16 = vsel %vm16123_vm4, 4294967295, %v19119_v16  ;;  %v16131_v34 = vsel %vm16123_vm4, 0.0, %v19109_v53  ;;  %vm19125_vm4 = vmmov %vm19118_vm6 }
0x113b   :  { %19121 = vst [vmem:[#allocation99_spill] sm:$0xff] %v19120_v16  ;;  %19122 = vst [vmem:[#allocation100_spill] sm:$0xff] %v16131_v34 }
0x113c   :  { %vm19126_vm13 = vmmov %vm19125_vm4 }
0x11bc   :  { %v2709_v45 = vpop.xlane.xlu1 %2708  ;;  %v2706_v33 = vpop.xlane.xlu0 %2705 }
0x11bd   :  { %v2717_v21 = vmul.f32 %v2709_v45, %v2698_v31  ;;  %v2716_v5 = vmul.f32 %v2706_v33, %v2698_v31 }
0x11bf   :  { %v2722_v15 = vmul.f32 %v2720_v37, %v2717_v21  ;;  %v2721_v9 = vmul.f32 %v2720_v37, %v2716_v5 }
0x11c0   :  { %v2712_v12 = vpop.xlane.xlu0 %2711 }
0x11c1   :  { %v2718_v24 = vmul.f32 %v2712_v12, %v2698_v31  ;;  %v2739_v45 = vadd.f32 %v16100_v28, %v2722_v15  ;;  %v2738_v33 = vadd.f32 %v16105_v14, %v2721_v9  ;;  %v75_v14 = vld [vmem:[%s18379_s5 + $0x30] sm:$0xff] }
0x11c3   :  { %v2723_v21 = vmul.f32 %v2720_v37, %v2718_v24  ;;  %v2745_v5 = vsel %vm19117_vm10, %v2739_v45, -inf  ;;  %v2742_v44 = vsel %vm19118_vm6, %v2738_v33, -inf  ;;  %vm19123_vm10 = vmmov %vm19118_vm6 }
0x11c4   :  { %2746 = vmax.xlane.f32.xlu0 %v2745_v5  ;;  %2743 = vmax.xlane.f32.xlu1 %v2742_v44  ;;  %v2715_v15 = vpop.xlane.xlu0 %2714 }
0x11c5   :  { %v2719_v12 = vmul.f32 %v2715_v15, %v2698_v31  ;;  %v2740_v9 = vadd.f32 %v16118_v36, %v2723_v21 }
0x11c7   :  { %v2724_v24 = vmul.f32 %v2720_v37, %v2719_v12  ;;  %v2748_v22 = vsel %vm19123_vm10, %v2740_v9, -inf  ;;  %vm19124_vm10 = vmmov %vm19118_vm6 }
0x11c8   :  { %2749 = vmax.xlane.f32.xlu1 %v2748_v22 }
0x11c9   :  { %v2741_v29 = vadd.f32 %v16131_v34, %v2724_v24 }
0x11cb   :  { %v2751_v43 = vsel %vm19118_vm6, %v2741_v29, -inf }
0x11cc   :  { %2752 = vmax.xlane.f32.xlu0 %v2751_v43 }
0x1251   :  { %v2744_v5 = vpop.xlane.xlu1 %2743  ;;  %v2747_v44 = vpop.xlane.xlu0 %2746 }
0x1252   :  { %v2754_v8 = vsub.f32 %v2738_v33, %v2744_v5  ;;  %v2755_v31 = vsub.f32 %v2739_v45, %v2747_v44  ;;  %v53_v5 = vld [vmem:[%s18377_s3 + $0x40] sm:$0xff] }
0x1253   :  { %v101_v44 = vld [vmem:[%s18382_s8 + $0x2] sm:$0x1] }
0x1254   :  { %v2758_v15 = vmul.f32 1.442695, %v2754_v8  ;;  %v2760_v21 = vmul.f32 1.442695, %v2755_v31  ;;  %v89_v31 = vld [vmem:[%s18380_s6 + $0x10] sm:$0xff] }
0x1255   :  { %v2750_v13 = vpop.xlane.xlu1 %2749 }
0x1256   :  { %14036 = vpow2.f32 %v2758_v15  ;;  %v2756_v16 = vsub.f32 %v2740_v9, %v2750_v13  ;;  %v52_v9 = vld [vmem:[%s18377_s3 + $0x38] sm:$0xff] }
0x1257   :  { %14038 = vpow2.f32 %v2760_v21 }
0x1258   :  { %v2762_v53 = vmul.f32 1.442695, %v2756_v16 }
0x1259   :  { %v2753_v37 = vpop.xlane.xlu0 %2752 }
0x125a   :  { %14040 = vpow2.f32 %v2762_v53  ;;  %v2757_v12 = vsub.f32 %v2741_v29, %v2753_v37  ;;  %v51_v53 = vld [vmem:[%s18377_s3 + $0x30] sm:$0xff]  ;;  %v16161_v37 = vld [vmem:[%s18375_s1] sm:$0x1]  ;;  %s9774_s1 = sld [smem:[#allocation2 + $0x1b]] }
0x125b   :  { %v65_v29 = vld [vmem:[%s18378_s4 + $0x10] sm:$0xff] }
0x125c   :  { %v2764_v22 = vmul.f32 1.442695, %v2757_v12 }
0x125e   :  { %14042 = vpow2.f32 %v2764_v22  ;;  %v2893_v22 = vrot.slane %v16161_v37, %v14937_v46 }
0x1260   :  { %v14037_v24 = vpop.eup %14036 }
0x1261   :  { %v14039_v51 = vpop.eup %14038  ;;  %v2766_v43 = vsel %vm19124_vm10, %v14037_v24, 0.0  ;;  %vm19131_vm10 = vmmov %vm19118_vm6 }
0x1262   :  { %2767 = vadd.xlane.f32.xlu1 %v2766_v43  ;;  %v2769_v33 = vsel %vm19118_vm6, %v14039_v51, 0.0 }
0x1263   :  { %2770 = vadd.xlane.f32.xlu0 %v2769_v33 }
0x1264   :  { %v14041_v8 = vpop.eup %14040 }
0x1265   :  { %v2772_v45 = vsel %vm19125_vm4, %v14041_v8, 0.0 }
0x1266   :  { %2773 = vadd.xlane.f32.xlu1 %v2772_v45 }
0x1268   :  { %v14043_v13 = vpop.eup %14042 }
0x1269   :  { %v2775_v16 = vsel %vm19126_vm13, %v14043_v13, 0.0  ;;  %vm19127_vm13 = vmmov %vm19125_vm4 }
0x126a   :  { %2776 = vadd.xlane.f32.xlu0 %v2775_v16  ;;  %vm16169_vm4 = vmpackc.low %vm19127_vm13, %vm19127_vm13 }
0x1277   :  { %2876 = vperm.xlu1 %13999, %v51_v53  }
0x127b   :  { %2881 = vperm.xlu1 %13999, %v52_v9  }
0x127f   :  { %3041 = vperm.xlu1 %13999, %v65_v29  }
0x1280   :  { %2886 = vperm.xlu0 %13998, %v53_v5   ;;  %v19128_v5 = vmov 0 }
0x1281   :  { %v19129_v5 = vsel %vm16169_vm4, 4294967295, %v19128_v5 }
0x1282   :  { %19130 = vst [vmem:[#allocation101_spill] sm:$0xff] %v19129_v5 }
0x1283   :  { %3504 = vperm.xlu1 %13999, %v101_v44  }
0x1284   :  { %3278 = vperm.xlu0 %13998, %v89_v31  }
0x12ef   :  { %v2768_v15 = vpop.xlane.xlu1 %2767 }
0x12f0   :  { %14044 = vrcp.f32 %v2768_v15  ;;  %v2771_v21 = vpop.xlane.xlu0 %2770 }
0x12f1   :  { %14046 = vrcp.f32 %v2771_v21 }
0x12f3   :  { %v2774_v12 = vpop.xlane.xlu1 %2773 }
0x12f4   :  { %14048 = vrcp.f32 %v2774_v12 }
0x12f7   :  { %v2877_v43 = vpop.permute.xlu1 %2876  ;;  %v2777_v33 = vpop.xlane.xlu0 %2776 }
0x12f8   :  { %v2895_v45 = vmul.f32 %v2893_v22, %v2877_v43  ;;  %14050 = vrcp.f32 %v2777_v33  ;;  %v19138_v43 = vld [vmem:[#allocation42_spill] sm:$0xff]  ;;  %v19140_v33 = vld [vmem:[#allocation48_spill] sm:$0xff] }
0x12f9   :  { %vm19141_vm15 = vnez %v19140_v33 }
0x12fa   :  { %v14045_v16 = vpop.eup %14044  ;;  %11504 = vmatmul.mubr.f32.vlgmr.msra.gmra.mrb[24].mxu1 %v2895_v45  ;;  %v19142_v45 = vld [vmem:[#allocation52_spill] sm:$0xff] }
0x12fb   :  { %v14047_v53 = vpop.eup %14046  ;;  %v2782_v9 = vmul.f32 %v14045_v16, %v14037_v24  ;;  %11543 = vmatprep.mubr.msk.f32.mxu1 %vm19064_vm3, %v18882_v38  ;;  %vm19143_vm14 = vnez %v19142_v45  ;;  %v19144_v16 = vld [vmem:[#allocation54_spill] sm:$0xff] }
0x12fc   :  { %v2783_v29 = vmul.f32 %v14047_v53, %v14039_v51  ;;  %v19132_v51 = vld [vmem:[#allocation24_spill] sm:$0xff]  ;;  %vm19145_vm8 = vnez %v19144_v16 }
0x12fd   :  { %vm19133_vm6 = vnez %v19132_v51 }
0x12fe   :  { %v13142_v44 = vpack.c.bf16 %v2783_v29, %v2782_v9  ;;  %v14049_v31 = vpop.eup %14048  ;;  %v19146_v9 = vld [vmem:[#allocation55_spill] sm:$0xff] }
0x12ff   :  { %v2784_v21 = vmul.f32 %v14049_v31, %v14041_v8  ;;  %v19134_v8 = vld [vmem:[#allocation30_spill] sm:$0xff]  ;;  %v2887_v53 = vpop.permute.xlu0 %2886  ;;  %vm19147_vm11 = vnez %v19146_v9 }
0x1300   :  { %13144 = vmatpush3.bf16.xpose.msk.msra.mxu0 %vm16169_vm4, %v13142_v44  ;;  %vm19135_vm13 = vnez %v19134_v8  ;;  %v2897_v29 = vmul.f32 %v2893_v22, %v2887_v53  ;;  %v2882_v44 = vpop.permute.xlu1 %2881 }
0x1301   :  { %13145 = vmatprep.subr.bf16.mxu0 %v18914_v17  ;;  %v2896_v31 = vmul.f32 %v2893_v22, %v2882_v44  ;;  %v76_v22 = vld [vmem:[%s18379_s5 + $0x38] sm:$0xff] }
0x1302   :  { %v14051_v15 = vpop.eup %14050 }
0x1303   :  { %v2785_v24 = vmul.f32 %v14051_v15, %v14043_v13  ;;  %v19136_v13 = vld [vmem:[#allocation36_spill] sm:$0xff] }
0x1304   :  { %v3042_v5 = vpop.permute.xlu1 %3041 }
0x1305   :  { %v13146_v12 = vpack.c.bf16 %v2785_v24, %v2784_v21 }
0x1308   :  { %13148 = vmatpush3.bf16.xpose.msk.msra.mxu0 %vm16169_vm4, %v13146_v12  ;;  %vm19137_vm4 = vnez %v19136_v13 }
0x1309   :  { %13173 = vmatprep.subr.bf16.mxu0 %v18914_v17 }
0x130f   :  { %11469 = vmatmul.mubr.msk.f32.vlgmr.msra.gmra.mrb[34].mxu0 %vm19131_vm10, %v16069_v4  ;;  %vm19139_vm10 = vnez %v19138_v43 }
0x1310   :  { %13175 = vmatpush3.bf16.msk.msra.mxu0 %vm19133_vm6, %v18918_v47  ;;  %11538 = vmatprep.mubr.msk.f32.mxu0 %vm19064_vm3, %v18882_v38 }
0x1311   :  { %13176 = vmatprep.subr.bf16.mxu0 %v18914_v17 }
0x1314   :  { %13178 = vmatpush3.bf16.msk.msra.mxu0 %vm19135_vm13, %v18918_v47 }
0x1315   :  { %13179 = vmatprep.subr.bf16.mxu0 %v18914_v17 }
0x1318   :  { %13181 = vmatpush3.bf16.msk.msra.mxu0 %vm19137_vm4, %v18918_v47 }
0x1319   :  { %13182 = vmatprep.subr.bf16.mxu0 %v18914_v17 }
0x131c   :  { %13184 = vmatpush3.bf16.msk.msra.mxu0 %vm19139_vm10, %v18918_v47 }
0x131d   :  { %13185 = vmatprep.subr.bf16.mxu0 %v18914_v17 }
0x1320   :  { %13187 = vmatpush3.bf16.msk.msra.mxu0 %vm19141_vm15, %v18918_v47 }
0x1321   :  { %13188 = vmatprep.subr.bf16.mxu0 %v18914_v17 }
0x1324   :  { %13190 = vmatpush3.bf16.msk.msra.mxu0 %vm19143_vm14, %v18918_v47 }
0x1325   :  { %13191 = vmatprep.subr.bf16.mxu0 %v18914_v17 }
0x1328   :  { %13193 = vmatpush3.bf16.msk.msra.mxu0 %vm19145_vm8, %v18918_v47 }
0x1329   :  { %13194 = vmatprep.subr.bf16.mxu0 %v18914_v17 }
0x132c   :  { %13196 = vmatpush3.bf16.msk.msra.mxu0 %vm19147_vm11, %v18918_v47 }
0x132d   :  { %13221 = vmatprep.subr.bf16.mxu0 %v18914_v17 }
0x132f   :  { %11539 = vmatmul.mubr.f32.vlgmr.msra.gmra.mrb[36].mxu0 %v2897_v29 }
0x1330   :  { %13223 = vmatpush3.bf16.msk.msra.mxu0 %vm19133_vm6, %v18918_v47  ;;  %11619 = vmatprep.mubr.msk.f32.mxu0 %vm19064_vm3, %v18882_v38 }
0x1331   :  { %13224 = vmatprep.subr.bf16.mxu0 %v18914_v17 }
0x1334   :  { %13226 = vmatpush3.bf16.msk.msra.mxu0 %vm19135_vm13, %v18918_v47 }
0x1335   :  { %13227 = vmatprep.subr.bf16.mxu0 %v18914_v17 }
0x1338   :  { %13229 = vmatpush3.bf16.msk.msra.mxu0 %vm19137_vm4, %v18918_v47 }
0x1339   :  { %13230 = vmatprep.subr.bf16.mxu0 %v18914_v17 }
0x133c   :  { %13232 = vmatpush3.bf16.msk.msra.mxu0 %vm19139_vm10, %v18918_v47 }
0x133d   :  { %13233 = vmatprep.subr.bf16.mxu0 %v18914_v17 }
0x1340   :  { %13235 = vmatpush3.bf16.msk.msra.mxu0 %vm19141_vm15, %v18918_v47 }
0x1341   :  { %13236 = vmatprep.subr.bf16.mxu0 %v18914_v17 }
0x1344   :  { %13238 = vmatpush3.bf16.msk.msra.mxu0 %vm19143_vm14, %v18918_v47 }
0x1345   :  { %13239 = vmatprep.subr.bf16.mxu0 %v18914_v17 }
0x1348   :  { %13241 = vmatpush3.bf16.msk.msra.mxu0 %vm19145_vm8, %v18918_v47 }
0x1349   :  { %13242 = vmatprep.subr.bf16.mxu0 %v18914_v17 }
0x134c   :  { %13244 = vmatpush3.bf16.msk.msra.mxu0 %vm19147_vm11, %v18918_v47  ;;  %vm19149_vm11 = vcmask 64512  }
0x134d   :  { %13269 = vmatprep.subr.bf16.mxu0 %v18914_v17  ;;  %vm19150_vm8 = vmmov %vm19149_vm11 }
0x13cd   :  { %v2964_v15 = vpop.f32.mrb[24].mxu1 }
0x13ce   :  { %v2965_v21 = vadd.f32 %v2964_v15, %v2896_v31  ;;  %v11505_v24 = vpop.f32.mrb[25].mxu1 }
0x13e2   :  { %v16249_v12 = vpop.f32.mrb[34].mxu0 }
0x13e3   :  { %19148 = vst [vmem:[#allocation102_spill] sm:$0xff] %v16249_v12  ;;  %v11470_v53 = vpop.f32.mrb[35].mxu0 }
0x1402   :  { %v3034_v29 = vpop.f32.mrb[36].mxu0 }
0x1403   :  { %v3038_v48 = vadd.f32 %v3034_v29, %v2965_v21  ;;  %v11540_v4 = vpop.f32.mrb[37].mxu0 }
0x1404   :  { %v77_v4 = vld [vmem:[%s18379_s5 + $0x40] sm:$0xff] }
0x1405   :  { %v3044_v34 = vadd.f32 %v3042_v5, %v3038_v48 }
0x1407   :  { %v3045_v36 = vmax.f32 %v3044_v34, 0.0 }
0x1409   :  { %11542 = vmatpush3.msra.mxu1 %v3045_v36 }
0x140a   :  { %11544 = vmatmul.mubr.msk.f32.vlgmr.msra.gmra.mrb[26].mxu1 %vm19149_vm11, %v75_v14  ;;  %13197 = vmatprep.subr.bf16.mxu1 %v18914_v17  ;;  %vm19151_vm11 = vmmov %vm19150_vm8 }
0x140b   :  { %11546 = vmatprep.mubr.msk.f32.mxu1 %vm19064_vm3, %v18882_v38  ;;  %13199 = vmatpush3.bf16.msk.msra.mxu1 %vm19090_vm2, %v18918_v47 }
0x140c   :  { %13200 = vmatprep.subr.bf16.mxu1 %v18914_v17 }
0x140e   :  { %11547 = vmatmul.mubr.msk.f32.gmra.mrb[28].mxu1 %vm19150_vm8, %v76_v22  ;;  %vm19152_vm8 = vnez %v18869_v10  ;;  %v3279_v22 = vpop.permute.xlu0 %3278 }
0x140f   :  { %11549 = vmatprep.mubr.msk.f32.mxu1 %vm19064_vm3, %v18882_v38  ;;  %13202 = vmatpush3.bf16.msk.msra.mxu1 %vm19091_vm9, %v18918_v47 }
0x1410   :  { %13203 = vmatprep.subr.bf16.mxu1 %v18914_v17 }
0x1412   :  { %11550 = vmatmul.mubr.msk.f32.gmra.mrb[30].mxu1 %vm19151_vm11, %v77_v4  ;;  %vm19153_vm11 = vnez %v19144_v16 }
0x1413   :  { %13205 = vmatpush3.bf16.msk.msra.mxu1 %vm19092_vm1, %v18918_v47  ;;  %11584 = vmatprep.mubr.msk.f32.mxu1 %vm19064_vm3, %v18882_v38 }
0x1414   :  { %13206 = vmatprep.subr.bf16.mxu1 %v18914_v17 }
0x1417   :  { %13208 = vmatpush3.bf16.msk.msra.mxu1 %vm19093_vm0, %v18918_v47 }
0x1418   :  { %13209 = vmatprep.subr.bf16.mxu1 %v18914_v17 }
0x141b   :  { %13211 = vmatpush3.bf16.msk.msra.mxu1 %vm19094_vm12, %v18918_v47 }
0x141c   :  { %13212 = vmatprep.subr.bf16.mxu1 %v18914_v17 }
0x141f   :  { %13214 = vmatpush3.bf16.msk.msra.mxu1 %vm19095_vm7, %v18918_v47 }
0x1420   :  { %13215 = vmatprep.subr.bf16.mxu1 %v18914_v17 }
0x1423   :  { %13217 = vmatpush3.bf16.msk.msra.mxu1 %vm19096_vm5, %v18918_v47 }
0x1424   :  { %13218 = vmatprep.subr.bf16.mxu1 %v18914_v17 }
0x1427   :  { %13220 = vmatpush3.bf16.msk.msra.mxu1 %vm19152_vm8, %v18918_v47 }
0x1428   :  { %11622 = vmatprep.subr.mxu1 %v18882_v38 }
0x14dd   :  { %v3121_v36 = vpop.f32.mrb[26].mxu1 }
0x14de   :  { %v11545_v48 = vpop.f32.mrb[27].mxu1  ;;  %11585 = vmatmul.mubr.f32.vlgmr.msra.gmra.mrb[32].mxu1 %v3121_v36 }
0x14df   :  { %11624 = vmatprep.mubr.msk.f32.mxu1 %vm19064_vm3, %v18882_v38  ;;  %v95_v48 = vld [vmem:[%s18381_s7 + $0x8] sm:$0x7] }
0x14e1   :  { %v3126_v14 = vpop.f32.mrb[28].mxu1 }
0x14e2   :  { %v11548_v34 = vpop.f32.mrb[29].mxu1 }
0x14e5   :  { %v3131_v5 = vpop.f32.mrb[30].mxu1 }
0x14e6   :  { %v11551_v44 = vpop.f32.mrb[31].mxu1  ;;  %11620 = vmatmul.mubr.f32.vlgmr.msra.gmra.mrb[38].mxu0 %v3131_v5 }
0x14e7   :  { %13271 = vmatpush3.bf16.msk.msra.mxu0 %vm19133_vm6, %v18918_v47  ;;  %11694 = vmatprep.mubr.msk.f32.mxu0 %vm19064_vm3, %v18882_v38  ;;  %v19156_v44 = vld [vmem:[#allocation56_spill] sm:$0xff] }
0x14e8   :  { %13272 = vmatprep.subr.bf16.mxu0 %v18914_v17 }
0x14eb   :  { %13274 = vmatpush3.bf16.msk.msra.mxu0 %vm19135_vm13, %v18918_v47 }
0x14ec   :  { %13275 = vmatprep.subr.bf16.mxu0 %v18914_v17 }
0x14ef   :  { %13277 = vmatpush3.bf16.msk.msra.mxu0 %vm19137_vm4, %v18918_v47 }
0x14f0   :  { %13278 = vmatprep.subr.bf16.mxu0 %v18914_v17 }
0x14f3   :  { %13280 = vmatpush3.bf16.msk.msra.mxu0 %vm19139_vm10, %v18918_v47  ;;  %vm19154_vm10 = vnez %v19146_v9 }
0x14f4   :  { %13281 = vmatprep.subr.bf16.mxu0 %v18914_v17 }
0x14f7   :  { %13283 = vmatpush3.bf16.msk.msra.mxu0 %vm19141_vm15, %v18918_v47  ;;  %vm19167_vm15 = vnez %v18925_v0 }
0x14f8   :  { %13284 = vmatprep.subr.bf16.mxu0 %v18914_v17 }
0x14fb   :  { %13286 = vmatpush3.bf16.msk.msra.mxu0 %vm19143_vm14, %v18918_v47  ;;  %vm19166_vm14 = vnez %v18922_v63 }
0x14fc   :  { %13287 = vmatprep.subr.bf16.mxu0 %v18914_v17 }
0x14ff   :  { %13289 = vmatpush3.bf16.msk.msra.mxu0 %vm19153_vm11, %v18918_v47  ;;  %vm19155_vm11 = vcmask 64512  }
0x1500   :  { %13290 = vmatprep.subr.bf16.mxu0 %v18914_v17 }
0x1503   :  { %13292 = vmatpush3.bf16.msk.msra.mxu0 %vm19154_vm10, %v18918_v47  ;;  %vm19165_vm10 = vnez %v18920_v54  ;;  %v19263_v54 = vld [vmem:[#allocation66_spill] sm:$0xff] }
0x1504   :  { %13317 = vmatprep.subr.bf16.mxu0 %v18914_v17 }
0x15b1   :  { %v3201_v31 = vpop.f32.mrb[32].mxu1 }
0x15b2   :  { %v3202_v15 = vadd.f32 %v3201_v31, %v3126_v14  ;;  %v11586_v21 = vpop.f32.mrb[33].mxu1  ;;  %v19157_v31 = vld [vmem:[#allocation57_spill] sm:$0xff] }
0x15b3   :  { %v19159_v21 = vld [vmem:[#allocation59_spill] sm:$0xff] }
0x15b9   :  { %v3271_v24 = vpop.f32.mrb[38].mxu0 }
0x15ba   :  { %v3275_v53 = vadd.f32 %v3271_v24, %v3202_v15  ;;  %v11621_v29 = vpop.f32.mrb[39].mxu0  ;;  %v19158_v15 = vld [vmem:[#allocation58_spill] sm:$0xff]  ;;  %v19160_v24 = vld [vmem:[#allocation60_spill] sm:$0xff] }
0x15bb   :  { %v19162_v29 = vld [vmem:[#allocation62_spill] sm:$0xff] }
0x15bc   :  { %v3281_v4 = vadd.f32 %v3279_v22, %v3275_v53  ;;  %v19161_v53 = vld [vmem:[#allocation61_spill] sm:$0xff]  ;;  %v19163_v22 = vld [vmem:[#allocation63_spill] sm:$0xff] }
0x15be   :  { %v3282_v36 = vmax.f32 %v3281_v4, 0.0 }
0x15c0   :  { %11623 = vmatpush3.msra.mxu1 %v3282_v36  ;;  %v3505_v36 = vpop.permute.xlu1 %3504 }
0x15c1   :  { %11625 = vmatmul.mubr.msk.f32.vlgmr.msra.gmra.mrb[34].mxu1 %vm19155_vm11, %v95_v48  ;;  %13245 = vmatprep.subr.bf16.mxu1 %v18914_v17  ;;  %vm19164_vm11 = vnez %v18917_v52 }
0x15c2   :  { %13247 = vmatpush3.bf16.msk.msra.mxu1 %vm19090_vm2, %v18918_v47  ;;  %11659 = vmatprep.mubr.msk.f32.mxu1 %vm19064_vm3, %v18882_v38 }
0x15c3   :  { %13248 = vmatprep.subr.bf16.mxu1 %v18914_v17 }
0x15c6   :  { %13250 = vmatpush3.bf16.msk.msra.mxu1 %vm19091_vm9, %v18918_v47  ;;  %vm19225_vm9 = vcmask 523264  }
0x15c7   :  { %13251 = vmatprep.subr.bf16.mxu1 %v18914_v17  ;;  %vm19226_vm2 = vmmov %vm19225_vm9 }
0x15ca   :  { %13253 = vmatpush3.bf16.msk.msra.mxu1 %vm19092_vm1, %v18918_v47 }
0x15cb   :  { %13254 = vmatprep.subr.bf16.mxu1 %v18914_v17 }
0x15ce   :  { %13256 = vmatpush3.bf16.msk.msra.mxu1 %vm19093_vm0, %v18918_v47 }
0x15cf   :  { %13257 = vmatprep.subr.bf16.mxu1 %v18914_v17 }
0x15d2   :  { %13259 = vmatpush3.bf16.msk.msra.mxu1 %vm19094_vm12, %v18918_v47 }
0x15d3   :  { %13260 = vmatprep.subr.bf16.mxu1 %v18914_v17 }
0x15d6   :  { %13262 = vmatpush3.bf16.msk.msra.mxu1 %vm19095_vm7, %v18918_v47 }
0x15d7   :  { %13263 = vmatprep.subr.bf16.mxu1 %v18914_v17 }
0x15da   :  { %13265 = vmatpush3.bf16.msk.msra.mxu1 %vm19096_vm5, %v18918_v47 }
0x15db   :  { %13266 = vmatprep.subr.bf16.mxu1 %v18914_v17 }
0x15de   :  { %13268 = vmatpush3.bf16.msk.msra.mxu1 %vm19152_vm8, %v18918_v47 }
0x15df   :  { %13293 = vmatprep.subr.bf16.mxu1 %v18914_v17 }
0x1694   :  { %v3352_v14 = vpop.f32.mrb[34].mxu1 }
0x1695   :  { %v3429_v34 = vrot.slane %v3352_v14, 2  ;;  %v11626_v5 = vpop.f32.mrb[35].mxu1  ;;  %11660 = vmatmul.mubr.f32.vlgmr.msra.gmra.mrb[36].mxu1 %v3352_v14  ;;  %v3357_v4 = vrot.slane %v3352_v14, 1  ;;  %v19170_v14 = vld [vmem:[#allocation72_spill] sm:$0xff] }
0x1696   :  { %13295 = vmatpush3.bf16.msra.mxu1 %v19156_v44  ;;  %11729 = vmatprep.mubr.msk.f32.mxu1 %vm19064_vm3, %v18882_v38  ;;  %vm19171_vm13 = vnez %v19170_v14 }
0x1697   :  { %11695 = vmatmul.mubr.f32.vlgmr.msra.gmra.mrb[40].mxu0 %v3429_v34  ;;  %13296 = vmatprep.subr.bf16.mxu1 %v18914_v17 }
0x1698   :  { %13319 = vmatpush3.bf16.msra.mxu0 %v19156_v44  ;;  %11764 = vmatprep.mubr.msk.f32.mxu0 %vm19064_vm3, %v18882_v38  ;;  %v19196_v44 = vld [vmem:[#allocation80_spill] sm:$0xff] }
0x1699   :  { %13320 = vmatprep.subr.bf16.mxu0 %v18914_v17 }
0x169a   :  { %13298 = vmatpush3.bf16.msra.mxu1 %v19157_v31 }
0x169b   :  { %13299 = vmatprep.subr.bf16.mxu1 %v18914_v17 }
0x169c   :  { %13322 = vmatpush3.bf16.msra.mxu0 %v19157_v31 }
0x169d   :  { %13323 = vmatprep.subr.bf16.mxu0 %v18914_v17 }
0x169e   :  { %13301 = vmatpush3.bf16.msra.mxu1 %v19158_v15 }
0x169f   :  { %13302 = vmatprep.subr.bf16.mxu1 %v18914_v17 }
0x16a0   :  { %13325 = vmatpush3.bf16.msra.mxu0 %v19158_v15 }
0x16a1   :  { %13326 = vmatprep.subr.bf16.mxu0 %v18914_v17 }
0x16a2   :  { %13304 = vmatpush3.bf16.msra.mxu1 %v19159_v21 }
0x16a3   :  { %13305 = vmatprep.subr.bf16.mxu1 %v18914_v17 }
0x16a4   :  { %13328 = vmatpush3.bf16.msra.mxu0 %v19159_v21 }
0x16a5   :  { %13329 = vmatprep.subr.bf16.mxu0 %v18914_v17 }
0x16a6   :  { %13307 = vmatpush3.bf16.msra.mxu1 %v19160_v24 }
0x16a7   :  { %13308 = vmatprep.subr.bf16.mxu1 %v18914_v17 }
0x16a8   :  { %13331 = vmatpush3.bf16.msra.mxu0 %v19160_v24  ;;  %v3510_v24 = vrot.slane %v3505_v36, %v14937_v46  ;;  %v19182_v36 = vld [vmem:[#allocation73_spill] sm:$0xff] }
0x16a9   :  { %13332 = vmatprep.subr.bf16.mxu0 %v18914_v17  ;;  %vm19183_vm7 = vnez %v19182_v36 }
0x16aa   :  { %13310 = vmatpush3.bf16.msra.mxu1 %v19161_v53 }
0x16ab   :  { %13311 = vmatprep.subr.bf16.mxu1 %v18914_v17 }
0x16ac   :  { %13334 = vmatpush3.bf16.msra.mxu0 %v19161_v53 }
0x16ad   :  { %13335 = vmatprep.subr.bf16.mxu0 %v18914_v17 }
0x16ae   :  { %13313 = vmatpush3.bf16.msra.mxu1 %v19162_v29 }
0x16af   :  { %13314 = vmatprep.subr.bf16.mxu1 %v18914_v17 }
0x16b0   :  { %13337 = vmatpush3.bf16.msra.mxu0 %v19162_v29 }
0x16b1   :  { %13338 = vmatprep.subr.bf16.mxu0 %v18914_v17 }
0x16b2   :  { %13316 = vmatpush3.bf16.msra.mxu1 %v19163_v22 }
0x16b3   :  { %13341 = vmatprep.subr.bf16.mxu1 %v18914_v17 }
0x16b4   :  { %13340 = vmatpush3.bf16.msra.mxu0 %v19163_v22 }
0x16b5   :  { %13365 = vmatprep.subr.bf16.mxu0 %v18914_v17 }
0x1768   :  { %v3425_v48 = vpop.f32.mrb[36].mxu1 }
0x1769   :  { %v3426_v34 = vadd.f32 %v3425_v48, %v3357_v4  ;;  %v11661_v5 = vpop.f32.mrb[37].mxu1  ;;  %v19184_v48 = vld [vmem:[#allocation75_spill] sm:$0xff] }
0x176a   :  { %v3497_v53 = vpop.f32.mrb[40].mxu0  ;;  %vm19185_vm12 = vnez %v19184_v48 }
0x176b   :  { %v3501_v21 = vadd.f32 %v3497_v53, %v3426_v34  ;;  %v11696_v29 = vpop.f32.mrb[41].mxu0  ;;  %v19186_v34 = vld [vmem:[#allocation77_spill] sm:$0xff] }
0x176c   :  { %vm19187_vm0 = vnez %v19186_v34 }
0x176d   :  { %v3511_v15 = vadd.f32 %v3510_v24, %v3501_v21  ;;  %v19174_v21 = vld [vmem:[#allocation76_spill] sm:$0xff] }
0x176e   :  { %vm19175_vm8 = vnez %v19174_v21 }
0x176f   :  { %v3512_v31 = vadd.f32 %v3511_v15, %v16161_v37  ;;  %v19168_v37 = vld [vmem:[#allocation70_spill] sm:$0xff] }
0x1770   :  { %vm19169_vm4 = vnez %v19168_v37  ;;  %v19172_v15 = vld [vmem:[#allocation74_spill] sm:$0xff] }
0x1771   :  { %11730 = vmatmul.mubr.f32.vlgmr.msra.gmra.mrb[38].mxu1 %v3512_v31  ;;  %vm19173_vm6 = vnez %v19172_v15 }
0x1772   :  { %13343 = vmatpush3.bf16.msk.msra.mxu1 %vm19164_vm11, %v18918_v47  ;;  %11799 = vmatprep.mubr.msk.f32.mxu1 %vm19064_vm3, %v18882_v38 }
0x1773   :  { %13344 = vmatprep.subr.bf16.mxu1 %v18914_v17 }
0x1776   :  { %13346 = vmatpush3.bf16.msk.msra.mxu1 %vm19165_vm10, %v18918_v47 }
0x1777   :  { %13347 = vmatprep.subr.bf16.mxu1 %v18914_v17 }
0x177a   :  { %13349 = vmatpush3.bf16.msk.msra.mxu1 %vm19166_vm14, %v18918_v47 }
0x177b   :  { %13350 = vmatprep.subr.bf16.mxu1 %v18914_v17 }
0x177e   :  { %13352 = vmatpush3.bf16.msk.msra.mxu1 %vm19167_vm15, %v18918_v47 }
0x177f   :  { %13353 = vmatprep.subr.bf16.mxu1 %v18914_v17 }
0x1782   :  { %13355 = vmatpush3.bf16.msk.msra.mxu1 %vm19169_vm4, %v18918_v47  ;;  %vm19176_vm4 = vnez %v18928_v60 }
0x1783   :  { %13356 = vmatprep.subr.bf16.mxu1 %v18914_v17 }
0x1786   :  { %13358 = vmatpush3.bf16.msk.msra.mxu1 %vm19171_vm13, %v18918_v47  ;;  %vm19178_vm13 = vnez %v18934_v6 }
0x1787   :  { %13359 = vmatprep.subr.bf16.mxu1 %v18914_v17 }
0x178a   :  { %13361 = vmatpush3.bf16.msk.msra.mxu1 %vm19173_vm6, %v18918_v47  ;;  %vm19177_vm6 = vnez %v18931_v59 }
0x178b   :  { %13362 = vmatprep.subr.bf16.mxu1 %v18914_v17 }
0x178e   :  { %13364 = vmatpush3.bf16.msk.msra.mxu1 %vm19175_vm8, %v18918_v47  ;;  %vm19179_vm8 = vnez %v18937_v39 }
0x178f   :  { %13389 = vmatprep.subr.bf16.mxu1 %v18914_v17 }
0x1844   :  { %v3579_v24 = vpop.f32.mrb[38].mxu1 }
0x1845   :  { %v3583_v53 = vsub.f32 %v3512_v31, %v3579_v24  ;;  %v11731_v29 = vpop.f32.mrb[39].mxu1  ;;  %v19180_v31 = vld [vmem:[#allocation71_spill] sm:$0xff] }
0x1846   :  { %vm19181_vm5 = vnez %v19180_v31  ;;  %v3803_v31 = vstv %s9558_s15  ;;  %s9674_s15 = sld [smem:[#allocation2 + $0x17]] }
0x1847   :  { %v3584_v4 = vmul.f32 %v3583_v53, %v3583_v53 }
0x1849   :  { %11765 = vmatmul.mubr.f32.vlgmr.msra.gmra.mrb[42].mxu0 %v3584_v4 }
0x184a   :  { %13367 = vmatpush3.bf16.msk.msra.mxu0 %vm19176_vm4, %v18918_v47  ;;  %11834 = vmatprep.mubr.msk.f32.mxu0 %vm19064_vm3, %v18882_v38  ;;  %vm19244_vm4 = vmmov %vm19226_vm2 }
0x184b   :  { %13368 = vmatprep.subr.bf16.mxu0 %v18914_v17 }
0x184e   :  { %13370 = vmatpush3.bf16.msk.msra.mxu0 %vm19177_vm6, %v18918_v47  ;;  %vm19229_vm6 = vmmov %vm19226_vm2 }
0x184f   :  { %13371 = vmatprep.subr.bf16.mxu0 %v18914_v17 }
0x1852   :  { %13373 = vmatpush3.bf16.msk.msra.mxu0 %vm19178_vm13, %v18918_v47  ;;  %vm19228_vm13 = vmmov %vm19226_vm2 }
0x1853   :  { %13374 = vmatprep.subr.bf16.mxu0 %v18914_v17 }
0x1856   :  { %13376 = vmatpush3.bf16.msk.msra.mxu0 %vm19179_vm8, %v18918_v47  ;;  %vm19227_vm8 = vmmov %vm19226_vm2 }
0x1857   :  { %13377 = vmatprep.subr.bf16.mxu0 %v18914_v17 }
0x185a   :  { %13379 = vmatpush3.bf16.msk.msra.mxu0 %vm19181_vm5, %v18918_v47  ;;  %vm19188_vm5 = vcmask 523264  }
0x185b   :  { %13380 = vmatprep.subr.bf16.mxu0 %v18914_v17 }
0x185e   :  { %13382 = vmatpush3.bf16.msk.msra.mxu0 %vm19183_vm7, %v18918_v47  ;;  %vm19189_vm7 = vmmov %vm19188_vm5 }
0x185f   :  { %13383 = vmatprep.subr.bf16.mxu0 %v18914_v17 }
0x1862   :  { %13385 = vmatpush3.bf16.msk.msra.mxu0 %vm19185_vm12, %v18918_v47  ;;  %vm19191_vm12 = vmmov %vm19188_vm5 }
0x1863   :  { %13386 = vmatprep.subr.bf16.mxu0 %v18914_v17 }
0x1866   :  { %13388 = vmatpush3.bf16.msk.msra.mxu0 %vm19187_vm0, %v18918_v47  ;;  %vm19192_vm0 = vmmov %vm19188_vm5 }
0x1867   :  { %13405 = vmatprep.subr.bf16.mxu0 %v18914_v17  ;;  %vm19216_vm1 = vmmov %vm19192_vm0 }
0x191c   :  { %v3651_v5 = vpop.f32.mrb[42].mxu0 }
0x191d   :  { %v3652_v37 = vadd.f32 1e-05, %v3651_v5  ;;  %v11766_v14 = vpop.f32.mrb[43].mxu0  ;;  %v3805_v5 = vstv %s9559_s2  ;;  %s9680_s2 = sld [smem:[#allocation2 + $0x28]] }
0x191f   :  { %14052 = vrsqrt.f32 %v3652_v37 }
0x1929   :  { %v14053_v15 = vpop.eup %14052 }
0x192a   :  { %v3656_v21 = vmul.f32 %v14053_v15, %v3583_v53 }
0x192c   :  { %v3657_v24 = vmax.f32 %v3656_v21, 0.0 }
0x192e   :  { %11800 = vmatmul.mubr.f32.vlgmr.msra.gmra.mrb[40].mxu1 %v3657_v24  ;;  %11835 = vmatmul.mubr.f32.vlgmr.msra.gmra.mrb[44].mxu0 %v3657_v24 }
0x192f   :  { %11853 = vmatprep.mubr.msk.f32.mxu1 %vm19064_vm3, %v18882_v38  ;;  %11872 = vmatprep.mubr.msk.f32.mxu0 %vm19064_vm3, %v18882_v38 }
0x1a01   :  { %v3724_v29 = vpop.f32.mrb[40].mxu1  ;;  %v3794_v4 = vpop.f32.mrb[44].mxu0 }
0x1a02   :  { %v3798_v36 = vmax.f32 %v3724_v29, %v3794_v4  ;;  %v11801_v48 = vpop.f32.mrb[41].mxu1  ;;  %v11836_v34 = vpop.f32.mrb[45].mxu0  ;;  %v19190_v4 = vld [vmem:[#allocation78_spill] sm:$0xff] }
0x1a04   :  { %v3804_v37 = vmul.f32 %v3803_v31, %v3798_v36 }
0x1a06   :  { %v16487_v53 = vadd.f32 %v3805_v5, %v3804_v37  ;;  %v19193_v5 = vld [vmem:[#allocation79_spill] sm:$0xff] }
0x1a08   :  { %v16491_v14 = vrot.slane %v16487_v53, %v14937_v46 }
0x1a0a   :  { %v3812_v15 = vmul.f32 %v15419_v42, %v16491_v14  ;;  %v3811_v21 = vmul.f32 %v15422_v50, %v16491_v14  ;;  %v3815_v48 = vmul.f32 %v19190_v4, %v16491_v14  ;;  %v3813_v31 = vmul.f32 %v15432_v56, %v16491_v14 }
0x1a0b   :  { %v3817_v37 = vmul.f32 %v19193_v5, %v16491_v14 }
0x1a0c   :  { %v3822_v24 = vsel %vm19188_vm5, %v3812_v15, 0.0  ;;  %v3819_v29 = vsel %vm19189_vm7, %v3811_v21, 0.0  ;;  %v3831_v36 = vsel %vm19191_vm12, %v3815_v48, 0.0  ;;  %v3825_v34 = vsel %vm19192_vm0, %v3813_v31, 0.0  ;;  %vm19194_vm5 = vmmov %vm19192_vm0  ;;  %v19198_v48 = vld [vmem:[#allocation81_spill] sm:$0xff] }
0x1a0d   :  { %3823 = vadd.xlane.f32.xlu1 %v3822_v24  ;;  %3820 = vadd.xlane.f32.xlu0 %v3819_v29  ;;  %v3814_v15 = vmul.f32 %v15452_v35, %v16491_v14  ;;  %v3837_v21 = vsel %vm19194_vm5, %v3817_v37, 0.0  ;;  %vm19195_vm7 = vmmov %vm19192_vm0  ;;  %v3816_v24 = vmul.f32 %v19196_v44, %v16491_v14  ;;  %v3818_v31 = vmul.f32 %v19198_v48, %v16491_v14 }
0x1a0e   :  { %vm19197_vm12 = vmmov %vm19192_vm0 }
0x1a0f   :  { %v3828_v22 = vsel %vm19195_vm7, %v3814_v15, 0.0  ;;  %v3834_v29 = vsel %vm19197_vm12, %v3816_v24, 0.0  ;;  %v3840_v9 = vsel %vm19192_vm0, %v3818_v31, 0.0  ;;  %v19200_v31 = vld [vmem:[#allocation83_spill] sm:$0xff]  ;;  %vm19201_vm5 = vmmov %vm19192_vm0 }
0x1a10   :  { %vm19202_vm7 = vmmov %vm19192_vm0 }
0x1a11   :  { %3832 = vadd.xlane.f32.xlu1 %v3831_v36  ;;  %3826 = vadd.xlane.f32.xlu0 %v3825_v34  ;;  %v3851_v36 = vstv %s9560_s16  ;;  %vm19204_vm12 = vmmov %vm19192_vm0  ;;  %s9682_s16 = sld [smem:[#allocation2 + $0x2a]] }
0x1a15   :  { %3838 = vadd.xlane.f32.xlu1 %v3837_v21  ;;  %3829 = vadd.xlane.f32.xlu0 %v3828_v22 }
0x1a19   :  { %3835 = vadd.xlane.f32.xlu0 %v3834_v29  ;;  %v19199_v29 = vld [vmem:[#allocation8_spill] sm:$0xff] }
0x1a1d   :  { %3841 = vadd.xlane.f32.xlu0 %v3840_v9 }
0x1a9a   :  { %v3824_v34 = vpop.xlane.xlu1 %3823  ;;  %v3821_v37 = vpop.xlane.xlu0 %3820 }
0x1a9b   :  { %v3844_v15 = vmul.f32 %v3824_v34, %v16491_v14  ;;  %v3843_v16 = vmul.f32 %v3821_v37, %v16491_v14 }
0x1a9d   :  { %v3853_v45 = vmul.f32 %v3851_v36, %v3844_v15  ;;  %v3852_v21 = vmul.f32 %v3851_v36, %v3843_v16 }
0x1a9e   :  { %v3833_v22 = vpop.xlane.xlu1 %3832  ;;  %v3827_v33 = vpop.xlane.xlu0 %3826 }
0x1a9f   :  { %v3847_v24 = vmul.f32 %v3833_v22, %v16491_v14  ;;  %v3845_v43 = vmul.f32 %v3827_v33, %v16491_v14  ;;  %v3861_v13 = vadd.f32 %v3853_v45, %v19199_v29  ;;  %v3860_v9 = vadd.f32 %v3852_v21, %v19200_v31  ;;  %v19203_v22 = vld [vmem:[#allocation84_spill] sm:$0xff] }
0x1aa1   :  { %v3856_v8 = vmul.f32 %v3851_v36, %v3847_v24  ;;  %v3854_v51 = vmul.f32 %v3851_v36, %v3845_v43  ;;  %v3871_v10 = vsel %vm19201_vm5, %v3861_v13, -inf  ;;  %v3868_v34 = vsel %vm19202_vm7, %v3860_v9, -inf  ;;  %v19205_v24 = vld [vmem:[#allocation85_spill] sm:$0xff]  ;;  %vm19207_vm5 = vmmov %vm19192_vm0 }
0x1aa2   :  { %v3839_v62 = vpop.xlane.xlu1 %3838  ;;  %3872 = vmax.xlane.f32.xlu0 %v3871_v10  ;;  %3869 = vmax.xlane.f32.xlu1 %v3868_v34  ;;  %v3830_v16 = vpop.xlane.xlu0 %3829  ;;  %vm19210_vm7 = vmmov %vm19192_vm0 }
0x1aa3   :  { %v3849_v37 = vmul.f32 %v3839_v62, %v16491_v14  ;;  %v3846_v15 = vmul.f32 %v3830_v16, %v16491_v14  ;;  %v3862_v33 = vadd.f32 %v3854_v51, %v19203_v22  ;;  %v3864_v43 = vadd.f32 %v3856_v8, %v19205_v24  ;;  %v19208_v16 = vld [vmem:[#allocation87_spill] sm:$0xff] }
0x1aa5   :  { %v3858_v1 = vmul.f32 %v3851_v36, %v3849_v37  ;;  %v3855_v45 = vmul.f32 %v3851_v36, %v3846_v15  ;;  %v3874_v21 = vsel %vm19204_vm12, %v3862_v33, -inf  ;;  %v3880_v32 = vsel %vm19192_vm0, %v3864_v43, -inf  ;;  %v19209_v15 = vld [vmem:[#allocation88_spill] sm:$0xff]  ;;  %vm19211_vm12 = vmmov %vm19192_vm0 }
0x1aa6   :  { %3875 = vmax.xlane.f32.xlu1 %v3874_v21  ;;  %v3836_v57 = vpop.xlane.xlu0 %3835 }
0x1aa7   :  { %v3848_v49 = vmul.f32 %v3836_v57, %v16491_v14  ;;  %v3863_v10 = vadd.f32 %v3855_v45, %v19206_v41  ;;  %v3866_v26 = vadd.f32 %v3858_v1, %v19208_v16 }
0x1aa9   :  { %v3857_v34 = vmul.f32 %v3851_v36, %v3848_v49  ;;  %v3877_v62 = vsel %vm19207_vm5, %v3863_v10, -inf  ;;  %v3886_v12 = vsel %vm19210_vm7, %v3866_v26, -inf  ;;  %v19212_v49 = vld [vmem:[#allocation89_spill] sm:$0xff]  ;;  %vm19213_vm5 = vmmov %vm19192_vm0 }
0x1aaa   :  { %3881 = vmax.xlane.f32.xlu1 %v3880_v32  ;;  %3878 = vmax.xlane.f32.xlu0 %v3877_v62  ;;  %v3842_v51 = vpop.xlane.xlu0 %3841  ;;  %vm19214_vm7 = vmmov %vm19192_vm0 }
0x1aab   :  { %v3850_v37 = vmul.f32 %v3842_v51, %v16491_v14  ;;  %v3865_v8 = vadd.f32 %v3857_v34, %v19209_v15 }
0x1aad   :  { %v3859_v21 = vmul.f32 %v3851_v36, %v3850_v37  ;;  %v3883_v57 = vsel %vm19211_vm12, %v3865_v8, -inf  ;;  %vm19215_vm12 = vmmov %vm19192_vm0 }
0x1aae   :  { %3887 = vmax.xlane.f32.xlu1 %v3886_v12  ;;  %3884 = vmax.xlane.f32.xlu0 %v3883_v57 }
0x1aaf   :  { %v3867_v45 = vadd.f32 %v3859_v21, %v19212_v49 }
0x1ab1   :  { %v3889_v28 = vsel %vm19192_vm0, %v3867_v45, -inf }
0x1ab2   :  { %3890 = vmax.xlane.f32.xlu0 %v3889_v28 }
0x1b2f   :  { %v3870_v1 = vpop.xlane.xlu1 %3869  ;;  %v3873_v32 = vpop.xlane.xlu0 %3872 }
0x1b30   :  { %v3892_v62 = vsub.f32 %v3860_v9, %v3870_v1  ;;  %v3893_v39 = vsub.f32 %v3861_v13, %v3873_v32 }
0x1b32   :  { %v3900_v6 = vmul.f32 1.442695, %v3892_v62  ;;  %v3902_v14 = vmul.f32 1.442695, %v3893_v39 }
0x1b33   :  { %v3876_v51 = vpop.xlane.xlu1 %3875 }
0x1b34   :  { %14054 = vpow2.f32 %v3900_v6  ;;  %v3894_v36 = vsub.f32 %v3862_v33, %v3876_v51 }
0x1b35   :  { %14056 = vpow2.f32 %v3902_v14 }
0x1b36   :  { %v3904_v34 = vmul.f32 1.442695, %v3894_v36 }
0x1b37   :  { %v3882_v37 = vpop.xlane.xlu1 %3881  ;;  %v3879_v59 = vpop.xlane.xlu0 %3878 }
0x1b38   :  { %14058 = vpow2.f32 %v3904_v34  ;;  %v3896_v12 = vsub.f32 %v3864_v43, %v3882_v37  ;;  %v3895_v57 = vsub.f32 %v3863_v10, %v3879_v59 }
0x1b3a   :  { %v3908_v21 = vmul.f32 1.442695, %v3896_v12  ;;  %v3906_v60 = vmul.f32 1.442695, %v3895_v57 }
0x1b3b   :  { %v3888_v0 = vpop.xlane.xlu1 %3887  ;;  %v3885_v28 = vpop.xlane.xlu0 %3884 }
0x1b3c   :  { %14060 = vpow2.f32 %v3908_v21  ;;  %v3898_v63 = vsub.f32 %v3866_v26, %v3888_v0  ;;  %v3897_v9 = vsub.f32 %v3865_v8, %v3885_v28 }
0x1b3d   :  { %14062 = vpow2.f32 %v3906_v60 }
0x1b3e   :  { %v14055_v13 = vpop.eup %14054  ;;  %v3912_v39 = vmul.f32 1.442695, %v3898_v63  ;;  %v3910_v1 = vmul.f32 1.442695, %v3897_v9 }
0x1b3f   :  { %v14057_v6 = vpop.eup %14056  ;;  %v3891_v33 = vpop.xlane.xlu0 %3890  ;;  %v3916_v32 = vsel %vm19213_vm5, %v14055_v13, 0.0  ;;  %vm19217_vm5 = vmmov %vm19192_vm0 }
0x1b40   :  { %14064 = vpow2.f32 %v3912_v39  ;;  %v3899_v62 = vsub.f32 %v3867_v45, %v3891_v33  ;;  %3917 = vadd.xlane.f32.xlu1 %v3916_v32  ;;  %v3919_v59 = vsel %vm19214_vm7, %v14057_v6, 0.0  ;;  %vm19218_vm7 = vmmov %vm19192_vm0 }
0x1b41   :  { %14066 = vpow2.f32 %v3910_v1  ;;  %3920 = vadd.xlane.f32.xlu0 %v3919_v59 }
0x1b42   :  { %v14059_v43 = vpop.eup %14058  ;;  %v3914_v10 = vmul.f32 1.442695, %v3899_v62 }
0x1b43   :  { %v3922_v26 = vsel %vm19215_vm12, %v14059_v43, 0.0  ;;  %vm19219_vm12 = vmmov %vm19192_vm0 }
0x1b44   :  { %14068 = vpow2.f32 %v3914_v10  ;;  %3923 = vadd.xlane.f32.xlu1 %v3922_v26 }
0x1b46   :  { %v14061_v0 = vpop.eup %14060 }
0x1b47   :  { %v14063_v63 = vpop.eup %14062  ;;  %v3928_v60 = vsel %vm19192_vm0, %v14061_v0, 0.0 }
0x1b48   :  { %3929 = vadd.xlane.f32.xlu1 %v3928_v60  ;;  %v3925_v8 = vsel %vm19216_vm1, %v14063_v63, 0.0  ;;  %vm19220_vm1 = vnez %v19061_v30 }
0x1b49   :  { %3926 = vadd.xlane.f32.xlu0 %v3925_v8 }
0x1b4a   :  { %v14065_v45 = vpop.eup %14064 }
0x1b4b   :  { %v14067_v14 = vpop.eup %14066  ;;  %v3934_v51 = vsel %vm19217_vm5, %v14065_v45, 0.0  ;;  %vm19221_vm5 = vnez %v18984_v23 }
0x1b4c   :  { %3935 = vadd.xlane.f32.xlu1 %v3934_v51  ;;  %v3931_v36 = vsel %vm19218_vm7, %v14067_v14, 0.0  ;;  %vm19222_vm7 = vnez %v19017_v25 }
0x1b4d   :  { %3932 = vadd.xlane.f32.xlu0 %v3931_v36 }
0x1b4e   :  { %v14069_v34 = vpop.eup %14068 }
0x1b4f   :  { %v3937_v37 = vsel %vm19219_vm12, %v14069_v34, 0.0  ;;  %vm19223_vm12 = vnez %v19025_v61 }
0x1b51   :  { %3938 = vadd.xlane.f32.xlu0 %v3937_v37 }
0x1bcd   :  { %v3918_v12 = vpop.xlane.xlu1 %3917 }
0x1bce   :  { %14070 = vrcp.f32 %v3918_v12  ;;  %v3921_v57 = vpop.xlane.xlu0 %3920 }
0x1bcf   :  { %14072 = vrcp.f32 %v3921_v57 }
0x1bd1   :  { %v3924_v21 = vpop.xlane.xlu1 %3923 }
0x1bd2   :  { %14074 = vrcp.f32 %v3924_v21 }
0x1bd5   :  { %v3930_v32 = vpop.xlane.xlu1 %3929 }
0x1bd6   :  { %v3927_v28 = vpop.xlane.xlu0 %3926 }
0x1bd7   :  { %14076 = vrcp.f32 %v3927_v28 }
0x1bd8   :  { %v14071_v9 = vpop.eup %14070 }
0x1bd9   :  { %v14073_v39 = vpop.eup %14072  ;;  %v3948_v1 = vmul.f32 %v14071_v9, %v14055_v13  ;;  %v3936_v36 = vpop.xlane.xlu1 %3935 }
0x1bda   :  { %v3949_v33 = vmul.f32 %v14073_v39, %v14057_v6  ;;  %v3933_v62 = vpop.xlane.xlu0 %3932 }
0x1bdb   :  { %14078 = vrcp.f32 %v3933_v62 }
0x1bdc   :  { %v13390_v59 = vpack.c.bf16 %v3949_v33, %v3948_v1  ;;  %14080 = vrcp.f32 %v3930_v32  ;;  %v14075_v10 = vpop.eup %14074  ;;  %v4060_v1 = vstv %s9571_s18  ;;  %v4062_v32 = vstv %s9572_s19  ;;  %s9662_s18 = sld [smem:[#allocation2 + $0x10]]  ;;  %s9663_s19 = sld [smem:[#allocation2 + $0x11]] }
0x1bdd   :  { %v3950_v8 = vmul.f32 %v14075_v10, %v14059_v43 }
0x1bde   :  { %13392 = vmatpush3.bf16.xpose.msk.msra.mxu1 %vm19220_vm1, %v13390_v59  ;;  %v3939_v26 = vpop.xlane.xlu0 %3938 }
0x1bdf   :  { %13393 = vmatprep.subr.bf16.mxu1 %v18914_v17  ;;  %14082 = vrcp.f32 %v3939_v26 }
0x1be0   :  { %14084 = vrcp.f32 %v3936_v36 }
0x1be1   :  { %v14077_v60 = vpop.eup %14076 }
0x1be2   :  { %v3951_v51 = vmul.f32 %v14077_v60, %v14063_v63 }
0x1be4   :  { %v13394_v37 = vpack.c.bf16 %v3951_v51, %v3950_v8 }
0x1be5   :  { %v14079_v13 = vpop.eup %14078 }
0x1be6   :  { %13396 = vmatpush3.bf16.xpose.msk.msra.mxu1 %vm19220_vm1, %v13394_v37  ;;  %v14081_v6 = vpop.eup %14080  ;;  %v3953_v12 = vmul.f32 %v14079_v13, %v14067_v14 }
0x1be7   :  { %13397 = vmatprep.subr.bf16.mxu1 %v18914_v17  ;;  %v3952_v57 = vmul.f32 %v14081_v6, %v14061_v0  ;;  %v4053_v0 = vstv %s9561_s17  ;;  %s9683_s17 = sld [smem:[#allocation2 + $0x2b]] }
0x1be9   :  { %v13398_v21 = vpack.c.bf16 %v3953_v12, %v3952_v57  ;;  %v14083_v28 = vpop.eup %14082 }
0x1bea   :  { %v14085_v43 = vpop.eup %14084  ;;  %v3955_v63 = vmul.f32 %v14083_v28, %v14069_v34 }
0x1beb   :  { %v3954_v9 = vmul.f32 %v14085_v43, %v14065_v45 }
0x1bed   :  { %v13402_v39 = vpack.c.bf16 %v3955_v63, %v3954_v9 }
0x1bee   :  { %13400 = vmatpush3.bf16.xpose.msk.msra.mxu1 %vm19220_vm1, %v13398_v21 }
0x1bef   :  { %13401 = vmatprep.subr.bf16.mxu1 %v18914_v17 }
0x1bf6   :  { %13404 = vmatpush3.bf16.xpose.msk.msra.mxu1 %vm19220_vm1, %v13402_v39  ;;  %v4108_v39 = vstv %s9573_s20  ;;  %s9664_s20 = sld [smem:[#allocation2 + $0x12]] }
0x1bf7   :  { %13421 = vmatprep.subr.bf16.mxu1 %v18914_v17 }
0x1bfd   :  { %11854 = vmatmul.mubr.msk.f32.vlgmr.msra.gmra.mrb[42].mxu1 %vm19192_vm0, %v16487_v53  ;;  %vm19224_vm0 = vnez %v19031_v18 }
0x1bfe   :  { %13423 = vmatpush3.bf16.msk.msra.mxu1 %vm19221_vm5, %v18918_v47  ;;  %11891 = vmatprep.mubr.msk.f32.mxu1 %vm19064_vm3, %v18882_v38 }
0x1bff   :  { %13424 = vmatprep.subr.bf16.mxu1 %v18914_v17 }
0x1c02   :  { %13426 = vmatpush3.bf16.msk.msra.mxu1 %vm19222_vm7, %v18918_v47 }
0x1c03   :  { %13427 = vmatprep.subr.bf16.mxu1 %v18914_v17 }
0x1c06   :  { %13429 = vmatpush3.bf16.msk.msra.mxu1 %vm19223_vm12, %v18918_v47 }
0x1c07   :  { %13430 = vmatprep.subr.bf16.mxu1 %v18914_v17 }
0x1c0a   :  { %13432 = vmatpush3.bf16.msk.msra.mxu1 %vm19224_vm0, %v18918_v47 }
0x1c0b   :  { %11913 = vmatprep.subr.mxu1 %v18882_v38 }
0x1cd0   :  { %v4049_v45 = vpop.f32.mrb[42].mxu1 }
0x1cd1   :  { %v4054_v14 = vmul.f32 %v4053_v0, %v4049_v45  ;;  %v11855_v34 = vpop.f32.mrb[43].mxu1 }
0x1cd3   :  { %v4055_v33 = vadd.f32 %v4054_v14, %v16487_v53 }
0x1cd5   :  { %v4061_v62 = vmul.f32 %v4060_v1, %v4055_v33 }
0x1cd7   :  { %v16582_v59 = vadd.f32 %v4062_v32, %v4061_v62 }
0x1cd9   :  { %v4067_v10 = vrot.slane %v16582_v59, %v14937_v46 }
0x1cdb   :  { %v4069_v26 = vmul.f32 %v15419_v42, %v4067_v10  ;;  %v4068_v60 = vmul.f32 %v15422_v50, %v4067_v10  ;;  %v4071_v36 = vmul.f32 %v15452_v35, %v4067_v10  ;;  %v4070_v37 = vmul.f32 %v15432_v56, %v4067_v10 }
0x1cdc   :  { %v4073_v6 = vmul.f32 %v19196_v44, %v4067_v10  ;;  %v4072_v12 = vmul.f32 %v19190_v4, %v4067_v10  ;;  %v4075_v28 = vmul.f32 %v19198_v48, %v4067_v10  ;;  %v4074_v43 = vmul.f32 %v19193_v5, %v4067_v10 }
0x1cdd   :  { %v4079_v8 = vsel %vm19225_vm9, %v4069_v26, 0.0  ;;  %v4076_v51 = vsel %vm19226_vm2, %v4068_v60, 0.0  ;;  %v4085_v53 = vsel %vm19227_vm8, %v4071_v36, 0.0  ;;  %v4082_v13 = vsel %vm19228_vm13, %v4070_v37, 0.0  ;;  %vm19230_vm9 = vmmov %vm19226_vm2 }
0x1cde   :  { %4080 = vadd.xlane.f32.xlu0 %v4079_v8  ;;  %4077 = vadd.xlane.f32.xlu1 %v4076_v51  ;;  %v4091_v57 = vsel %vm19229_vm6, %v4073_v6, 0.0  ;;  %v4088_v21 = vsel %vm19230_vm9, %v4072_v12, 0.0  ;;  %v4097_v63 = vsel %vm19226_vm2, %v4075_v28, 0.0  ;;  %vm19231_vm8 = vmmov %vm19226_vm2 }
0x1cdf   :  { %v4094_v9 = vsel %vm19231_vm8, %v4074_v43, 0.0  ;;  %vm19232_vm6 = vmmov %vm19226_vm2 }
0x1ce0   :  { %vm19233_vm13 = vmmov %vm19226_vm2 }
0x1ce1   :  { %vm19234_vm9 = vmmov %vm19226_vm2 }
0x1ce2   :  { %4086 = vadd.xlane.f32.xlu0 %v4085_v53  ;;  %4083 = vadd.xlane.f32.xlu1 %v4082_v13  ;;  %vm19235_vm8 = vmmov %vm19226_vm2 }
0x1ce6   :  { %4092 = vadd.xlane.f32.xlu0 %v4091_v57  ;;  %4089 = vadd.xlane.f32.xlu1 %v4088_v21 }
0x1cea   :  { %4098 = vadd.xlane.f32.xlu0 %v4097_v63  ;;  %4095 = vadd.xlane.f32.xlu1 %v4094_v9 }
0x1d6b   :  { %v4081_v0 = vpop.xlane.xlu0 %4080  ;;  %v4078_v45 = vpop.xlane.xlu1 %4077 }
0x1d6c   :  { %v4101_v14 = vmul.f32 %v4081_v0, %v15846_v2  ;;  %v4100_v34 = vmul.f32 %v4078_v45, %v15846_v2 }
0x1d6e   :  { %v4110_v1 = vmul.f32 %v4108_v39, %v4101_v14  ;;  %v4109_v33 = vmul.f32 %v4108_v39, %v4100_v34 }
0x1d6f   :  { %v4087_v32 = vpop.xlane.xlu0 %4086  ;;  %v4084_v62 = vpop.xlane.xlu1 %4083 }
0x1d70   :  { %v4103_v10 = vmul.f32 %v4087_v32, %v15846_v2  ;;  %v4102_v26 = vmul.f32 %v4084_v62, %v15846_v2  ;;  %v4118_v60 = vadd.f32 %v4110_v1, %v19199_v29  ;;  %v4117_v8 = vadd.f32 %v4109_v33, %v19200_v31 }
0x1d72   :  { %v4112_v51 = vmul.f32 %v4108_v39, %v4103_v10  ;;  %v4111_v36 = vmul.f32 %v4108_v39, %v4102_v26  ;;  %v4128_v37 = vsel %vm19232_vm6, %v4118_v60, -inf  ;;  %v4125_v53 = vsel %vm19233_vm13, %v4117_v8, -inf  ;;  %vm19236_vm6 = vmmov %vm19226_vm2 }
0x1d73   :  { %4129 = vmax.xlane.f32.xlu0 %v4128_v37  ;;  %v4093_v13 = vpop.xlane.xlu0 %4092  ;;  %4126 = vmax.xlane.f32.xlu1 %v4125_v53  ;;  %v4090_v6 = vpop.xlane.xlu1 %4089  ;;  %vm19237_vm13 = vmmov %vm19226_vm2 }
0x1d74   :  { %v4105_v12 = vmul.f32 %v4093_v13, %v15846_v2  ;;  %v4104_v57 = vmul.f32 %v4090_v6, %v15846_v2  ;;  %v4120_v21 = vadd.f32 %v4112_v51, %v19206_v41  ;;  %v4119_v28 = vadd.f32 %v4111_v36, %v19203_v22 }
0x1d76   :  { %v4114_v43 = vmul.f32 %v4108_v39, %v4105_v12  ;;  %v4113_v63 = vmul.f32 %v4108_v39, %v4104_v57  ;;  %v4134_v9 = vsel %vm19234_vm9, %v4120_v21, -inf  ;;  %v4131_v0 = vsel %vm19226_vm2, %v4119_v28, -inf  ;;  %vm19238_vm9 = vmmov %vm19226_vm2 }
0x1d77   :  { %4135 = vmax.xlane.f32.xlu0 %v4134_v9  ;;  %v4099_v45 = vpop.xlane.xlu0 %4098  ;;  %4132 = vmax.xlane.f32.xlu1 %v4131_v0  ;;  %v4096_v14 = vpop.xlane.xlu1 %4095 }
0x1d78   :  { %v4107_v34 = vmul.f32 %v4099_v45, %v15846_v2  ;;  %v4106_v1 = vmul.f32 %v4096_v14, %v15846_v2  ;;  %v4122_v33 = vadd.f32 %v4114_v43, %v19209_v15  ;;  %v4121_v32 = vadd.f32 %v4113_v63, %v19205_v24 }
0x1d7a   :  { %v4116_v62 = vmul.f32 %v4108_v39, %v4107_v34  ;;  %v4115_v10 = vmul.f32 %v4108_v39, %v4106_v1  ;;  %v4140_v26 = vsel %vm19235_vm8, %v4122_v33, -inf  ;;  %v4137_v51 = vsel %vm19236_vm6, %v4121_v32, -inf  ;;  %vm19239_vm8 = vmmov %vm19226_vm2 }
0x1d7b   :  { %4141 = vmax.xlane.f32.xlu0 %v4140_v26  ;;  %4138 = vmax.xlane.f32.xlu1 %v4137_v51  ;;  %vm19240_vm6 = vmmov %vm19226_vm2 }
0x1d7c   :  { %v4124_v36 = vadd.f32 %v4116_v62, %v19212_v49  ;;  %v4123_v37 = vadd.f32 %v4115_v10, %v19208_v16 }
0x1d7e   :  { %v4146_v53 = vsel %vm19237_vm13, %v4124_v36, -inf  ;;  %v4143_v2 = vsel %vm19238_vm9, %v4123_v37, -inf  ;;  %vm19241_vm13 = vmmov %vm19226_vm2 }
0x1d7f   :  { %4147 = vmax.xlane.f32.xlu0 %v4146_v53  ;;  %4144 = vmax.xlane.f32.xlu1 %v4143_v2  ;;  %vm19242_vm9 = vmmov %vm19226_vm2 }
0x1e00   :  { %v4130_v13 = vpop.xlane.xlu0 %4129  ;;  %v4127_v6 = vpop.xlane.xlu1 %4126 }
0x1e01   :  { %v4150_v12 = vsub.f32 %v4118_v60, %v4130_v13  ;;  %v4149_v39 = vsub.f32 %v4117_v8, %v4127_v6 }
0x1e03   :  { %v4159_v57 = vmul.f32 1.442695, %v4150_v12  ;;  %v4157_v43 = vmul.f32 1.442695, %v4149_v39 }
0x1e04   :  { %v4136_v63 = vpop.xlane.xlu0 %4135  ;;  %v4133_v9 = vpop.xlane.xlu1 %4132 }
0x1e05   :  { %14086 = vpow2.f32 %v4159_v57  ;;  %v4152_v0 = vsub.f32 %v4120_v21, %v4136_v63  ;;  %v4151_v45 = vsub.f32 %v4119_v28, %v4133_v9 }
0x1e06   :  { %14088 = vpow2.f32 %v4157_v43 }
0x1e07   :  { %v4163_v14 = vmul.f32 1.442695, %v4152_v0  ;;  %v4161_v34 = vmul.f32 1.442695, %v4151_v45 }
0x1e08   :  { %v4142_v1 = vpop.xlane.xlu0 %4141  ;;  %v4139_v62 = vpop.xlane.xlu1 %4138 }
0x1e09   :  { %14090 = vpow2.f32 %v4163_v14  ;;  %v4154_v10 = vsub.f32 %v4122_v33, %v4142_v1  ;;  %v4153_v26 = vsub.f32 %v4121_v32, %v4139_v62  ;;  %v54_v62 = vld [vmem:[%s18377_s3 + $0x48] sm:$0xff] }
0x1e0a   :  { %14092 = vpow2.f32 %v4161_v34 }
0x1e0b   :  { %v4167_v51 = vmul.f32 1.442695, %v4154_v10  ;;  %v4165_v53 = vmul.f32 1.442695, %v4153_v26  ;;  %v55_v10 = vld [vmem:[%s18377_s3 + $0x50] sm:$0xff]  ;;  %v56_v26 = vld [vmem:[%s18377_s3 + $0x58] sm:$0xff] }
0x1e0c   :  { %v4148_v60 = vpop.xlane.xlu0 %4147  ;;  %v4145_v8 = vpop.xlane.xlu1 %4144 }
0x1e0d   :  { %14094 = vpow2.f32 %v4167_v51  ;;  %v4156_v2 = vsub.f32 %v4124_v36, %v4148_v60  ;;  %v4155_v13 = vsub.f32 %v4123_v37, %v4145_v8  ;;  %v66_v51 = vld [vmem:[%s18378_s4 + $0x18] sm:$0xff]  ;;  %v102_v60 = vld [vmem:[%s18382_s8 + $0x3] sm:$0x1] }
0x1e0e   :  { %14096 = vpow2.f32 %v4165_v53  ;;  %v90_v53 = vld [vmem:[%s18380_s6 + $0x18] sm:$0xff] }
0x1e0f   :  { %v14087_v6 = vpop.eup %14086  ;;  %v4171_v21 = vmul.f32 1.442695, %v4156_v2  ;;  %v4169_v28 = vmul.f32 1.442695, %v4155_v13 }
0x1e10   :  { %v14089_v12 = vpop.eup %14088  ;;  %v4176_v39 = vsel %vm19226_vm2, %v14087_v6, 0.0 }
0x1e11   :  { %14098 = vpow2.f32 %v4171_v21  ;;  %4177 = vadd.xlane.f32.xlu0 %v4176_v39  ;;  %v4173_v33 = vsel %vm19239_vm8, %v14089_v12, 0.0  ;;  %vm19243_vm8 = vmmov %vm19226_vm2 }
0x1e12   :  { %14100 = vpow2.f32 %v4169_v28  ;;  %4174 = vadd.xlane.f32.xlu1 %v4173_v33 }
0x1e13   :  { %v14091_v32 = vpop.eup %14090 }
0x1e14   :  { %v14093_v57 = vpop.eup %14092  ;;  %v4182_v43 = vsel %vm19240_vm6, %v14091_v32, 0.0  ;;  %vm19246_vm6 = vnez %v18992_v40  ;;  %v6944_v40 = vstv %s9774_s1  ;;  %s9937_s1 = sld [smem:[#allocation2 + $0x21]] }
0x1e15   :  { %4183 = vadd.xlane.f32.xlu0 %v4182_v43  ;;  %v4179_v36 = vsel %vm19241_vm13, %v14093_v57, 0.0  ;;  %vm19247_vm13 = vnez %v19019_v27 }
0x1e16   :  { %4180 = vadd.xlane.f32.xlu1 %v4179_v36 }
0x1e17   :  { %v14095_v37 = vpop.eup %14094 }
0x1e18   :  { %v14097_v63 = vpop.eup %14096  ;;  %v4188_v9 = vsel %vm19242_vm9, %v14095_v37, 0.0  ;;  %vm19248_vm9 = vnez %v19027_v11  ;;  %v6953_v11 = vstv %s9785_s30  ;;  %s9939_s30 = sld [smem:[#allocation2 + $0x23]] }
0x1e19   :  { %4189 = vadd.xlane.f32.xlu0 %v4188_v9  ;;  %v4185_v0 = vsel %vm19226_vm2, %v14097_v63, 0.0 }
0x1e1a   :  { %4186 = vadd.xlane.f32.xlu1 %v4185_v0 }
0x1e1b   :  { %v14099_v45 = vpop.eup %14098 }
0x1e1c   :  { %v14101_v14 = vpop.eup %14100  ;;  %v4194_v34 = vsel %vm19243_vm8, %v14099_v45, 0.0 }
0x1e1d   :  { %4195 = vadd.xlane.f32.xlu0 %v4194_v34  ;;  %v4191_v1 = vsel %vm19244_vm4, %v14101_v14, 0.0  ;;  %vm19245_vm4 = vmmov %vm19226_vm2  ;;  %vm19249_vm2 = vnez %v19033_v19 }
0x1e1e   :  { %4192 = vadd.xlane.f32.xlu1 %v4191_v1  ;;  %vm19251_vm8 = vmmov %vm19245_vm4 }
0x1e2f   :  { %4315 = vperm.xlu1 %13999, %v54_v62  }
0x1e33   :  { %4320 = vperm.xlu1 %13999, %v55_v10   ;;  %4325 = vperm.xlu0 %13998, %v56_v26  }
0x1e37   :  { %4484 = vperm.xlu1 %13999, %v66_v51   ;;  %4727 = vperm.xlu0 %13998, %v90_v53  }
0x1e3b   :  { %4956 = vperm.xlu1 %13999, %v102_v60  }
0x1e9e   :  { %v4178_v8 = vpop.xlane.xlu0 %4177 }
0x1e9f   :  { %14102 = vrcp.f32 %v4178_v8  ;;  %v4175_v2 = vpop.xlane.xlu1 %4174 }
0x1ea0   :  { %14104 = vrcp.f32 %v4175_v2 }
0x1ea2   :  { %v4184_v13 = vpop.xlane.xlu0 %4183 }
0x1ea3   :  { %14106 = vrcp.f32 %v4184_v13  ;;  %v4181_v21 = vpop.xlane.xlu1 %4180 }
0x1ea4   :  { %14108 = vrcp.f32 %v4181_v21 }
0x1ea6   :  { %v4190_v28 = vpop.xlane.xlu0 %4189 }
0x1ea7   :  { %v4187_v33 = vpop.xlane.xlu1 %4186  ;;  %14110 = vrcp.f32 %v4190_v28 }
0x1ea8   :  { %14112 = vrcp.f32 %v4187_v33 }
0x1ea9   :  { %v14103_v39 = vpop.eup %14102 }
0x1eaa   :  { %v14105_v43 = vpop.eup %14104  ;;  %v4206_v36 = vmul.f32 %v14103_v39, %v14087_v6  ;;  %v4196_v62 = vpop.xlane.xlu0 %4195 }
0x1eab   :  { %v4205_v9 = vmul.f32 %v14105_v43, %v14089_v12  ;;  %v4193_v51 = vpop.xlane.xlu1 %4192  ;;  %14114 = vrcp.f32 %v4196_v62 }
0x1eac   :  { %14116 = vrcp.f32 %v4193_v51 }
0x1ead   :  { %v14107_v0 = vpop.eup %14106  ;;  %v13406_v34 = vpack.c.bf16 %v4206_v36, %v4205_v9 }
0x1eae   :  { %v14109_v1 = vpop.eup %14108  ;;  %v4208_v10 = vmul.f32 %v14107_v0, %v14091_v32 }
0x1eaf   :  { %13408 = vmatpush3.bf16.xpose.msk.msra.mxu0 %vm19220_vm1, %v13406_v34  ;;  %v4207_v26 = vmul.f32 %v14109_v1, %v14093_v57  ;;  %v4316_v33 = vpop.permute.xlu1 %4315 }
0x1eb0   :  { %13409 = vmatprep.subr.bf16.mxu0 %v18914_v17 }
0x1eb1   :  { %v14111_v53 = vpop.eup %14110  ;;  %v13410_v60 = vpack.c.bf16 %v4208_v10, %v4207_v26 }
0x1eb2   :  { %v14113_v6 = vpop.eup %14112  ;;  %v4210_v12 = vmul.f32 %v14111_v53, %v14095_v37  ;;  %v4326_v43 = vpop.permute.xlu0 %4325 }
0x1eb3   :  { %v4209_v8 = vmul.f32 %v14113_v6, %v14097_v63 }
0x1eb5   :  { %v14115_v2 = vpop.eup %14114  ;;  %v13414_v13 = vpack.c.bf16 %v4210_v12, %v4209_v8  ;;  %v78_v12 = vld [vmem:[%s18379_s5 + $0x48] sm:$0xff]  ;;  %v79_v8 = vld [vmem:[%s18379_s5 + $0x50] sm:$0xff] }
0x1eb6   :  { %v14117_v21 = vpop.eup %14116  ;;  %v4212_v32 = vmul.f32 %v14115_v2, %v14099_v45  ;;  %v80_v2 = vld [vmem:[%s18379_s5 + $0x58] sm:$0xff] }
0x1eb7   :  { %13412 = vmatpush3.bf16.xpose.msk.msra.mxu0 %vm19220_vm1, %v13410_v60  ;;  %v4211_v57 = vmul.f32 %v14117_v21, %v14101_v14 }
0x1eb8   :  { %13413 = vmatprep.subr.bf16.mxu0 %v18914_v17 }
0x1eb9   :  { %v13418_v28 = vpack.c.bf16 %v4212_v32, %v4211_v57 }
0x1ebf   :  { %13416 = vmatpush3.bf16.xpose.msk.msra.mxu0 %vm19220_vm1, %v13414_v13 }
0x1ec0   :  { %13417 = vmatprep.subr.bf16.mxu0 %v18914_v17 }
0x1ec7   :  { %13420 = vmatpush3.bf16.xpose.msk.msra.mxu0 %vm19220_vm1, %v13418_v28 }
0x1ec8   :  { %13433 = vmatprep.subr.bf16.mxu0 %v18914_v17 }
0x1ece   :  { %11873 = vmatmul.mubr.msk.f32.vlgmr.msra.gmra.mrb[46].mxu0 %vm19245_vm4, %v15842_v3  ;;  %v4310_v3 = vstv %s9574_s10  ;;  %s9786_s10 = sld [smem:[#allocation2 + $0x1e]] }
0x1ecf   :  { %13435 = vmatpush3.bf16.msk.msra.mxu0 %vm19246_vm6, %v18918_v47  ;;  %11910 = vmatprep.mubr.msk.f32.mxu0 %vm19064_vm3, %v18882_v38 }
0x1ed0   :  { %13436 = vmatprep.subr.bf16.mxu0 %v18914_v17 }
0x1ed3   :  { %13438 = vmatpush3.bf16.msk.msra.mxu0 %vm19247_vm13, %v18918_v47 }
0x1ed4   :  { %13439 = vmatprep.subr.bf16.mxu0 %v18914_v17 }
0x1ed7   :  { %13441 = vmatpush3.bf16.msk.msra.mxu0 %vm19248_vm9, %v18918_v47 }
0x1ed8   :  { %13442 = vmatprep.subr.bf16.mxu0 %v18914_v17 }
0x1edb   :  { %13444 = vmatpush3.bf16.msk.msra.mxu0 %vm19249_vm2, %v18918_v47 }
0x1edc   :  { %13457 = vmatprep.subr.bf16.mxu0 %v18914_v17 }
0x1fa1   :  { %v4306_v37 = vpop.f32.mrb[46].mxu0 }
0x1fa2   :  { %v4311_v63 = vmul.f32 %v4310_v3, %v4306_v37  ;;  %v11874_v45 = vpop.f32.mrb[47].mxu0 }
0x1fa4   :  { %v16685_v14 = vadd.f32 %v4311_v63, %v16582_v59  ;;  %v4321_v59 = vpop.permute.xlu1 %4320 }
0x1fa6   :  { %19250 = vst [vmem:[#allocation70_spill] sm:$0xff] %v16685_v14  ;;  %v16689_v39 = vrot.slane %v16685_v14, %v14937_v46 }
0x1fa8   :  { %v4332_v36 = vmul.f32 %v16689_v39, %v4316_v33  ;;  %v4334_v9 = vmul.f32 %v16689_v39, %v4326_v43  ;;  %v4333_v0 = vmul.f32 %v16689_v39, %v4321_v59  ;;  %v4485_v53 = vpop.permute.xlu1 %4484 }
0x1faa   :  { %11892 = vmatmul.mubr.msk.f32.vlgmr.msra.gmra.mrb[44].mxu1 %vm19251_vm8, %v4332_v36  ;;  %11911 = vmatmul.mubr.msk.f32.vlgmr.msra.gmra.mrb[48].mxu0 %vm19245_vm4, %v4334_v9  ;;  %vm19252_vm8 = vcmask 64512   ;;  %v4728_v9 = vpop.permute.xlu0 %4727 }
0x1fab   :  { %11915 = vmatprep.mubr.msk.f32.mxu1 %vm19064_vm3, %v18882_v38  ;;  %13459 = vmatpush3.bf16.msk.msra.mxu0 %vm19246_vm6, %v18918_v47  ;;  %vm19253_vm4 = vmmov %vm19252_vm8 }
0x1fac   :  { %13460 = vmatprep.subr.bf16.mxu0 %v18914_v17  ;;  %11959 = vmatprep.mubr.msk.f32.mxu0 %vm19064_vm3, %v18882_v38 }
0x1faf   :  { %13462 = vmatpush3.bf16.msk.msra.mxu0 %vm19247_vm13, %v18918_v47 }
0x1fb0   :  { %13463 = vmatprep.subr.bf16.mxu0 %v18914_v17 }
0x1fb3   :  { %13465 = vmatpush3.bf16.msk.msra.mxu0 %vm19248_vm9, %v18918_v47 }
0x1fb4   :  { %13466 = vmatprep.subr.bf16.mxu0 %v18914_v17 }
0x1fb7   :  { %13468 = vmatpush3.bf16.msk.msra.mxu0 %vm19249_vm2, %v18918_v47 }
0x1fb8   :  { %13469 = vmatprep.subr.bf16.mxu0 %v18914_v17 }
0x207d   :  { %v4404_v34 = vpop.f32.mrb[44].mxu1  ;;  %v4477_v1 = vpop.f32.mrb[48].mxu0 }
0x207e   :  { %v4405_v62 = vadd.f32 %v4404_v34, %v4333_v0  ;;  %v11893_v10 = vpop.f32.mrb[45].mxu1  ;;  %v11912_v26 = vpop.f32.mrb[49].mxu0  ;;  %v96_v34 = vld [vmem:[%s18381_s7 + $0xc] sm:$0x7] }
0x2080   :  { %v4481_v51 = vadd.f32 %v4477_v1, %v4405_v62 }
0x2082   :  { %v4487_v60 = vadd.f32 %v4485_v53, %v4481_v51  ;;  %v4957_v51 = vpop.permute.xlu1 %4956 }
0x2084   :  { %v4488_v6 = vmax.f32 %v4487_v60, 0.0 }
0x2086   :  { %11914 = vmatpush3.msra.mxu1 %v4488_v6 }
0x2087   :  { %11916 = vmatmul.mubr.msk.f32.vlgmr.msra.gmra.mrb[46].mxu1 %vm19252_vm8, %v78_v12  ;;  %13445 = vmatprep.subr.bf16.mxu1 %v18914_v17  ;;  %vm19254_vm8 = vmmov %vm19253_vm4 }
0x2088   :  { %11918 = vmatprep.mubr.msk.f32.mxu1 %vm19064_vm3, %v18882_v38  ;;  %13447 = vmatpush3.bf16.msk.msra.mxu1 %vm19221_vm5, %v18918_v47 }
0x2089   :  { %13448 = vmatprep.subr.bf16.mxu1 %v18914_v17 }
0x208b   :  { %11919 = vmatmul.mubr.msk.f32.gmra.mrb[48].mxu1 %vm19253_vm4, %v79_v8  ;;  %vm19255_vm4 = vcmask 523264   ;;  %v4962_v8 = vrot.slane %v4957_v51, %v14937_v46 }
0x208c   :  { %11921 = vmatprep.mubr.msk.f32.mxu1 %vm19064_vm3, %v18882_v38  ;;  %13450 = vmatpush3.bf16.msk.msra.mxu1 %vm19222_vm7, %v18918_v47 }
0x208d   :  { %13451 = vmatprep.subr.bf16.mxu1 %v18914_v17 }
0x208f   :  { %11922 = vmatmul.mubr.msk.f32.gmra.mrb[50].mxu1 %vm19254_vm8, %v80_v2  ;;  %vm19256_vm8 = vmmov %vm19255_vm4 }
0x2090   :  { %13453 = vmatpush3.bf16.msk.msra.mxu1 %vm19223_vm12, %v18918_v47  ;;  %11940 = vmatprep.mubr.msk.f32.mxu1 %vm19064_vm3, %v18882_v38 }
0x2091   :  { %13454 = vmatprep.subr.bf16.mxu1 %v18914_v17 }
0x2094   :  { %13456 = vmatpush3.bf16.msk.msra.mxu1 %vm19224_vm0, %v18918_v47 }
0x2095   :  { %11962 = vmatprep.subr.mxu1 %v18882_v38 }
0x215a   :  { %v4564_v13 = vpop.f32.mrb[46].mxu1 }
0x215b   :  { %v11917_v21 = vpop.f32.mrb[47].mxu1  ;;  %11941 = vmatmul.mubr.msk.f32.vlgmr.msra.gmra.mrb[52].mxu1 %vm19255_vm4, %v4564_v13  ;;  %vm19257_vm4 = vcmask 64512  }
0x215c   :  { %11964 = vmatprep.mubr.msk.f32.mxu1 %vm19064_vm3, %v18882_v38 }
0x215e   :  { %v4569_v32 = vpop.f32.mrb[48].mxu1 }
0x215f   :  { %v11920_v57 = vpop.f32.mrb[49].mxu1 }
0x2162   :  { %v4574_v28 = vpop.f32.mrb[50].mxu1 }
0x2163   :  { %v11923_v3 = vpop.f32.mrb[51].mxu1  ;;  %11960 = vmatmul.mubr.msk.f32.vlgmr.msra.gmra.mrb[50].mxu0 %vm19256_vm8, %v4574_v28 }
0x2164   :  { %13471 = vmatpush3.bf16.msk.msra.mxu0 %vm19221_vm5, %v18918_v47  ;;  %11983 = vmatprep.mubr.msk.f32.mxu0 %vm19064_vm3, %v18882_v38 }
0x2165   :  { %13472 = vmatprep.subr.bf16.mxu0 %v18914_v17 }
0x2168   :  { %13474 = vmatpush3.bf16.msk.msra.mxu0 %vm19222_vm7, %v18918_v47 }
0x2169   :  { %13475 = vmatprep.subr.bf16.mxu0 %v18914_v17 }
0x216c   :  { %13477 = vmatpush3.bf16.msk.msra.mxu0 %vm19223_vm12, %v18918_v47 }
0x216d   :  { %13478 = vmatprep.subr.bf16.mxu0 %v18914_v17 }
0x2170   :  { %13480 = vmatpush3.bf16.msk.msra.mxu0 %vm19224_vm0, %v18918_v47 }
0x2171   :  { %13493 = vmatprep.subr.bf16.mxu0 %v18914_v17 }
0x222e   :  { %v4647_v37 = vpop.f32.mrb[52].mxu1 }
0x222f   :  { %v4648_v63 = vadd.f32 %v4647_v37, %v4569_v32  ;;  %v11942_v45 = vpop.f32.mrb[53].mxu1 }
0x2230   :  { %v19265_v45 = vld [vmem:[#allocation67_spill] sm:$0xff] }
0x2236   :  { %v4720_v33 = vpop.f32.mrb[50].mxu0 }
0x2237   :  { %v4724_v43 = vadd.f32 %v4720_v33, %v4648_v63  ;;  %v11961_v36 = vpop.f32.mrb[51].mxu0  ;;  %v19267_v33 = vld [vmem:[#allocation68_spill] sm:$0xff] }
0x2239   :  { %v4730_v59 = vadd.f32 %v4728_v9, %v4724_v43  ;;  %v19269_v43 = vld [vmem:[#allocation69_spill] sm:$0xff] }
0x223b   :  { %v4731_v0 = vmax.f32 %v4730_v59, 0.0 }
0x223d   :  { %11963 = vmatpush3.msra.mxu1 %v4731_v0 }
0x223e   :  { %11965 = vmatmul.mubr.msk.f32.vlgmr.msra.gmra.mrb[54].mxu1 %vm19257_vm4, %v96_v34  ;;  %13481 = vmatprep.subr.bf16.mxu1 %v18914_v17  ;;  %vm19258_vm4 = vmmov %vm19256_vm8 }
0x223f   :  { %13483 = vmatpush3.bf16.msk.msra.mxu1 %vm19246_vm6, %v18918_v47  ;;  %12002 = vmatprep.mubr.msk.f32.mxu1 %vm19064_vm3, %v18882_v38 }
0x2240   :  { %13484 = vmatprep.subr.bf16.mxu1 %v18914_v17 }
0x2243   :  { %13486 = vmatpush3.bf16.msk.msra.mxu1 %vm19247_vm13, %v18918_v47 }
0x2244   :  { %13487 = vmatprep.subr.bf16.mxu1 %v18914_v17 }
0x2247   :  { %13489 = vmatpush3.bf16.msk.msra.mxu1 %vm19248_vm9, %v18918_v47 }
0x2248   :  { %13490 = vmatprep.subr.bf16.mxu1 %v18914_v17 }
0x224b   :  { %13492 = vmatpush3.bf16.msk.msra.mxu1 %vm19249_vm2, %v18918_v47 }
0x224c   :  { %13505 = vmatprep.subr.bf16.mxu1 %v18914_v17 }
0x2311   :  { %v4801_v1 = vpop.f32.mrb[54].mxu1 }
0x2312   :  { %v4880_v62 = vrot.slane %v4801_v1, 2  ;;  %v11966_v10 = vpop.f32.mrb[55].mxu1  ;;  %11984 = vmatmul.mubr.msk.f32.vlgmr.msra.gmra.mrb[52].mxu0 %vm19256_vm8, %v4801_v1  ;;  %v4806_v26 = vrot.slane %v4801_v1, 1  ;;  %vm19259_vm8 = vmmov %vm19258_vm4 }
0x2313   :  { %13495 = vmatpush3.bf16.msra.mxu0 %v15536_v20  ;;  %12021 = vmatprep.mubr.msk.f32.mxu0 %vm19064_vm3, %v18882_v38 }
0x2314   :  { %12003 = vmatmul.mubr.msk.f32.vlgmr.msra.gmra.mrb[56].mxu1 %vm19258_vm4, %v4880_v62  ;;  %13496 = vmatprep.subr.bf16.mxu0 %v18914_v17 }
0x2315   :  { %13507 = vmatpush3.bf16.msra.mxu1 %v15536_v20  ;;  %12040 = vmatprep.mubr.msk.f32.mxu1 %vm19064_vm3, %v18882_v38 }
0x2316   :  { %13508 = vmatprep.subr.bf16.mxu1 %v18914_v17 }
0x2317   :  { %13498 = vmatpush3.bf16.msra.mxu0 %v15607_v55 }
0x2318   :  { %13499 = vmatprep.subr.bf16.mxu0 %v18914_v17 }
0x2319   :  { %13510 = vmatpush3.bf16.msra.mxu1 %v15607_v55 }
0x231a   :  { %13511 = vmatprep.subr.bf16.mxu1 %v18914_v17 }
0x231b   :  { %13501 = vmatpush3.bf16.msra.mxu0 %v15654_v58 }
0x231c   :  { %13502 = vmatprep.subr.bf16.mxu0 %v18914_v17 }
0x231d   :  { %13513 = vmatpush3.bf16.msra.mxu1 %v15654_v58 }
0x231e   :  { %13514 = vmatprep.subr.bf16.mxu1 %v18914_v17 }
0x231f   :  { %13504 = vmatpush3.bf16.msra.mxu0 %v15679_v7 }
0x2320   :  { %13517 = vmatprep.subr.bf16.mxu0 %v18914_v17 }
0x2321   :  { %13516 = vmatpush3.bf16.msra.mxu1 %v15679_v7 }
0x2322   :  { %13529 = vmatprep.subr.bf16.mxu1 %v18914_v17 }
0x23e5   :  { %v4876_v53 = vpop.f32.mrb[52].mxu0 }
0x23e6   :  { %v4877_v60 = vadd.f32 %v4876_v53, %v4806_v26  ;;  %v11985_v6 = vpop.f32.mrb[53].mxu0  ;;  %v5264_v26 = vstv %s9662_s18  ;;  %s9681_s18 = sld [smem:[#allocation2 + $0x29]] }
0x23e7   :  { %v4949_v12 = vpop.f32.mrb[56].mxu1  ;;  %v5266_v6 = vstv %s9663_s19 }
0x23e8   :  { %v4953_v2 = vadd.f32 %v4949_v12, %v4877_v60  ;;  %v12004_v13 = vpop.f32.mrb[57].mxu1 }
0x23ea   :  { %v4963_v21 = vadd.f32 %v4962_v8, %v4953_v2 }
0x23ec   :  { %v4964_v32 = vadd.f32 %v4963_v21, %v16685_v14 }
0x23ee   :  { %12022 = vmatmul.mubr.msk.f32.vlgmr.msra.gmra.mrb[54].mxu0 %vm19259_vm8, %v4964_v32 }
0x23ef   :  { %13519 = vmatpush3.bf16.msk.msra.mxu0 %vm19164_vm11, %v18918_v47  ;;  %12059 = vmatprep.mubr.msk.f32.mxu0 %vm19064_vm3, %v18882_v38  ;;  %vm19262_vm11 = vmmov %vm19258_vm4  ;;  %vm19270_vm4 = vnez %v19269_v43 }
0x23f0   :  { %13520 = vmatprep.subr.bf16.mxu0 %v18914_v17 }
0x23f3   :  { %13522 = vmatpush3.bf16.msk.msra.mxu0 %vm19165_vm10, %v18918_v47  ;;  %vm19264_vm10 = vnez %v19263_v54 }
0x23f4   :  { %13523 = vmatprep.subr.bf16.mxu0 %v18914_v17 }
0x23f7   :  { %13525 = vmatpush3.bf16.msk.msra.mxu0 %vm19166_vm14, %v18918_v47  ;;  %vm19266_vm14 = vnez %v19265_v45 }
0x23f8   :  { %13526 = vmatprep.subr.bf16.mxu0 %v18914_v17 }
0x23fb   :  { %13528 = vmatpush3.bf16.msk.msra.mxu0 %vm19167_vm15, %v18918_v47  ;;  %vm19268_vm15 = vnez %v19267_v33 }
0x23fc   :  { %13541 = vmatprep.subr.bf16.mxu0 %v18914_v17 }
0x24c1   :  { %v5034_v28 = vpop.f32.mrb[54].mxu0 }
0x24c2   :  { %v5038_v3 = vsub.f32 %v4964_v32, %v5034_v28  ;;  %v12023_v37 = vpop.f32.mrb[55].mxu0 }
0x24c4   :  { %v5039_v63 = vmul.f32 %v5038_v3, %v5038_v3 }
0x24c6   :  { %12041 = vmatmul.mubr.msk.f32.vlgmr.msra.gmra.mrb[58].mxu1 %vm19262_vm11, %v5039_v63  ;;  %vm19271_vm11 = vmmov %vm19259_vm8  ;;  %v5292_v63 = vstv %s9664_s20 }
0x24c7   :  { %13531 = vmatpush3.bf16.msk.msra.mxu1 %vm19264_vm10, %v18918_v47  ;;  %12078 = vmatprep.mubr.msk.f32.mxu1 %vm19064_vm3, %v18882_v38  ;;  %vm19272_vm10 = vcmask 261120  }
0x24c8   :  { %13532 = vmatprep.subr.bf16.mxu1 %v18914_v17 }
0x24cb   :  { %13534 = vmatpush3.bf16.msk.msra.mxu1 %vm19266_vm14, %v18918_v47  ;;  %vm19273_vm14 = vmmov %vm19272_vm10 }
0x24cc   :  { %13535 = vmatprep.subr.bf16.mxu1 %v18914_v17 }
0x24cf   :  { %13537 = vmatpush3.bf16.msk.msra.mxu1 %vm19268_vm15, %v18918_v47  ;;  %vm19274_vm15 = vmmov %vm19272_vm10 }
0x24d0   :  { %13538 = vmatprep.subr.bf16.mxu1 %v18914_v17 }
0x24d3   :  { %13540 = vmatpush3.bf16.msk.msra.mxu1 %vm19270_vm4, %v18918_v47  ;;  %vm19275_vm4 = vmmov %vm19272_vm10 }
0x24d4   :  { %13549 = vmatprep.subr.bf16.mxu1 %v18914_v17 }
0x2599   :  { %v5109_v36 = vpop.f32.mrb[58].mxu1 }
0x259a   :  { %v5110_v9 = vadd.f32 1e-05, %v5109_v36  ;;  %v12042_v59 = vpop.f32.mrb[59].mxu1 }
0x259c   :  { %14118 = vrsqrt.f32 %v5110_v9 }
0x25a6   :  { %v14119_v0 = vpop.eup %14118 }
0x25a7   :  { %v5114_v34 = vmul.f32 %v14119_v0, %v5038_v3 }
0x25a9   :  { %v5115_v1 = vmax.f32 %v5114_v34, 0.0  ;;  %v19276_v34 = vld [vmem:[#allocation95_spill] sm:$0xff] }
0x25ab   :  { %12060 = vmatmul.mubr.msk.f32.vlgmr.msra.gmra.mrb[56].mxu0 %vm19259_vm8, %v5115_v1  ;;  %12079 = vmatmul.mubr.msk.f32.vlgmr.msra.gmra.mrb[60].mxu1 %vm19271_vm11, %v5115_v1  ;;  %vm19278_vm8 = vmmov %vm19275_vm4 }
0x25ac   :  { %12089 = vmatprep.mubr.msk.f32.mxu0 %vm19064_vm3, %v18882_v38  ;;  %12100 = vmatprep.mubr.msk.f32.mxu1 %vm19064_vm3, %v18882_v38  ;;  %vm19279_vm11 = vmmov %vm19275_vm4 }
0x267e   :  { %v5185_v62 = vpop.f32.mrb[56].mxu0  ;;  %v5255_v10 = vpop.f32.mrb[60].mxu1 }
0x267f   :  { %v5259_v51 = vmax.f32 %v5185_v62, %v5255_v10  ;;  %v12061_v53 = vpop.f32.mrb[57].mxu0  ;;  %v12080_v60 = vpop.f32.mrb[61].mxu1  ;;  %v19277_v62 = vld [vmem:[#allocation96_spill] sm:$0xff] }
0x2681   :  { %v5265_v12 = vmul.f32 %v5264_v26, %v5259_v51 }
0x2683   :  { %v16864_v8 = vadd.f32 %v5266_v6, %v5265_v12  ;;  %v19280_v12 = vld [vmem:[#allocation98_spill] sm:$0xff] }
0x2685   :  { %v5271_v2 = vrot.slane %v16864_v8, %v14937_v46 }
0x2687   :  { %v5273_v13 = vmul.f32 %v15419_v42, %v5271_v2  ;;  %v5272_v21 = vmul.f32 %v15422_v50, %v5271_v2  ;;  %v5274_v52 = vmul.f32 %v15432_v56, %v5271_v2  ;;  %v5275_v3 = vmul.f32 %v15452_v35, %v5271_v2 }
0x2689   :  { %v5279_v32 = vsel %vm19272_vm10, %v5273_v13, 0.0  ;;  %v5276_v57 = vsel %vm19273_vm14, %v5272_v21, 0.0  ;;  %v5282_v28 = vsel %vm19274_vm15, %v5274_v52, 0.0  ;;  %v5285_v37 = vsel %vm19275_vm4, %v5275_v3, 0.0  ;;  %vm19281_vm10 = vmmov %vm19275_vm4 }
0x268a   :  { %5280 = vadd.xlane.f32.xlu1 %v5279_v32  ;;  %5277 = vadd.xlane.f32.xlu0 %v5276_v57  ;;  %v19282_v57 = vld [vmem:[#allocation100_spill] sm:$0xff]  ;;  %vm19283_vm14 = vmmov %vm19275_vm4 }
0x268b   :  { %vm19284_vm15 = vmmov %vm19275_vm4 }
0x268e   :  { %5283 = vadd.xlane.f32.xlu0 %v5282_v28 }
0x2692   :  { %5286 = vadd.xlane.f32.xlu0 %v5285_v37 }
0x2717   :  { %v5281_v54 = vpop.xlane.xlu1 %5280  ;;  %v5278_v45 = vpop.xlane.xlu0 %5277 }
0x2718   :  { %v5289_v33 = vmul.f32 %v5281_v54, %v5271_v2  ;;  %v5288_v43 = vmul.f32 %v5278_v45, %v5271_v2 }
0x271a   :  { %v5294_v36 = vmul.f32 %v5292_v63, %v5289_v33  ;;  %v5293_v9 = vmul.f32 %v5292_v63, %v5288_v43 }
0x271b   :  { %v5284_v59 = vpop.xlane.xlu0 %5283 }
0x271c   :  { %v5290_v0 = vmul.f32 %v5284_v59, %v5271_v2  ;;  %v5298_v1 = vadd.f32 %v5294_v36, %v19276_v34  ;;  %v5297_v10 = vadd.f32 %v5293_v9, %v19277_v62 }
0x271e   :  { %v5295_v26 = vmul.f32 %v5292_v63, %v5290_v0  ;;  %v5304_v51 = vsel %vm19278_vm8, %v5298_v1, -inf  ;;  %v5301_v53 = vsel %vm19279_vm11, %v5297_v10, -inf  ;;  %vm19285_vm8 = vmmov %vm19275_vm4 }
0x271f   :  { %5305 = vmax.xlane.f32.xlu0 %v5304_v51  ;;  %5302 = vmax.xlane.f32.xlu1 %v5301_v53  ;;  %v5287_v60 = vpop.xlane.xlu0 %5286  ;;  %vm19286_vm11 = vmmov %vm19275_vm4 }
0x2720   :  { %v5291_v6 = vmul.f32 %v5287_v60, %v5271_v2  ;;  %v5299_v13 = vadd.f32 %v5295_v26, %v19280_v12 }
0x2722   :  { %v5296_v21 = vmul.f32 %v5292_v63, %v5291_v6  ;;  %v5307_v32 = vsel %vm19281_vm10, %v5299_v13, -inf }
0x2723   :  { %5308 = vmax.xlane.f32.xlu1 %v5307_v32 }
0x2724   :  { %v5300_v52 = vadd.f32 %v5296_v21, %v19282_v57 }
0x2726   :  { %v5310_v28 = vsel %vm19283_vm14, %v5300_v52, -inf  ;;  %vm19289_vm14 = vmmov %vm19275_vm4 }
0x2727   :  { %5311 = vmax.xlane.f32.xlu0 %v5310_v28 }
0x27ac   :  { %v5303_v3 = vpop.xlane.xlu1 %5302  ;;  %v5306_v37 = vpop.xlane.xlu0 %5305 }
0x27ad   :  { %v5313_v54 = vsub.f32 %v5297_v10, %v5303_v3  ;;  %v5314_v45 = vsub.f32 %v5298_v1, %v5306_v37 }
0x27af   :  { %v5317_v33 = vmul.f32 1.442695, %v5313_v54  ;;  %v5319_v43 = vmul.f32 1.442695, %v5314_v45 }
0x27b0   :  { %v5309_v36 = vpop.xlane.xlu1 %5308 }
0x27b1   :  { %14120 = vpow2.f32 %v5317_v33  ;;  %v5315_v2 = vsub.f32 %v5299_v13, %v5309_v36  ;;  %v19287_v36 = vld [vmem:[#allocation101_spill] sm:$0xff] }
0x27b2   :  { %14122 = vpow2.f32 %v5319_v43  ;;  %vm19288_vm10 = vnez %v19287_v36 }
0x27b3   :  { %v5321_v9 = vmul.f32 1.442695, %v5315_v2 }
0x27b4   :  { %v5312_v63 = vpop.xlane.xlu0 %5311 }
0x27b5   :  { %14124 = vpow2.f32 %v5321_v9  ;;  %v5316_v59 = vsub.f32 %v5300_v52, %v5312_v63 }
0x27b7   :  { %v5323_v0 = vmul.f32 1.442695, %v5316_v59 }
0x27b9   :  { %14126 = vpow2.f32 %v5323_v0  ;;  %v5430_v0 = vstv %s9665_s21 }
0x27bb   :  { %v14121_v26 = vpop.eup %14120 }
0x27bc   :  { %v14123_v51 = vpop.eup %14122  ;;  %v5325_v53 = vsel %vm19284_vm15, %v14121_v26, 0.0  ;;  %vm19290_vm15 = vmmov %vm19275_vm4 }
0x27bd   :  { %5326 = vadd.xlane.f32.xlu1 %v5325_v53  ;;  %v5328_v10 = vsel %vm19275_vm4, %v14123_v51, 0.0 }
0x27be   :  { %5329 = vadd.xlane.f32.xlu0 %v5328_v10  ;;  %v5437_v10 = vstv %s9671_s22  ;;  %s9798_s22 = sld [smem:[#allocation2 + $0x2d]] }
0x27bf   :  { %v14125_v1 = vpop.eup %14124 }
0x27c0   :  { %v5331_v60 = vsel %vm19285_vm8, %v14125_v1, 0.0  ;;  %vm19291_vm8 = vmmov %vm19275_vm4 }
0x27c1   :  { %5332 = vadd.xlane.f32.xlu1 %v5331_v60  ;;  %v5439_v60 = vstv %s9672_s23 }
0x27c3   :  { %v14127_v6 = vpop.eup %14126 }
0x27c4   :  { %v5334_v13 = vsel %vm19286_vm11, %v14127_v6, 0.0  ;;  %vm19292_vm11 = vmmov %vm19275_vm4 }
0x27c5   :  { %5335 = vadd.xlane.f32.xlu0 %v5334_v13 }
0x284a   :  { %v5327_v21 = vpop.xlane.xlu1 %5326 }
0x284b   :  { %14128 = vrcp.f32 %v5327_v21  ;;  %v5330_v32 = vpop.xlane.xlu0 %5329 }
0x284c   :  { %14130 = vrcp.f32 %v5330_v32 }
0x284e   :  { %v5333_v52 = vpop.xlane.xlu1 %5332 }
0x284f   :  { %14132 = vrcp.f32 %v5333_v52 }
0x2852   :  { %v5336_v28 = vpop.xlane.xlu0 %5335 }
0x2853   :  { %14134 = vrcp.f32 %v5336_v28 }
0x2855   :  { %v14129_v3 = vpop.eup %14128 }
0x2856   :  { %v14131_v37 = vpop.eup %14130  ;;  %v5341_v54 = vmul.f32 %v14129_v3, %v14121_v26 }
0x2857   :  { %v5342_v45 = vmul.f32 %v14131_v37, %v14123_v51 }
0x2859   :  { %v13542_v33 = vpack.c.bf16 %v5342_v45, %v5341_v54  ;;  %v14133_v43 = vpop.eup %14132 }
0x285a   :  { %v5343_v9 = vmul.f32 %v14133_v43, %v14125_v1  ;;  %v19293_v43 = vld [vmem:[#allocation102_spill] sm:$0xff] }
0x285b   :  { %13544 = vmatpush3.bf16.xpose.msk.msra.mxu0 %vm19288_vm10, %v13542_v33  ;;  %v2871_v33 = vstv %s9420_s24 }
0x285c   :  { %13545 = vmatprep.subr.bf16.mxu0 %v18914_v17 }
0x285d   :  { %v14135_v2 = vpop.eup %14134 }
0x285e   :  { %v5344_v63 = vmul.f32 %v14135_v2, %v14127_v6  ;;  %v2872_v2 = vmul.f32 %v2871_v33, %v19293_v43 }
0x2860   :  { %v13546_v59 = vpack.c.bf16 %v5344_v63, %v5343_v9  ;;  %v19294_v9 = vld [vmem:[#allocation91_spill] sm:$0xff] }
0x2861   :  { %v16913_v63 = vadd.f32 %v2872_v2, %v19294_v9 }
0x2863   :  { %13548 = vmatpush3.bf16.xpose.msk.msra.mxu0 %vm19288_vm10, %v13546_v59  ;;  %v5464_v59 = vrot.slane %v16913_v63, %v14937_v46 }
0x2864   :  { %13557 = vmatprep.subr.bf16.mxu0 %v18914_v17 }
0x286a   :  { %12090 = vmatmul.mubr.msk.f32.vlgmr.msra.gmra.mrb[58].mxu0 %vm19289_vm14, %v16864_v8  ;;  %vm19295_vm14 = vmmov %vm19275_vm4 }
0x286b   :  { %12111 = vmatprep.mubr.msk.f32.mxu0 %vm19064_vm3, %v18882_v38 }
0x293d   :  { %v5426_v26 = vpop.f32.mrb[58].mxu0 }
0x293e   :  { %v5431_v51 = vmul.f32 %v5430_v0, %v5426_v26  ;;  %v12091_v53 = vpop.f32.mrb[59].mxu0  ;;  %v5469_v0 = vstv %s9673_s25 }
0x2940   :  { %v5432_v1 = vadd.f32 %v5431_v51, %v16864_v8 }
0x2942   :  { %v5438_v6 = vmul.f32 %v5437_v10, %v5432_v1 }
0x2944   :  { %v16899_v13 = vadd.f32 %v5439_v60, %v5438_v6 }
0x2946   :  { %v5444_v21 = vrot.slane %v16899_v13, %v14937_v46 }
0x2948   :  { %v5446_v32 = vmul.f32 %v15419_v42, %v5444_v21  ;;  %v5445_v52 = vmul.f32 %v15422_v50, %v5444_v21  ;;  %v5448_v37 = vmul.f32 %v15452_v35, %v5444_v21  ;;  %v5447_v54 = vmul.f32 %v15432_v56, %v5444_v21 }
0x294a   :  { %v5452_v28 = vsel %vm19290_vm15, %v5446_v32, 0.0  ;;  %v5449_v3 = vsel %vm19275_vm4, %v5445_v52, 0.0  ;;  %v5458_v8 = vsel %vm19291_vm8, %v5448_v37, 0.0  ;;  %v5455_v45 = vsel %vm19292_vm11, %v5447_v54, 0.0  ;;  %vm19296_vm15 = vmmov %vm19275_vm4 }
0x294b   :  { %5453 = vadd.xlane.f32.xlu0 %v5452_v28  ;;  %5450 = vadd.xlane.f32.xlu1 %v5449_v3  ;;  %vm19297_vm8 = vmmov %vm19275_vm4 }
0x294c   :  { %vm19298_vm11 = vmmov %vm19275_vm4 }
0x294f   :  { %5459 = vadd.xlane.f32.xlu0 %v5458_v8  ;;  %5456 = vadd.xlane.f32.xlu1 %v5455_v45 }
0x29d8   :  { %v5454_v26 = vpop.xlane.xlu0 %5453  ;;  %v5451_v51 = vpop.xlane.xlu1 %5450 }
0x29d9   :  { %v5466_v53 = vmul.f32 %v5464_v59, %v5454_v26  ;;  %v5465_v10 = vmul.f32 %v5464_v59, %v5451_v51 }
0x29db   :  { %v5471_v1 = vmul.f32 %v5469_v0, %v5466_v53  ;;  %v5470_v60 = vmul.f32 %v5469_v0, %v5465_v10 }
0x29dc   :  { %v5460_v6 = vpop.xlane.xlu0 %5459  ;;  %v5457_v21 = vpop.xlane.xlu1 %5456 }
0x29dd   :  { %v5468_v32 = vmul.f32 %v5464_v59, %v5460_v6  ;;  %v5467_v52 = vmul.f32 %v5464_v59, %v5457_v21  ;;  %v5475_v28 = vadd.f32 %v5471_v1, %v19276_v34  ;;  %v5474_v3 = vadd.f32 %v5470_v60, %v19277_v62 }
0x29df   :  { %v5473_v37 = vmul.f32 %v5469_v0, %v5468_v32  ;;  %v5472_v54 = vmul.f32 %v5469_v0, %v5467_v52  ;;  %v5481_v8 = vsel %vm19295_vm14, %v5475_v28, -inf  ;;  %v5478_v45 = vsel %vm19296_vm15, %v5474_v3, -inf  ;;  %vm19299_vm14 = vmmov %vm19275_vm4 }
0x29e0   :  { %5482 = vmax.xlane.f32.xlu0 %v5481_v8  ;;  %5479 = vmax.xlane.f32.xlu1 %v5478_v45  ;;  %vm19300_vm15 = vmmov %vm19275_vm4  ;;  %v57_v8 = vld [vmem:[%s18377_s3 + $0x60] sm:$0xff]  ;;  %v58_v45 = vld [vmem:[%s18377_s3 + $0x68] sm:$0xff] }
0x29e1   :  { %v5477_v33 = vadd.f32 %v5473_v37, %v19282_v57  ;;  %v5476_v43 = vadd.f32 %v5472_v54, %v19280_v12 }
0x29e3   :  { %v5487_v2 = vsel %vm19275_vm4, %v5477_v33, -inf  ;;  %v5484_v9 = vsel %vm19297_vm8, %v5476_v43, -inf }
0x29e4   :  { %5488 = vmax.xlane.f32.xlu0 %v5487_v2  ;;  %5485 = vmax.xlane.f32.xlu1 %v5484_v9  ;;  %v91_v2 = vld [vmem:[%s18380_s6 + $0x20] sm:$0xff] }
0x29e5   :  { %v103_v9 = vld [vmem:[%s18382_s8 + $0x4] sm:$0x1] }
0x2a6d   :  { %v5483_v34 = vpop.xlane.xlu0 %5482  ;;  %v5480_v62 = vpop.xlane.xlu1 %5479 }
0x2a6e   :  { %v5491_v59 = vsub.f32 %v5475_v28, %v5483_v34  ;;  %v5490_v0 = vsub.f32 %v5474_v3, %v5480_v62  ;;  %v19301_v34 = vld [vmem:[#allocation94_spill] sm:$0xff]  ;;  %v19303_v62 = vld [vmem:[#allocation5_spill] sm:$0xff] }
0x2a6f   :  { %vm19302_vm8 = vnez %v19301_v34 }
0x2a70   :  { %v5496_v26 = vmul.f32 1.442695, %v5491_v59  ;;  %v5494_v51 = vmul.f32 1.442695, %v5490_v0  ;;  %v19304_v59 = vld [vmem:[#allocation13_spill] sm:$0xff] }
0x2a71   :  { %v5489_v53 = vpop.xlane.xlu0 %5488  ;;  %v5486_v10 = vpop.xlane.xlu1 %5485  ;;  %v19306_v0 = vld [vmem:[#allocation93_spill] sm:$0xff] }
0x2a72   :  { %14136 = vpow2.f32 %v5496_v26  ;;  %v5493_v1 = vsub.f32 %v5477_v33, %v5489_v53  ;;  %v5492_v60 = vsub.f32 %v5476_v43, %v5486_v10  ;;  %v59_v33 = vld [vmem:[%s18377_s3 + $0x70] sm:$0xff]  ;;  %v67_v43 = vld [vmem:[%s18378_s4 + $0x20] sm:$0xff] }
0x2a73   :  { %14138 = vpow2.f32 %v5494_v51  ;;  %v19308_v26 = vld [vmem:[#allocation7_spill] sm:$0xff] }
0x2a74   :  { %v5500_v57 = vmul.f32 1.442695, %v5493_v1  ;;  %v5498_v12 = vmul.f32 1.442695, %v5492_v60 }
0x2a76   :  { %14140 = vpow2.f32 %v5500_v57 }
0x2a77   :  { %14142 = vpow2.f32 %v5498_v12 }
0x2a7c   :  { %v14137_v6 = vpop.eup %14136 }
0x2a7d   :  { %v14139_v21 = vpop.eup %14138  ;;  %v5505_v32 = vsel %vm19298_vm11, %v14137_v6, 0.0  ;;  %vm19305_vm11 = vcmp.eq.s32.totalorder %v19303_v62, %v19304_v59 }
0x2a7e   :  { %5506 = vadd.xlane.f32.xlu0 %v5505_v32  ;;  %v5502_v52 = vsel %vm19299_vm14, %v14139_v21, 0.0  ;;  %vm5614_vm14 = vmand %vm19305_vm11, %vm19302_vm8 }
0x2a7f   :  { %5503 = vadd.xlane.f32.xlu1 %v5502_v52 }
0x2a80   :  { %v14141_v28 = vpop.eup %14140 }
0x2a81   :  { %v14143_v3 = vpop.eup %14142  ;;  %v5511_v37 = vsel %vm19300_vm15, %v14141_v28, 0.0  ;;  %vm19307_vm15 = vnez %v19306_v0 }
0x2a82   :  { %5512 = vadd.xlane.f32.xlu0 %v5511_v37  ;;  %v5508_v54 = vsel %vm19275_vm4, %v14143_v3, 0.0  ;;  %vm19309_vm4 = vcmp.eq.s32.totalorder %v19308_v26, %v19304_v59 }
0x2a83   :  { %5509 = vadd.xlane.f32.xlu1 %v5508_v54  ;;  %vm5615_vm1 = vmand %vm19309_vm4, %vm19307_vm15 }
0x2a84   :  { %vm13558_vm2 = vmpackc.low %vm5615_vm1, %vm5614_vm14  ;;  %vm19310_vm1 = vcmask 261120  }
0x2a85   :  { %13559 = vmatpush3.bf16.msk.msra.mxu0 %vm13558_vm2, %v18918_v47 }
0x2a86   :  { %13560 = vmatprep.subr.bf16.mxu0 %v18914_v17 }
0x2a94   :  { %5889 = vperm.xlu1 %13999, %v57_v8  }
0x2a98   :  { %5894 = vperm.xlu1 %13999, %v58_v45   ;;  %5899 = vperm.xlu0 %13998, %v59_v33  }
0x2a9c   :  { %6058 = vperm.xlu1 %13999, %v67_v43   ;;  %6301 = vperm.xlu0 %13998, %v91_v2  }
0x2aa0   :  { %6530 = vperm.xlu1 %13999, %v103_v9  }
0x2b0b   :  { %v5507_v51 = vpop.xlane.xlu0 %5506 }
0x2b0c   :  { %14144 = vrcp.f32 %v5507_v51  ;;  %v5504_v53 = vpop.xlane.xlu1 %5503 }
0x2b0d   :  { %14146 = vrcp.f32 %v5504_v53  ;;  %v19319_v53 = vld [vmem:[#allocation6_spill] sm:$0xff] }
0x2b0f   :  { %v5513_v10 = vpop.xlane.xlu0 %5512 }
0x2b10   :  { %14148 = vrcp.f32 %v5513_v10  ;;  %v5510_v1 = vpop.xlane.xlu1 %5509 }
0x2b11   :  { %14150 = vrcp.f32 %v5510_v1 }
0x2b16   :  { %v14145_v60 = vpop.eup %14144 }
0x2b17   :  { %v14147_v57 = vpop.eup %14146  ;;  %v5519_v12 = vmul.f32 %v14145_v60, %v14137_v6  ;;  %v19311_v6 = vld [vmem:[#allocation97_spill] sm:$0xff] }
0x2b18   :  { %v5518_v32 = vmul.f32 %v14147_v57, %v14139_v21  ;;  %vm19312_vm2 = vnez %v19311_v6  ;;  %v19313_v21 = vld [vmem:[#allocation9_spill] sm:$0xff] }
0x2b19   :  { %vm19314_vm8 = vcmp.eq.s32.totalorder %v19313_v21, %v19304_v59  ;;  %v5711_v10 = vmul.u32 2, %v19313_v21 }
0x2b1a   :  { %v14149_v52 = vpop.eup %14148  ;;  %v13550_v37 = vpack.c.bf16 %v5519_v12, %v5518_v32  ;;  %vm5616_vm11 = vmand %vm19314_vm8, %vm19312_vm2  ;;  %v19322_v32 = vmov 0 }
0x2b1b   :  { %v14151_v54 = vpop.eup %14150  ;;  %v5521_v8 = vmul.f32 %v14149_v52, %v14141_v28  ;;  %v19315_v28 = vld [vmem:[#allocation99_spill] sm:$0xff]  ;;  %v5727_v57 = vadd.s32 1, %v5711_v10  ;;  %v7225_v52 = vstv %s9798_s22 }
0x2b1c   :  { %13552 = vmatpush3.bf16.xpose.msk.msra.mxu1 %vm19288_vm10, %v13550_v37  ;;  %v5520_v45 = vmul.f32 %v14151_v54, %v14143_v3  ;;  %vm19316_vm14 = vnez %v19315_v28  ;;  %v19317_v3 = vld [vmem:[#allocation10_spill] sm:$0xff]  ;;  %v19437_v54 = vld [vmem:[#allocation24_spill] sm:$0xff] }
0x2b1d   :  { %13553 = vmatprep.subr.bf16.mxu1 %v18914_v17  ;;  %vm19318_vm15 = vcmp.eq.s32.totalorder %v19317_v3, %v19304_v59  ;;  %v5710_v59 = vmul.u32 2, %v19308_v26  ;;  %v5712_v1 = vmul.u32 2, %v19317_v3 }
0x2b1e   :  { %v13554_v33 = vpack.c.bf16 %v5521_v8, %v5520_v45  ;;  %vm5617_vm4 = vmand %vm19318_vm15, %vm19316_vm14  ;;  %v5703_v45 = vstv %s9680_s2 }
0x2b1f   :  { %v5726_v51 = vadd.s32 1, %v5710_v59  ;;  %v5728_v12 = vadd.s32 1, %v5712_v1 }
0x2b21   :  { %vm5730_vm2 = vcmp.eq.s32.totalorder %v19319_v53, %v5726_v51  ;;  %vm5732_vm14 = vcmp.eq.s32.totalorder %v19319_v53, %v5728_v12  ;;  %v5890_v12 = vpop.permute.xlu1 %5889 }
0x2b24   :  { %13556 = vmatpush3.bf16.xpose.msk.msra.mxu1 %vm19288_vm10, %v13554_v33  ;;  %vm13561_vm10 = vmpackc.low %vm5617_vm4, %vm5616_vm11  ;;  %vm5731_vm11 = vcmp.eq.s32.totalorder %v19319_v53, %v5727_v57  ;;  %v5705_v33 = vstv %s9682_s16 }
0x2b25   :  { %13563 = vmatprep.subr.bf16.mxu1 %v18914_v17  ;;  %13562 = vmatpush3.bf16.msk.msra.mxu0 %vm13561_vm10, %v18918_v47  ;;  %vm17020_vm15 = vmpackc.low %vm5732_vm14, %vm5731_vm11  ;;  %vm17048_vm11 = vcmp.eq.s32.totalorder %v19319_v53, %v5712_v1 }
0x2b26   :  { %13575 = vmatprep.subr.bf16.mxu0 %v18914_v17  ;;  %v19323_v32 = vsel %vm17020_vm15, 4294967295, %v19322_v32 }
0x2b2b   :  { %12101 = vmatmul.mubr.msk.f32.vlgmr.msra.gmra.mrb[62].mxu1 %vm19310_vm1, %v16913_v63  ;;  %v5607_v63 = vstv %s9674_s15 }
0x2b2c   :  { %12122 = vmatprep.mubr.msk.f32.mxu1 %vm19064_vm3, %v18882_v38 }
0x2bfe   :  { %v5603_v43 = vpop.f32.mrb[62].mxu1 }
0x2bff   :  { %v5608_v2 = vmul.f32 %v5607_v63, %v5603_v43  ;;  %v12102_v9 = vpop.f32.mrb[63].mxu1 }
0x2c00   :  { %v5628_v9 = vstv %s9683_s17 }
0x2c01   :  { %v16982_v34 = vadd.f32 %v5608_v2, %v16899_v13  ;;  %v5709_v13 = vmul.u32 2, %v19303_v62 }
0x2c03   :  { %12112 = vmatmul.mubr.msk.f32.vlgmr.msra.gmra.mrb[60].mxu0 %vm19310_vm1, %v16982_v34  ;;  %v5725_v0 = vadd.s32 1, %v5709_v13  ;;  %vm17029_vm4 = vcmp.eq.s32.totalorder %v19319_v53, %v5709_v13  ;;  %vm17034_vm1 = vcmp.eq.s32.totalorder %v19319_v53, %v5710_v59  ;;  %v5706_v63 = vmul.f32 %v5705_v33, %v16982_v34 }
0x2c04   :  { %13577 = vmatpush3.bf16.msk.msra.mxu0 %vm19221_vm5, %v18918_v47  ;;  %12152 = vmatprep.mubr.msk.f32.mxu0 %vm19064_vm3, %v18882_v38  ;;  %v5626_v59 = vstv %s9681_s18  ;;  %vm19333_vm14 = vmpackc.low %vm17034_vm1, %vm17029_vm4 }
0x2c05   :  { %13578 = vmatprep.subr.bf16.mxu0 %v18914_v17  ;;  %vm5729_vm10 = vcmp.eq.s32.totalorder %v19319_v53, %v5725_v0  ;;  %v5627_v0 = vmul.f32 %v5626_v59, %v16982_v34 }
0x2c06   :  { %vm17010_vm8 = vmpackc.low %vm5730_vm2, %vm5729_vm10  ;;  %vm17043_vm2 = vcmp.eq.s32.totalorder %v19319_v53, %v5711_v10  ;;  %vm19332_vm10 = vcmask 261120  }
0x2c07   :  { %13565 = vmatpush3.bf16.msk.msra.mxu1 %vm17010_vm8, %v18918_v47  ;;  %v5629_v51 = vadd.f32 %v5628_v9, %v5627_v0 }
0x2c08   :  { %13580 = vmatpush3.bf16.msk.msra.mxu0 %vm19222_vm7, %v18918_v47  ;;  %13566 = vmatprep.subr.bf16.mxu1 %v18914_v17 }
0x2c09   :  { %13581 = vmatprep.subr.bf16.mxu0 %v18914_v17 }
0x2c0b   :  { %13568 = vmatpush3.bf16.msk.msra.mxu1 %vm17020_vm15, %v18918_v47  ;;  %vm19335_vm15 = vcmask 261120  }
0x2c0c   :  { %13583 = vmatpush3.bf16.msk.msra.mxu0 %vm19223_vm12, %v18918_v47  ;;  %13569 = vmatprep.subr.bf16.mxu1 %v18914_v17 }
0x2c0d   :  { %13584 = vmatprep.subr.bf16.mxu0 %v18914_v17 }
0x2c10   :  { %13586 = vmatpush3.bf16.msk.msra.mxu0 %vm19224_vm0, %v18918_v47 }
0x2c11   :  { %12174 = vmatprep.subr.mxu0 %v18882_v38 }
0x2cd6   :  { %v5699_v6 = vpop.f32.mrb[60].mxu0 }
0x2cd7   :  { %v5704_v28 = vmul.f32 %v5703_v45, %v5699_v6  ;;  %v12113_v43 = vpop.f32.mrb[61].mxu0  ;;  %v5900_v45 = vpop.permute.xlu0 %5899 }
0x2cd9   :  { %v5707_v2 = vadd.f32 %v5706_v63, %v5704_v28  ;;  %v5895_v28 = vpop.permute.xlu1 %5894 }
0x2cdb   :  { %v5708_v13 = vadd.f32 %v5707_v2, %v5628_v9 }
0x2cdd   :  { %12123 = vmatmul.mubr.msk.f32.vlgmr.msra.gmra.mrb[64].mxu1 %vm19332_vm10, %v5708_v13  ;;  %vm19334_vm10 = vmpackc.low %vm17048_vm11, %vm17043_vm2 }
0x2cde   :  { %13571 = vmatpush3.bf16.msk.msra.mxu1 %vm19333_vm14, %v18918_v47  ;;  %12133 = vmatprep.mubr.msk.f32.mxu1 %vm19064_vm3, %v18882_v38  ;;  %vm19337_vm14 = vcmask 523264  }
0x2cdf   :  { %13572 = vmatprep.subr.bf16.mxu1 %v18914_v17 }
0x2ce2   :  { %13574 = vmatpush3.bf16.msk.msra.mxu1 %vm19334_vm10, %v18918_v47  ;;  %vm19338_vm10 = vmmov %vm19337_vm14 }
0x2ce3   :  { %13587 = vmatprep.subr.bf16.mxu1 %v18914_v17 }
0x2ce5   :  { %12134 = vmatmul.mubr.msk.f32.vlgmr.msra.gmra.mrb[64].mxu1 %vm19335_vm15, %v5629_v51  ;;  %vm19336_vm15 = vnez %v19033_v19  ;;  %v6059_v51 = vpop.permute.xlu1 %6058 }
0x2ce6   :  { %13589 = vmatpush3.bf16.msk.msra.mxu1 %vm19246_vm6, %v18918_v47  ;;  %12171 = vmatprep.mubr.msk.f32.mxu1 %vm19064_vm3, %v18882_v38 }
0x2ce7   :  { %13590 = vmatprep.subr.bf16.mxu1 %v18914_v17 }
0x2cea   :  { %13592 = vmatpush3.bf16.msk.msra.mxu1 %vm19247_vm13, %v18918_v47 }
0x2ceb   :  { %13593 = vmatprep.subr.bf16.mxu1 %v18914_v17 }
0x2cee   :  { %13595 = vmatpush3.bf16.msk.msra.mxu1 %vm19248_vm9, %v18918_v47 }
0x2cef   :  { %13596 = vmatprep.subr.bf16.mxu1 %v18914_v17 }
0x2cf2   :  { %13598 = vmatpush3.bf16.msk.msra.mxu1 %vm19336_vm15, %v18918_v47 }
0x2cf3   :  { %13611 = vmatprep.subr.bf16.mxu1 %v18914_v17 }
0x2db8   :  { %v17094_v10 = vpop.f32.mrb[64].mxu1 }
0x2db9   :  { %v5905_v1 = vrot.slane %v17094_v10, %v14937_v46  ;;  %v12135_v57 = vpop.f32.mrb[65].mxu1 }
0x2dbb   :  { %v5906_v33 = vmul.f32 %v5905_v1, %v5890_v12  ;;  %v5908_v6 = vmul.f32 %v5905_v1, %v5900_v45  ;;  %v5907_v63 = vmul.f32 %v5905_v1, %v5895_v28  ;;  %v81_v45 = vld [vmem:[%s18379_s5 + $0x60] sm:$0xff]  ;;  %v82_v1 = vld [vmem:[%s18379_s5 + $0x68] sm:$0xff] }
0x2dbd   :  { %12153 = vmatmul.mubr.msk.f32.vlgmr.msra.gmra.mrb[62].mxu0 %vm19337_vm14, %v5906_v33  ;;  %12172 = vmatmul.mubr.msk.f32.vlgmr.msra.gmra.mrb[66].mxu1 %vm19338_vm10, %v5908_v6  ;;  %vm19339_vm14 = vcmask 64512   ;;  %v83_v33 = vld [vmem:[%s18379_s5 + $0x70] sm:$0xff] }
0x2dbe   :  { %12176 = vmatprep.mubr.msk.f32.mxu0 %vm19064_vm3, %v18882_v38  ;;  %13613 = vmatpush3.bf16.msk.msra.mxu1 %vm19246_vm6, %v18918_v47  ;;  %vm19340_vm10 = vmmov %vm19339_vm14 }
0x2dbf   :  { %13614 = vmatprep.subr.bf16.mxu1 %v18914_v17  ;;  %12220 = vmatprep.mubr.msk.f32.mxu1 %vm19064_vm3, %v18882_v38 }
0x2dc2   :  { %13616 = vmatpush3.bf16.msk.msra.mxu1 %vm19247_vm13, %v18918_v47 }
0x2dc3   :  { %13617 = vmatprep.subr.bf16.mxu1 %v18914_v17 }
0x2dc6   :  { %13619 = vmatpush3.bf16.msk.msra.mxu1 %vm19248_vm9, %v18918_v47 }
0x2dc7   :  { %13620 = vmatprep.subr.bf16.mxu1 %v18914_v17 }
0x2dca   :  { %13622 = vmatpush3.bf16.msk.msra.mxu1 %vm19336_vm15, %v18918_v47 }
0x2dcb   :  { %13635 = vmatprep.subr.bf16.mxu1 %v18914_v17 }
0x2e90   :  { %v5978_v43 = vpop.f32.mrb[62].mxu0  ;;  %v6051_v2 = vpop.f32.mrb[66].mxu1 }
0x2e91   :  { %v5979_v9 = vadd.f32 %v5978_v43, %v5907_v63  ;;  %v12154_v13 = vpop.f32.mrb[63].mxu0  ;;  %v12173_v59 = vpop.f32.mrb[67].mxu1 }
0x2e93   :  { %v6055_v0 = vadd.f32 %v6051_v2, %v5979_v9 }
0x2e95   :  { %v6061_v57 = vadd.f32 %v6059_v51, %v6055_v0 }
0x2e97   :  { %v6062_v12 = vmax.f32 %v6061_v57, 0.0 }
0x2e99   :  { %12175 = vmatpush3.msra.mxu0 %v6062_v12 }
0x2e9a   :  { %12177 = vmatmul.mubr.msk.f32.vlgmr.msra.gmra.mrb[64].mxu0 %vm19339_vm14, %v81_v45  ;;  %13599 = vmatprep.subr.bf16.mxu0 %v18914_v17  ;;  %vm19341_vm14 = vmmov %vm19340_vm10  ;;  %v6302_v45 = vpop.permute.xlu0 %6301 }
0x2e9b   :  { %12179 = vmatprep.mubr.msk.f32.mxu0 %vm19064_vm3, %v18882_v38  ;;  %13601 = vmatpush3.bf16.msk.msra.mxu0 %vm19221_vm5, %v18918_v47 }
0x2e9c   :  { %13602 = vmatprep.subr.bf16.mxu0 %v18914_v17 }
0x2e9e   :  { %12180 = vmatmul.mubr.msk.f32.gmra.mrb[66].mxu0 %vm19340_vm10, %v82_v1  ;;  %vm19342_vm10 = vcmask 523264  }
0x2e9f   :  { %12182 = vmatprep.mubr.msk.f32.mxu0 %vm19064_vm3, %v18882_v38  ;;  %13604 = vmatpush3.bf16.msk.msra.mxu0 %vm19222_vm7, %v18918_v47 }
0x2ea0   :  { %13605 = vmatprep.subr.bf16.mxu0 %v18914_v17 }
0x2ea2   :  { %12183 = vmatmul.mubr.msk.f32.gmra.mrb[68].mxu0 %vm19341_vm14, %v83_v33  ;;  %vm19343_vm14 = vmmov %vm19342_vm10 }
0x2ea3   :  { %13607 = vmatpush3.bf16.msk.msra.mxu0 %vm19223_vm12, %v18918_v47  ;;  %12201 = vmatprep.mubr.msk.f32.mxu0 %vm19064_vm3, %v18882_v38 }
0x2ea4   :  { %13608 = vmatprep.subr.bf16.mxu0 %v18914_v17 }
0x2ea7   :  { %13610 = vmatpush3.bf16.msk.msra.mxu0 %vm19224_vm0, %v18918_v47 }
0x2ea8   :  { %12223 = vmatprep.subr.mxu0 %v18882_v38 }
0x2f6d   :  { %v6138_v6 = vpop.f32.mrb[64].mxu0 }
0x2f6e   :  { %v12178_v28 = vpop.f32.mrb[65].mxu0  ;;  %12202 = vmatmul.mubr.msk.f32.vlgmr.msra.gmra.mrb[70].mxu0 %vm19342_vm10, %v6138_v6  ;;  %v97_v6 = vld [vmem:[%s18381_s7 + $0x10] sm:$0x7]  ;;  %vm19344_vm10 = vcmask 64512  }
0x2f6f   :  { %12225 = vmatprep.mubr.msk.f32.mxu0 %vm19064_vm3, %v18882_v38 }
0x2f71   :  { %v6143_v63 = vpop.f32.mrb[66].mxu0 }
0x2f72   :  { %v12181_v43 = vpop.f32.mrb[67].mxu0 }
0x2f75   :  { %v6148_v2 = vpop.f32.mrb[68].mxu0 }
0x2f76   :  { %v12184_v9 = vpop.f32.mrb[69].mxu0  ;;  %12221 = vmatmul.mubr.msk.f32.vlgmr.msra.gmra.mrb[68].mxu1 %vm19343_vm14, %v6148_v2 }
0x2f77   :  { %13637 = vmatpush3.bf16.msk.msra.mxu1 %vm19246_vm6, %v18918_v47  ;;  %12263 = vmatprep.mubr.msk.f32.mxu1 %vm19064_vm3, %v18882_v38 }
0x2f78   :  { %13638 = vmatprep.subr.bf16.mxu1 %v18914_v17 }
0x2f7b   :  { %13640 = vmatpush3.bf16.msk.msra.mxu1 %vm19247_vm13, %v18918_v47 }
0x2f7c   :  { %13641 = vmatprep.subr.bf16.mxu1 %v18914_v17 }
0x2f7f   :  { %13643 = vmatpush3.bf16.msk.msra.mxu1 %vm19248_vm9, %v18918_v47 }
0x2f80   :  { %13644 = vmatprep.subr.bf16.mxu1 %v18914_v17 }
0x2f83   :  { %13646 = vmatpush3.bf16.msk.msra.mxu1 %vm19336_vm15, %v18918_v47 }
0x2f84   :  { %13659 = vmatprep.subr.bf16.mxu1 %v18914_v17 }
0x3041   :  { %v6221_v13 = vpop.f32.mrb[70].mxu0 }
0x3042   :  { %v6222_v59 = vadd.f32 %v6221_v13, %v6143_v63  ;;  %v12203_v0 = vpop.f32.mrb[71].mxu0 }
0x3049   :  { %v6294_v51 = vpop.f32.mrb[68].mxu1 }
0x304a   :  { %v6298_v57 = vadd.f32 %v6294_v51, %v6222_v59  ;;  %v12222_v12 = vpop.f32.mrb[69].mxu1 }
0x304c   :  { %v6304_v1 = vadd.f32 %v6302_v45, %v6298_v57 }
0x304e   :  { %v6305_v33 = vmax.f32 %v6304_v1, 0.0 }
0x3050   :  { %12224 = vmatpush3.msra.mxu0 %v6305_v33 }
0x3051   :  { %12226 = vmatmul.mubr.msk.f32.vlgmr.msra.gmra.mrb[72].mxu0 %vm19344_vm10, %v97_v6  ;;  %13623 = vmatprep.subr.bf16.mxu0 %v18914_v17  ;;  %v6694_v6 = vstv %s9771_s0 }
0x3052   :  { %13625 = vmatpush3.bf16.msk.msra.mxu0 %vm19221_vm5, %v18918_v47  ;;  %12244 = vmatprep.mubr.msk.f32.mxu0 %vm19064_vm3, %v18882_v38  ;;  %vm19345_vm5 = vmmov %vm19343_vm14 }
0x3053   :  { %13626 = vmatprep.subr.bf16.mxu0 %v18914_v17 }
0x3056   :  { %13628 = vmatpush3.bf16.msk.msra.mxu0 %vm19222_vm7, %v18918_v47  ;;  %vm19346_vm7 = vmmov %vm19345_vm5 }
0x3057   :  { %13629 = vmatprep.subr.bf16.mxu0 %v18914_v17 }
0x305a   :  { %13631 = vmatpush3.bf16.msk.msra.mxu0 %vm19223_vm12, %v18918_v47  ;;  %vm19347_vm12 = vmmov %vm19345_vm5 }
0x305b   :  { %13632 = vmatprep.subr.bf16.mxu0 %v18914_v17 }
0x305e   :  { %13634 = vmatpush3.bf16.msk.msra.mxu0 %vm19224_vm0, %v18918_v47  ;;  %vm19348_vm0 = vmmov %vm19345_vm5 }
0x305f   :  { %13647 = vmatprep.subr.bf16.mxu0 %v18914_v17  ;;  %vm19349_vm14 = vmmov %vm19348_vm0 }
0x3060   :  { %vm19350_vm10 = vmmov %vm19348_vm0 }
0x3124   :  { %v6375_v23 = vpop.f32.mrb[72].mxu0 }
0x3125   :  { %v6454_v28 = vrot.slane %v6375_v23, 2  ;;  %v12227_v63 = vpop.f32.mrb[73].mxu0  ;;  %12245 = vmatmul.mubr.msk.f32.vlgmr.msra.gmra.mrb[74].mxu0 %vm19345_vm5, %v6375_v23  ;;  %v6380_v25 = vrot.slane %v6375_v23, 1  ;;  %vm19351_vm5 = vmmov %vm19348_vm0 }
0x3126   :  { %13649 = vmatpush3.bf16.msra.mxu0 %v15536_v20  ;;  %12282 = vmatprep.mubr.msk.f32.mxu0 %vm19064_vm3, %v18882_v38 }
0x3127   :  { %12264 = vmatmul.mubr.msk.f32.vlgmr.msra.gmra.mrb[70].mxu1 %vm19346_vm7, %v6454_v28  ;;  %13650 = vmatprep.subr.bf16.mxu0 %v18914_v17  ;;  %v6696_v28 = vstv %s9772_s27  ;;  %vm19352_vm7 = vmmov %vm19348_vm0 }
0x3128   :  { %13661 = vmatpush3.bf16.msra.mxu1 %v15536_v20  ;;  %12301 = vmatprep.mubr.msk.f32.mxu1 %vm19064_vm3, %v18882_v38 }
0x3129   :  { %13662 = vmatprep.subr.bf16.mxu1 %v18914_v17 }
0x312a   :  { %13652 = vmatpush3.bf16.msra.mxu0 %v15607_v55 }
0x312b   :  { %13653 = vmatprep.subr.bf16.mxu0 %v18914_v17 }
0x312c   :  { %13664 = vmatpush3.bf16.msra.mxu1 %v15607_v55  ;;  %v6531_v55 = vpop.permute.xlu1 %6530 }
0x312d   :  { %13665 = vmatprep.subr.bf16.mxu1 %v18914_v17  ;;  %v6536_v2 = vrot.slane %v6531_v55, %v14937_v46 }
0x312e   :  { %13655 = vmatpush3.bf16.msra.mxu0 %v15654_v58 }
0x312f   :  { %13656 = vmatprep.subr.bf16.mxu0 %v18914_v17 }
0x3130   :  { %13667 = vmatpush3.bf16.msra.mxu1 %v15654_v58 }
0x3131   :  { %13668 = vmatprep.subr.bf16.mxu1 %v18914_v17 }
0x3132   :  { %13658 = vmatpush3.bf16.msra.mxu0 %v15679_v7 }
0x3133   :  { %13671 = vmatprep.subr.bf16.mxu0 %v18914_v17 }
0x3134   :  { %13670 = vmatpush3.bf16.msra.mxu1 %v15679_v7 }
0x3135   :  { %13687 = vmatprep.subr.bf16.mxu1 %v18914_v17 }
0x31f8   :  { %v6450_v20 = vpop.f32.mrb[74].mxu0 }
0x31f9   :  { %v6451_v61 = vadd.f32 %v6450_v20, %v6380_v25  ;;  %v12246_v18 = vpop.f32.mrb[75].mxu0 }
0x31fa   :  { %v6523_v43 = vpop.f32.mrb[70].mxu1 }
0x31fb   :  { %v6527_v9 = vadd.f32 %v6523_v43, %v6451_v61  ;;  %v12265_v58 = vpop.f32.mrb[71].mxu1 }
0x31fd   :  { %v6537_v13 = vadd.f32 %v6536_v2, %v6527_v9 }
0x31ff   :  { %v6538_v59 = vadd.f32 %v6537_v13, %v17094_v10 }
0x3201   :  { %12283 = vmatmul.mubr.msk.f32.vlgmr.msra.gmra.mrb[76].mxu0 %vm19347_vm12, %v6538_v59  ;;  %vm19353_vm12 = vmmov %vm19348_vm0 }
0x3202   :  { %12320 = vmatprep.mubr.msk.f32.mxu0 %vm19064_vm3, %v18882_v38 }
0x32d4   :  { %v6608_v7 = vpop.f32.mrb[76].mxu0 }
0x32d5   :  { %v6612_v0 = vsub.f32 %v6538_v59, %v6608_v7  ;;  %v12284_v51 = vpop.f32.mrb[77].mxu0 }
0x32d7   :  { %v6613_v57 = vmul.f32 %v6612_v0, %v6612_v0 }
0x32d9   :  { %12302 = vmatmul.mubr.msk.f32.vlgmr.msra.gmra.mrb[72].mxu1 %vm19348_vm0, %v6613_v57 }
0x32da   :  { %12339 = vmatprep.mubr.msk.f32.mxu1 %vm19064_vm3, %v18882_v38 }
0x33ac   :  { %v6683_v12 = vpop.f32.mrb[72].mxu1 }
0x33ad   :  { %v6684_v45 = vadd.f32 1e-05, %v6683_v12  ;;  %v12303_v1 = vpop.f32.mrb[73].mxu1 }
0x33af   :  { %14152 = vrsqrt.f32 %v6684_v45 }
0x33b9   :  { %v14153_v10 = vpop.eup %14152 }
0x33ba   :  { %v6688_v33 = vmul.f32 %v14153_v10, %v6612_v0  ;;  %v6742_v10 = vstv %s9773_s28 }
0x33bc   :  { %v6689_v23 = vmax.f32 %v6688_v33, 0.0 }
0x33be   :  { %v6695_v63 = vmul.f32 %v6694_v6, %v6689_v23 }
0x33c0   :  { %v17230_v25 = vadd.f32 %v6696_v28, %v6695_v63 }
0x33c2   :  { %v17234_v55 = vrot.slane %v17230_v25, %v14937_v46 }
0x33c4   :  { %v6703_v20 = vmul.f32 %v15419_v42, %v17234_v55  ;;  %v6702_v61 = vmul.f32 %v15422_v50, %v17234_v55  ;;  %v6706_v2 = vmul.f32 %v19190_v4, %v17234_v55  ;;  %v6704_v9 = vmul.f32 %v15432_v56, %v17234_v55 }
0x33c5   :  { %v6708_v59 = vmul.f32 %v19193_v5, %v17234_v55  ;;  %v6705_v7 = vmul.f32 %v15452_v35, %v17234_v55  ;;  %v6707_v57 = vmul.f32 %v19196_v44, %v17234_v55  ;;  %v6709_v45 = vmul.f32 %v19198_v48, %v17234_v55 }
0x33c6   :  { %v6713_v18 = vsel %vm19349_vm14, %v6703_v20, 0.0  ;;  %v6710_v43 = vsel %vm19350_vm10, %v6702_v61, 0.0  ;;  %v6722_v58 = vsel %vm19351_vm5, %v6706_v2, 0.0  ;;  %v6716_v13 = vsel %vm19352_vm7, %v6704_v9, 0.0  ;;  %vm19354_vm14 = vmmov %vm19348_vm0 }
0x33c7   :  { %6714 = vadd.xlane.f32.xlu1 %v6713_v18  ;;  %6711 = vadd.xlane.f32.xlu0 %v6710_v43  ;;  %v6728_v0 = vsel %vm19353_vm12, %v6708_v59, 0.0  ;;  %v6719_v51 = vsel %vm19348_vm0, %v6705_v7, 0.0  ;;  %v6725_v12 = vsel %vm19354_vm14, %v6707_v57, 0.0  ;;  %vm19355_vm10 = vmmov %vm19348_vm0 }
0x33c8   :  { %v6731_v1 = vsel %vm19355_vm10, %v6709_v45, 0.0  ;;  %vm19356_vm5 = vmmov %vm19348_vm0 }
0x33c9   :  { %vm19357_vm7 = vmmov %vm19348_vm0 }
0x33ca   :  { %vm19358_vm12 = vmmov %vm19348_vm0 }
0x33cb   :  { %6723 = vadd.xlane.f32.xlu1 %v6722_v58  ;;  %6717 = vadd.xlane.f32.xlu0 %v6716_v13  ;;  %vm19359_vm14 = vmmov %vm19348_vm0 }
0x33cc   :  { %vm19360_vm10 = vmmov %vm19348_vm0 }
0x33cf   :  { %6729 = vadd.xlane.f32.xlu1 %v6728_v0  ;;  %6720 = vadd.xlane.f32.xlu0 %v6719_v51 }
0x33d3   :  { %6726 = vadd.xlane.f32.xlu0 %v6725_v12 }
0x33d7   :  { %6732 = vadd.xlane.f32.xlu0 %v6731_v1 }
0x3454   :  { %v6715_v33 = vpop.xlane.xlu1 %6714  ;;  %v6712_v6 = vpop.xlane.xlu0 %6711 }
0x3455   :  { %v6735_v23 = vmul.f32 %v6715_v33, %v17234_v55  ;;  %v6734_v28 = vmul.f32 %v6712_v6, %v17234_v55 }
0x3457   :  { %v6744_v63 = vmul.f32 %v6742_v10, %v6735_v23  ;;  %v6743_v20 = vmul.f32 %v6742_v10, %v6734_v28 }
0x3458   :  { %v6724_v61 = vpop.xlane.xlu1 %6723  ;;  %v6718_v18 = vpop.xlane.xlu0 %6717 }
0x3459   :  { %v6738_v43 = vmul.f32 %v6724_v61, %v17234_v55  ;;  %v6736_v2 = vmul.f32 %v6718_v18, %v17234_v55  ;;  %v6752_v9 = vadd.f32 %v6744_v63, %v19199_v29  ;;  %v6751_v58 = vadd.f32 %v6743_v20, %v19200_v31 }
0x345b   :  { %v6747_v13 = vmul.f32 %v6742_v10, %v6738_v43  ;;  %v6745_v59 = vmul.f32 %v6742_v10, %v6736_v2  ;;  %v6762_v7 = vsel %vm19356_vm5, %v6752_v9, -inf  ;;  %v6759_v0 = vsel %vm19357_vm7, %v6751_v58, -inf  ;;  %vm19361_vm5 = vmmov %vm19348_vm0 }
0x345c   :  { %v6730_v51 = vpop.xlane.xlu1 %6729  ;;  %6763 = vmax.xlane.f32.xlu0 %v6762_v7  ;;  %6760 = vmax.xlane.f32.xlu1 %v6759_v0  ;;  %v6721_v57 = vpop.xlane.xlu0 %6720  ;;  %vm19362_vm7 = vmmov %vm19348_vm0 }
0x345d   :  { %v6740_v12 = vmul.f32 %v6730_v51, %v17234_v55  ;;  %v6737_v45 = vmul.f32 %v6721_v57, %v17234_v55  ;;  %v6753_v1 = vadd.f32 %v6745_v59, %v19203_v22  ;;  %v6755_v6 = vadd.f32 %v6747_v13, %v19205_v24 }
0x345f   :  { %v6749_v33 = vmul.f32 %v6742_v10, %v6740_v12  ;;  %v6746_v29 = vmul.f32 %v6742_v10, %v6737_v45  ;;  %v6765_v31 = vsel %vm19358_vm12, %v6753_v1, -inf  ;;  %v6771_v61 = vsel %vm19348_vm0, %v6755_v6, -inf  ;;  %vm19363_vm12 = vmmov %vm19348_vm0 }
0x3460   :  { %6766 = vmax.xlane.f32.xlu1 %v6765_v31  ;;  %v6727_v23 = vpop.xlane.xlu0 %6726 }
0x3461   :  { %v6739_v28 = vmul.f32 %v6727_v23, %v17234_v55  ;;  %v6754_v63 = vadd.f32 %v6746_v29, %v19206_v41  ;;  %v6757_v43 = vadd.f32 %v6749_v33, %v19208_v16 }
0x3463   :  { %v6748_v20 = vmul.f32 %v6742_v10, %v6739_v28  ;;  %v6768_v18 = vsel %vm19359_vm14, %v6754_v63, -inf  ;;  %v6777_v59 = vsel %vm19360_vm10, %v6757_v43, -inf  ;;  %vm19364_vm14 = vmmov %vm19348_vm0 }
0x3464   :  { %6772 = vmax.xlane.f32.xlu1 %v6771_v61  ;;  %6769 = vmax.xlane.f32.xlu0 %v6768_v18  ;;  %v6733_v22 = vpop.xlane.xlu0 %6732  ;;  %vm19365_vm10 = vmmov %vm19348_vm0 }
0x3465   :  { %v6741_v2 = vmul.f32 %v6733_v22, %v17234_v55  ;;  %v6756_v24 = vadd.f32 %v6748_v20, %v19209_v15 }
0x3467   :  { %v6750_v13 = vmul.f32 %v6742_v10, %v6741_v2  ;;  %v6774_v7 = vsel %vm19361_vm5, %v6756_v24, -inf  ;;  %vm19366_vm5 = vmmov %vm19348_vm0 }
0x3468   :  { %6778 = vmax.xlane.f32.xlu1 %v6777_v59  ;;  %6775 = vmax.xlane.f32.xlu0 %v6774_v7 }
0x3469   :  { %v6758_v41 = vadd.f32 %v6750_v13, %v19212_v49 }
0x346b   :  { %v6780_v0 = vsel %vm19362_vm7, %v6758_v41, -inf  ;;  %vm19367_vm7 = vmmov %vm19348_vm0 }
0x346c   :  { %6781 = vmax.xlane.f32.xlu0 %v6780_v0 }
0x34e9   :  { %v6761_v16 = vpop.xlane.xlu1 %6760  ;;  %v6764_v51 = vpop.xlane.xlu0 %6763 }
0x34ea   :  { %v6783_v57 = vsub.f32 %v6751_v58, %v6761_v16  ;;  %v6784_v12 = vsub.f32 %v6752_v9, %v6764_v51 }
0x34ec   :  { %v6791_v45 = vmul.f32 1.442695, %v6783_v57  ;;  %v6793_v55 = vmul.f32 1.442695, %v6784_v12 }
0x34ed   :  { %v6767_v33 = vpop.xlane.xlu1 %6766 }
0x34ee   :  { %14154 = vpow2.f32 %v6791_v45  ;;  %v6785_v15 = vsub.f32 %v6753_v1, %v6767_v33 }
0x34ef   :  { %14156 = vpow2.f32 %v6793_v55 }
0x34f0   :  { %v6795_v10 = vmul.f32 1.442695, %v6785_v15 }
0x34f1   :  { %v6773_v29 = vpop.xlane.xlu1 %6772  ;;  %v6770_v31 = vpop.xlane.xlu0 %6769 }
0x34f2   :  { %14158 = vpow2.f32 %v6795_v10  ;;  %v6787_v23 = vsub.f32 %v6755_v6, %v6773_v29  ;;  %v6786_v28 = vsub.f32 %v6754_v63, %v6770_v31 }
0x34f4   :  { %v6799_v49 = vmul.f32 1.442695, %v6787_v23  ;;  %v6797_v20 = vmul.f32 1.442695, %v6786_v28 }
0x34f5   :  { %v6779_v61 = vpop.xlane.xlu1 %6778  ;;  %v6776_v18 = vpop.xlane.xlu0 %6775 }
0x34f6   :  { %14160 = vpow2.f32 %v6799_v49  ;;  %v6789_v22 = vsub.f32 %v6757_v43, %v6779_v61  ;;  %v6788_v58 = vsub.f32 %v6756_v24, %v6776_v18 }
0x34f7   :  { %14162 = vpow2.f32 %v6797_v20 }
0x34f8   :  { %v14155_v9 = vpop.eup %14154  ;;  %v6803_v2 = vmul.f32 1.442695, %v6789_v22  ;;  %v6801_v13 = vmul.f32 1.442695, %v6788_v58 }
0x34f9   :  { %v14157_v59 = vpop.eup %14156  ;;  %v6782_v1 = vpop.xlane.xlu0 %6781  ;;  %v6807_v7 = vsel %vm19363_vm12, %v14155_v9, 0.0  ;;  %vm19368_vm12 = vmmov %vm19348_vm0 }
0x34fa   :  { %14164 = vpow2.f32 %v6803_v2  ;;  %v6790_v0 = vsub.f32 %v6758_v41, %v6782_v1  ;;  %6808 = vadd.xlane.f32.xlu1 %v6807_v7  ;;  %v6810_v6 = vsel %vm19348_vm0, %v14157_v59, 0.0 }
0x34fb   :  { %14166 = vpow2.f32 %v6801_v13  ;;  %6811 = vadd.xlane.f32.xlu0 %v6810_v6 }
0x34fc   :  { %v14159_v63 = vpop.eup %14158  ;;  %v6805_v16 = vmul.f32 1.442695, %v6790_v0 }
0x34fd   :  { %v6813_v43 = vsel %vm19364_vm14, %v14159_v63, 0.0  ;;  %vm19369_vm14 = vnez %v19061_v30 }
0x34fe   :  { %14168 = vpow2.f32 %v6805_v16  ;;  %6814 = vadd.xlane.f32.xlu1 %v6813_v43 }
0x3500   :  { %v14161_v24 = vpop.eup %14160 }
0x3501   :  { %v14163_v51 = vpop.eup %14162  ;;  %v6819_v57 = vsel %vm19365_vm10, %v14161_v24, 0.0  ;;  %vm19370_vm10 = vmmov %vm19348_vm0 }
0x3502   :  { %6820 = vadd.xlane.f32.xlu1 %v6819_v57  ;;  %v6816_v12 = vsel %vm19366_vm5, %v14163_v51, 0.0  ;;  %vm19375_vm5 = vmmov %vm19348_vm0 }
0x3503   :  { %6817 = vadd.xlane.f32.xlu0 %v6816_v12 }
0x3504   :  { %v14165_v41 = vpop.eup %14164 }
0x3505   :  { %v14167_v45 = vpop.eup %14166  ;;  %v6825_v55 = vsel %vm19367_vm7, %v14165_v41, 0.0  ;;  %vm19376_vm7 = vmmov %vm19348_vm0 }
0x3506   :  { %6826 = vadd.xlane.f32.xlu1 %v6825_v55  ;;  %v6822_v33 = vsel %vm19368_vm12, %v14167_v45, 0.0  ;;  %vm19377_vm12 = vmmov %vm19348_vm0 }
0x3507   :  { %6823 = vadd.xlane.f32.xlu0 %v6822_v33 }
0x3508   :  { %v14169_v15 = vpop.eup %14168 }
0x3509   :  { %v6828_v10 = vsel %vm19348_vm0, %v14169_v15, 0.0 }
0x350b   :  { %6829 = vadd.xlane.f32.xlu0 %v6828_v10 }
0x3587   :  { %v6809_v29 = vpop.xlane.xlu1 %6808 }
0x3588   :  { %14170 = vrcp.f32 %v6809_v29  ;;  %v6812_v31 = vpop.xlane.xlu0 %6811 }
0x3589   :  { %14172 = vrcp.f32 %v6812_v31 }
0x358b   :  { %v6815_v23 = vpop.xlane.xlu1 %6814 }
0x358c   :  { %14174 = vrcp.f32 %v6815_v23 }
0x358f   :  { %v6821_v22 = vpop.xlane.xlu1 %6820 }
0x3590   :  { %v6818_v28 = vpop.xlane.xlu0 %6817 }
0x3591   :  { %14176 = vrcp.f32 %v6818_v28 }
0x3592   :  { %v14171_v49 = vpop.eup %14170 }
0x3593   :  { %v14173_v20 = vpop.eup %14172  ;;  %v6839_v61 = vmul.f32 %v14171_v49, %v14155_v9  ;;  %v6827_v16 = vpop.xlane.xlu1 %6826 }
0x3594   :  { %v6840_v18 = vmul.f32 %v14173_v20, %v14157_v59  ;;  %v6824_v58 = vpop.xlane.xlu0 %6823 }
0x3595   :  { %14178 = vrcp.f32 %v6824_v58 }
0x3596   :  { %v13672_v2 = vpack.c.bf16 %v6840_v18, %v6839_v61  ;;  %14180 = vrcp.f32 %v6821_v22  ;;  %v14175_v13 = vpop.eup %14174 }
0x3597   :  { %v6841_v0 = vmul.f32 %v14175_v13, %v14159_v63 }
0x3598   :  { %13674 = vmatpush3.bf16.xpose.msk.msra.mxu0 %vm19369_vm14, %v13672_v2  ;;  %v6830_v1 = vpop.xlane.xlu0 %6829 }
0x3599   :  { %13675 = vmatprep.subr.bf16.mxu0 %v18914_v17  ;;  %14182 = vrcp.f32 %v6830_v1 }
0x359a   :  { %14184 = vrcp.f32 %v6827_v16 }
0x359b   :  { %v14177_v7 = vpop.eup %14176 }
0x359c   :  { %v6842_v6 = vmul.f32 %v14177_v7, %v14163_v51 }
0x359e   :  { %v13676_v43 = vpack.c.bf16 %v6842_v6, %v6841_v0 }
0x359f   :  { %v14179_v9 = vpop.eup %14178 }
0x35a0   :  { %13678 = vmatpush3.bf16.xpose.msk.msra.mxu0 %vm19369_vm14, %v13676_v43  ;;  %v14181_v59 = vpop.eup %14180  ;;  %v6844_v57 = vmul.f32 %v14179_v9, %v14167_v45  ;;  %v6951_v45 = vstv %s9784_s29  ;;  %v6994_v9 = vrot.slane %v16982_v34, %v14937_v46  ;;  %s9938_s29 = sld [smem:[#allocation2 + $0x22]] }
0x35a1   :  { %13679 = vmatprep.subr.bf16.mxu0 %v18914_v17  ;;  %v6843_v12 = vmul.f32 %v14181_v59, %v14161_v24  ;;  %v19378_v59 = vld [vmem:[#allocation92_spill] sm:$0xff] }
0x35a3   :  { %v13680_v55 = vpack.c.bf16 %v6844_v57, %v6843_v12  ;;  %v14183_v33 = vpop.eup %14182  ;;  %v19379_v57 = vshra.s32 %v19308_v26, 5  ;;  %v19380_v12 = vshra.s32 %v19303_v62, 5 }
0x35a4   :  { %v14185_v63 = vpop.eup %14184  ;;  %v6846_v51 = vmul.f32 %v14183_v33, %v14169_v15 }
0x35a5   :  { %v6845_v10 = vmul.f32 %v14185_v63, %v14165_v41 }
0x35a7   :  { %v13684_v29 = vpack.c.bf16 %v6846_v51, %v6845_v10 }
0x35a8   :  { %13682 = vmatpush3.bf16.xpose.msk.msra.mxu0 %vm19369_vm14, %v13680_v55  ;;  %v7003_v55 = vstv %s9786_s10  ;;  %s9948_s10 = sld [smem:[#allocation2 + $0x24]] }
0x35a9   :  { %13683 = vmatprep.subr.bf16.mxu0 %v18914_v17 }
0x35b0   :  { %13686 = vmatpush3.bf16.xpose.msk.msra.mxu0 %vm19369_vm14, %v13684_v29  ;;  %v19381_v29 = vmov -1e+30  }
0x35b1   :  { %13703 = vmatprep.subr.bf16.mxu0 %v18914_v17 }
0x35b7   :  { %12321 = vmatmul.mubr.msk.f32.vlgmr.msra.gmra.mrb[78].mxu0 %vm19370_vm10, %v17230_v25  ;;  %vm7013_vm10 = vcmp.eq.s32.totalorder %v19379_v57, %v19378_v59 }
0x35b8   :  { %13705 = vmatpush3.bf16.msk.msra.mxu0 %vm19246_vm6, %v18918_v47  ;;  %12358 = vmatprep.mubr.msk.f32.mxu0 %vm19064_vm3, %v18882_v38  ;;  %vm19371_vm6 = vmmov %vm19348_vm0 }
0x35b9   :  { %13706 = vmatprep.subr.bf16.mxu0 %v18914_v17 }
0x35bc   :  { %13708 = vmatpush3.bf16.msk.msra.mxu0 %vm19247_vm13, %v18918_v47  ;;  %vm19372_vm13 = vmmov %vm19348_vm0 }
0x35bd   :  { %13709 = vmatprep.subr.bf16.mxu0 %v18914_v17 }
0x35c0   :  { %13711 = vmatpush3.bf16.msk.msra.mxu0 %vm19248_vm9, %v18918_v47  ;;  %vm19373_vm9 = vmmov %vm19348_vm0 }
0x35c1   :  { %13712 = vmatprep.subr.bf16.mxu0 %v18914_v17 }
0x35c4   :  { %13714 = vmatpush3.bf16.msk.msra.mxu0 %vm19336_vm15, %v18918_v47  ;;  %vm19374_vm15 = vmmov %vm19348_vm0 }
0x35c5   :  { %13739 = vmatprep.subr.bf16.mxu0 %v18914_v17 }
0x368a   :  { %v6940_v27 = vpop.f32.mrb[78].mxu0 }
0x368b   :  { %v6945_v24 = vmul.f32 %v6944_v40, %v6940_v27  ;;  %v12322_v41 = vpop.f32.mrb[79].mxu0  ;;  %v7021_v40 = vsel %vm7013_vm10, 0.0, %v19381_v29 }
0x368d   :  { %v6946_v15 = vadd.f32 %v6945_v24, %v17230_v25 }
0x368f   :  { %v6952_v31 = vmul.f32 %v6951_v45, %v6946_v15  ;;  %v19382_v45 = vshra.s32 %v19317_v3, 5  ;;  %v19383_v15 = vshra.s32 %v19313_v21, 5 }
0x3691   :  { %v17325_v23 = vadd.f32 %v6953_v11, %v6952_v31 }
0x3693   :  { %v6958_v19 = vrot.slane %v17325_v23, %v14937_v46 }
0x3695   :  { %v6960_v28 = vmul.f32 %v15419_v42, %v6958_v19  ;;  %v6959_v49 = vmul.f32 %v15422_v50, %v6958_v19  ;;  %v6962_v18 = vmul.f32 %v15452_v35, %v6958_v19  ;;  %v6961_v22 = vmul.f32 %v15432_v56, %v6958_v19 }
0x3696   :  { %v6964_v2 = vmul.f32 %v19196_v44, %v6958_v19  ;;  %v6963_v13 = vmul.f32 %v19190_v4, %v6958_v19  ;;  %v6966_v0 = vmul.f32 %v19198_v48, %v6958_v19  ;;  %v6965_v6 = vmul.f32 %v19193_v5, %v6958_v19 }
0x3697   :  { %v6970_v20 = vsel %vm19371_vm6, %v6960_v28, 0.0  ;;  %v6967_v61 = vsel %vm19372_vm13, %v6959_v49, 0.0  ;;  %v6976_v25 = vsel %vm19373_vm9, %v6962_v18, 0.0  ;;  %v6973_v58 = vsel %vm19374_vm15, %v6961_v22, 0.0  ;;  %v19384_v22 = vld [vmem:[#allocation15_spill] sm:$0xff] }
0x3698   :  { %6971 = vadd.xlane.f32.xlu0 %v6970_v20  ;;  %6968 = vadd.xlane.f32.xlu1 %v6967_v61  ;;  %v6982_v1 = vsel %vm19375_vm5, %v6964_v2, 0.0  ;;  %v6979_v7 = vsel %vm19376_vm7, %v6963_v13, 0.0  ;;  %v6988_v16 = vsel %vm19377_vm12, %v6966_v0, 0.0  ;;  %v6985_v43 = vsel %vm19348_vm0, %v6965_v6, 0.0 }
0x3699   :  { %vm7012_vm6 = vcmp.eq.s32.totalorder %v19380_v12, %v19378_v59  ;;  %vm7015_vm13 = vcmp.eq.s32.totalorder %v19382_v45, %v19378_v59  ;;  %vm7014_vm9 = vcmp.eq.s32.totalorder %v19383_v15, %v19378_v59  ;;  %vm19388_vm7 = vcmask 261120  }
0x369a   :  { %v7020_v27 = vsel %vm7012_vm6, 0.0, %v19381_v29  ;;  %v7023_v61 = vsel %vm7015_vm13, 0.0, %v19381_v29  ;;  %v7022_v18 = vsel %vm7014_vm9, 0.0, %v19381_v29  ;;  %vm19389_vm12 = vmmov %vm19388_vm7 }
0x369b   :  { %vm19394_vm6 = vmmov %vm19388_vm7 }
0x369c   :  { %6977 = vadd.xlane.f32.xlu0 %v6976_v25  ;;  %6974 = vadd.xlane.f32.xlu1 %v6973_v58  ;;  %v19385_v25 = vshra.s32 %v19384_v22, 5  ;;  %v19386_v58 = vld [vmem:[#allocation11_spill] sm:$0xff]  ;;  %vm19395_vm13 = vmmov %vm19394_vm6 }
0x369d   :  { %v19387_v2 = vshra.s32 %v19386_v58, 5  ;;  %vm19396_vm9 = vmmov %vm19394_vm6 }
0x369e   :  { %vm7017_vm15 = vcmp.eq.s32.totalorder %v19385_v25, %v19378_v59 }
0x369f   :  { %vm7016_vm5 = vcmp.eq.s32.totalorder %v19387_v2, %v19378_v59 }
0x36a0   :  { %6983 = vadd.xlane.f32.xlu0 %v6982_v1  ;;  %6980 = vadd.xlane.f32.xlu1 %v6979_v7 }
0x36a4   :  { %6989 = vadd.xlane.f32.xlu0 %v6988_v16  ;;  %6986 = vadd.xlane.f32.xlu1 %v6985_v43 }
0x3725   :  { %v6972_v33 = vpop.xlane.xlu0 %6971  ;;  %v6969_v63 = vpop.xlane.xlu1 %6968 }
0x3726   :  { %v6996_v51 = vmul.f32 %v6994_v9, %v6972_v33  ;;  %v6995_v10 = vmul.f32 %v6994_v9, %v6969_v63  ;;  %v7025_v63 = vsel %vm7017_vm15, 0.0, %v19381_v29  ;;  %vm19397_vm15 = vmmov %vm19394_vm6 }
0x3728   :  { %v7005_v24 = vmul.f32 %v7003_v55, %v6996_v51  ;;  %v7004_v41 = vmul.f32 %v7003_v55, %v6995_v10  ;;  %v7024_v51 = vsel %vm7016_vm5, 0.0, %v19381_v29  ;;  %v19390_v10 = vld [vmem:[#allocation21_spill] sm:$0xff]  ;;  %vm19398_vm5 = vmmov %vm19394_vm6 }
0x3729   :  { %v6978_v11 = vpop.xlane.xlu0 %6977  ;;  %v6975_v31 = vpop.xlane.xlu1 %6974 }
0x372a   :  { %v6998_v19 = vmul.f32 %v6994_v9, %v6978_v11  ;;  %v6997_v28 = vmul.f32 %v6994_v9, %v6975_v31  ;;  %v7029_v49 = vadd.f32 %v7021_v40, %v7005_v24  ;;  %v7028_v20 = vadd.f32 %v7020_v27, %v7004_v41  ;;  %v19392_v27 = vld [vmem:[#allocation19_spill] sm:$0xff] }
0x372b   :  { %v19391_v40 = vshra.s32 %v19390_v10, 5  ;;  %v19393_v24 = vshra.s32 %v19392_v27, 5 }
0x372c   :  { %v7007_v13 = vmul.f32 %v7003_v55, %v6998_v19  ;;  %v7006_v1 = vmul.f32 %v7003_v55, %v6997_v28  ;;  %v7039_v7 = vsel %vm19388_vm7, %v7029_v49, -inf  ;;  %v7036_v0 = vsel %vm19389_vm12, %v7028_v20, -inf  ;;  %vm19399_vm7 = vmmov %vm19398_vm5 }
0x372d   :  { %7040 = vmax.xlane.f32.xlu0 %v7039_v7  ;;  %v6984_v6 = vpop.xlane.xlu0 %6983  ;;  %7037 = vmax.xlane.f32.xlu1 %v7036_v0  ;;  %v6981_v16 = vpop.xlane.xlu1 %6980  ;;  %vm7019_vm0 = vcmp.eq.s32.totalorder %v19391_v40, %v19378_v59  ;;  %vm7018_vm10 = vcmp.eq.s32.totalorder %v19393_v24, %v19378_v59  ;;  %vm19400_vm12 = vmmov %vm19398_vm5 }
0x372e   :  { %v7000_v43 = vmul.f32 %v6994_v9, %v6984_v6  ;;  %v6999_v57 = vmul.f32 %v6994_v9, %v6981_v16  ;;  %v7031_v12 = vadd.f32 %v7023_v61, %v7007_v13  ;;  %v7030_v33 = vadd.f32 %v7022_v18, %v7006_v1 }
0x372f   :  { %v7027_v2 = vsel %vm7019_vm0, 0.0, %v19381_v29  ;;  %v7026_v13 = vsel %vm7018_vm10, 0.0, %v19381_v29  ;;  %vm19401_vm0 = vmmov %vm19398_vm5 }
0x3730   :  { %v7009_v41 = vmul.f32 %v7003_v55, %v7000_v43  ;;  %v7008_v45 = vmul.f32 %v7003_v55, %v6999_v57  ;;  %v7045_v15 = vsel %vm19394_vm6, %v7031_v12, -inf  ;;  %v7042_v11 = vsel %vm19395_vm13, %v7030_v33, -inf  ;;  %vm19402_vm10 = vmmov %vm19401_vm0 }
0x3731   :  { %7046 = vmax.xlane.f32.xlu0 %v7045_v15  ;;  %v6990_v31 = vpop.xlane.xlu0 %6989  ;;  %7043 = vmax.xlane.f32.xlu1 %v7042_v11  ;;  %v6987_v19 = vpop.xlane.xlu1 %6986  ;;  %vm19403_vm6 = vmmov %vm19401_vm0 }
0x3732   :  { %v7002_v28 = vmul.f32 %v6994_v9, %v6990_v31  ;;  %v7001_v61 = vmul.f32 %v6994_v9, %v6987_v19  ;;  %v7033_v18 = vadd.f32 %v7025_v63, %v7009_v41  ;;  %v7032_v25 = vadd.f32 %v7024_v51, %v7008_v45  ;;  %vm19404_vm13 = vmmov %vm19401_vm0 }
0x3734   :  { %v7011_v1 = vmul.f32 %v7003_v55, %v7002_v28  ;;  %v7010_v59 = vmul.f32 %v7003_v55, %v7001_v61  ;;  %v7051_v7 = vsel %vm19396_vm9, %v7033_v18, -inf  ;;  %v7048_v0 = vsel %vm19397_vm15, %v7032_v25, -inf  ;;  %vm19405_vm9 = vmmov %vm19401_vm0 }
0x3735   :  { %7052 = vmax.xlane.f32.xlu0 %v7051_v7  ;;  %7049 = vmax.xlane.f32.xlu1 %v7048_v0  ;;  %vm19406_vm15 = vmmov %vm19401_vm0 }
0x3736   :  { %v7035_v6 = vadd.f32 %v7027_v2, %v7011_v1  ;;  %v7034_v16 = vadd.f32 %v7026_v13, %v7010_v59 }
0x3738   :  { %v7057_v43 = vsel %vm19398_vm5, %v7035_v6, -inf  ;;  %v7054_v9 = vsel %vm19399_vm7, %v7034_v16, -inf  ;;  %vm19407_vm5 = vmmov %vm19401_vm0  ;;  %vm19408_vm7 = vnez %v19287_v36  ;;  %v7308_v36 = vmul.u32 2, %v19386_v58 }
0x3739   :  { %7058 = vmax.xlane.f32.xlu0 %v7057_v43  ;;  %7055 = vmax.xlane.f32.xlu1 %v7054_v9 }
0x37ba   :  { %v7041_v57 = vpop.xlane.xlu0 %7040  ;;  %v7038_v63 = vpop.xlane.xlu1 %7037 }
0x37bb   :  { %v7061_v51 = vsub.f32 %v7029_v49, %v7041_v57  ;;  %v7060_v40 = vsub.f32 %v7028_v20, %v7038_v63 }
0x37bd   :  { %v7070_v24 = vmul.f32 1.442695, %v7061_v51  ;;  %v7068_v55 = vmul.f32 1.442695, %v7060_v40 }
0x37be   :  { %v7047_v41 = vpop.xlane.xlu0 %7046  ;;  %v7044_v45 = vpop.xlane.xlu1 %7043 }
0x37bf   :  { %14186 = vpow2.f32 %v7070_v24  ;;  %v7063_v15 = vsub.f32 %v7031_v12, %v7047_v41  ;;  %v7062_v11 = vsub.f32 %v7030_v33, %v7044_v45 }
0x37c0   :  { %14188 = vpow2.f32 %v7068_v55 }
0x37c1   :  { %v7074_v31 = vmul.f32 1.442695, %v7063_v15  ;;  %v7072_v19 = vmul.f32 1.442695, %v7062_v11 }
0x37c2   :  { %v7053_v28 = vpop.xlane.xlu0 %7052  ;;  %v7050_v61 = vpop.xlane.xlu1 %7049 }
0x37c3   :  { %14190 = vpow2.f32 %v7074_v31  ;;  %v7065_v2 = vsub.f32 %v7033_v18, %v7053_v28  ;;  %v7064_v13 = vsub.f32 %v7032_v25, %v7050_v61  ;;  %v60_v31 = vld [vmem:[%s18377_s3 + $0x78] sm:$0xff]  ;;  %v62_v28 = vld [vmem:[%s18377_s3 + $0x88] sm:$0xff] }
0x37c4   :  { %14192 = vpow2.f32 %v7072_v19  ;;  %v61_v19 = vld [vmem:[%s18377_s3 + $0x80] sm:$0xff]  ;;  %v68_v61 = vld [vmem:[%s18378_s4 + $0x28] sm:$0xff]  ;;  %s9787_s3 = sld [smem:[#allocation2 + $0x1f]]  ;;  %s9797_s4 = sld [smem:[#allocation2 + $0x2c]] }
0x37c5   :  { %v7078_v1 = vmul.f32 1.442695, %v7065_v2  ;;  %v7076_v59 = vmul.f32 1.442695, %v7064_v13  ;;  %v92_v2 = vld [vmem:[%s18380_s6 + $0x28] sm:$0xff]  ;;  %s9799_s6 = sld [smem:[#allocation2 + $0x2e]] }
0x37c6   :  { %v7059_v49 = vpop.xlane.xlu0 %7058  ;;  %v7056_v20 = vpop.xlane.xlu1 %7055  ;;  %v104_v13 = vld [vmem:[%s18382_s8 + $0x5] sm:$0x1]  ;;  %s9800_s8 = sld [smem:[#allocation2 + $0x2f]] }
0x37c7   :  { %14194 = vpow2.f32 %v7078_v1  ;;  %v7067_v7 = vsub.f32 %v7035_v6, %v7059_v49  ;;  %v7066_v0 = vsub.f32 %v7034_v16, %v7056_v20 }
0x37c8   :  { %14196 = vpow2.f32 %v7076_v59 }
0x37c9   :  { %v14187_v43 = vpop.eup %14186  ;;  %v7082_v12 = vmul.f32 1.442695, %v7067_v7  ;;  %v7080_v33 = vmul.f32 1.442695, %v7066_v0 }
0x37ca   :  { %v14189_v9 = vpop.eup %14188  ;;  %v7087_v57 = vsel %vm19400_vm12, %v14187_v43, 0.0  ;;  %vm19409_vm12 = vmmov %vm19401_vm0  ;;  %v7218_v60 = vstv %s9787_s3 }
0x37cb   :  { %14198 = vpow2.f32 %v7082_v12  ;;  %7088 = vadd.xlane.f32.xlu0 %v7087_v57  ;;  %v7084_v18 = vsel %vm19401_vm0, %v14189_v9, 0.0  ;;  %vm19410_vm0 = vnez %v19323_v32 }
0x37cc   :  { %14200 = vpow2.f32 %v7080_v33  ;;  %7085 = vadd.xlane.f32.xlu1 %v7084_v18 }
0x37cd   :  { %v14191_v25 = vpop.eup %14190 }
0x37ce   :  { %v14193_v63 = vpop.eup %14192  ;;  %v7093_v51 = vsel %vm19402_vm10, %v14191_v25, 0.0 }
0x37cf   :  { %7094 = vadd.xlane.f32.xlu0 %v7093_v51  ;;  %v7090_v6 = vsel %vm19403_vm6, %v14193_v63, 0.0 }
0x37d0   :  { %7091 = vadd.xlane.f32.xlu1 %v7090_v6 }
0x37d1   :  { %v14195_v16 = vpop.eup %14194 }
0x37d2   :  { %v14197_v40 = vpop.eup %14196  ;;  %v7099_v24 = vsel %vm19404_vm13, %v14195_v16, 0.0  ;;  %vm19411_vm13 = vcmask 523264  }
0x37d3   :  { %7100 = vadd.xlane.f32.xlu0 %v7099_v24  ;;  %v7096_v55 = vsel %vm19405_vm9, %v14197_v40, 0.0 }
0x37d4   :  { %7097 = vadd.xlane.f32.xlu1 %v7096_v55 }
0x37d5   :  { %v14199_v41 = vpop.eup %14198 }
0x37d6   :  { %v14201_v45 = vpop.eup %14200  ;;  %v7105_v15 = vsel %vm19406_vm15, %v14199_v41, 0.0 }
0x37d7   :  { %7106 = vadd.xlane.f32.xlu0 %v7105_v15  ;;  %v7102_v11 = vsel %vm19407_vm5, %v14201_v45, 0.0 }
0x37d8   :  { %7103 = vadd.xlane.f32.xlu1 %v7102_v11 }
0x37e9   :  { %7488 = vperm.xlu1 %13999, %v60_v31  }
0x37ed   :  { %7493 = vperm.xlu1 %13999, %v61_v19   ;;  %7498 = vperm.xlu0 %13998, %v62_v28  }
0x37f1   :  { %7651 = vperm.xlu1 %13999, %v68_v61   ;;  %7888 = vperm.xlu0 %13998, %v92_v2  }
0x37f5   :  { %8114 = vperm.xlu1 %13999, %v104_v13  }
0x3858   :  { %v7089_v1 = vpop.xlane.xlu0 %7088 }
0x3859   :  { %14202 = vrcp.f32 %v7089_v1  ;;  %v7086_v59 = vpop.xlane.xlu1 %7085 }
0x385a   :  { %14204 = vrcp.f32 %v7086_v59 }
0x385c   :  { %v7095_v49 = vpop.xlane.xlu0 %7094 }
0x385d   :  { %14206 = vrcp.f32 %v7095_v49  ;;  %v7092_v20 = vpop.xlane.xlu1 %7091 }
0x385e   :  { %14208 = vrcp.f32 %v7092_v20  ;;  %v19412_v20 = vld [vmem:[#allocation18_spill] sm:$0xff] }
0x385f   :  { %vm19413_vm9 = vnez %v19412_v20 }
0x3860   :  { %v7101_v7 = vpop.xlane.xlu0 %7100 }
0x3861   :  { %v7098_v12 = vpop.xlane.xlu1 %7097  ;;  %14210 = vrcp.f32 %v7101_v7  ;;  %v19414_v7 = vld [vmem:[#allocation20_spill] sm:$0xff] }
0x3862   :  { %14212 = vrcp.f32 %v7098_v12  ;;  %vm19415_vm15 = vnez %v19414_v7  ;;  %v19420_v12 = vld [vmem:[#allocation38_spill] sm:$0xff] }
0x3863   :  { %v14203_v0 = vpop.eup %14202 }
0x3864   :  { %v14205_v33 = vpop.eup %14204  ;;  %v7117_v57 = vmul.f32 %v14203_v0, %v14187_v43  ;;  %v7107_v55 = vpop.xlane.xlu0 %7106  ;;  %v19416_v0 = vld [vmem:[#allocation26_spill] sm:$0xff] }
0x3865   :  { %v7116_v18 = vmul.f32 %v14205_v33, %v14189_v9  ;;  %v7104_v31 = vpop.xlane.xlu1 %7103  ;;  %14214 = vrcp.f32 %v7107_v55  ;;  %vm19417_vm5 = vnez %v19416_v0  ;;  %v19422_v33 = vld [vmem:[#allocation44_spill] sm:$0xff] }
0x3866   :  { %14216 = vrcp.f32 %v7104_v31  ;;  %v7302_v31 = vstv %s9797_s4 }
0x3867   :  { %v14207_v51 = vpop.eup %14206  ;;  %v13688_v6 = vpack.c.bf16 %v7117_v57, %v7116_v18  ;;  %v19424_v57 = vld [vmem:[#allocation49_spill] sm:$0xff] }
0x3868   :  { %v14209_v24 = vpop.eup %14208  ;;  %v7119_v15 = vmul.f32 %v14207_v51, %v14191_v25  ;;  %v19426_v18 = vld [vmem:[#allocation53_spill] sm:$0xff]  ;;  %v7310_v51 = vmul.u32 2, %v19392_v27 }
0x3869   :  { %13690 = vmatpush3.bf16.xpose.msk.msra.mxu1 %vm19408_vm7, %v13688_v6  ;;  %v7118_v11 = vmul.f32 %v14209_v24, %v14193_v63  ;;  %v7311_v6 = vmul.u32 2, %v19390_v10 }
0x386a   :  { %13691 = vmatprep.subr.bf16.mxu1 %v18914_v17  ;;  %v7326_v24 = vadd.s32 1, %v7310_v51 }
0x386b   :  { %v14211_v19 = vpop.eup %14210  ;;  %v13692_v28 = vpack.c.bf16 %v7119_v15, %v7118_v11  ;;  %v7327_v55 = vadd.s32 1, %v7311_v6 }
0x386c   :  { %v14213_v43 = vpop.eup %14212  ;;  %v7121_v9 = vmul.f32 %v14211_v19, %v14195_v16  ;;  %v7309_v16 = vmul.u32 2, %v19384_v22  ;;  %v7304_v19 = vstv %s9799_s6 }
0x386d   :  { %v7120_v61 = vmul.f32 %v14213_v43, %v14197_v40 }
0x386e   :  { %v7325_v40 = vadd.s32 1, %v7309_v16 }
0x386f   :  { %v14215_v2 = vpop.eup %14214  ;;  %v13696_v13 = vpack.c.bf16 %v7121_v9, %v7120_v61 }
0x3870   :  { %v14217_v1 = vpop.eup %14216  ;;  %v7123_v25 = vmul.f32 %v14215_v2, %v14199_v41 }
0x3871   :  { %13694 = vmatpush3.bf16.xpose.msk.msra.mxu1 %vm19408_vm7, %v13692_v28  ;;  %v7122_v63 = vmul.f32 %v14217_v1, %v14201_v45 }
0x3872   :  { %13695 = vmatprep.subr.bf16.mxu1 %v18914_v17 }
0x3873   :  { %v13700_v59 = vpack.c.bf16 %v7123_v25, %v7122_v63  ;;  %v19439_v25 = vld [vmem:[#allocation30_spill] sm:$0xff]  ;;  %v19441_v63 = vld [vmem:[#allocation36_spill] sm:$0xff] }
0x3879   :  { %13698 = vmatpush3.bf16.xpose.msk.msra.mxu1 %vm19408_vm7, %v13696_v13  ;;  %v7227_v13 = vstv %s9800_s8 }
0x387a   :  { %13699 = vmatprep.subr.bf16.mxu1 %v18914_v17 }
0x3881   :  { %13702 = vmatpush3.bf16.xpose.msk.msra.mxu1 %vm19408_vm7, %v13700_v59  ;;  %v19443_v59 = vld [vmem:[#allocation42_spill] sm:$0xff] }
0x3882   :  { %13715 = vmatprep.subr.bf16.mxu1 %v18914_v17 }
0x3888   :  { %12340 = vmatmul.mubr.msk.f32.vlgmr.msra.gmra.mrb[74].mxu1 %vm19409_vm12, %v16982_v34  ;;  %v7324_v34 = vadd.s32 1, %v7308_v36  ;;  %vm19421_vm12 = vnez %v19420_v12  ;;  %v19462_v12 = vld [vmem:[#allocation58_spill] sm:$0xff] }
0x3889   :  { %13717 = vmatpush3.bf16.msk.msra.mxu1 %vm17010_vm8, %v18918_v47  ;;  %12377 = vmatprep.mubr.msk.f32.mxu1 %vm19064_vm3, %v18882_v38  ;;  %vm7329_vm8 = vcmp.eq.s32.totalorder %v19319_v53, %v7325_v40  ;;  %v19451_v40 = vld [vmem:[#allocation55_spill] sm:$0xff] }
0x388a   :  { %13718 = vmatprep.subr.bf16.mxu1 %v18914_v17  ;;  %vm7328_vm10 = vcmp.eq.s32.totalorder %v19319_v53, %v7324_v34  ;;  %v19449_v34 = vld [vmem:[#allocation54_spill] sm:$0xff] }
0x388b   :  { %vm13722_vm6 = vmpackc.low %vm7329_vm8, %vm7328_vm10  ;;  %vm19425_vm10 = vnez %v19424_v57  ;;  %vm19427_vm8 = vnez %v19426_v18 }
0x388d   :  { %13720 = vmatpush3.bf16.msk.msra.mxu1 %vm19410_vm0, %v18918_v47  ;;  %vm19423_vm0 = vnez %v19422_v33 }
0x388e   :  { %13721 = vmatprep.subr.bf16.mxu1 %v18914_v17 }
0x3891   :  { %13723 = vmatpush3.bf16.msk.msra.mxu1 %vm13722_vm6, %v18918_v47  ;;  %vm7330_vm6 = vcmp.eq.s32.totalorder %v19319_v53, %v7326_v24 }
0x3892   :  { %13724 = vmatprep.subr.bf16.mxu1 %v18914_v17 }
0x395b   :  { %v7214_v32 = vpop.f32.mrb[74].mxu1 }
0x395c   :  { %v7219_v41 = vmul.f32 %v7218_v60, %v7214_v32  ;;  %v12341_v45 = vpop.f32.mrb[75].mxu1 }
0x395d   :  { %v7489_v45 = vpop.permute.xlu1 %7488 }
0x395e   :  { %v7220_v49 = vadd.f32 %v7219_v41, %v17325_v23  ;;  %v19418_v23 = vld [vmem:[#allocation32_spill] sm:$0xff] }
0x395f   :  { %vm19419_vm7 = vnez %v19418_v23 }
0x3960   :  { %12359 = vmatmul.mubr.msk.f32.vlgmr.msra.gmra.mrb[80].mxu0 %vm19411_vm13, %v7220_v49  ;;  %vm7331_vm13 = vcmp.eq.s32.totalorder %v19319_v53, %v7327_v55  ;;  %v7305_v9 = vmul.f32 %v7304_v19, %v7220_v49  ;;  %v7226_v37 = vmul.f32 %v7225_v52, %v7220_v49  ;;  %v7499_v49 = vpop.permute.xlu0 %7498  ;;  %v86_v52 = vld [vmem:[%s18379_s5 + $0x88] sm:$0xff] }
0x3961   :  { %13741 = vmatpush3.bf16.msk.msra.mxu0 %vm19413_vm9, %v18918_v47  ;;  %12431 = vmatprep.mubr.msk.f32.mxu0 %vm19064_vm3, %v18882_v38  ;;  %vm13725_vm14 = vmpackc.low %vm7331_vm13, %vm7330_vm6  ;;  %vm7312_vm13 = vcmp.eq.s32.totalorder %v19319_v53, %v7308_v36  ;;  %v19445_v36 = vld [vmem:[#allocation48_spill] sm:$0xff]  ;;  %v7494_v24 = vpop.permute.xlu1 %7493 }
0x3962   :  { %13742 = vmatprep.subr.bf16.mxu0 %v18914_v17  ;;  %13726 = vmatpush3.bf16.msk.msra.mxu1 %vm13725_vm14, %v18918_v47  ;;  %vm19432_vm14 = vcmask 523264   ;;  %vm19433_vm6 = vmpackc.low %vm17034_vm1, %vm17029_vm4  ;;  %v7228_v8 = vadd.f32 %v7227_v13, %v7226_v37 }
0x3963   :  { %13727 = vmatprep.subr.bf16.mxu1 %v18914_v17 }
0x3965   :  { %13744 = vmatpush3.bf16.msk.msra.mxu0 %vm19415_vm15, %v18918_v47 }
0x3966   :  { %13745 = vmatprep.subr.bf16.mxu0 %v18914_v17 }
0x3969   :  { %13747 = vmatpush3.bf16.msk.msra.mxu0 %vm19417_vm5, %v18918_v47 }
0x396a   :  { %13748 = vmatprep.subr.bf16.mxu0 %v18914_v17 }
0x396d   :  { %13750 = vmatpush3.bf16.msk.msra.mxu0 %vm19419_vm7, %v18918_v47 }
0x396e   :  { %13751 = vmatprep.subr.bf16.mxu0 %v18914_v17 }
0x3971   :  { %13753 = vmatpush3.bf16.msk.msra.mxu0 %vm19421_vm12, %v18918_v47 }
0x3972   :  { %13754 = vmatprep.subr.bf16.mxu0 %v18914_v17 }
0x3975   :  { %13756 = vmatpush3.bf16.msk.msra.mxu0 %vm19423_vm0, %v18918_v47  ;;  %vm7313_vm0 = vcmp.eq.s32.totalorder %v19319_v53, %v7309_v16  ;;  %v19447_v16 = vld [vmem:[#allocation52_spill] sm:$0xff] }
0x3976   :  { %13757 = vmatprep.subr.bf16.mxu0 %v18914_v17  ;;  %vm13734_vm4 = vmpackc.low %vm7313_vm0, %vm7312_vm13  ;;  %vm19440_vm0 = vnez %v19439_v25  ;;  %vm19448_vm13 = vnez %v19447_v16 }
0x3979   :  { %13759 = vmatpush3.bf16.msk.msra.mxu0 %vm19425_vm10, %v18918_v47  ;;  %vm17486_vm10 = vcmp.eq.s32.totalorder %v19319_v53, %v7310_v51 }
0x397a   :  { %13760 = vmatprep.subr.bf16.mxu0 %v18914_v17 }
0x397d   :  { %13762 = vmatpush3.bf16.msk.msra.mxu0 %vm19427_vm8, %v18918_v47  ;;  %vm17491_vm8 = vcmp.eq.s32.totalorder %v19319_v53, %v7311_v6 }
0x397e   :  { %12469 = vmatprep.subr.mxu0 %v18882_v38  ;;  %vm19435_vm1 = vmpackc.low %vm17491_vm8, %vm17486_vm10  ;;  %vm19442_vm10 = vnez %v19441_v63  ;;  %vm19444_vm8 = vnez %v19443_v59 }
0x3a33   :  { %v7298_v28 = vpop.f32.mrb[80].mxu0 }
0x3a34   :  { %v7303_v43 = vmul.f32 %v7302_v31, %v7298_v28  ;;  %v12360_v61 = vpop.f32.mrb[81].mxu0 }
0x3a36   :  { %v7306_v2 = vadd.f32 %v7305_v9, %v7303_v43  ;;  %v7652_v9 = vpop.permute.xlu1 %7651 }
0x3a38   :  { %v7307_v1 = vadd.f32 %v7306_v2, %v7227_v13  ;;  %v84_v13 = vld [vmem:[%s18379_s5 + $0x78] sm:$0xff] }
0x3a3a   :  { %12378 = vmatmul.mubr.msk.f32.vlgmr.msra.gmra.mrb[76].mxu1 %vm19432_vm14, %v7307_v1  ;;  %vm19434_vm14 = vmpackc.low %vm17048_vm11, %vm17043_vm2  ;;  %vm19436_vm2 = vcmask 523264   ;;  %vm19438_vm11 = vnez %v19437_v54  ;;  %v85_v1 = vld [vmem:[%s18379_s5 + $0x80] sm:$0xff] }
0x3a3b   :  { %13729 = vmatpush3.bf16.msk.msra.mxu1 %vm19433_vm6, %v18918_v47  ;;  %12396 = vmatprep.mubr.msk.f32.mxu1 %vm19064_vm3, %v18882_v38  ;;  %vm19446_vm6 = vnez %v19445_v36 }
0x3a3c   :  { %13730 = vmatprep.subr.bf16.mxu1 %v18914_v17 }
0x3a3f   :  { %13732 = vmatpush3.bf16.msk.msra.mxu1 %vm19434_vm14, %v18918_v47  ;;  %vm19450_vm14 = vnez %v19449_v34  ;;  %v98_v34 = vld [vmem:[%s18381_s7 + $0x14] sm:$0x7]  ;;  %s9936_s7 = sld [smem:[#allocation2 + $0x20]] }
0x3a40   :  { %13733 = vmatprep.subr.bf16.mxu1 %v18914_v17 }
0x3a43   :  { %13735 = vmatpush3.bf16.msk.msra.mxu1 %vm13734_vm4, %v18918_v47  ;;  %vm19452_vm4 = vnez %v19451_v40  ;;  %v19466_v40 = vld [vmem:[#allocation62_spill] sm:$0xff] }
0x3a44   :  { %13736 = vmatprep.subr.bf16.mxu1 %v18914_v17 }
0x3a47   :  { %13738 = vmatpush3.bf16.msk.msra.mxu1 %vm19435_vm1, %v18918_v47  ;;  %vm19453_vm1 = vcmask 64512  }
0x3a48   :  { %13763 = vmatprep.subr.bf16.mxu1 %v18914_v17 }
0x3a4a   :  { %12397 = vmatmul.mubr.msk.f32.vlgmr.msra.gmra.mrb[76].mxu1 %vm19436_vm2, %v7228_v8  ;;  %vm19454_vm2 = vmmov %vm19453_vm1 }
0x3a4b   :  { %13765 = vmatpush3.bf16.msk.msra.mxu1 %vm19438_vm11, %v18918_v47  ;;  %12466 = vmatprep.mubr.msk.f32.mxu1 %vm19064_vm3, %v18882_v38 }
0x3a4c   :  { %13766 = vmatprep.subr.bf16.mxu1 %v18914_v17 }
0x3a4f   :  { %13768 = vmatpush3.bf16.msk.msra.mxu1 %vm19440_vm0, %v18918_v47 }
0x3a50   :  { %13769 = vmatprep.subr.bf16.mxu1 %v18914_v17 }
0x3a53   :  { %13771 = vmatpush3.bf16.msk.msra.mxu1 %vm19442_vm10, %v18918_v47 }
0x3a54   :  { %13772 = vmatprep.subr.bf16.mxu1 %v18914_v17 }
0x3a57   :  { %13774 = vmatpush3.bf16.msk.msra.mxu1 %vm19444_vm8, %v18918_v47 }
0x3a58   :  { %13775 = vmatprep.subr.bf16.mxu1 %v18914_v17 }
0x3a5b   :  { %13777 = vmatpush3.bf16.msk.msra.mxu1 %vm19446_vm6, %v18918_v47 }
0x3a5c   :  { %13778 = vmatprep.subr.bf16.mxu1 %v18914_v17 }
0x3a5f   :  { %13780 = vmatpush3.bf16.msk.msra.mxu1 %vm19448_vm13, %v18918_v47 }
0x3a60   :  { %13781 = vmatprep.subr.bf16.mxu1 %v18914_v17 }
0x3a63   :  { %13783 = vmatpush3.bf16.msk.msra.mxu1 %vm19450_vm14, %v18918_v47 }
0x3a64   :  { %13784 = vmatprep.subr.bf16.mxu1 %v18914_v17 }
0x3a67   :  { %13786 = vmatpush3.bf16.msk.msra.mxu1 %vm19452_vm4, %v18918_v47 }
0x3a68   :  { %13811 = vmatprep.subr.bf16.mxu1 %v18914_v17 }
0x3b1d   :  { %v17562_v60 = vpop.f32.mrb[76].mxu1 }
0x3b1e   :  { %v7504_v32 = vrot.slane %v17562_v60, %v14937_v46  ;;  %v12398_v41 = vpop.f32.mrb[77].mxu1 }
0x3b20   :  { %v7505_v51 = vmul.f32 %v7504_v32, %v7489_v45  ;;  %v7507_v6 = vmul.f32 %v7504_v32, %v7499_v49  ;;  %v7506_v55 = vmul.f32 %v7504_v32, %v7494_v24 }
0x3b22   :  { %12432 = vmatmul.mubr.f32.vlgmr.msra.gmra.mrb[82].mxu0 %v7505_v51  ;;  %12467 = vmatmul.mubr.f32.vlgmr.msra.gmra.mrb[78].mxu1 %v7507_v6  ;;  %v7889_v51 = vpop.permute.xlu0 %7888 }
0x3b23   :  { %12471 = vmatprep.mubr.msk.f32.mxu0 %vm19064_vm3, %v18882_v38  ;;  %13813 = vmatpush3.bf16.msk.msra.mxu1 %vm19438_vm11, %v18918_v47 }
0x3b24   :  { %13814 = vmatprep.subr.bf16.mxu1 %v18914_v17  ;;  %12547 = vmatprep.mubr.msk.f32.mxu1 %vm19064_vm3, %v18882_v38 }
0x3b27   :  { %13816 = vmatpush3.bf16.msk.msra.mxu1 %vm19440_vm0, %v18918_v47 }
0x3b28   :  { %13817 = vmatprep.subr.bf16.mxu1 %v18914_v17 }
0x3b2b   :  { %13819 = vmatpush3.bf16.msk.msra.mxu1 %vm19442_vm10, %v18918_v47 }
0x3b2c   :  { %13820 = vmatprep.subr.bf16.mxu1 %v18914_v17 }
0x3b2f   :  { %13822 = vmatpush3.bf16.msk.msra.mxu1 %vm19444_vm8, %v18918_v47 }
0x3b30   :  { %13823 = vmatprep.subr.bf16.mxu1 %v18914_v17 }
0x3b33   :  { %13825 = vmatpush3.bf16.msk.msra.mxu1 %vm19446_vm6, %v18918_v47 }
0x3b34   :  { %13826 = vmatprep.subr.bf16.mxu1 %v18914_v17 }
0x3b37   :  { %13828 = vmatpush3.bf16.msk.msra.mxu1 %vm19448_vm13, %v18918_v47 }
0x3b38   :  { %13829 = vmatprep.subr.bf16.mxu1 %v18914_v17 }
0x3b3b   :  { %13831 = vmatpush3.bf16.msk.msra.mxu1 %vm19450_vm14, %v18918_v47 }
0x3b3c   :  { %13832 = vmatprep.subr.bf16.mxu1 %v18914_v17 }
0x3b3f   :  { %13834 = vmatpush3.bf16.msk.msra.mxu1 %vm19452_vm4, %v18918_v47 }
0x3b40   :  { %13859 = vmatprep.subr.bf16.mxu1 %v18914_v17 }
0x3bf5   :  { %v7574_v15 = vpop.f32.mrb[82].mxu0  ;;  %v7644_v11 = vpop.f32.mrb[78].mxu1 }
0x3bf6   :  { %v7575_v31 = vadd.f32 %v7574_v15, %v7506_v55  ;;  %v12433_v19 = vpop.f32.mrb[83].mxu0  ;;  %v12468_v28 = vpop.f32.mrb[79].mxu1  ;;  %v19467_v55 = vld [vmem:[#allocation63_spill] sm:$0xff] }
0x3bf8   :  { %v7648_v43 = vadd.f32 %v7644_v11, %v7575_v31  ;;  %v8115_v11 = vpop.permute.xlu1 %8114 }
0x3bfa   :  { %v7654_v61 = vadd.f32 %v7652_v9, %v7648_v43  ;;  %v8120_v9 = vrot.slane %v8115_v11, %v14937_v46 }
0x3bfc   :  { %v7655_v2 = vmax.f32 %v7654_v61, 0.0 }
0x3bfe   :  { %12470 = vmatpush3.msra.mxu0 %v7655_v2 }
0x3bff   :  { %12472 = vmatmul.mubr.msk.f32.vlgmr.msra.gmra.mrb[84].mxu0 %vm19453_vm1, %v84_v13  ;;  %13787 = vmatprep.subr.bf16.mxu0 %v18914_v17 }
0x3c00   :  { %12474 = vmatprep.mubr.msk.f32.mxu0 %vm19064_vm3, %v18882_v38  ;;  %13789 = vmatpush3.bf16.msk.msra.mxu0 %vm19413_vm9, %v18918_v47 }
0x3c01   :  { %13790 = vmatprep.subr.bf16.mxu0 %v18914_v17 }
0x3c03   :  { %12475 = vmatmul.mubr.msk.f32.gmra.mrb[86].mxu0 %vm19454_vm2, %v85_v1  ;;  %vm19455_vm2 = vnez %v19422_v33  ;;  %v19463_v33 = vld [vmem:[#allocation59_spill] sm:$0xff] }
0x3c04   :  { %12477 = vmatprep.mubr.msk.f32.mxu0 %vm19064_vm3, %v18882_v38  ;;  %13792 = vmatpush3.bf16.msk.msra.mxu0 %vm19415_vm15, %v18918_v47 }
0x3c05   :  { %13793 = vmatprep.subr.bf16.mxu0 %v18914_v17 }
0x3c07   :  { %12478 = vmatmul.mubr.msk.f32.gmra.mrb[88].mxu0 %vm19453_vm1, %v86_v52  ;;  %vm19456_vm1 = vnez %v19424_v57  ;;  %v19464_v57 = vld [vmem:[#allocation60_spill] sm:$0xff] }
0x3c08   :  { %13795 = vmatpush3.bf16.msk.msra.mxu0 %vm19417_vm5, %v18918_v47  ;;  %12512 = vmatprep.mubr.msk.f32.mxu0 %vm19064_vm3, %v18882_v38 }
0x3c09   :  { %13796 = vmatprep.subr.bf16.mxu0 %v18914_v17 }
0x3c0c   :  { %13798 = vmatpush3.bf16.msk.msra.mxu0 %vm19419_vm7, %v18918_v47  ;;  %vm19457_vm7 = vnez %v19426_v18  ;;  %v19465_v18 = vld [vmem:[#allocation61_spill] sm:$0xff] }
0x3c0d   :  { %13799 = vmatprep.subr.bf16.mxu0 %v18914_v17 }
0x3c10   :  { %13801 = vmatpush3.bf16.msk.msra.mxu0 %vm19421_vm12, %v18918_v47 }
0x3c11   :  { %13802 = vmatprep.subr.bf16.mxu0 %v18914_v17 }
0x3c14   :  { %13804 = vmatpush3.bf16.msk.msra.mxu0 %vm19455_vm2, %v18918_v47 }
0x3c15   :  { %13805 = vmatprep.subr.bf16.mxu0 %v18914_v17 }
0x3c18   :  { %13807 = vmatpush3.bf16.msk.msra.mxu0 %vm19456_vm1, %v18918_v47 }
0x3c19   :  { %13808 = vmatprep.subr.bf16.mxu0 %v18914_v17 }
0x3c1c   :  { %13810 = vmatpush3.bf16.msk.msra.mxu0 %vm19457_vm7, %v18918_v47 }
0x3c1d   :  { %12550 = vmatprep.subr.mxu0 %v18882_v38 }
0x3cd2   :  { %v7731_v37 = vpop.f32.mrb[84].mxu0 }
0x3cd3   :  { %v12473_v8 = vpop.f32.mrb[85].mxu0  ;;  %12513 = vmatmul.mubr.f32.vlgmr.msra.gmra.mrb[90].mxu0 %v7731_v37 }
0x3cd4   :  { %12552 = vmatprep.mubr.msk.f32.mxu0 %vm19064_vm3, %v18882_v38 }
0x3cd6   :  { %v7736_v32 = vpop.f32.mrb[86].mxu0 }
0x3cd7   :  { %v12476_v41 = vpop.f32.mrb[87].mxu0 }
0x3cda   :  { %v7741_v45 = vpop.f32.mrb[88].mxu0 }
0x3cdb   :  { %v12479_v49 = vpop.f32.mrb[89].mxu0  ;;  %12548 = vmatmul.mubr.f32.vlgmr.msra.gmra.mrb[80].mxu1 %v7741_v45 }
0x3cdc   :  { %13861 = vmatpush3.bf16.msk.msra.mxu1 %vm19438_vm11, %v18918_v47  ;;  %12622 = vmatprep.mubr.msk.f32.mxu1 %vm19064_vm3, %v18882_v38  ;;  %vm19458_vm11 = vcmask 64512  }
0x3cdd   :  { %13862 = vmatprep.subr.bf16.mxu1 %v18914_v17 }
0x3ce0   :  { %13864 = vmatpush3.bf16.msk.msra.mxu1 %vm19440_vm0, %v18918_v47 }
0x3ce1   :  { %13865 = vmatprep.subr.bf16.mxu1 %v18914_v17 }
0x3ce4   :  { %13867 = vmatpush3.bf16.msk.msra.mxu1 %vm19442_vm10, %v18918_v47 }
0x3ce5   :  { %13868 = vmatprep.subr.bf16.mxu1 %v18914_v17 }
0x3ce8   :  { %13870 = vmatpush3.bf16.msk.msra.mxu1 %vm19444_vm8, %v18918_v47 }
0x3ce9   :  { %13871 = vmatprep.subr.bf16.mxu1 %v18914_v17 }
0x3cec   :  { %13873 = vmatpush3.bf16.msk.msra.mxu1 %vm19446_vm6, %v18918_v47 }
0x3ced   :  { %13874 = vmatprep.subr.bf16.mxu1 %v18914_v17 }
0x3cf0   :  { %13876 = vmatpush3.bf16.msk.msra.mxu1 %vm19448_vm13, %v18918_v47 }
0x3cf1   :  { %13877 = vmatprep.subr.bf16.mxu1 %v18914_v17 }
0x3cf4   :  { %13879 = vmatpush3.bf16.msk.msra.mxu1 %vm19450_vm14, %v18918_v47 }
0x3cf5   :  { %13880 = vmatprep.subr.bf16.mxu1 %v18914_v17 }
0x3cf8   :  { %13882 = vmatpush3.bf16.msk.msra.mxu1 %vm19452_vm4, %v18918_v47 }
0x3cf9   :  { %13907 = vmatprep.subr.bf16.mxu1 %v18914_v17 }
0x3da6   :  { %v7811_v54 = vpop.f32.mrb[90].mxu0 }
0x3da7   :  { %v7812_v25 = vadd.f32 %v7811_v54, %v7736_v32  ;;  %v12514_v63 = vpop.f32.mrb[91].mxu0 }
0x3dae   :  { %v7881_v59 = vpop.f32.mrb[80].mxu1 }
0x3daf   :  { %v7885_v36 = vadd.f32 %v7881_v59, %v7812_v25  ;;  %v12549_v16 = vpop.f32.mrb[81].mxu1  ;;  %v8272_v25 = vstv %s9936_s7  ;;  %v8274_v59 = vstv %s9937_s1 }
0x3db1   :  { %v7891_v6 = vadd.f32 %v7889_v51, %v7885_v36 }
0x3db3   :  { %v7892_v24 = vmax.f32 %v7891_v6, 0.0 }
0x3db5   :  { %12551 = vmatpush3.msra.mxu0 %v7892_v24 }
0x3db6   :  { %12553 = vmatmul.mubr.msk.f32.vlgmr.msra.gmra.mrb[92].mxu0 %vm19458_vm11, %v98_v34  ;;  %13835 = vmatprep.subr.bf16.mxu0 %v18914_v17 }
0x3db7   :  { %13837 = vmatpush3.bf16.msk.msra.mxu0 %vm19413_vm9, %v18918_v47  ;;  %12587 = vmatprep.mubr.msk.f32.mxu0 %vm19064_vm3, %v18882_v38  ;;  %vm19459_vm9 = vnez %v19418_v23  ;;  %v19460_v23 = vld [vmem:[#allocation56_spill] sm:$0xff] }
0x3db8   :  { %13838 = vmatprep.subr.bf16.mxu0 %v18914_v17 }
0x3dbb   :  { %13840 = vmatpush3.bf16.msk.msra.mxu0 %vm19415_vm15, %v18918_v47 }
0x3dbc   :  { %13841 = vmatprep.subr.bf16.mxu0 %v18914_v17 }
0x3dbf   :  { %13843 = vmatpush3.bf16.msk.msra.mxu0 %vm19417_vm5, %v18918_v47 }
0x3dc0   :  { %13844 = vmatprep.subr.bf16.mxu0 %v18914_v17 }
0x3dc3   :  { %13846 = vmatpush3.bf16.msk.msra.mxu0 %vm19459_vm9, %v18918_v47 }
0x3dc4   :  { %13847 = vmatprep.subr.bf16.mxu0 %v18914_v17 }
0x3dc7   :  { %13849 = vmatpush3.bf16.msk.msra.mxu0 %vm19421_vm12, %v18918_v47 }
0x3dc8   :  { %13850 = vmatprep.subr.bf16.mxu0 %v18914_v17 }
0x3dcb   :  { %13852 = vmatpush3.bf16.msk.msra.mxu0 %vm19455_vm2, %v18918_v47 }
0x3dcc   :  { %13853 = vmatprep.subr.bf16.mxu0 %v18914_v17 }
0x3dcf   :  { %13855 = vmatpush3.bf16.msk.msra.mxu0 %vm19456_vm1, %v18918_v47 }
0x3dd0   :  { %13856 = vmatprep.subr.bf16.mxu0 %v18914_v17 }
0x3dd3   :  { %13858 = vmatpush3.bf16.msk.msra.mxu0 %vm19457_vm7, %v18918_v47  ;;  %v19461_v47 = vld [vmem:[#allocation57_spill] sm:$0xff] }
0x3dd4   :  { %13883 = vmatprep.subr.bf16.mxu0 %v18914_v17 }
0x3e89   :  { %v7962_v20 = vpop.f32.mrb[92].mxu0 }
0x3e8a   :  { %v8039_v7 = vrot.slane %v7962_v20, 2  ;;  %12588 = vmatmul.mubr.f32.vlgmr.msra.gmra.mrb[94].mxu0 %v7962_v20  ;;  %v12554_v0 = vpop.f32.mrb[93].mxu0  ;;  %v7967_v15 = vrot.slane %v7962_v20, 1 }
0x3e8b   :  { %13885 = vmatpush3.bf16.msra.mxu0 %v19460_v23  ;;  %12657 = vmatprep.mubr.msk.f32.mxu0 %vm19064_vm3, %v18882_v38 }
0x3e8c   :  { %12623 = vmatmul.mubr.f32.vlgmr.msra.gmra.mrb[82].mxu1 %v8039_v7  ;;  %13886 = vmatprep.subr.bf16.mxu0 %v18914_v17  ;;  %v19468_v7 = vld [vmem:[#allocation25_spill] sm:$0xff] }
0x3e8d   :  { %13909 = vmatpush3.bf16.msra.mxu1 %v19460_v23  ;;  %12692 = vmatprep.mubr.msk.f32.mxu1 %vm19064_vm3, %v18882_v38 }
0x3e8e   :  { %13910 = vmatprep.subr.bf16.mxu1 %v18914_v17 }
0x3e8f   :  { %13888 = vmatpush3.bf16.msra.mxu0 %v19461_v47 }
0x3e90   :  { %13889 = vmatprep.subr.bf16.mxu0 %v18914_v17 }
0x3e91   :  { %13912 = vmatpush3.bf16.msra.mxu1 %v19461_v47 }
0x3e92   :  { %13913 = vmatprep.subr.bf16.mxu1 %v18914_v17 }
0x3e93   :  { %13891 = vmatpush3.bf16.msra.mxu0 %v19462_v12 }
0x3e94   :  { %13892 = vmatprep.subr.bf16.mxu0 %v18914_v17 }
0x3e95   :  { %13915 = vmatpush3.bf16.msra.mxu1 %v19462_v12  ;;  %v19469_v12 = vld [vmem:[#allocation31_spill] sm:$0xff] }
0x3e96   :  { %13916 = vmatprep.subr.bf16.mxu1 %v18914_v17  ;;  %vm8278_vm15 = vcmp.eq.s32.totalorder %v19469_v12, %v19319_v53 }
0x3e97   :  { %13894 = vmatpush3.bf16.msra.mxu0 %v19463_v33 }
0x3e98   :  { %13895 = vmatprep.subr.bf16.mxu0 %v18914_v17 }
0x3e99   :  { %13918 = vmatpush3.bf16.msra.mxu1 %v19463_v33 }
0x3e9a   :  { %13919 = vmatprep.subr.bf16.mxu1 %v18914_v17 }
0x3e9b   :  { %13897 = vmatpush3.bf16.msra.mxu0 %v19464_v57 }
0x3e9c   :  { %13898 = vmatprep.subr.bf16.mxu0 %v18914_v17 }
0x3e9d   :  { %13921 = vmatpush3.bf16.msra.mxu1 %v19464_v57 }
0x3e9e   :  { %13922 = vmatprep.subr.bf16.mxu1 %v18914_v17 }
0x3e9f   :  { %13900 = vmatpush3.bf16.msra.mxu0 %v19465_v18 }
0x3ea0   :  { %13901 = vmatprep.subr.bf16.mxu0 %v18914_v17 }
0x3ea1   :  { %13924 = vmatpush3.bf16.msra.mxu1 %v19465_v18  ;;  %v17800_v18 = vsel %vm8278_vm15, 1.0, %v18882_v38 }
0x3ea2   :  { %13925 = vmatprep.subr.bf16.mxu1 %v18914_v17 }
0x3ea3   :  { %13903 = vmatpush3.bf16.msra.mxu0 %v19466_v40 }
0x3ea4   :  { %13904 = vmatprep.subr.bf16.mxu0 %v18914_v17 }
0x3ea5   :  { %13927 = vmatpush3.bf16.msra.mxu1 %v19466_v40  ;;  %v19470_v40 = vld [vmem:[#allocation37_spill] sm:$0xff] }
0x3ea6   :  { %13928 = vmatprep.subr.bf16.mxu1 %v18914_v17  ;;  %vm8280_vm5 = vcmp.eq.s32.totalorder %v19470_v40, %v19319_v53 }
0x3ea7   :  { %13906 = vmatpush3.bf16.msra.mxu0 %v19467_v55 }
0x3ea8   :  { %13931 = vmatprep.subr.bf16.mxu0 %v18914_v17 }
0x3ea9   :  { %13930 = vmatpush3.bf16.msra.mxu1 %v19467_v55  ;;  %v19471_v55 = vld [vmem:[#allocation27_spill] sm:$0xff] }
0x3eaa   :  { %13955 = vmatprep.subr.bf16.mxu1 %v18914_v17  ;;  %vm8277_vm7 = vcmp.eq.s32.totalorder %v19471_v55, %v19319_v53 }
0x3f5d   :  { %v8035_v31 = vpop.f32.mrb[94].mxu0 }
0x3f5e   :  { %v8036_v19 = vadd.f32 %v8035_v31, %v7967_v15  ;;  %v12589_v28 = vpop.f32.mrb[95].mxu0  ;;  %v17811_v31 = vsel %vm8280_vm5, 1.0, %v18882_v38 }
0x3f5f   :  { %v8107_v43 = vpop.f32.mrb[82].mxu1  ;;  %v19472_v28 = vld [vmem:[#allocation43_spill] sm:$0xff] }
0x3f60   :  { %v8111_v61 = vadd.f32 %v8107_v43, %v8036_v19  ;;  %v12624_v2 = vpop.f32.mrb[83].mxu1  ;;  %v17814_v19 = vsel %vm8277_vm7, 1.0, %v18882_v38  ;;  %vm8282_vm12 = vcmp.eq.s32.totalorder %v19472_v28, %v19319_v53  ;;  %v19473_v43 = vld [vmem:[#allocation33_spill] sm:$0xff] }
0x3f61   :  { %vm8279_vm0 = vcmp.eq.s32.totalorder %v19473_v43, %v19319_v53  ;;  %v17825_v2 = vsel %vm8282_vm12, 1.0, %v18882_v38 }
0x3f62   :  { %v8121_v13 = vadd.f32 %v8120_v9, %v8111_v61 }
0x3f64   :  { %v8122_v1 = vadd.f32 %v8121_v13, %v17562_v60  ;;  %v17828_v13 = vsel %vm8279_vm0, 1.0, %v18882_v38 }
0x3f66   :  { %12658 = vmatmul.mubr.f32.vlgmr.msra.gmra.mrb[96].mxu0 %v8122_v1 }
0x3f67   :  { %12727 = vmatprep.mubr.msk.f32.mxu0 %vm19064_vm3, %v18882_v38 }
0x4039   :  { %v8189_v52 = vpop.f32.mrb[96].mxu0 }
0x403a   :  { %v8193_v37 = vsub.f32 %v8122_v1, %v8189_v52  ;;  %v12659_v8 = vpop.f32.mrb[97].mxu0  ;;  %v19474_v1 = vld [vmem:[#allocation39_spill] sm:$0xff] }
0x403b   :  { %vm8281_vm10 = vcmp.eq.s32.totalorder %v19474_v1, %v19319_v53 }
0x403c   :  { %v8194_v32 = vmul.f32 %v8193_v37, %v8193_v37  ;;  %v17837_v8 = vsel %vm8281_vm10, 1.0, %v18882_v38 }
0x403e   :  { %12693 = vmatmul.mubr.f32.vlgmr.msra.gmra.mrb[84].mxu1 %v8194_v32  ;;  %v19475_v32 = vld [vmem:[#allocation45_spill] sm:$0xff] }
0x403f   :  { %12762 = vmatprep.mubr.msk.f32.mxu1 %vm19064_vm3, %v18882_v38  ;;  %vm8276_vm3 = vcmp.eq.s32.totalorder %v19468_v7, %v19319_v53  ;;  %vm8283_vm8 = vcmp.eq.s32.totalorder %v19475_v32, %v19319_v53 }
0x4040   :  { %v17791_v47 = vsel %vm8276_vm3, 1.0, %v18882_v38 }
0x4111   :  { %v8261_v41 = vpop.f32.mrb[84].mxu1 }
0x4112   :  { %v8262_v45 = vadd.f32 1e-05, %v8261_v41  ;;  %v12694_v49 = vpop.f32.mrb[85].mxu1 }
0x4114   :  { %14218 = vrsqrt.f32 %v8262_v45  ;;  %v17844_v45 = vsel %vm8283_vm8, 1.0, %v18882_v38  ;;  %v19478_v38 = vld [vmem:[#allocation12_spill] sm:$0xff] }
0x4115   :  { %vm19479_vm13 = vnez %v19478_v38 }
0x411e   :  { %v14219_v54 = vpop.eup %14218 }
0x411f   :  { %v8266_v60 = vmul.f32 %v14219_v54, %v8193_v37  ;;  %v17848_v54 = vstv %s9938_s29 }
0x4121   :  { %v8267_v63 = vmax.f32 %v8266_v60, 0.0 }
0x4123   :  { %v8273_v36 = vmul.f32 %v8272_v25, %v8267_v63 }
0x4125   :  { %v17770_v16 = vadd.f32 %v8274_v59, %v8273_v36  ;;  %v19476_v59 = vld [vmem:[#allocation14_spill] sm:$0xff] }
0x4126   :  { %vm19477_vm6 = vnez %v19476_v59  ;;  %v19484_v59 = vld [vmem:[#allocation17_spill] sm:$0xff] }
0x4127   :  { %v17774_v51 = vrot.slane %v17770_v16, %v14937_v46  ;;  %v8386_v36 = vsel %vm19477_vm6, 0.0, %v19381_v29  ;;  %vm19485_vm2 = vnez %v19484_v59 }
0x4129   :  { %v8305_v6 = vmul.f32 %v15419_v42, %v17774_v51  ;;  %v8304_v24 = vmul.f32 %v15422_v50, %v17774_v51  ;;  %v8308_v34 = vmul.f32 %v19190_v4, %v17774_v51  ;;  %v8306_v20 = vmul.f32 %v15432_v56, %v17774_v51 }
0x412a   :  { %v8310_v0 = vmul.f32 %v19193_v5, %v17774_v51  ;;  %v8307_v23 = vmul.f32 %v15452_v35, %v17774_v51  ;;  %v8312_v33 = vmul.f32 %v17791_v47, %v17774_v51  ;;  %v8309_v57 = vmul.f32 %v19196_v44, %v17774_v51 }
0x412b   :  { %8322 = vadd.xlane.f32.xlu1 %v8305_v6  ;;  %8320 = vadd.xlane.f32.xlu0 %v8304_v24  ;;  %v8314_v15 = vmul.f32 %v17800_v18, %v17774_v51  ;;  %v8311_v11 = vmul.f32 %v19198_v48, %v17774_v51  ;;  %v8316_v9 = vmul.f32 %v17811_v31, %v17774_v51  ;;  %v8385_v6 = vsel %vm19479_vm13, 0.0, %v19381_v29 }
0x412c   :  { %v8313_v61 = vmul.f32 %v17814_v19, %v17774_v51  ;;  %v8318_v52 = vmul.f32 %v17825_v2, %v17774_v51  ;;  %v8315_v37 = vmul.f32 %v17828_v13, %v17774_v51  ;;  %v8317_v41 = vmul.f32 %v17837_v8, %v17774_v51 }
0x412d   :  { %v8319_v49 = vmul.f32 %v17844_v45, %v17774_v51 }
0x412f   :  { %8328 = vadd.xlane.f32.xlu1 %v8308_v34  ;;  %8324 = vadd.xlane.f32.xlu0 %v8306_v20 }
0x4133   :  { %8332 = vadd.xlane.f32.xlu1 %v8310_v0  ;;  %8326 = vadd.xlane.f32.xlu0 %v8307_v23 }
0x4137   :  { %8336 = vadd.xlane.f32.xlu1 %v8312_v33  ;;  %8330 = vadd.xlane.f32.xlu0 %v8309_v57 }
0x413b   :  { %8340 = vadd.xlane.f32.xlu1 %v8314_v15  ;;  %8334 = vadd.xlane.f32.xlu0 %v8311_v11  ;;  %v19480_v11 = vld [vmem:[#allocation16_spill] sm:$0xff] }
0x413c   :  { %vm19481_vm14 = vnez %v19480_v11 }
0x413f   :  { %8344 = vadd.xlane.f32.xlu1 %v8316_v9  ;;  %8338 = vadd.xlane.f32.xlu0 %v8313_v61  ;;  %v8387_v9 = vsel %vm19481_vm14, 0.0, %v19381_v29 }
0x4143   :  { %8348 = vadd.xlane.f32.xlu1 %v8318_v52  ;;  %8342 = vadd.xlane.f32.xlu0 %v8315_v37 }
0x4147   :  { %8346 = vadd.xlane.f32.xlu0 %v8317_v41 }
0x414b   :  { %8350 = vadd.xlane.f32.xlu0 %v8319_v49 }
0x41b8   :  { %v8323_v60 = vpop.xlane.xlu1 %8322  ;;  %v8321_v25 = vpop.xlane.xlu0 %8320 }
0x41b9   :  { %v8353_v63 = vmul.f32 %v8323_v60, %v17774_v51  ;;  %v8352_v53 = vmul.f32 %v8321_v25, %v17774_v51 }
0x41bb   :  { %v8370_v24 = vmul.f32 %v17848_v54, %v8353_v63  ;;  %v8369_v34 = vmul.f32 %v17848_v54, %v8352_v53  ;;  %v19482_v63 = vld [vmem:[#allocation22_spill] sm:$0xff] }
0x41bc   :  { %v8329_v20 = vpop.xlane.xlu1 %8328  ;;  %v8325_v0 = vpop.xlane.xlu0 %8324  ;;  %vm19483_vm4 = vnez %v19482_v63 }
0x41bd   :  { %v8356_v23 = vmul.f32 %v8329_v20, %v17774_v51  ;;  %v8354_v33 = vmul.f32 %v8325_v0, %v17774_v51  ;;  %v17862_v57 = vadd.f32 %v8386_v36, %v8370_v24  ;;  %v17864_v15 = vadd.f32 %v8385_v6, %v8369_v34  ;;  %v19486_v20 = vld [vmem:[#allocation28_spill] sm:$0xff] }
0x41be   :  { %v8389_v53 = vsel %vm19483_vm4, 0.0, %v19381_v29  ;;  %v8388_v36 = vsel %vm19485_vm2, 0.0, %v19381_v29  ;;  %vm19487_vm1 = vnez %v19486_v20 }
0x41bf   :  { %v8371_v61 = vmul.f32 %v17848_v54, %v8354_v33  ;;  %8419 = vmax.xlane.f32.xlu0 %v17862_v57  ;;  %8417 = vmax.xlane.f32.xlu1 %v17864_v15  ;;  %v8373_v41 = vmul.f32 %v17848_v54, %v8356_v23  ;;  %v8391_v0 = vsel %vm19487_vm1, 0.0, %v19381_v29 }
0x41c0   :  { %v8333_v52 = vpop.xlane.xlu1 %8332  ;;  %v8327_v37 = vpop.xlane.xlu0 %8326 }
0x41c1   :  { %v8358_v49 = vmul.f32 %v8333_v52, %v17774_v51  ;;  %v8355_v60 = vmul.f32 %v8327_v37, %v17774_v51  ;;  %v17875_v25 = vadd.f32 %v8387_v9, %v8371_v61  ;;  %v17891_v11 = vadd.f32 %v8389_v53, %v8373_v41  ;;  %v19488_v61 = vld [vmem:[#allocation23_spill] sm:$0xff] }
0x41c2   :  { %vm19489_vm11 = vnez %v19488_v61  ;;  %v19494_v61 = vld [vmem:[#allocation40_spill] sm:$0xff] }
0x41c3   :  { %v8372_v38 = vmul.f32 %v17848_v54, %v8355_v60  ;;  %8421 = vmax.xlane.f32.xlu1 %v17875_v25  ;;  %v8375_v6 = vmul.f32 %v17848_v54, %v8358_v49  ;;  %v8390_v52 = vsel %vm19489_vm11, 0.0, %v19381_v29  ;;  %vm19495_vm15 = vnez %v19494_v61 }
0x41c4   :  { %v8337_v24 = vpop.xlane.xlu1 %8336  ;;  %v8331_v34 = vpop.xlane.xlu0 %8330  ;;  %vm19515_vm11 = vcmask 523264  }
0x41c5   :  { %v8360_v23 = vmul.f32 %v8337_v24, %v17774_v51  ;;  %v8357_v33 = vmul.f32 %v8331_v34, %v17774_v51  ;;  %v17893_v9 = vadd.f32 %v8388_v36, %v8372_v38  ;;  %v17901_v63 = vadd.f32 %v8391_v0, %v8375_v6  ;;  %v19490_v38 = vld [vmem:[#allocation34_spill] sm:$0xff]  ;;  %v19492_v34 = vld [vmem:[#allocation29_spill] sm:$0xff] }
0x41c6   :  { %vm19491_vm9 = vnez %v19490_v38  ;;  %vm19493_vm3 = vnez %v19492_v34 }
0x41c7   :  { %v8374_v37 = vmul.f32 %v17848_v54, %v8357_v33  ;;  %8425 = vmax.xlane.f32.xlu1 %v17891_v11  ;;  %8423 = vmax.xlane.f32.xlu0 %v17893_v9  ;;  %v8377_v59 = vmul.f32 %v17848_v54, %v8360_v23  ;;  %v8393_v24 = vsel %vm19491_vm9, 0.0, %v19381_v29  ;;  %v8392_v20 = vsel %vm19493_vm3, 0.0, %v19381_v29  ;;  %vm19516_vm9 = vmmov %vm19515_vm11 }
0x41c8   :  { %v8341_v49 = vpop.xlane.xlu1 %8340  ;;  %v8335_v60 = vpop.xlane.xlu0 %8334 }
0x41c9   :  { %v8362_v41 = vmul.f32 %v8341_v49, %v17774_v51  ;;  %v8359_v53 = vmul.f32 %v8335_v60, %v17774_v51  ;;  %v17906_v36 = vadd.f32 %v8390_v52, %v8374_v37  ;;  %v8395_v52 = vsel %vm19495_vm15, 0.0, %v19381_v29 }
0x41ca   :  { %v17923_v60 = vadd.f32 %v8393_v24, %v8377_v59 }
0x41cb   :  { %v8376_v33 = vmul.f32 %v17848_v54, %v8359_v53  ;;  %8429 = vmax.xlane.f32.xlu1 %v17901_v63  ;;  %8427 = vmax.xlane.f32.xlu0 %v17906_v36  ;;  %v8379_v6 = vmul.f32 %v17848_v54, %v8362_v41  ;;  %v19496_v53 = vld [vmem:[#allocation35_spill] sm:$0xff] }
0x41cc   :  { %v8345_v0 = vpop.xlane.xlu1 %8344  ;;  %v8339_v23 = vpop.xlane.xlu0 %8338  ;;  %vm19497_vm5 = vnez %v19496_v53 }
0x41cd   :  { %v8364_v37 = vmul.f32 %v8345_v0, %v17774_v51  ;;  %v8361_v49 = vmul.f32 %v8339_v23, %v17774_v51  ;;  %v17925_v38 = vadd.f32 %v8392_v20, %v8376_v33  ;;  %v8394_v34 = vsel %vm19497_vm5, 0.0, %v19381_v29  ;;  %v19498_v33 = vld [vmem:[#allocation46_spill] sm:$0xff]  ;;  %vm19519_vm5 = vmmov %vm19516_vm9 }
0x41ce   :  { %v17933_v30 = vadd.f32 %v8395_v52, %v8379_v6  ;;  %vm19499_vm7 = vnez %v19498_v33  ;;  %v19504_v33 = vld [vmem:[#allocation47_spill] sm:$0xff] }
0x41cf   :  { %v8378_v41 = vmul.f32 %v17848_v54, %v8361_v49  ;;  %8433 = vmax.xlane.f32.xlu1 %v17923_v60  ;;  %8431 = vmax.xlane.f32.xlu0 %v17925_v38  ;;  %v8381_v0 = vmul.f32 %v17848_v54, %v8364_v37  ;;  %v8397_v23 = vsel %vm19499_vm7, 0.0, %v19381_v29  ;;  %v19500_v49 = vld [vmem:[#allocation41_spill] sm:$0xff]  ;;  %vm19505_vm10 = vnez %v19504_v33  ;;  %vm19520_vm7 = vmmov %vm19519_vm5 }
0x41d0   :  { %v8349_v61 = vpop.xlane.xlu1 %8348  ;;  %v8343_v14 = vpop.xlane.xlu0 %8342  ;;  %vm19501_vm12 = vnez %v19500_v49 }
0x41d1   :  { %v8366_v59 = vmul.f32 %v8349_v61, %v17774_v51  ;;  %v8363_v24 = vmul.f32 %v8343_v14, %v17774_v51  ;;  %v17938_v20 = vadd.f32 %v8394_v34, %v8378_v41  ;;  %v8396_v53 = vsel %vm19501_vm12, 0.0, %v19381_v29  ;;  %v19502_v41 = vld [vmem:[#allocation50_spill] sm:$0xff] }
0x41d2   :  { %v17951_v37 = vadd.f32 %v8397_v23, %v8381_v0  ;;  %vm19503_vm0 = vnez %v19502_v41 }
0x41d3   :  { %v8380_v28 = vmul.f32 %v17848_v54, %v8363_v24  ;;  %8437 = vmax.xlane.f32.xlu1 %v17933_v30  ;;  %8435 = vmax.xlane.f32.xlu0 %v17938_v20  ;;  %v8383_v52 = vmul.f32 %v17848_v54, %v8366_v59  ;;  %v8399_v61 = vsel %vm19503_vm0, 0.0, %v19381_v29  ;;  %v8398_v24 = vsel %vm19505_vm10, 0.0, %v19381_v29  ;;  %vm19523_vm10 = vmmov %vm19519_vm5 }
0x41d4   :  { %v8347_v6 = vpop.xlane.xlu0 %8346 }
0x41d5   :  { %v8365_v14 = vmul.f32 %v8347_v6, %v17774_v51  ;;  %v17953_v34 = vadd.f32 %v8396_v53, %v8380_v28  ;;  %v17965_v23 = vadd.f32 %v8399_v61, %v8383_v52  ;;  %v19506_v53 = vld [vmem:[#allocation51_spill] sm:$0xff] }
0x41d6   :  { %vm19507_vm8 = vnez %v19506_v53 }
0x41d7   :  { %v8382_v49 = vmul.f32 %v17848_v54, %v8365_v14  ;;  %8441 = vmax.xlane.f32.xlu1 %v17951_v37  ;;  %8439 = vmax.xlane.f32.xlu0 %v17953_v34  ;;  %v8400_v6 = vsel %vm19507_vm8, 0.0, %v19381_v29  ;;  %vm19524_vm8 = vmmov %vm19519_vm5 }
0x41d8   :  { %v8351_v59 = vpop.xlane.xlu0 %8350 }
0x41d9   :  { %v8367_v0 = vmul.f32 %v8351_v59, %v17774_v51  ;;  %v17967_v28 = vadd.f32 %v8398_v24, %v8382_v49 }
0x41db   :  { %v8384_v41 = vmul.f32 %v17848_v54, %v8367_v0  ;;  %8445 = vmax.xlane.f32.xlu1 %v17965_v23  ;;  %8443 = vmax.xlane.f32.xlu0 %v17967_v28 }
0x41dd   :  { %v17975_v14 = vadd.f32 %v8400_v6, %v8384_v41 }
0x41df   :  { %8447 = vmax.xlane.f32.xlu0 %v17975_v14 }
0x424c   :  { %v8418_v33 = vpop.xlane.xlu1 %8417  ;;  %v8420_v51 = vpop.xlane.xlu0 %8419 }
0x424d   :  { %v8449_v52 = vsub.f32 %v17864_v15, %v8418_v33  ;;  %v8450_v61 = vsub.f32 %v17862_v57, %v8420_v51 }
0x424f   :  { %v8465_v24 = vmul.f32 1.442695, %v8449_v52  ;;  %v8467_v49 = vmul.f32 1.442695, %v8450_v61 }
0x4250   :  { %v8422_v59 = vpop.xlane.xlu1 %8421 }
0x4251   :  { %14220 = vpow2.f32 %v8465_v24  ;;  %v8451_v54 = vsub.f32 %v17875_v25, %v8422_v59 }
0x4252   :  { %14222 = vpow2.f32 %v8467_v49 }
0x4253   :  { %v8469_v0 = vmul.f32 1.442695, %v8451_v54 }
0x4254   :  { %v8426_v53 = vpop.xlane.xlu1 %8425  ;;  %v8424_v32 = vpop.xlane.xlu0 %8423 }
0x4255   :  { %14224 = vpow2.f32 %v8469_v0  ;;  %v8453_v6 = vsub.f32 %v17891_v11, %v8426_v53  ;;  %v8452_v41 = vsub.f32 %v17893_v9, %v8424_v32 }
0x4257   :  { %v8473_v40 = vmul.f32 1.442695, %v8453_v6  ;;  %v8471_v1 = vmul.f32 1.442695, %v8452_v41 }
0x4258   :  { %v8430_v15 = vpop.xlane.xlu1 %8429  ;;  %v8428_v33 = vpop.xlane.xlu0 %8427 }
0x4259   :  { %14226 = vpow2.f32 %v8473_v40  ;;  %v8455_v57 = vsub.f32 %v17901_v63, %v8430_v15  ;;  %v8454_v51 = vsub.f32 %v17906_v36, %v8428_v33 }
0x425a   :  { %14228 = vpow2.f32 %v8471_v1 }
0x425b   :  { %v17985_v25 = vpop.eup %14220  ;;  %v8477_v52 = vmul.f32 1.442695, %v8455_v57  ;;  %v8475_v61 = vmul.f32 1.442695, %v8454_v51 }
0x425c   :  { %v17987_v24 = vpop.eup %14222  ;;  %8497 = vadd.xlane.f32.xlu1 %v17985_v25  ;;  %v8434_v11 = vpop.xlane.xlu1 %8433 }
0x425d   :  { %v8432_v32 = vpop.xlane.xlu0 %8431  ;;  %14230 = vpow2.f32 %v8477_v52  ;;  %v8457_v9 = vsub.f32 %v17923_v60, %v8434_v11  ;;  %8499 = vadd.xlane.f32.xlu0 %v17987_v24 }
0x425e   :  { %v8456_v40 = vsub.f32 %v17925_v38, %v8432_v32  ;;  %14232 = vpow2.f32 %v8475_v61 }
0x425f   :  { %v17993_v63 = vpop.eup %14224  ;;  %v8481_v1 = vmul.f32 1.442695, %v8457_v9 }
0x4260   :  { %v8479_v36 = vmul.f32 1.442695, %v8456_v40  ;;  %8501 = vadd.xlane.f32.xlu1 %v17993_v63  ;;  %v8438_v49 = vpop.xlane.xlu1 %8437 }
0x4261   :  { %v8436_v59 = vpop.xlane.xlu0 %8435  ;;  %14234 = vpow2.f32 %v8481_v1  ;;  %v8459_v54 = vsub.f32 %v17933_v30, %v8438_v49 }
0x4262   :  { %v8458_v0 = vsub.f32 %v17938_v20, %v8436_v59  ;;  %14236 = vpow2.f32 %v8479_v36 }
0x4263   :  { %v17998_v60 = vpop.eup %14226  ;;  %v8485_v53 = vmul.f32 1.442695, %v8459_v54 }
0x4264   :  { %v8483_v6 = vmul.f32 1.442695, %v8458_v0  ;;  %v18000_v38 = vpop.eup %14228  ;;  %8505 = vadd.xlane.f32.xlu1 %v17998_v60  ;;  %v8442_v41 = vpop.xlane.xlu1 %8441 }
0x4265   :  { %v8440_v15 = vpop.xlane.xlu0 %8439  ;;  %14238 = vpow2.f32 %v8485_v53  ;;  %v8461_v33 = vsub.f32 %v17951_v37, %v8442_v41  ;;  %8503 = vadd.xlane.f32.xlu0 %v18000_v38 }
0x4266   :  { %v8460_v30 = vsub.f32 %v17953_v34, %v8440_v15  ;;  %14240 = vpow2.f32 %v8483_v6 }
0x4267   :  { %v18006_v20 = vpop.eup %14230  ;;  %v8489_v57 = vmul.f32 1.442695, %v8461_v33 }
0x4268   :  { %v8487_v51 = vmul.f32 1.442695, %v8460_v30  ;;  %v18008_v52 = vpop.eup %14232  ;;  %8509 = vadd.xlane.f32.xlu1 %v18006_v20  ;;  %v8446_v61 = vpop.xlane.xlu1 %8445 }
0x4269   :  { %v8444_v11 = vpop.xlane.xlu0 %8443  ;;  %14242 = vpow2.f32 %v8489_v57  ;;  %v8463_v32 = vsub.f32 %v17965_v23, %v8446_v61  ;;  %8507 = vadd.xlane.f32.xlu0 %v18008_v52 }
0x426a   :  { %v8462_v37 = vsub.f32 %v17967_v28, %v8444_v11  ;;  %14244 = vpow2.f32 %v8487_v51 }
0x426b   :  { %v18014_v34 = vpop.eup %14234  ;;  %v8493_v9 = vmul.f32 1.442695, %v8463_v32 }
0x426c   :  { %v8491_v40 = vmul.f32 1.442695, %v8462_v37  ;;  %v18016_v1 = vpop.eup %14236  ;;  %8513 = vadd.xlane.f32.xlu1 %v18014_v34 }
0x426d   :  { %v8448_v36 = vpop.xlane.xlu0 %8447  ;;  %14246 = vpow2.f32 %v8493_v9  ;;  %8511 = vadd.xlane.f32.xlu0 %v18016_v1 }
0x426e   :  { %v8464_v49 = vsub.f32 %v17975_v14, %v8448_v36  ;;  %14248 = vpow2.f32 %v8491_v40 }
0x426f   :  { %v18021_v23 = vpop.eup %14238 }
0x4270   :  { %v8495_v59 = vmul.f32 1.442695, %v8464_v49  ;;  %v18023_v28 = vpop.eup %14240  ;;  %8517 = vadd.xlane.f32.xlu1 %v18021_v23 }
0x4271   :  { %8515 = vadd.xlane.f32.xlu0 %v18023_v28 }
0x4272   :  { %14250 = vpow2.f32 %v8495_v59 }
0x4273   :  { %v18027_v54 = vpop.eup %14242 }
0x4274   :  { %v18029_v0 = vpop.eup %14244  ;;  %8521 = vadd.xlane.f32.xlu1 %v18027_v54 }
0x4275   :  { %8519 = vadd.xlane.f32.xlu0 %v18029_v0 }
0x4277   :  { %v18033_v14 = vpop.eup %14246 }
0x4278   :  { %v18035_v53 = vpop.eup %14248  ;;  %8525 = vadd.xlane.f32.xlu1 %v18033_v14 }
0x4279   :  { %8523 = vadd.xlane.f32.xlu0 %v18035_v53 }
0x427c   :  { %v18039_v6 = vpop.eup %14250 }
0x427d   :  { %8527 = vadd.xlane.f32.xlu0 %v18039_v6 }
0x42e9   :  { %v8498_v41 = vpop.xlane.xlu1 %8497 }
0x42ea   :  { %14252 = vrcp.f32 %v8498_v41  ;;  %v8500_v15 = vpop.xlane.xlu0 %8499 }
0x42eb   :  { %14254 = vrcp.f32 %v8500_v15 }
0x42ed   :  { %v8502_v33 = vpop.xlane.xlu1 %8501 }
0x42ee   :  { %14256 = vrcp.f32 %v8502_v33 }
0x42f1   :  { %v8506_v11 = vpop.xlane.xlu1 %8505 }
0x42f2   :  { %v8504_v30 = vpop.xlane.xlu0 %8503 }
0x42f3   :  { %14258 = vrcp.f32 %v8504_v30 }
0x42f4   :  { %v14253_v57 = vpop.eup %14252 }
0x42f5   :  { %v14255_v51 = vpop.eup %14254  ;;  %v8545_v61 = vmul.f32 %v14253_v57, %v17985_v25  ;;  %v8510_v59 = vpop.xlane.xlu1 %8509 }
0x42f6   :  { %v8508_v32 = vpop.xlane.xlu0 %8507  ;;  %v8546_v37 = vmul.f32 %v14255_v51, %v17987_v24 }
0x42f7   :  { %14260 = vrcp.f32 %v8508_v32 }
0x42f8   :  { %v13932_v9 = vpack.c.bf16 %v8546_v37, %v8545_v61  ;;  %14262 = vrcp.f32 %v8506_v11  ;;  %v14257_v40 = vpop.eup %14256 }
0x42f9   :  { %v8547_v41 = vmul.f32 %v14257_v40, %v17993_v63  ;;  %v8514_v51 = vpop.xlane.xlu1 %8513 }
0x42fa   :  { %13933 = vmatpush3.bf16.xpose.msra.mxu0 %v13932_v9  ;;  %v8512_v36 = vpop.xlane.xlu0 %8511 }
0x42fb   :  { %13934 = vmatprep.subr.bf16.mxu0 %v18914_v17  ;;  %14264 = vrcp.f32 %v8512_v36 }
0x42fc   :  { %14266 = vrcp.f32 %v8510_v59 }
0x42fd   :  { %v14259_v49 = vpop.eup %14258  ;;  %v8518_v9 = vpop.xlane.xlu1 %8517 }
0x42fe   :  { %v8548_v15 = vmul.f32 %v14259_v49, %v18000_v38  ;;  %v8516_v30 = vpop.xlane.xlu0 %8515 }
0x42ff   :  { %14268 = vrcp.f32 %v8516_v30 }
0x4300   :  { %v13935_v25 = vpack.c.bf16 %v8548_v15, %v8547_v41  ;;  %14270 = vrcp.f32 %v8514_v51 }
0x4301   :  { %v14261_v33 = vpop.eup %14260  ;;  %v8522_v41 = vpop.xlane.xlu1 %8521 }
0x4302   :  { %13936 = vmatpush3.bf16.xpose.msra.mxu0 %v13935_v25  ;;  %v14263_v24 = vpop.eup %14262  ;;  %v8550_v57 = vmul.f32 %v14261_v33, %v18008_v52  ;;  %v8520_v38 = vpop.xlane.xlu0 %8519 }
0x4303   :  { %13937 = vmatprep.subr.bf16.mxu0 %v18914_v17  ;;  %v8549_v61 = vmul.f32 %v14263_v24, %v17998_v60  ;;  %14272 = vrcp.f32 %v8520_v38 }
0x4304   :  { %14274 = vrcp.f32 %v8518_v9 }
0x4305   :  { %v13938_v11 = vpack.c.bf16 %v8550_v57, %v8549_v61  ;;  %v14265_v32 = vpop.eup %14264  ;;  %v8526_v30 = vpop.xlane.xlu1 %8525 }
0x4306   :  { %v14267_v63 = vpop.eup %14266  ;;  %v8552_v37 = vmul.f32 %v14265_v32, %v18016_v1  ;;  %v8524_v49 = vpop.xlane.xlu0 %8523 }
0x4307   :  { %v8551_v40 = vmul.f32 %v14267_v63, %v18006_v20  ;;  %14276 = vrcp.f32 %v8524_v49 }
0x4308   :  { %14278 = vrcp.f32 %v8522_v41 }
0x4309   :  { %v13941_v36 = vpack.c.bf16 %v8552_v37, %v8551_v40  ;;  %v14269_v52 = vpop.eup %14268 }
0x430a   :  { %13939 = vmatpush3.bf16.xpose.msra.mxu0 %v13938_v11  ;;  %v14271_v60 = vpop.eup %14270  ;;  %v8554_v59 = vmul.f32 %v14269_v52, %v18023_v28  ;;  %v8528_v33 = vpop.xlane.xlu0 %8527 }
0x430b   :  { %13940 = vmatprep.subr.bf16.mxu0 %v18914_v17  ;;  %v8553_v15 = vmul.f32 %v14271_v60, %v18014_v34  ;;  %14280 = vrcp.f32 %v8528_v33  ;;  %v8640_v60 = vstv %s9949_s11 }
0x430c   :  { %14282 = vrcp.f32 %v8526_v30 }
0x430d   :  { %v13944_v25 = vpack.c.bf16 %v8554_v59, %v8553_v15  ;;  %v14273_v1 = vpop.eup %14272 }
0x430e   :  { %v14275_v20 = vpop.eup %14274  ;;  %v8556_v24 = vmul.f32 %v14273_v1, %v18029_v0 }
0x430f   :  { %v8555_v57 = vmul.f32 %v14275_v20, %v18021_v23 }
0x4311   :  { %v13947_v51 = vpack.c.bf16 %v8556_v24, %v8555_v57  ;;  %v14277_v28 = vpop.eup %14276  ;;  %v19512_v57 = vshra.s32 %v19313_v21, 6  ;;  %v19514_v21 = vshra.s32 %v19386_v58, 6 }
0x4312   :  { %13942 = vmatpush3.bf16.xpose.msra.mxu0 %v13941_v36  ;;  %v14279_v34 = vpop.eup %14278  ;;  %v8558_v61 = vmul.f32 %v14277_v28, %v18035_v53  ;;  %v8631_v53 = vstv %s9939_s30  ;;  %v8638_v36 = vstv %s9948_s10 }
0x4313   :  { %13943 = vmatprep.subr.bf16.mxu0 %v18914_v17  ;;  %v8557_v11 = vmul.f32 %v14279_v34, %v18027_v54 }
0x4315   :  { %v13950_v32 = vpack.c.bf16 %v8558_v61, %v8557_v11  ;;  %v14281_v63 = vpop.eup %14280 }
0x4316   :  { %v14283_v38 = vpop.eup %14282  ;;  %v8560_v23 = vmul.f32 %v14281_v63, %v18039_v6 }
0x4317   :  { %v8559_v0 = vmul.f32 %v14283_v38, %v18033_v14 }
0x4319   :  { %v13953_v37 = vpack.c.bf16 %v8560_v23, %v8559_v0 }
0x431a   :  { %13945 = vmatpush3.bf16.xpose.msra.mxu0 %v13944_v25 }
0x431b   :  { %13946 = vmatprep.subr.bf16.mxu0 %v18914_v17 }
0x4322   :  { %13948 = vmatpush3.bf16.xpose.msra.mxu0 %v13947_v51 }
0x4323   :  { %13949 = vmatprep.subr.bf16.mxu0 %v18914_v17 }
0x432a   :  { %13951 = vmatpush3.bf16.xpose.msra.mxu0 %v13950_v32 }
0x432b   :  { %13952 = vmatprep.subr.bf16.mxu0 %v18914_v17 }
0x4332   :  { %13954 = vmatpush3.bf16.xpose.msra.mxu0 %v13953_v37 }
0x4339   :  { %12728 = vmatmul.mubr.f32.vlgmr.msra.gmra.mrb[98].mxu0 %v17770_v16 }
0x440c   :  { %v8627_v9 = vpop.f32.mrb[98].mxu0 }
0x440d   :  { %v8632_v54 = vmul.f32 %v8631_v53, %v8627_v9  ;;  %v12729_v40 = vpop.f32.mrb[99].mxu0 }
0x440f   :  { %v8633_v52 = vadd.f32 %v8632_v54, %v17770_v16 }
0x4411   :  { %v8639_v49 = vmul.f32 %v8638_v36, %v8633_v52 }
0x4413   :  { %v18067_v59 = vadd.f32 %v8640_v60, %v8639_v49  ;;  %v19517_v49 = vshra.s32 %v19390_v10, 6 }
0x4415   :  { %v8645_v14 = vrot.slane %v18067_v59, %v14937_v46 }
0x4417   :  { %v8647_v6 = vmul.f32 %v15419_v42, %v8645_v14  ;;  %v8646_v41 = vmul.f32 %v15422_v50, %v8645_v14  ;;  %v8649_v15 = vmul.f32 %v15452_v35, %v8645_v14  ;;  %v8648_v25 = vmul.f32 %v15432_v56, %v8645_v14 }
0x4418   :  { %v8651_v16 = vmul.f32 %v19196_v44, %v8645_v14  ;;  %v8650_v1 = vmul.f32 %v19190_v4, %v8645_v14  ;;  %v8653_v46 = vmul.f32 %v19198_v48, %v8645_v14  ;;  %v8652_v42 = vmul.f32 %v19193_v5, %v8645_v14 }
0x4419   :  { %8664 = vadd.xlane.f32.xlu0 %v8647_v6  ;;  %8662 = vadd.xlane.f32.xlu1 %v8646_v41  ;;  %v8655_v50 = vmul.f32 %v17814_v19, %v8645_v14  ;;  %v8654_v35 = vmul.f32 %v17791_v47, %v8645_v14  ;;  %v8657_v56 = vmul.f32 %v17828_v13, %v8645_v14  ;;  %v19508_v47 = vld [vmem:[#allocation82_spill] sm:$0xff]  ;;  %v19509_v13 = vshra.s32 %v19308_v26, 6 }
0x441a   :  { %v8656_v44 = vmul.f32 %v17800_v18, %v8645_v14  ;;  %v8659_v4 = vmul.f32 %v17837_v8, %v8645_v14  ;;  %v8658_v48 = vmul.f32 %v17811_v31, %v8645_v14  ;;  %v8661_v5 = vmul.f32 %v17844_v45, %v8645_v14 }
0x441b   :  { %v8660_v19 = vmul.f32 %v17825_v2, %v8645_v14  ;;  %vm8728_vm6 = vcmp.eq.s32.totalorder %v19509_v13, %v19508_v47  ;;  %v19510_v18 = vshra.s32 %v19303_v62, 6  ;;  %v18093_v8 = vstv %s9950_s12 }
0x441c   :  { %v8744_v2 = vsel %vm8728_vm6, 0.0, %v19381_v29  ;;  %v19511_v62 = vshra.s32 %v19317_v3, 6  ;;  %vm8729_vm4 = vcmp.eq.s32.totalorder %v19512_v57, %v19508_v47  ;;  %v19513_v3 = vshra.s32 %v19384_v22, 6 }
0x441d   :  { %8668 = vadd.xlane.f32.xlu0 %v8649_v15  ;;  %8666 = vadd.xlane.f32.xlu1 %v8648_v25  ;;  %vm8727_vm13 = vcmp.eq.s32.totalorder %v19510_v18, %v19508_v47  ;;  %v8745_v38 = vsel %vm8729_vm4, 0.0, %v19381_v29  ;;  %vm8731_vm1 = vcmp.eq.s32.totalorder %v19514_v21, %v19508_v47  ;;  %vm8734_vm3 = vcmp.eq.s32.totalorder %v19517_v49, %v19508_v47  ;;  %vm19528_vm4 = vmmov %vm19519_vm5 }
0x441e   :  { %v8743_v24 = vsel %vm8727_vm13, 0.0, %v19381_v29  ;;  %vm8730_vm14 = vcmp.eq.s32.totalorder %v19511_v62, %v19508_v47  ;;  %vm8732_vm2 = vcmp.eq.s32.totalorder %v19513_v3, %v19508_v47  ;;  %v8747_v60 = vsel %vm8731_vm1, 0.0, %v19381_v29  ;;  %v19529_v3 = vld [vmem:[#allocation39_spill] sm:$0xff] }
0x441f   :  { %v8746_v63 = vsel %vm8730_vm14, 0.0, %v19381_v29  ;;  %v8748_v52 = vsel %vm8732_vm2, 0.0, %v19381_v29  ;;  %v19518_v14 = vshra.s32 %v19392_v27, 6  ;;  %vm19527_vm14 = vmmov %vm19519_vm5  ;;  %v19530_v21 = vshra.s32 %v19529_v3, 6 }
0x4421   :  { %8672 = vadd.xlane.f32.xlu0 %v8651_v16  ;;  %8670 = vadd.xlane.f32.xlu1 %v8650_v1  ;;  %vm8733_vm15 = vcmp.eq.s32.totalorder %v19518_v14, %v19508_v47  ;;  %vm8740_vm2 = vcmp.eq.s32.totalorder %v19530_v21, %v19508_v47 }
0x4425   :  { %8676 = vadd.xlane.f32.xlu0 %v8653_v46  ;;  %8674 = vadd.xlane.f32.xlu1 %v8652_v42 }
0x4429   :  { %8680 = vadd.xlane.f32.xlu0 %v8655_v50  ;;  %8678 = vadd.xlane.f32.xlu1 %v8654_v35  ;;  %v8750_v50 = vsel %vm8734_vm3, 0.0, %v19381_v29  ;;  %v8749_v35 = vsel %vm8733_vm15, 0.0, %v19381_v29 }
0x442d   :  { %8684 = vadd.xlane.f32.xlu0 %v8657_v56  ;;  %8682 = vadd.xlane.f32.xlu1 %v8656_v44  ;;  %v19521_v56 = vshra.s32 %v19471_v55, 6  ;;  %v19522_v44 = vshra.s32 %v19468_v7, 6 }
0x442f   :  { %vm8736_vm12 = vcmp.eq.s32.totalorder %v19521_v56, %v19508_v47  ;;  %vm8735_vm0 = vcmp.eq.s32.totalorder %v19522_v44, %v19508_v47 }
0x4431   :  { %8688 = vadd.xlane.f32.xlu0 %v8659_v4  ;;  %8686 = vadd.xlane.f32.xlu1 %v8658_v48 }
0x4435   :  { %8692 = vadd.xlane.f32.xlu0 %v8661_v5  ;;  %8690 = vadd.xlane.f32.xlu1 %v8660_v19 }
0x44a6   :  { %v8665_v31 = vpop.xlane.xlu0 %8664  ;;  %v8663_v20 = vpop.xlane.xlu1 %8662 }
0x44a7   :  { %v8695_v33 = vmul.f32 %v8665_v31, %v16689_v39  ;;  %v8694_v45 = vmul.f32 %v8663_v20, %v16689_v39 }
0x44a9   :  { %v8712_v30 = vmul.f32 %v18093_v8, %v8695_v33  ;;  %v8711_v26 = vmul.f32 %v18093_v8, %v8694_v45  ;;  %v8752_v33 = vsel %vm8736_vm12, 0.0, %v19381_v29  ;;  %v8751_v45 = vsel %vm8735_vm0, 0.0, %v19381_v29  ;;  %vm19541_vm12 = vmmov %vm19528_vm4 }
0x44aa   :  { %v8669_v51 = vpop.xlane.xlu0 %8668  ;;  %v8667_v28 = vpop.xlane.xlu1 %8666  ;;  %vm19542_vm0 = vmmov %vm19528_vm4 }
0x44ab   :  { %v8697_v34 = vmul.f32 %v8669_v51, %v16689_v39  ;;  %v8696_v61 = vmul.f32 %v8667_v28, %v16689_v39  ;;  %v18109_v11 = vadd.f32 %v8744_v2, %v8712_v30  ;;  %v18111_v32 = vadd.f32 %v8743_v24, %v8711_v26 }
0x44ac   :  { %v19525_v2 = vshra.s32 %v19473_v43, 6  ;;  %v19526_v24 = vshra.s32 %v19469_v12, 6 }
0x44ad   :  { %v8714_v23 = vmul.f32 %v18093_v8, %v8697_v34  ;;  %v8713_v0 = vmul.f32 %v18093_v8, %v8696_v61  ;;  %v8778_v37 = vsel %vm19515_vm11, %v18109_v11, -inf  ;;  %v8775_v53 = vsel %vm19516_vm9, %v18111_v32, -inf  ;;  %vm19533_vm11 = vmmov %vm19528_vm4 }
0x44ae   :  { %8779 = vmax.xlane.f32.xlu0 %v8778_v37  ;;  %v8673_v9 = vpop.xlane.xlu0 %8672  ;;  %8776 = vmax.xlane.f32.xlu1 %v8775_v53  ;;  %v8671_v54 = vpop.xlane.xlu1 %8670  ;;  %vm8738_vm6 = vcmp.eq.s32.totalorder %v19525_v2, %v19508_v47  ;;  %vm8737_vm13 = vcmp.eq.s32.totalorder %v19526_v24, %v19508_v47  ;;  %vm19534_vm9 = vmmov %vm19528_vm4 }
0x44af   :  { %v8699_v22 = vmul.f32 %v8673_v9, %v16689_v39  ;;  %v8698_v40 = vmul.f32 %v8671_v54, %v16689_v39  ;;  %v18129_v58 = vadd.f32 %v8746_v63, %v8714_v23  ;;  %v18131_v36 = vadd.f32 %v8745_v38, %v8713_v0  ;;  %v19531_v23 = vld [vmem:[#allocation37_spill] sm:$0xff] }
0x44b0   :  { %v8754_v63 = vsel %vm8738_vm6, 0.0, %v19381_v29  ;;  %v8753_v38 = vsel %vm8737_vm13, 0.0, %v19381_v29  ;;  %v19532_v0 = vshra.s32 %v19531_v23, 6  ;;  %vm19545_vm6 = vmmov %vm19542_vm0 }
0x44b1   :  { %v8716_v6 = vmul.f32 %v18093_v8, %v8699_v22  ;;  %v8715_v41 = vmul.f32 %v18093_v8, %v8698_v40  ;;  %v8784_v15 = vsel %vm19519_vm5, %v18129_v58, -inf  ;;  %v8781_v25 = vsel %vm19520_vm7, %v18131_v36, -inf  ;;  %vm19539_vm5 = vmmov %vm19528_vm4 }
0x44b2   :  { %8785 = vmax.xlane.f32.xlu0 %v8784_v15  ;;  %v8677_v16 = vpop.xlane.xlu0 %8676  ;;  %8782 = vmax.xlane.f32.xlu1 %v8781_v25  ;;  %v8675_v1 = vpop.xlane.xlu1 %8674  ;;  %vm8739_vm1 = vcmp.eq.s32.totalorder %v19532_v0, %v19508_v47  ;;  %v19535_v15 = vld [vmem:[#allocation45_spill] sm:$0xff]  ;;  %vm19540_vm7 = vmmov %vm19528_vm4 }
0x44b3   :  { %v8701_v10 = vmul.f32 %v8677_v16, %v16689_v39  ;;  %v8700_v46 = vmul.f32 %v8675_v1, %v16689_v39  ;;  %v18149_v27 = vadd.f32 %v8748_v52, %v8716_v6  ;;  %v18151_v42 = vadd.f32 %v8747_v60, %v8715_v41  ;;  %v19537_v16 = vld [vmem:[#allocation43_spill] sm:$0xff]  ;;  %vm19546_vm13 = vmmov %vm19542_vm0 }
0x44b4   :  { %v8756_v6 = vsel %vm8740_vm2, 0.0, %v19381_v29  ;;  %v8755_v41 = vsel %vm8739_vm1, 0.0, %v19381_v29  ;;  %v19536_v25 = vshra.s32 %v19535_v15, 6  ;;  %v19538_v1 = vshra.s32 %v19537_v16, 6  ;;  %vm19549_vm2 = vmmov %vm19542_vm0 }
0x44b5   :  { %v8718_v4 = vmul.f32 %v18093_v8, %v8701_v10  ;;  %v8717_v48 = vmul.f32 %v18093_v8, %v8700_v46  ;;  %v8790_v5 = vsel %vm19523_vm10, %v18149_v27, -inf  ;;  %v8787_v19 = vsel %vm19524_vm8, %v18151_v42, -inf  ;;  %vm19543_vm10 = vmmov %vm19542_vm0 }
0x44b6   :  { %8791 = vmax.xlane.f32.xlu0 %v8790_v5  ;;  %v8681_v13 = vpop.xlane.xlu0 %8680  ;;  %8788 = vmax.xlane.f32.xlu1 %v8787_v19  ;;  %v8679_v18 = vpop.xlane.xlu1 %8678  ;;  %vm8742_vm3 = vcmp.eq.s32.totalorder %v19536_v25, %v19508_v47  ;;  %vm8741_vm15 = vcmp.eq.s32.totalorder %v19538_v1, %v19508_v47  ;;  %vm19544_vm8 = vmmov %vm19542_vm0 }
0x44b7   :  { %v8703_v55 = vmul.f32 %v8681_v13, %v16689_v39  ;;  %v8702_v31 = vmul.f32 %v8679_v18, %v16689_v39  ;;  %v18169_v7 = vadd.f32 %v8750_v50, %v8718_v4  ;;  %v18171_v20 = vadd.f32 %v8749_v35, %v8717_v48  ;;  %vm19550_vm1 = vmmov %vm19542_vm0 }
0x44b8   :  { %v8758_v19 = vsel %vm8742_vm3, 0.0, %v19381_v29  ;;  %v8757_v13 = vsel %vm8741_vm15, 0.0, %v19381_v29  ;;  %vm19553_vm3 = vmmov %vm19542_vm0 }
0x44b9   :  { %v8720_v30 = vmul.f32 %v18093_v8, %v8703_v55  ;;  %v8719_v26 = vmul.f32 %v18093_v8, %v8702_v31  ;;  %v8796_v62 = vsel %vm19527_vm14, %v18169_v7, -inf  ;;  %v8793_v57 = vsel %vm19528_vm4, %v18171_v20, -inf  ;;  %vm19547_vm14 = vmmov %vm19542_vm0 }
0x44ba   :  { %8797 = vmax.xlane.f32.xlu0 %v8796_v62  ;;  %v8685_v51 = vpop.xlane.xlu0 %8684  ;;  %8794 = vmax.xlane.f32.xlu1 %v8793_v57  ;;  %v8683_v28 = vpop.xlane.xlu1 %8682  ;;  %vm19548_vm4 = vmmov %vm19542_vm0 }
0x44bb   :  { %v8705_v43 = vmul.f32 %v8685_v51, %v16689_v39  ;;  %v8704_v34 = vmul.f32 %v8683_v28, %v16689_v39  ;;  %v18189_v12 = vadd.f32 %v8752_v33, %v8720_v30  ;;  %v18191_v61 = vadd.f32 %v8751_v45, %v8719_v26  ;;  %vm19554_vm15 = vmmov %vm19542_vm0 }
0x44bd   :  { %v8722_v37 = vmul.f32 %v18093_v8, %v8705_v43  ;;  %v8721_v53 = vmul.f32 %v18093_v8, %v8704_v34  ;;  %v8802_v9 = vsel %vm19533_vm11, %v18189_v12, -inf  ;;  %v8799_v54 = vsel %vm19534_vm9, %v18191_v61, -inf  ;;  %vm19551_vm11 = vmmov %vm19542_vm0 }
0x44be   :  { %8803 = vmax.xlane.f32.xlu0 %v8802_v9  ;;  %v8689_v22 = vpop.xlane.xlu0 %8688  ;;  %8800 = vmax.xlane.f32.xlu1 %v8799_v54  ;;  %v8687_v40 = vpop.xlane.xlu1 %8686  ;;  %vm19552_vm9 = vmmov %vm19542_vm0 }
0x44bf   :  { %v8707_v52 = vmul.f32 %v8689_v22, %v16689_v39  ;;  %v8706_v60 = vmul.f32 %v8687_v40, %v16689_v39  ;;  %v18209_v49 = vadd.f32 %v8754_v63, %v8722_v37  ;;  %v18211_v14 = vadd.f32 %v8753_v38, %v8721_v53 }
0x44c1   :  { %v8724_v10 = vmul.f32 %v18093_v8, %v8707_v52  ;;  %v8723_v46 = vmul.f32 %v18093_v8, %v8706_v60  ;;  %v8808_v50 = vsel %vm19539_vm5, %v18209_v49, -inf  ;;  %v8805_v35 = vsel %vm19540_vm7, %v18211_v14, -inf  ;;  %vm19555_vm5 = vmmov %vm19542_vm0 }
0x44c2   :  { %8809 = vmax.xlane.f32.xlu0 %v8808_v50  ;;  %v8693_v56 = vpop.xlane.xlu0 %8692  ;;  %8806 = vmax.xlane.f32.xlu1 %v8805_v35  ;;  %v8691_v44 = vpop.xlane.xlu1 %8690  ;;  %vm19556_vm7 = vmmov %vm19542_vm0 }
0x44c3   :  { %v8709_v4 = vmul.f32 %v8693_v56, %v16689_v39  ;;  %v8708_v48 = vmul.f32 %v8691_v44, %v16689_v39  ;;  %v18229_v5 = vadd.f32 %v8756_v6, %v8724_v10  ;;  %v18231_v47 = vadd.f32 %v8755_v41, %v8723_v46 }
0x44c5   :  { %v8726_v18 = vmul.f32 %v18093_v8, %v8709_v4  ;;  %v8725_v55 = vmul.f32 %v18093_v8, %v8708_v48  ;;  %v8814_v31 = vsel %vm19541_vm12, %v18229_v5, -inf  ;;  %v8811_v33 = vsel %vm19542_vm0, %v18231_v47, -inf  ;;  %vm19557_vm12 = vmmov %vm19542_vm0 }
0x44c6   :  { %8815 = vmax.xlane.f32.xlu0 %v8814_v31  ;;  %8812 = vmax.xlane.f32.xlu1 %v8811_v33 }
0x44c7   :  { %v18241_v39 = vadd.f32 %v8758_v19, %v8726_v18  ;;  %v18243_v45 = vadd.f32 %v8757_v13, %v8725_v55 }
0x44c9   :  { %v8820_v2 = vsel %vm19543_vm10, %v18241_v39, -inf  ;;  %v8817_v29 = vsel %vm19544_vm8, %v18243_v45, -inf  ;;  %vm19558_vm10 = vmmov %vm19542_vm0 }
0x44ca   :  { %8821 = vmax.xlane.f32.xlu0 %v8820_v2  ;;  %8818 = vmax.xlane.f32.xlu1 %v8817_v29  ;;  %vm19559_vm8 = vmmov %vm19542_vm0 }
0x453b   :  { %v8780_v8 = vpop.xlane.xlu0 %8779  ;;  %v8777_v24 = vpop.xlane.xlu1 %8776 }
0x453c   :  { %v8824_v30 = vsub.f32 %v18109_v11, %v8780_v8  ;;  %v8823_v26 = vsub.f32 %v18111_v32, %v8777_v24 }
0x453e   :  { %v8841_v62 = vmul.f32 1.442695, %v8824_v30  ;;  %v8839_v57 = vmul.f32 1.442695, %v8823_v26 }
0x453f   :  { %v8786_v51 = vpop.xlane.xlu0 %8785  ;;  %v8783_v28 = vpop.xlane.xlu1 %8782 }
0x4540   :  { %14284 = vpow2.f32 %v8841_v62  ;;  %v8826_v43 = vsub.f32 %v18129_v58, %v8786_v51  ;;  %v8825_v34 = vsub.f32 %v18131_v36, %v8783_v28 }
0x4541   :  { %14286 = vpow2.f32 %v8839_v57 }
0x4542   :  { %v8845_v63 = vmul.f32 1.442695, %v8826_v43  ;;  %v8843_v38 = vmul.f32 1.442695, %v8825_v34 }
0x4543   :  { %v8792_v3 = vpop.xlane.xlu0 %8791  ;;  %v8789_v21 = vpop.xlane.xlu1 %8788 }
0x4544   :  { %14288 = vpow2.f32 %v8845_v63  ;;  %v8828_v23 = vsub.f32 %v18149_v27, %v8792_v3  ;;  %v8827_v11 = vsub.f32 %v18151_v42, %v8789_v21 }
0x4545   :  { %14290 = vpow2.f32 %v8843_v38 }
0x4546   :  { %v8849_v32 = vmul.f32 1.442695, %v8828_v23  ;;  %v8847_v0 = vmul.f32 1.442695, %v8827_v11 }
0x4547   :  { %v8798_v37 = vpop.xlane.xlu0 %8797  ;;  %v8795_v53 = vpop.xlane.xlu1 %8794 }
0x4548   :  { %14292 = vpow2.f32 %v8849_v32  ;;  %v8830_v58 = vsub.f32 %v18169_v7, %v8798_v37  ;;  %v8829_v36 = vsub.f32 %v18171_v20, %v8795_v53 }
0x4549   :  { %14294 = vpow2.f32 %v8847_v0 }
0x454a   :  { %v18257_v9 = vpop.eup %14284  ;;  %v8853_v54 = vmul.f32 1.442695, %v8830_v58  ;;  %v8851_v22 = vmul.f32 1.442695, %v8829_v36 }
0x454b   :  { %v18259_v40 = vpop.eup %14286  ;;  %v8804_v27 = vpop.xlane.xlu0 %8803  ;;  %v8874_v42 = vsel %vm19545_vm6, %v18257_v9, 0.0 }
0x454c   :  { %v8801_v52 = vpop.xlane.xlu1 %8800  ;;  %14296 = vpow2.f32 %v8853_v54  ;;  %v8832_v60 = vsub.f32 %v18189_v12, %v8804_v27  ;;  %8875 = vadd.xlane.f32.xlu0 %v8874_v42  ;;  %v8871_v7 = vsel %vm19546_vm13, %v18259_v40, 0.0  ;;  %vm19563_vm13 = vmmov %vm19542_vm0 }
0x454d   :  { %v8831_v6 = vsub.f32 %v18191_v61, %v8801_v52  ;;  %14298 = vpow2.f32 %v8851_v22  ;;  %8872 = vadd.xlane.f32.xlu1 %v8871_v7 }
0x454e   :  { %v18267_v20 = vpop.eup %14288  ;;  %v8857_v41 = vmul.f32 1.442695, %v8832_v60 }
0x454f   :  { %v8855_v15 = vmul.f32 1.442695, %v8831_v6  ;;  %v18269_v25 = vpop.eup %14290  ;;  %v8810_v16 = vpop.xlane.xlu0 %8809  ;;  %v8880_v10 = vsel %vm19547_vm14, %v18267_v20, 0.0 }
0x4550   :  { %v8807_v1 = vpop.xlane.xlu1 %8806  ;;  %14300 = vpow2.f32 %v8857_v41  ;;  %v8834_v12 = vsub.f32 %v18209_v49, %v8810_v16  ;;  %8881 = vadd.xlane.f32.xlu0 %v8880_v10  ;;  %v8877_v46 = vsel %vm19548_vm4, %v18269_v25, 0.0 }
0x4551   :  { %v8833_v61 = vsub.f32 %v18211_v14, %v8807_v1  ;;  %14302 = vpow2.f32 %v8855_v15  ;;  %8878 = vadd.xlane.f32.xlu1 %v8877_v46  ;;  %v19560_v15 = vld [vmem:[#allocation90_spill] sm:$0xff] }
0x4552   :  { %v18277_v50 = vpop.eup %14292  ;;  %v8861_v35 = vmul.f32 1.442695, %v8834_v12  ;;  %vm19561_vm6 = vnez %v19560_v15 }
0x4553   :  { %v8859_v56 = vmul.f32 1.442695, %v8833_v61  ;;  %v18279_v44 = vpop.eup %14294  ;;  %v8816_v4 = vpop.xlane.xlu0 %8815  ;;  %v8886_v19 = vsel %vm19549_vm2, %v18277_v50, 0.0 }
0x4554   :  { %v8813_v48 = vpop.xlane.xlu1 %8812  ;;  %14304 = vpow2.f32 %v8861_v35  ;;  %v8836_v49 = vsub.f32 %v18229_v5, %v8816_v4  ;;  %8887 = vadd.xlane.f32.xlu0 %v8886_v19  ;;  %v8883_v13 = vsel %vm19550_vm1, %v18279_v44, 0.0 }
0x4555   :  { %v8835_v14 = vsub.f32 %v18231_v47, %v8813_v48  ;;  %14306 = vpow2.f32 %v8859_v56  ;;  %8884 = vadd.xlane.f32.xlu1 %v8883_v13 }
0x4556   :  { %v18287_v18 = vpop.eup %14296  ;;  %v8865_v55 = vmul.f32 1.442695, %v8836_v49 }
0x4557   :  { %v8863_v31 = vmul.f32 1.442695, %v8835_v14  ;;  %v18289_v33 = vpop.eup %14298  ;;  %v8822_v2 = vpop.xlane.xlu0 %8821  ;;  %v8892_v8 = vsel %vm19551_vm11, %v18287_v18, 0.0 }
0x4558   :  { %v8819_v29 = vpop.xlane.xlu1 %8818  ;;  %14308 = vpow2.f32 %v8865_v55  ;;  %v8838_v5 = vsub.f32 %v18241_v39, %v8822_v2  ;;  %8893 = vadd.xlane.f32.xlu0 %v8892_v8  ;;  %v8889_v24 = vsel %vm19552_vm9, %v18289_v33, 0.0 }
0x4559   :  { %v8837_v47 = vsub.f32 %v18243_v45, %v8819_v29  ;;  %14310 = vpow2.f32 %v8863_v31  ;;  %8890 = vadd.xlane.f32.xlu1 %v8889_v24 }
0x455a   :  { %v18297_v30 = vpop.eup %14300  ;;  %v8869_v26 = vmul.f32 1.442695, %v8838_v5 }
0x455b   :  { %v8867_v62 = vmul.f32 1.442695, %v8837_v47  ;;  %v18299_v57 = vpop.eup %14302  ;;  %v8898_v51 = vsel %vm19553_vm3, %v18297_v30, 0.0 }
0x455c   :  { %14312 = vpow2.f32 %v8869_v26  ;;  %8899 = vadd.xlane.f32.xlu0 %v8898_v51  ;;  %v8895_v39 = vsel %vm19554_vm15, %v18299_v57, 0.0 }
0x455d   :  { %14314 = vpow2.f32 %v8867_v62  ;;  %8896 = vadd.xlane.f32.xlu1 %v8895_v39 }
0x455e   :  { %v18305_v45 = vpop.eup %14304 }
0x455f   :  { %v18307_v28 = vpop.eup %14306  ;;  %v8904_v43 = vsel %vm19555_vm5, %v18305_v45, 0.0 }
0x4560   :  { %8905 = vadd.xlane.f32.xlu0 %v8904_v43  ;;  %v8901_v34 = vsel %vm19556_vm7, %v18307_v28, 0.0 }
0x4561   :  { %8902 = vadd.xlane.f32.xlu1 %v8901_v34 }
0x4562   :  { %v18313_v63 = vpop.eup %14308 }
0x4563   :  { %v18315_v38 = vpop.eup %14310  ;;  %v8910_v3 = vsel %vm19557_vm12, %v18313_v63, 0.0 }
0x4564   :  { %8911 = vadd.xlane.f32.xlu0 %v8910_v3  ;;  %v8907_v21 = vsel %vm19542_vm0, %v18315_v38, 0.0 }
0x4565   :  { %8908 = vadd.xlane.f32.xlu1 %v8907_v21 }
0x4566   :  { %v18321_v23 = vpop.eup %14312 }
0x4567   :  { %v18323_v11 = vpop.eup %14314  ;;  %v8916_v32 = vsel %vm19558_vm10, %v18321_v23, 0.0 }
0x4568   :  { %8917 = vadd.xlane.f32.xlu0 %v8916_v32  ;;  %v8913_v0 = vsel %vm19559_vm8, %v18323_v11, 0.0 }
0x4569   :  { %8914 = vadd.xlane.f32.xlu1 %v8913_v0  ;;  %v19562_v0 = vld [vmem:[#allocation70_spill] sm:$0xff] }
0x45d9   :  { %v8876_v37 = vpop.xlane.xlu0 %8875 }
0x45da   :  { %14316 = vrcp.f32 %v8876_v37  ;;  %v8873_v53 = vpop.xlane.xlu1 %8872 }
0x45db   :  { %14318 = vrcp.f32 %v8873_v53 }
0x45dd   :  { %v8882_v58 = vpop.xlane.xlu0 %8881 }
0x45de   :  { %14320 = vrcp.f32 %v8882_v58  ;;  %v8879_v36 = vpop.xlane.xlu1 %8878 }
0x45df   :  { %14322 = vrcp.f32 %v8879_v36 }
0x45e1   :  { %v8888_v54 = vpop.xlane.xlu0 %8887 }
0x45e2   :  { %v8885_v27 = vpop.xlane.xlu1 %8884  ;;  %14324 = vrcp.f32 %v8888_v54 }
0x45e3   :  { %14326 = vrcp.f32 %v8885_v27 }
0x45e4   :  { %v14317_v22 = vpop.eup %14316 }
0x45e5   :  { %v14319_v52 = vpop.eup %14318  ;;  %v8936_v42 = vmul.f32 %v14317_v22, %v18257_v9  ;;  %v8894_v16 = vpop.xlane.xlu0 %8893 }
0x45e6   :  { %v8935_v60 = vmul.f32 %v14319_v52, %v18259_v40  ;;  %v8891_v12 = vpop.xlane.xlu1 %8890  ;;  %14328 = vrcp.f32 %v8894_v16 }
0x45e7   :  { %14330 = vrcp.f32 %v8891_v12 }
0x45e8   :  { %v14321_v6 = vpop.eup %14320  ;;  %v13956_v7 = vpack.c.bf16 %v8936_v42, %v8935_v60 }
0x45e9   :  { %v14323_v41 = vpop.eup %14322  ;;  %v8938_v1 = vmul.f32 %v14321_v6, %v18267_v20  ;;  %v8900_v46 = vpop.xlane.xlu0 %8899 }
0x45ea   :  { %13958 = vmatpush3.bf16.xpose.msk.msra.mxu1 %vm19561_vm6, %v13956_v7  ;;  %v8937_v10 = vmul.f32 %v14323_v41, %v18269_v25  ;;  %v8897_v4 = vpop.xlane.xlu1 %8896  ;;  %14332 = vrcp.f32 %v8900_v46 }
0x45eb   :  { %13959 = vmatprep.subr.bf16.mxu1 %v18914_v17  ;;  %14334 = vrcp.f32 %v8897_v4 }
0x45ec   :  { %v14325_v9 = vpop.eup %14324  ;;  %v13960_v40 = vpack.c.bf16 %v8938_v1, %v8937_v10 }
0x45ed   :  { %v14327_v61 = vpop.eup %14326  ;;  %v8940_v35 = vmul.f32 %v14325_v9, %v18277_v50  ;;  %v8906_v19 = vpop.xlane.xlu0 %8905 }
0x45ee   :  { %v8939_v56 = vmul.f32 %v14327_v61, %v18279_v44  ;;  %v8903_v13 = vpop.xlane.xlu1 %8902  ;;  %14336 = vrcp.f32 %v8906_v19 }
0x45ef   :  { %14338 = vrcp.f32 %v8903_v13 }
0x45f0   :  { %v14329_v20 = vpop.eup %14328  ;;  %v13964_v25 = vpack.c.bf16 %v8940_v35, %v8939_v56 }
0x45f1   :  { %v14331_v48 = vpop.eup %14330  ;;  %v8942_v49 = vmul.f32 %v14329_v20, %v18287_v18  ;;  %v8912_v31 = vpop.xlane.xlu0 %8911 }
0x45f2   :  { %13962 = vmatpush3.bf16.xpose.msk.msra.mxu1 %vm19561_vm6, %v13960_v40  ;;  %v8941_v14 = vmul.f32 %v14331_v48, %v18289_v33  ;;  %v8909_v8 = vpop.xlane.xlu1 %8908  ;;  %14340 = vrcp.f32 %v8912_v31 }
0x45f3   :  { %13963 = vmatprep.subr.bf16.mxu1 %v18914_v17  ;;  %14342 = vrcp.f32 %v8909_v8 }
0x45f4   :  { %v14333_v50 = vpop.eup %14332  ;;  %v13968_v44 = vpack.c.bf16 %v8942_v49, %v8941_v14 }
0x45f5   :  { %v14335_v55 = vpop.eup %14334  ;;  %v8944_v2 = vmul.f32 %v14333_v50, %v18297_v30  ;;  %v8918_v47 = vpop.xlane.xlu0 %8917 }
0x45f6   :  { %v8943_v29 = vmul.f32 %v14335_v55, %v18299_v57  ;;  %v8915_v62 = vpop.xlane.xlu1 %8914  ;;  %14344 = vrcp.f32 %v8918_v47 }
0x45f7   :  { %14346 = vrcp.f32 %v8915_v62 }
0x45f8   :  { %v14337_v18 = vpop.eup %14336  ;;  %v13972_v33 = vpack.c.bf16 %v8944_v2, %v8943_v29 }
0x45f9   :  { %v14339_v5 = vpop.eup %14338  ;;  %v8946_v24 = vmul.f32 %v14337_v18, %v18305_v45 }
0x45fa   :  { %13966 = vmatpush3.bf16.xpose.msk.msra.mxu1 %vm19561_vm6, %v13964_v25  ;;  %v8945_v26 = vmul.f32 %v14339_v5, %v18307_v28 }
0x45fb   :  { %13967 = vmatprep.subr.bf16.mxu1 %v18914_v17 }
0x45fc   :  { %v14341_v30 = vpop.eup %14340  ;;  %v13976_v57 = vpack.c.bf16 %v8946_v24, %v8945_v26 }
0x45fd   :  { %v14343_v51 = vpop.eup %14342  ;;  %v8948_v39 = vmul.f32 %v14341_v30, %v18313_v63  ;;  %v9072_v63 = vstv %s9951_s13 }
0x45fe   :  { %v8947_v43 = vmul.f32 %v14343_v51, %v18315_v38 }
0x4600   :  { %v14345_v34 = vpop.eup %14344  ;;  %v13980_v3 = vpack.c.bf16 %v8948_v39, %v8947_v43 }
0x4601   :  { %v14347_v45 = vpop.eup %14346  ;;  %v8950_v28 = vmul.f32 %v14345_v34, %v18321_v23 }
0x4602   :  { %13970 = vmatpush3.bf16.xpose.msk.msra.mxu1 %vm19561_vm6, %v13968_v44  ;;  %v8949_v21 = vmul.f32 %v14347_v45, %v18323_v11 }
0x4603   :  { %13971 = vmatprep.subr.bf16.mxu1 %v18914_v17 }
0x4604   :  { %v13984_v32 = vpack.c.bf16 %v8950_v28, %v8949_v21 }
0x460a   :  { %13974 = vmatpush3.bf16.xpose.msk.msra.mxu1 %vm19561_vm6, %v13972_v33 }
0x460b   :  { %13975 = vmatprep.subr.bf16.mxu1 %v18914_v17 }
0x4612   :  { %13978 = vmatpush3.bf16.xpose.msk.msra.mxu1 %vm19561_vm6, %v13976_v57 }
0x4613   :  { %13979 = vmatprep.subr.bf16.mxu1 %v18914_v17 }
0x461a   :  { %13982 = vmatpush3.bf16.xpose.msk.msra.mxu1 %vm19561_vm6, %v13980_v3 }
0x461b   :  { %13983 = vmatprep.subr.bf16.mxu1 %v18914_v17 }
0x4622   :  { %13986 = vmatpush3.bf16.xpose.msk.msra.mxu1 %vm19561_vm6, %v13984_v32 }
0x4629   :  { %12763 = vmatmul.mubr.msk.f32.vlgmr.msra.gmra.mrb[86].mxu1 %vm19563_vm13, %v19562_v0 }
0x46fc   :  { %v9068_v38 = vpop.f32.mrb[86].mxu1 }
0x46fd   :  { %v9073_v37 = vmul.f32 %v9072_v63, %v9068_v38  ;;  %v12764_v53 = vpop.f32.mrb[87].mxu1 }
0x46ff   :  { %v9074_v58 = vadd.f32 %v9073_v37, %v18067_v59 }
0x4701   :  { %v9075_v36 = vmax.f32 %v9074_v58, 0.0 }
0x4703   :  { %9076 = vst [vmem:[%s18383_s9] sm:$0x1] %v9075_v36 }
0x4704   :  { %9081 = vsyncpa [#allocation3], 1 }

</bundles_post_ra>
